<compile_context>
chip_gen: v6e
topology: v6e:2x2x1
jax: 0.10.0
libtpu: 0.0.40
codegen_flags: <defaults>
</compile_context>

<pallas_src>
import functools

import jax
import jax.numpy as jnp
import numpy as np
from jax.experimental import pallas as pl
from jax.experimental.pallas import tpu as pltpu

EPS = 1e-5


# ---------------------------------------------------------------------------
# Kernel helpers
# ---------------------------------------------------------------------------
def _zero_halo(pad_s):
    """Zero only the 1-pixel halo ring of the padded-activation scratch."""
    Hp, Wp, Cp = pad_s.shape
    pad_s[0:1, :, :] = jnp.zeros((1, Wp, Cp), pad_s.dtype)
    pad_s[Hp - 1:Hp, :, :] = jnp.zeros((1, Wp, Cp), pad_s.dtype)
    pad_s[1:Hp - 1, 0:1, :] = jnp.zeros((Hp - 2, 1, Cp), pad_s.dtype)
    pad_s[1:Hp - 1, Wp - 1:Wp, :] = jnp.zeros((Hp - 2, 1, Cp), pad_s.dtype)


def _conv3x3_taps(a_hwc, w_ref, pad_s):
    """3x3 stride-1 'same' conv of one image via 9 tap-wise MXU matmuls.

    a_hwc : (H, W, Cp) activation (halo handled via pad_s; no im2col scratch)
    w_ref : (9*Cp, Cp) packed conv weights (row block t = dy*3 + dx, then Cin)
    pad_s : (H+2, W+2, Cp) persistent VMEM scratch (halo ring pre-zeroed)
    returns (H*W, Cp) f32 conv output (pre-BN)
    """
    H, W, Cp = a_hwc.shape
    pad_s[1:H + 1, 1:W + 1, :] = a_hwc.astype(pad_s.dtype)
    acc = jnp.zeros((H * W, Cp), jnp.float32)
    for t in range(9):
        dy, dx = divmod(t, 3)
        patch = pad_s[dy:dy + H, dx:dx + W, :].reshape(H * W, Cp)
        acc = acc + jnp.dot(patch, w_ref[t * Cp:(t + 1) * Cp, :],
                            preferred_element_type=jnp.float32)
    return acc


def _store_partial_stats(st_ref, acc):
    """Per-channel partial sum / sum-of-squares (f32) for this grid step."""
    st_ref[0, 0:1, :] = jnp.sum(acc, axis=0, keepdims=True)
    st_ref[0, 1:2, :] = jnp.sum(acc * acc, axis=0, keepdims=True)


# ---------------------------------------------------------------------------
# Kernels
# ---------------------------------------------------------------------------
def _conv1_kernel(x_ref, w_ref, y_ref, st_ref, pad_s):
    """conv1 of one image + partial BN1 statistics."""
    @pl.when(pl.program_id(0) == 0)
    def _():
        _zero_halo(pad_s)

    _, H, W, Cp = x_ref.shape
    acc = _conv3x3_taps(x_ref[0], w_ref, pad_s)
    y_ref[...] = acc.reshape(1, H, W, Cp).astype(y_ref.dtype)
    _store_partial_stats(st_ref, acc)


def _conv2_kernel(y1_ref, w_ref, s1_ref, b1_ref, y_ref, st_ref, pad_s):
    """bn1 (folded scale/bias FMA) + relu -> conv2 + partial BN2 statistics."""
    @pl.when(pl.program_id(0) == 0)
    def _():
        _zero_halo(pad_s)

    _, H, W, Cp = y1_ref.shape
    a = jnp.maximum(y1_ref[0].astype(jnp.float32) * s1_ref[0] + b1_ref[0], 0.0)
    acc = _conv3x3_taps(a, w_ref, pad_s)
    y_ref[...] = acc.reshape(1, H, W, Cp).astype(y_ref.dtype)
    _store_partial_stats(st_ref, acc)


def _bn_add_relu_kernel(y2_ref, x_ref, s2_ref, b2_ref, out_ref):
    """bn2 (folded scale/bias FMA) + residual add + relu (writes in place of y2)."""
    y = y2_ref[...].astype(jnp.float32)
    r = x_ref[...].astype(jnp.float32)
    out = jnp.maximum(y * s2_ref[0] + b2_ref[0] + r, 0.0)
    out_ref[...] = out.astype(out_ref.dtype)


# ---------------------------------------------------------------------------
# Wrapper
# ---------------------------------------------------------------------------
def _round_up(x, m):
    return (x + m - 1) // m * m


def _finalize_bn(stats, gamma_p, beta_p, n_elems):
    """Reduce per-step partial stats; fold BN into per-channel scale & bias.

    Padded channels have sum = sumsq = 0 and zero-padded gamma/beta, so their
    scale/bias collapse to exactly 0 (keeps padded lanes at zero downstream).
    Note: single-pass E[x^2]-E[x]^2 variance; fine for normalized activations.
    """
    s = jnp.sum(stats[:, 0, :], axis=0)
    ss = jnp.sum(stats[:, 1, :], axis=0)
    mean = s / n_elems
    var = jnp.maximum(ss / n_elems - mean * mean, 0.0)   # biased batch variance
    scale = gamma_p * jax.lax.rsqrt(var + EPS)
    bias = beta_p - mean * scale
    cp = scale.shape[0]
    return scale.reshape(1, cp), bias.reshape(1, cp)


def init_basic_block_params(key, inplanes, planes):
    """Deterministic synthetic parameters (shapes from BasicBlock.__init__)."""
    k1, k2, k3, k4, k5, k6 = jax.random.split(key, 6)
    w1 = jax.random.normal(k1, (planes, inplanes, 3, 3), jnp.float32) / np.sqrt(9 * inplanes)
    w2 = jax.random.normal(k2, (planes, planes, 3, 3), jnp.float32) / np.sqrt(9 * planes)
    gamma1 = 1.0 + 0.1 * jax.random.normal(k3, (planes,), jnp.float32)
    beta1 = 0.1 * jax.random.normal(k4, (planes,), jnp.float32)
    gamma2 = 1.0 + 0.1 * jax.random.normal(k5, (planes,), jnp.float32)
    beta2 = 0.1 * jax.random.normal(k6, (planes,), jnp.float32)
    return dict(w1=w1, w2=w2, gamma1=gamma1, beta1=beta1,
                gamma2=gamma2, beta2=beta2)


@functools.partial(jax.jit, static_argnames=("compute_dtype",))
def basic_block_forward(x_nchw, params, compute_dtype=jnp.float32):
    N, C, H, W = x_nchw.shape
    Cout = params["w1"].shape[0]
    assert C == Cout, "stride=1 / downsample=None requires inplanes == planes"
    Cp = _round_up(C, 128)            # lane-dense channel axis
    cdtype = jnp.dtype(compute_dtype)

    # NOTE: padding C -> Cp costs (Cp/C) in HBM traffic and (Cp/C)^2 in MXU
    # FLOPs; acceptable for real stages (C >= 64) but the C=8 self-check shape
    # is numerics-only, not a performance proxy.

    # --- wrapper glue: NCHW -> NHWC, pad channels, pack weights / BN params ---
    x = jnp.transpose(x_nchw, (0, 2, 3, 1))
    x = jnp.pad(x, ((0, 0), (0, 0), (0, 0), (0, Cp - C))).astype(cdtype)

    def pack_w(w):                    # OIHW -> (9*Cp, Cp), row = t*Cp + cin
        w = jnp.transpose(w, (2, 3, 1, 0))                    # (3,3,Cin,Cout)
        w = jnp.pad(w, ((0, 0), (0, 0),
                        (0, Cp - w.shape[2]), (0, Cp - w.shape[3])))
        return w.reshape(9 * Cp, Cp).astype(cdtype)

    w1 = pack_w(params["w1"])
    w2 = pack_w(params["w2"])
    g1 = jnp.pad(params["gamma1"], (0, Cp - C)).astype(jnp.float32)
    b1 = jnp.pad(params["beta1"], (0, Cp - C)).astype(jnp.float32)
    g2 = jnp.pad(params["gamma2"], (0, Cp - C)).astype(jnp.float32)
    b2 = jnp.pad(params["beta2"], (0, Cp - C)).astype(jnp.float32)

    # --- common specs: grid over batch, one image per grid step ---
    img_spec = pl.BlockSpec((1, H, W, Cp), lambda n: (n, 0, 0, 0))
    w_spec = pl.BlockSpec((9 * Cp, Cp), lambda n: (0, 0))
    vec_spec = pl.BlockSpec((1, Cp), lambda n: (0, 0))
    st_spec = pl.BlockSpec((1, 2, Cp), lambda n: (n, 0, 0))
    conv_scratch = [pltpu.VMEM((H + 2, W + 2, Cp), cdtype)]

    # explicit VMEM budget from the actual block + scratch sizes (+ headroom)
    isz = cdtype.itemsize
    img_b = H * W * Cp * isz
    est = (4 * img_b                        # in + out image blocks, double-buffered
           + 2 * 9 * Cp * Cp * isz          # packed weights (double-buffered)
           + (H + 2) * (W + 2) * Cp * isz   # pad_s scratch
           + 3 * H * W * Cp * 4             # f32 accumulator + tap temporaries
           + (4 << 20))                     # headroom
    vmem_limit = int(min(64 << 20, max(est, 16 << 20)))
    cparams = pltpu.CompilerParams(dimension_semantics=("parallel",),
                                   vmem_limit_bytes=vmem_limit)

    y_shape = jax.ShapeDtypeStruct((N, H, W, Cp), cdtype)
    st_shape = jax.ShapeDtypeStruct((N, 2, Cp), jnp.float32)
    n_elems = jnp.float32(N * H * W)

    # --- pass 1: conv1 + partial BN1 stats ---
    y1, st1 = pl.pallas_call(
        _conv1_kernel,
        grid=(N,),
        in_specs=[img_spec, w_spec],
        out_specs=(img_spec, st_spec),
        out_shape=(y_shape, st_shape),
        scratch_shapes=conv_scratch,
        compiler_params=cparams,
    )(x, w1)

    scale1, bias1 = _finalize_bn(st1, g1, b1, n_elems)

    # --- pass 2: bn1 + relu -> conv2 + partial BN2 stats ---
    y2, st2 = pl.pallas_call(
        _conv2_kernel,
        grid=(N,),
        in_specs=[img_spec, w_spec, vec_spec, vec_spec],
        out_specs=(img_spec, st_spec),
        out_shape=(y_shape, st_shape),
        scratch_shapes=conv_scratch,
        compiler_params=cparams,
    )(y1, w2, scale1, bias1)

    scale2, bias2 = _finalize_bn(st2, g2, b2, n_elems)

    # --- pass 3: bn2 + residual add + relu (in place of y2) ---
    out = pl.pallas_call(
        _bn_add_relu_kernel,
        grid=(N,),
        in_specs=[img_spec, img_spec, vec_spec, vec_spec],
        out_specs=img_spec,
        out_shape=y_shape,
        input_output_aliases={0: 0},         # reuse y2's HBM buffer
        compiler_params=cparams,
    )(y2, x, scale2, bias2)

    out = out[..., :C]                          # drop channel padding
    return jnp.transpose(out, (0, 3, 1, 2)).astype(x_nchw.dtype)   # back to NCHW


# ---------------------------------------------------------------------------
# Pure-JAX reference (mirrors the PyTorch forward, training-mode BatchNorm)
# ---------------------------------------------------------------------------
def reference_basic_block(x_nchw, params):
    def conv3x3(x, w):
        return jax.lax.conv_general_dilated(
            x, w, window_strides=(1, 1), padding=((1, 1), (1, 1)),
            dimension_numbers=("NCHW", "OIHW", "NCHW"))

    def bn(x, g, b):
        mean = jnp.mean(x, axis=(0, 2, 3), keepdims=True)
        var = jnp.mean(jnp.square(x - mean), axis=(0, 2, 3), keepdims=True)
        return ((x - mean) * jax.lax.rsqrt(var + EPS)
                * g.reshape(1, -1, 1, 1) + b.reshape(1, -1, 1, 1))

    out = jax.nn.relu(bn(conv3x3(x_nchw, params["w1"]),
                         params["gamma1"], params["beta1"]))
    out = bn(conv3x3(out, params["w2"]), params["gamma2"], params["beta2"])
    return jax.nn.relu(out + x_nchw)


if __name__ == "__main__":
    key = jax.random.PRNGKey(0)
    kx, kp = jax.random.split(key)

    N, C, H, W = 2, 8, 16, 16            # inplanes == planes == 8
    x = jax.random.normal(kx, (N, C, H, W), jnp.float32)
    params = init_basic_block_params(kp, inplanes=C, planes=C)

    ref = jax.block_until_ready(reference_basic_block(x, params))

    # f32 MXU path: strict check.
    out_f32 = jax.block_until_ready(basic_block_forward(x, params))
    if not np.allclose(np.asarray(out_f32), np.asarray(ref), atol=1e-3, rtol=1e-3):
        raise AssertionError("f32 Pallas BasicBlock does not match JAX reference")

    # bf16 weights/activations with f32 accumulation (perf path): loose check.
    out_bf16 = jax.block_until_ready(
        basic_block_forward(x, params, compute_dtype=jnp.bfloat16))
    if not np.allclose(np.asarray(out_bf16), np.asarray(ref), atol=1e-1, rtol=1e-1):
        raise AssertionError("bf16 Pallas BasicBlock does not match JAX reference")

    print("KERNEL_OK")
</pallas_src>

<mosaic_0001>
module attributes {stable_mosaic.version = 11 : i64} {
  func.func @_conv1_kernel(%arg0: i32, %arg1: memref<1x16x16x128xf32, #tpu.memory_space<vmem>>, %arg2: memref<1152x128xf32, #tpu.memory_space<vmem>>, %arg3: memref<1x16x16x128xf32, #tpu.memory_space<vmem>>, %arg4: memref<1x2x128xf32, #tpu.memory_space<vmem>>, %arg5: memref<18x18x128xf32, #tpu.memory_space<vmem>>) attributes {dimension_semantics = [#tpu.dimension_semantics<parallel>], iteration_bounds = array<i64: 2>, scalar_prefetch = 0 : i64, scratch_operands = 1 : i64, tpu.core_type = #tpu.core_type<tc>, window_params = [{transform_indices = @transform_0, window_bounds = array<i64: 1, 16, 16, 128>}, {pipeline_mode = #tpu.pipeline_mode<synchronous>, transform_indices = @transform_1, window_bounds = array<i64: 1152, 128>}, {transform_indices = @transform_2, window_bounds = array<i64: 1, 16, 16, 128>}, {transform_indices = @transform_3, window_bounds = array<i64: 1, 2, 128>}]} {
    %c0_i32 = arith.constant 0 : i32
    %0 = arith.cmpi eq, %arg0, %c0_i32 : i32
    %1 = arith.extui %0 : i1 to i32
    %c0_i32_0 = arith.constant 0 : i32
    %2 = arith.cmpi ne, %1, %c0_i32_0 : i32
    scf.if %2 {
      %cst_63 = arith.constant 0.000000e+00 : f32
      %65 = vector.broadcast %cst_63 : f32 to vector<1x18x128xf32>
      %c0_64 = arith.constant 0 : index
      %c0_65 = arith.constant 0 : index
      %c0_66 = arith.constant 0 : index
      %66 = vector.load %arg5[%c0_64, %c0_65, %c0_66] : memref<18x18x128xf32, #tpu.memory_space<vmem>>, vector<1x18x128xf32>
      tpu.vector_store %arg5[%c0_64, %c0_65, %c0_66], %65 {strides = array<i32>} : memref<18x18x128xf32, #tpu.memory_space<vmem>>, vector<1x18x128xf32>,
      %cst_67 = arith.constant 0.000000e+00 : f32
      %67 = vector.broadcast %cst_67 : f32 to vector<1x18x128xf32>
      %c17 = arith.constant 17 : index
      %c0_68 = arith.constant 0 : index
      %c0_69 = arith.constant 0 : index
      %68 = vector.load %arg5[%c17, %c0_68, %c0_69] : memref<18x18x128xf32, #tpu.memory_space<vmem>>, vector<1x18x128xf32>
      tpu.vector_store %arg5[%c17, %c0_68, %c0_69], %67 {strides = array<i32>} : memref<18x18x128xf32, #tpu.memory_space<vmem>>, vector<1x18x128xf32>,
      %cst_70 = arith.constant 0.000000e+00 : f32
      %69 = vector.broadcast %cst_70 : f32 to vector<16x1x128xf32>
      %c1_71 = arith.constant 1 : index
      %c0_72 = arith.constant 0 : index
      %c0_73 = arith.constant 0 : index
      %70 = vector.load %arg5[%c1_71, %c0_72, %c0_73] : memref<18x18x128xf32, #tpu.memory_space<vmem>>, vector<16x1x128xf32>
      tpu.vector_store %arg5[%c1_71, %c0_72, %c0_73], %69 {strides = array<i32>} : memref<18x18x128xf32, #tpu.memory_space<vmem>>, vector<16x1x128xf32>,
      %cst_74 = arith.constant 0.000000e+00 : f32
      %71 = vector.broadcast %cst_74 : f32 to vector<16x1x128xf32>
      %c1_75 = arith.constant 1 : index
      %c17_76 = arith.constant 17 : index
      %c0_77 = arith.constant 0 : index
      %72 = vector.load %arg5[%c1_75, %c17_76, %c0_77] : memref<18x18x128xf32, #tpu.memory_space<vmem>>, vector<16x1x128xf32>
      tpu.vector_store %arg5[%c1_75, %c17_76, %c0_77], %71 {strides = array<i32>} : memref<18x18x128xf32, #tpu.memory_space<vmem>>, vector<16x1x128xf32>,
    } else {
    }
    %c0 = arith.constant 0 : index
    %c0_1 = arith.constant 0 : index
    %c0_2 = arith.constant 0 : index
    %c0_3 = arith.constant 0 : index
    %3 = vector.load %arg1[%c0, %c0_1, %c0_2, %c0_3] : memref<1x16x16x128xf32, #tpu.memory_space<vmem>>, vector<1x16x16x128xf32>
    %4 = vector.shape_cast %3 : vector<1x16x16x128xf32> to vector<16x16x128xf32>
    %c1 = arith.constant 1 : index
    %c1_4 = arith.constant 1 : index
    %c0_5 = arith.constant 0 : index
    %5 = vector.load %arg5[%c1, %c1_4, %c0_5] : memref<18x18x128xf32, #tpu.memory_space<vmem>>, vector<16x16x128xf32>
    tpu.vector_store %arg5[%c1, %c1_4, %c0_5], %4 {strides = array<i32>} : memref<18x18x128xf32, #tpu.memory_space<vmem>>, vector<16x16x128xf32>,
    %cst = arith.constant 0.000000e+00 : f32
    %6 = vector.broadcast %cst : f32 to vector<256x128xf32>
    %c0_6 = arith.constant 0 : index
    %c0_7 = arith.constant 0 : index
    %c0_8 = arith.constant 0 : index
    %7 = vector.load %arg5[%c0_6, %c0_7, %c0_8] : memref<18x18x128xf32, #tpu.memory_space<vmem>>, vector<16x16x128xf32>
    %8 = vector.shape_cast %7 : vector<16x16x128xf32> to vector<256x128xf32>
    %c0_9 = arith.constant 0 : index
    %c0_10 = arith.constant 0 : index
    %9 = vector.load %arg2[%c0_9, %c0_10] : memref<1152x128xf32, #tpu.memory_space<vmem>>, vector<128x128xf32>
    %cst_11 = arith.constant dense<0.000000e+00> : vector<256x128xf32>
    %10 = tpu.matmul %8, %9, %cst_11 {dimension_numbers = #tpu.dot_dimension_numbers<[1], [0], [0], [1], [0, 0, 1, 1], [], []>} : vector<256x128xf32>, vector<128x128xf32>, vector<256x128xf32> -> vector<256x128xf32>
    %11 = arith.addf %6, %10 : vector<256x128xf32>
    %c0_12 = arith.constant 0 : index
    %c1_13 = arith.constant 1 : index
    %c0_14 = arith.constant 0 : index
    %12 = vector.load %arg5[%c0_12, %c1_13, %c0_14] : memref<18x18x128xf32, #tpu.memory_space<vmem>>, vector<16x16x128xf32>
    %13 = vector.shape_cast %12 : vector<16x16x128xf32> to vector<256x128xf32>
    %c128 = arith.constant 128 : index
    %c0_15 = arith.constant 0 : index
    %14 = vector.load %arg2[%c128, %c0_15] : memref<1152x128xf32, #tpu.memory_space<vmem>>, vector<128x128xf32>
    %cst_16 = arith.constant dense<0.000000e+00> : vector<256x128xf32>
    %15 = tpu.matmul %13, %14, %cst_16 {dimension_numbers = #tpu.dot_dimension_numbers<[1], [0], [0], [1], [0, 0, 1, 1], [], []>} : vector<256x128xf32>, vector<128x128xf32>, vector<256x128xf32> -> vector<256x128xf32>
    %16 = arith.addf %11, %15 : vector<256x128xf32>
    %c0_17 = arith.constant 0 : index
    %c2 = arith.constant 2 : index
    %c0_18 = arith.constant 0 : index
    %17 = vector.load %arg5[%c0_17, %c2, %c0_18] : memref<18x18x128xf32, #tpu.memory_space<vmem>>, vector<16x16x128xf32>
    %18 = vector.shape_cast %17 : vector<16x16x128xf32> to vector<256x128xf32>
    %c256 = arith.constant 256 : index
    %c0_19 = arith.constant 0 : index
    %19 = vector.load %arg2[%c256, %c0_19] : memref<1152x128xf32, #tpu.memory_space<vmem>>, vector<128x128xf32>
    %cst_20 = arith.constant dense<0.000000e+00> : vector<256x128xf32>
    %20 = tpu.matmul %18, %19, %cst_20 {dimension_numbers = #tpu.dot_dimension_numbers<[1], [0], [0], [1], [0, 0, 1, 1], [], []>} : vector<256x128xf32>, vector<128x128xf32>, vector<256x128xf32> -> vector<256x128xf32>
    %21 = arith.addf %16, %20 : vector<256x128xf32>
    %c1_21 = arith.constant 1 : index
    %c0_22 = arith.constant 0 : index
    %c0_23 = arith.constant 0 : index
    %22 = vector.load %arg5[%c1_21, %c0_22, %c0_23] : memref<18x18x128xf32, #tpu.memory_space<vmem>>, vector<16x16x128xf32>
    %23 = vector.shape_cast %22 : vector<16x16x128xf32> to vector<256x128xf32>
    %c384 = arith.constant 384 : index
    %c0_24 = arith.constant 0 : index
    %24 = vector.load %arg2[%c384, %c0_24] : memref<1152x128xf32, #tpu.memory_space<vmem>>, vector<128x128xf32>
    %cst_25 = arith.constant dense<0.000000e+00> : vector<256x128xf32>
    %25 = tpu.matmul %23, %24, %cst_25 {dimension_numbers = #tpu.dot_dimension_numbers<[1], [0], [0], [1], [0, 0, 1, 1], [], []>} : vector<256x128xf32>, vector<128x128xf32>, vector<256x128xf32> -> vector<256x128xf32>
    %26 = arith.addf %21, %25 : vector<256x128xf32>
    %c1_26 = arith.constant 1 : index
    %c1_27 = arith.constant 1 : index
    %c0_28 = arith.constant 0 : index
    %27 = vector.load %arg5[%c1_26, %c1_27, %c0_28] : memref<18x18x128xf32, #tpu.memory_space<vmem>>, vector<16x16x128xf32>
    %28 = vector.shape_cast %27 : vector<16x16x128xf32> to vector<256x128xf32>
    %c512 = arith.constant 512 : index
    %c0_29 = arith.constant 0 : index
    %29 = vector.load %arg2[%c512, %c0_29] : memref<1152x128xf32, #tpu.memory_space<vmem>>, vector<128x128xf32>
    %cst_30 = arith.constant dense<0.000000e+00> : vector<256x128xf32>
    %30 = tpu.matmul %28, %29, %cst_30 {dimension_numbers = #tpu.dot_dimension_numbers<[1], [0], [0], [1], [0, 0, 1, 1], [], []>} : vector<256x128xf32>, vector<128x128xf32>, vector<256x128xf32> -> vector<256x128xf32>
    %31 = arith.addf %26, %30 : vector<256x128xf32>
    %c1_31 = arith.constant 1 : index
    %c2_32 = arith.constant 2 : index
    %c0_33 = arith.constant 0 : index
    %32 = vector.load %arg5[%c1_31, %c2_32, %c0_33] : memref<18x18x128xf32, #tpu.memory_space<vmem>>, vector<16x16x128xf32>
    %33 = vector.shape_cast %32 : vector<16x16x128xf32> to vector<256x128xf32>
    %c640 = arith.constant 640 : index
    %c0_34 = arith.constant 0 : index
    %34 = vector.load %arg2[%c640, %c0_34] : memref<1152x128xf32, #tpu.memory_space<vmem>>, vector<128x128xf32>
    %cst_35 = arith.constant dense<0.000000e+00> : vector<256x128xf32>
    %35 = tpu.matmul %33, %34, %cst_35 {dimension_numbers = #tpu.dot_dimension_numbers<[1], [0], [0], [1], [0, 0, 1, 1], [], []>} : vector<256x128xf32>, vector<128x128xf32>, vector<256x128xf32> -> vector<256x128xf32>
    %36 = arith.addf %31, %35 : vector<256x128xf32>
    %c2_36 = arith.constant 2 : index
    %c0_37 = arith.constant 0 : index
    %c0_38 = arith.constant 0 : index
    %37 = vector.load %arg5[%c2_36, %c0_37, %c0_38] : memref<18x18x128xf32, #tpu.memory_space<vmem>>, vector<16x16x128xf32>
    %38 = vector.shape_cast %37 : vector<16x16x128xf32> to vector<256x128xf32>
    %c768 = arith.constant 768 : index
    %c0_39 = arith.constant 0 : index
    %39 = vector.load %arg2[%c768, %c0_39] : memref<1152x128xf32, #tpu.memory_space<vmem>>, vector<128x128xf32>
    %cst_40 = arith.constant dense<0.000000e+00> : vector<256x128xf32>
    %40 = tpu.matmul %38, %39, %cst_40 {dimension_numbers = #tpu.dot_dimension_numbers<[1], [0], [0], [1], [0, 0, 1, 1], [], []>} : vector<256x128xf32>, vector<128x128xf32>, vector<256x128xf32> -> vector<256x128xf32>
    %41 = arith.addf %36, %40 : vector<256x128xf32>
    %c2_41 = arith.constant 2 : index
    %c1_42 = arith.constant 1 : index
    %c0_43 = arith.constant 0 : index
    %42 = vector.load %arg5[%c2_41, %c1_42, %c0_43] : memref<18x18x128xf32, #tpu.memory_space<vmem>>, vector<16x16x128xf32>
    %43 = vector.shape_cast %42 : vector<16x16x128xf32> to vector<256x128xf32>
    %c896 = arith.constant 896 : index
    %c0_44 = arith.constant 0 : index
    %44 = vector.load %arg2[%c896, %c0_44] : memref<1152x128xf32, #tpu.memory_space<vmem>>, vector<128x128xf32>
    %cst_45 = arith.constant dense<0.000000e+00> : vector<256x128xf32>
    %45 = tpu.matmul %43, %44, %cst_45 {dimension_numbers = #tpu.dot_dimension_numbers<[1], [0], [0], [1], [0, 0, 1, 1], [], []>} : vector<256x128xf32>, vector<128x128xf32>, vector<256x128xf32> -> vector<256x128xf32>
    %46 = arith.addf %41, %45 : vector<256x128xf32>
    %c2_46 = arith.constant 2 : index
    %c2_47 = arith.constant 2 : index
    %c0_48 = arith.constant 0 : index
    %47 = vector.load %arg5[%c2_46, %c2_47, %c0_48] : memref<18x18x128xf32, #tpu.memory_space<vmem>>, vector<16x16x128xf32>
    %48 = vector.shape_cast %47 : vector<16x16x128xf32> to vector<256x128xf32>
    %c1024 = arith.constant 1024 : index
    %c0_49 = arith.constant 0 : index
    %49 = vector.load %arg2[%c1024, %c0_49] : memref<1152x128xf32, #tpu.memory_space<vmem>>, vector<128x128xf32>
    %cst_50 = arith.constant dense<0.000000e+00> : vector<256x128xf32>
    %50 = tpu.matmul %48, %49, %cst_50 {dimension_numbers = #tpu.dot_dimension_numbers<[1], [0], [0], [1], [0, 0, 1, 1], [], []>} : vector<256x128xf32>, vector<128x128xf32>, vector<256x128xf32> -> vector<256x128xf32>
    %51 = arith.addf %46, %50 : vector<256x128xf32>
    %52 = vector.shape_cast %51 : vector<256x128xf32> to vector<1x16x16x128xf32>
    %c0_51 = arith.constant 0 : index
    %c0_52 = arith.constant 0 : index
    %c0_53 = arith.constant 0 : index
    %c0_54 = arith.constant 0 : index
    %53 = vector.load %arg3[%c0_51, %c0_52, %c0_53, %c0_54] : memref<1x16x16x128xf32, #tpu.memory_space<vmem>>, vector<1x16x16x128xf32>
    tpu.vector_store %arg3[%c0_51, %c0_52, %c0_53, %c0_54], %52 {strides = array<i32>} : memref<1x16x16x128xf32, #tpu.memory_space<vmem>>, vector<1x16x16x128xf32>,
    %cst_55 = arith.constant dense<0.000000e+00> : vector<128xf32>
    %54 = vector.multi_reduction <add>, %51, %cst_55 [0] : vector<256x128xf32> to vector<128xf32>
    %55 = vector.shape_cast %54 : vector<128xf32> to vector<1x128xf32>
    %c0_56 = arith.constant 0 : index
    %c0_57 = arith.constant 0 : index
    %c0_58 = arith.constant 0 : index
    %56 = vector.load %arg4[%c0_56, %c0_57, %c0_58] : memref<1x2x128xf32, #tpu.memory_space<vmem>>, vector<1x1x128xf32>
    %57 = vector.shape_cast %56 : vector<1x1x128xf32> to vector<1x128xf32>
    %58 = vector.shape_cast %55 : vector<1x128xf32> to vector<1x1x128xf32>
    tpu.vector_store %arg4[%c0_56, %c0_57, %c0_58], %58 {strides = array<i32>} : memref<1x2x128xf32, #tpu.memory_space<vmem>>, vector<1x1x128xf32>,
    %59 = arith.mulf %51, %51 : vector<256x128xf32>
    %cst_59 = arith.constant dense<0.000000e+00> : vector<128xf32>
    %60 = vector.multi_reduction <add>, %59, %cst_59 [0] : vector<256x128xf32> to vector<128xf32>
    %61 = vector.shape_cast %60 : vector<128xf32> to vector<1x128xf32>
    %c0_60 = arith.constant 0 : index
    %c1_61 = arith.constant 1 : index
    %c0_62 = arith.constant 0 : index
    %62 = vector.load %arg4[%c0_60, %c1_61, %c0_62] : memref<1x2x128xf32, #tpu.memory_space<vmem>>, vector<1x1x128xf32>
    %63 = vector.shape_cast %62 : vector<1x1x128xf32> to vector<1x128xf32>
    %64 = vector.shape_cast %61 : vector<1x128xf32> to vector<1x1x128xf32>
    tpu.vector_store %arg4[%c0_60, %c1_61, %c0_62], %64 {strides = array<i32>} : memref<1x2x128xf32, #tpu.memory_space<vmem>>, vector<1x1x128xf32>,
    return
  }
  func.func @transform_0(%arg0: i32) -> (i32, i32, i32, i32) {
    %c0_i32 = arith.constant 0 : i32
    %c0_i32_0 = arith.constant 0 : i32
    %c0_i32_1 = arith.constant 0 : i32
    %c0_i32_2 = arith.constant 0 : i32
    return %arg0, %c0_i32, %c0_i32_0, %c0_i32_1 : i32, i32, i32, i32
  }
  func.func @transform_1(%arg0: i32) -> (i32, i32) {
    %c0_i32 = arith.constant 0 : i32
    %c0_i32_0 = arith.constant 0 : i32
    %c0_i32_1 = arith.constant 0 : i32
    return %c0_i32, %c0_i32_0 : i32, i32
  }
  func.func @transform_2(%arg0: i32) -> (i32, i32, i32, i32) {
    %c0_i32 = arith.constant 0 : i32
    %c0_i32_0 = arith.constant 0 : i32
    %c0_i32_1 = arith.constant 0 : i32
    %c0_i32_2 = arith.constant 0 : i32
    return %arg0, %c0_i32, %c0_i32_0, %c0_i32_1 : i32, i32, i32, i32
  }
  func.func @transform_3(%arg0: i32) -> (i32, i32, i32) {
    %c0_i32 = arith.constant 0 : i32
    %c0_i32_0 = arith.constant 0 : i32
    %c0_i32_1 = arith.constant 0 : i32
    return %arg0, %c0_i32, %c0_i32_0 : i32, i32, i32
  }
}

module attributes {stable_mosaic.version = 11 : i64} {
  func.func @_conv2_kernel(%arg0: i32, %arg1: memref<1x16x16x128xf32, #tpu.memory_space<vmem>>, %arg2: memref<1152x128xf32, #tpu.memory_space<vmem>>, %arg3: memref<1x128xf32, #tpu.memory_space<vmem>>, %arg4: memref<1x128xf32, #tpu.memory_space<vmem>>, %arg5: memref<1x16x16x128xf32, #tpu.memory_space<vmem>>, %arg6: memref<1x2x128xf32, #tpu.memory_space<vmem>>, %arg7: memref<18x18x128xf32, #tpu.memory_space<vmem>>) attributes {dimension_semantics = [#tpu.dimension_semantics<parallel>], iteration_bounds = array<i64: 2>, scalar_prefetch = 0 : i64, scratch_operands = 1 : i64, tpu.core_type = #tpu.core_type<tc>, window_params = [{transform_indices = @transform_0, window_bounds = array<i64: 1, 16, 16, 128>}, {pipeline_mode = #tpu.pipeline_mode<synchronous>, transform_indices = @transform_1, window_bounds = array<i64: 1152, 128>}, {pipeline_mode = #tpu.pipeline_mode<synchronous>, transform_indices = @transform_2, window_bounds = array<i64: 1, 128>}, {pipeline_mode = #tpu.pipeline_mode<synchronous>, transform_indices = @transform_3, window_bounds = array<i64: 1, 128>}, {transform_indices = @transform_4, window_bounds = array<i64: 1, 16, 16, 128>}, {transform_indices = @transform_5, window_bounds = array<i64: 1, 2, 128>}]} {
    %c0_i32 = arith.constant 0 : i32
    %0 = arith.cmpi eq, %arg0, %c0_i32 : i32
    %1 = arith.extui %0 : i1 to i32
    %c0_i32_0 = arith.constant 0 : i32
    %2 = arith.cmpi ne, %1, %c0_i32_0 : i32
    scf.if %2 {
      %cst_68 = arith.constant 0.000000e+00 : f32
      %77 = vector.broadcast %cst_68 : f32 to vector<1x18x128xf32>
      %c0_69 = arith.constant 0 : index
      %c0_70 = arith.constant 0 : index
      %c0_71 = arith.constant 0 : index
      %78 = vector.load %arg7[%c0_69, %c0_70, %c0_71] : memref<18x18x128xf32, #tpu.memory_space<vmem>>, vector<1x18x128xf32>
      tpu.vector_store %arg7[%c0_69, %c0_70, %c0_71], %77 {strides = array<i32>} : memref<18x18x128xf32, #tpu.memory_space<vmem>>, vector<1x18x128xf32>,
      %cst_72 = arith.constant 0.000000e+00 : f32
      %79 = vector.broadcast %cst_72 : f32 to vector<1x18x128xf32>
      %c17 = arith.constant 17 : index
      %c0_73 = arith.constant 0 : index
      %c0_74 = arith.constant 0 : index
      %80 = vector.load %arg7[%c17, %c0_73, %c0_74] : memref<18x18x128xf32, #tpu.memory_space<vmem>>, vector<1x18x128xf32>
      tpu.vector_store %arg7[%c17, %c0_73, %c0_74], %79 {strides = array<i32>} : memref<18x18x128xf32, #tpu.memory_space<vmem>>, vector<1x18x128xf32>,
      %cst_75 = arith.constant 0.000000e+00 : f32
      %81 = vector.broadcast %cst_75 : f32 to vector<16x1x128xf32>
      %c1_76 = arith.constant 1 : index
      %c0_77 = arith.constant 0 : index
      %c0_78 = arith.constant 0 : index
      %82 = vector.load %arg7[%c1_76, %c0_77, %c0_78] : memref<18x18x128xf32, #tpu.memory_space<vmem>>, vector<16x1x128xf32>
      tpu.vector_store %arg7[%c1_76, %c0_77, %c0_78], %81 {strides = array<i32>} : memref<18x18x128xf32, #tpu.memory_space<vmem>>, vector<16x1x128xf32>,
      %cst_79 = arith.constant 0.000000e+00 : f32
      %83 = vector.broadcast %cst_79 : f32 to vector<16x1x128xf32>
      %c1_80 = arith.constant 1 : index
      %c17_81 = arith.constant 17 : index
      %c0_82 = arith.constant 0 : index
      %84 = vector.load %arg7[%c1_80, %c17_81, %c0_82] : memref<18x18x128xf32, #tpu.memory_space<vmem>>, vector<16x1x128xf32>
      tpu.vector_store %arg7[%c1_80, %c17_81, %c0_82], %83 {strides = array<i32>} : memref<18x18x128xf32, #tpu.memory_space<vmem>>, vector<16x1x128xf32>,
    } else {
    }
    %c0 = arith.constant 0 : index
    %c0_1 = arith.constant 0 : index
    %c0_2 = arith.constant 0 : index
    %c0_3 = arith.constant 0 : index
    %3 = vector.load %arg1[%c0, %c0_1, %c0_2, %c0_3] : memref<1x16x16x128xf32, #tpu.memory_space<vmem>>, vector<1x16x16x128xf32>
    %4 = vector.shape_cast %3 : vector<1x16x16x128xf32> to vector<16x16x128xf32>
    %c0_4 = arith.constant 0 : index
    %c0_5 = arith.constant 0 : index
    %5 = vector.load %arg3[%c0_4, %c0_5] : memref<1x128xf32, #tpu.memory_space<vmem>>, vector<1x128xf32>
    %6 = vector.shape_cast %5 : vector<1x128xf32> to vector<128xf32>
    %7 = vector.shape_cast %6 : vector<128xf32> to vector<1x1x128xf32>
    %8 = vector.broadcast %7 : vector<1x1x128xf32> to vector<16x16x128xf32>
    %9 = arith.mulf %4, %8 : vector<16x16x128xf32>
    %c0_6 = arith.constant 0 : index
    %c0_7 = arith.constant 0 : index
    %10 = vector.load %arg4[%c0_6, %c0_7] : memref<1x128xf32, #tpu.memory_space<vmem>>, vector<1x128xf32>
    %11 = vector.shape_cast %10 : vector<1x128xf32> to vector<128xf32>
    %12 = vector.shape_cast %11 : vector<128xf32> to vector<1x1x128xf32>
    %13 = vector.broadcast %12 : vector<1x1x128xf32> to vector<16x16x128xf32>
    %14 = arith.addf %9, %13 : vector<16x16x128xf32>
    %cst = arith.constant 0.000000e+00 : f32
    %15 = vector.broadcast %cst : f32 to vector<16x16x128xf32>
    %16 = arith.maximumf %14, %15 : vector<16x16x128xf32>
    %c1 = arith.constant 1 : index
    %c1_8 = arith.constant 1 : index
    %c0_9 = arith.constant 0 : index
    %17 = vector.load %arg7[%c1, %c1_8, %c0_9] : memref<18x18x128xf32, #tpu.memory_space<vmem>>, vector<16x16x128xf32>
    tpu.vector_store %arg7[%c1, %c1_8, %c0_9], %16 {strides = array<i32>} : memref<18x18x128xf32, #tpu.memory_space<vmem>>, vector<16x16x128xf32>,
    %cst_10 = arith.constant 0.000000e+00 : f32
    %18 = vector.broadcast %cst_10 : f32 to vector<256x128xf32>
    %c0_11 = arith.constant 0 : index
    %c0_12 = arith.constant 0 : index
    %c0_13 = arith.constant 0 : index
    %19 = vector.load %arg7[%c0_11, %c0_12, %c0_13] : memref<18x18x128xf32, #tpu.memory_space<vmem>>, vector<16x16x128xf32>
    %20 = vector.shape_cast %19 : vector<16x16x128xf32> to vector<256x128xf32>
    %c0_14 = arith.constant 0 : index
    %c0_15 = arith.constant 0 : index
    %21 = vector.load %arg2[%c0_14, %c0_15] : memref<1152x128xf32, #tpu.memory_space<vmem>>, vector<128x128xf32>
    %cst_16 = arith.constant dense<0.000000e+00> : vector<256x128xf32>
    %22 = tpu.matmul %20, %21, %cst_16 {dimension_numbers = #tpu.dot_dimension_numbers<[1], [0], [0], [1], [0, 0, 1, 1], [], []>} : vector<256x128xf32>, vector<128x128xf32>, vector<256x128xf32> -> vector<256x128xf32>
    %23 = arith.addf %18, %22 : vector<256x128xf32>
    %c0_17 = arith.constant 0 : index
    %c1_18 = arith.constant 1 : index
    %c0_19 = arith.constant 0 : index
    %24 = vector.load %arg7[%c0_17, %c1_18, %c0_19] : memref<18x18x128xf32, #tpu.memory_space<vmem>>, vector<16x16x128xf32>
    %25 = vector.shape_cast %24 : vector<16x16x128xf32> to vector<256x128xf32>
    %c128 = arith.constant 128 : index
    %c0_20 = arith.constant 0 : index
    %26 = vector.load %arg2[%c128, %c0_20] : memref<1152x128xf32, #tpu.memory_space<vmem>>, vector<128x128xf32>
    %cst_21 = arith.constant dense<0.000000e+00> : vector<256x128xf32>
    %27 = tpu.matmul %25, %26, %cst_21 {dimension_numbers = #tpu.dot_dimension_numbers<[1], [0], [0], [1], [0, 0, 1, 1], [], []>} : vector<256x128xf32>, vector<128x128xf32>, vector<256x128xf32> -> vector<256x128xf32>
    %28 = arith.addf %23, %27 : vector<256x128xf32>
    %c0_22 = arith.constant 0 : index
    %c2 = arith.constant 2 : index
    %c0_23 = arith.constant 0 : index
    %29 = vector.load %arg7[%c0_22, %c2, %c0_23] : memref<18x18x128xf32, #tpu.memory_space<vmem>>, vector<16x16x128xf32>
    %30 = vector.shape_cast %29 : vector<16x16x128xf32> to vector<256x128xf32>
    %c256 = arith.constant 256 : index
    %c0_24 = arith.constant 0 : index
    %31 = vector.load %arg2[%c256, %c0_24] : memref<1152x128xf32, #tpu.memory_space<vmem>>, vector<128x128xf32>
    %cst_25 = arith.constant dense<0.000000e+00> : vector<256x128xf32>
    %32 = tpu.matmul %30, %31, %cst_25 {dimension_numbers = #tpu.dot_dimension_numbers<[1], [0], [0], [1], [0, 0, 1, 1], [], []>} : vector<256x128xf32>, vector<128x128xf32>, vector<256x128xf32> -> vector<256x128xf32>
    %33 = arith.addf %28, %32 : vector<256x128xf32>
    %c1_26 = arith.constant 1 : index
    %c0_27 = arith.constant 0 : index
    %c0_28 = arith.constant 0 : index
    %34 = vector.load %arg7[%c1_26, %c0_27, %c0_28] : memref<18x18x128xf32, #tpu.memory_space<vmem>>, vector<16x16x128xf32>
    %35 = vector.shape_cast %34 : vector<16x16x128xf32> to vector<256x128xf32>
    %c384 = arith.constant 384 : index
    %c0_29 = arith.constant 0 : index
    %36 = vector.load %arg2[%c384, %c0_29] : memref<1152x128xf32, #tpu.memory_space<vmem>>, vector<128x128xf32>
    %cst_30 = arith.constant dense<0.000000e+00> : vector<256x128xf32>
    %37 = tpu.matmul %35, %36, %cst_30 {dimension_numbers = #tpu.dot_dimension_numbers<[1], [0], [0], [1], [0, 0, 1, 1], [], []>} : vector<256x128xf32>, vector<128x128xf32>, vector<256x128xf32> -> vector<256x128xf32>
    %38 = arith.addf %33, %37 : vector<256x128xf32>
    %c1_31 = arith.constant 1 : index
    %c1_32 = arith.constant 1 : index
    %c0_33 = arith.constant 0 : index
    %39 = vector.load %arg7[%c1_31, %c1_32, %c0_33] : memref<18x18x128xf32, #tpu.memory_space<vmem>>, vector<16x16x128xf32>
    %40 = vector.shape_cast %39 : vector<16x16x128xf32> to vector<256x128xf32>
    %c512 = arith.constant 512 : index
    %c0_34 = arith.constant 0 : index
    %41 = vector.load %arg2[%c512, %c0_34] : memref<1152x128xf32, #tpu.memory_space<vmem>>, vector<128x128xf32>
    %cst_35 = arith.constant dense<0.000000e+00> : vector<256x128xf32>
    %42 = tpu.matmul %40, %41, %cst_35 {dimension_numbers = #tpu.dot_dimension_numbers<[1], [0], [0], [1], [0, 0, 1, 1], [], []>} : vector<256x128xf32>, vector<128x128xf32>, vector<256x128xf32> -> vector<256x128xf32>
    %43 = arith.addf %38, %42 : vector<256x128xf32>
    %c1_36 = arith.constant 1 : index
    %c2_37 = arith.constant 2 : index
    %c0_38 = arith.constant 0 : index
    %44 = vector.load %arg7[%c1_36, %c2_37, %c0_38] : memref<18x18x128xf32, #tpu.memory_space<vmem>>, vector<16x16x128xf32>
    %45 = vector.shape_cast %44 : vector<16x16x128xf32> to vector<256x128xf32>
    %c640 = arith.constant 640 : index
    %c0_39 = arith.constant 0 : index
    %46 = vector.load %arg2[%c640, %c0_39] : memref<1152x128xf32, #tpu.memory_space<vmem>>, vector<128x128xf32>
    %cst_40 = arith.constant dense<0.000000e+00> : vector<256x128xf32>
    %47 = tpu.matmul %45, %46, %cst_40 {dimension_numbers = #tpu.dot_dimension_numbers<[1], [0], [0], [1], [0, 0, 1, 1], [], []>} : vector<256x128xf32>, vector<128x128xf32>, vector<256x128xf32> -> vector<256x128xf32>
    %48 = arith.addf %43, %47 : vector<256x128xf32>
    %c2_41 = arith.constant 2 : index
    %c0_42 = arith.constant 0 : index
    %c0_43 = arith.constant 0 : index
    %49 = vector.load %arg7[%c2_41, %c0_42, %c0_43] : memref<18x18x128xf32, #tpu.memory_space<vmem>>, vector<16x16x128xf32>
    %50 = vector.shape_cast %49 : vector<16x16x128xf32> to vector<256x128xf32>
    %c768 = arith.constant 768 : index
    %c0_44 = arith.constant 0 : index
    %51 = vector.load %arg2[%c768, %c0_44] : memref<1152x128xf32, #tpu.memory_space<vmem>>, vector<128x128xf32>
    %cst_45 = arith.constant dense<0.000000e+00> : vector<256x128xf32>
    %52 = tpu.matmul %50, %51, %cst_45 {dimension_numbers = #tpu.dot_dimension_numbers<[1], [0], [0], [1], [0, 0, 1, 1], [], []>} : vector<256x128xf32>, vector<128x128xf32>, vector<256x128xf32> -> vector<256x128xf32>
    %53 = arith.addf %48, %52 : vector<256x128xf32>
    %c2_46 = arith.constant 2 : index
    %c1_47 = arith.constant 1 : index
    %c0_48 = arith.constant 0 : index
    %54 = vector.load %arg7[%c2_46, %c1_47, %c0_48] : memref<18x18x128xf32, #tpu.memory_space<vmem>>, vector<16x16x128xf32>
    %55 = vector.shape_cast %54 : vector<16x16x128xf32> to vector<256x128xf32>
    %c896 = arith.constant 896 : index
    %c0_49 = arith.constant 0 : index
    %56 = vector.load %arg2[%c896, %c0_49] : memref<1152x128xf32, #tpu.memory_space<vmem>>, vector<128x128xf32>
    %cst_50 = arith.constant dense<0.000000e+00> : vector<256x128xf32>
    %57 = tpu.matmul %55, %56, %cst_50 {dimension_numbers = #tpu.dot_dimension_numbers<[1], [0], [0], [1], [0, 0, 1, 1], [], []>} : vector<256x128xf32>, vector<128x128xf32>, vector<256x128xf32> -> vector<256x128xf32>
    %58 = arith.addf %53, %57 : vector<256x128xf32>
    %c2_51 = arith.constant 2 : index
    %c2_52 = arith.constant 2 : index
    %c0_53 = arith.constant 0 : index
    %59 = vector.load %arg7[%c2_51, %c2_52, %c0_53] : memref<18x18x128xf32, #tpu.memory_space<vmem>>, vector<16x16x128xf32>
    %60 = vector.shape_cast %59 : vector<16x16x128xf32> to vector<256x128xf32>
    %c1024 = arith.constant 1024 : index
    %c0_54 = arith.constant 0 : index
    %61 = vector.load %arg2[%c1024, %c0_54] : memref<1152x128xf32, #tpu.memory_space<vmem>>, vector<128x128xf32>
    %cst_55 = arith.constant dense<0.000000e+00> : vector<256x128xf32>
    %62 = tpu.matmul %60, %61, %cst_55 {dimension_numbers = #tpu.dot_dimension_numbers<[1], [0], [0], [1], [0, 0, 1, 1], [], []>} : vector<256x128xf32>, vector<128x128xf32>, vector<256x128xf32> -> vector<256x128xf32>
    %63 = arith.addf %58, %62 : vector<256x128xf32>
    %64 = vector.shape_cast %63 : vector<256x128xf32> to vector<1x16x16x128xf32>
    %c0_56 = arith.constant 0 : index
    %c0_57 = arith.constant 0 : index
    %c0_58 = arith.constant 0 : index
    %c0_59 = arith.constant 0 : index
    %65 = vector.load %arg5[%c0_56, %c0_57, %c0_58, %c0_59] : memref<1x16x16x128xf32, #tpu.memory_space<vmem>>, vector<1x16x16x128xf32>
    tpu.vector_store %arg5[%c0_56, %c0_57, %c0_58, %c0_59], %64 {strides = array<i32>} : memref<1x16x16x128xf32, #tpu.memory_space<vmem>>, vector<1x16x16x128xf32>,
    %cst_60 = arith.constant dense<0.000000e+00> : vector<128xf32>
    %66 = vector.multi_reduction <add>, %63, %cst_60 [0] : vector<256x128xf32> to vector<128xf32>
    %67 = vector.shape_cast %66 : vector<128xf32> to vector<1x128xf32>
    %c0_61 = arith.constant 0 : index
    %c0_62 = arith.constant 0 : index
    %c0_63 = arith.constant 0 : index
    %68 = vector.load %arg6[%c0_61, %c0_62, %c0_63] : memref<1x2x128xf32, #tpu.memory_space<vmem>>, vector<1x1x128xf32>
    %69 = vector.shape_cast %68 : vector<1x1x128xf32> to vector<1x128xf32>
    %70 = vector.shape_cast %67 : vector<1x128xf32> to vector<1x1x128xf32>
    tpu.vector_store %arg6[%c0_61, %c0_62, %c0_63], %70 {strides = array<i32>} : memref<1x2x128xf32, #tpu.memory_space<vmem>>, vector<1x1x128xf32>,
    %71 = arith.mulf %63, %63 : vector<256x128xf32>
    %cst_64 = arith.constant dense<0.000000e+00> : vector<128xf32>
    %72 = vector.multi_reduction <add>, %71, %cst_64 [0] : vector<256x128xf32> to vector<128xf32>
    %73 = vector.shape_cast %72 : vector<128xf32> to vector<1x128xf32>
    %c0_65 = arith.constant 0 : index
    %c1_66 = arith.constant 1 : index
    %c0_67 = arith.constant 0 : index
    %74 = vector.load %arg6[%c0_65, %c1_66, %c0_67] : memref<1x2x128xf32, #tpu.memory_space<vmem>>, vector<1x1x128xf32>
    %75 = vector.shape_cast %74 : vector<1x1x128xf32> to vector<1x128xf32>
    %76 = vector.shape_cast %73 : vector<1x128xf32> to vector<1x1x128xf32>
    tpu.vector_store %arg6[%c0_65, %c1_66, %c0_67], %76 {strides = array<i32>} : memref<1x2x128xf32, #tpu.memory_space<vmem>>, vector<1x1x128xf32>,
    return
  }
  func.func @transform_0(%arg0: i32) -> (i32, i32, i32, i32) {
    %c0_i32 = arith.constant 0 : i32
    %c0_i32_0 = arith.constant 0 : i32
    %c0_i32_1 = arith.constant 0 : i32
    %c0_i32_2 = arith.constant 0 : i32
    return %arg0, %c0_i32, %c0_i32_0, %c0_i32_1 : i32, i32, i32, i32
  }
  func.func @transform_1(%arg0: i32) -> (i32, i32) {
    %c0_i32 = arith.constant 0 : i32
    %c0_i32_0 = arith.constant 0 : i32
    %c0_i32_1 = arith.constant 0 : i32
    return %c0_i32, %c0_i32_0 : i32, i32
  }
  func.func @transform_2(%arg0: i32) -> (i32, i32) {
    %c0_i32 = arith.constant 0 : i32
    %c0_i32_0 = arith.constant 0 : i32
    %c0_i32_1 = arith.constant 0 : i32
    return %c0_i32, %c0_i32_0 : i32, i32
  }
  func.func @transform_3(%arg0: i32) -> (i32, i32) {
    %c0_i32 = arith.constant 0 : i32
    %c0_i32_0 = arith.constant 0 : i32
    %c0_i32_1 = arith.constant 0 : i32
    return %c0_i32, %c0_i32_0 : i32, i32
  }
  func.func @transform_4(%arg0: i32) -> (i32, i32, i32, i32) {
    %c0_i32 = arith.constant 0 : i32
    %c0_i32_0 = arith.constant 0 : i32
    %c0_i32_1 = arith.constant 0 : i32
    %c0_i32_2 = arith.constant 0 : i32
    return %arg0, %c0_i32, %c0_i32_0, %c0_i32_1 : i32, i32, i32, i32
  }
  func.func @transform_5(%arg0: i32) -> (i32, i32, i32) {
    %c0_i32 = arith.constant 0 : i32
    %c0_i32_0 = arith.constant 0 : i32
    %c0_i32_1 = arith.constant 0 : i32
    return %arg0, %c0_i32, %c0_i32_0 : i32, i32, i32
  }
}

module attributes {stable_mosaic.version = 11 : i64} {
  func.func @_bn_add_relu_kernel(%arg0: i32, %arg1: memref<1x16x16x128xf32, #tpu.memory_space<vmem>>, %arg2: memref<1x16x16x128xf32, #tpu.memory_space<vmem>>, %arg3: memref<1x128xf32, #tpu.memory_space<vmem>>, %arg4: memref<1x128xf32, #tpu.memory_space<vmem>>, %arg5: memref<1x16x16x128xf32, #tpu.memory_space<vmem>>) attributes {dimension_semantics = [#tpu.dimension_semantics<parallel>], iteration_bounds = array<i64: 2>, scalar_prefetch = 0 : i64, scratch_operands = 0 : i64, tpu.core_type = #tpu.core_type<tc>, window_params = [{transform_indices = @transform_0, window_bounds = array<i64: 1, 16, 16, 128>}, {transform_indices = @transform_1, window_bounds = array<i64: 1, 16, 16, 128>}, {pipeline_mode = #tpu.pipeline_mode<synchronous>, transform_indices = @transform_2, window_bounds = array<i64: 1, 128>}, {pipeline_mode = #tpu.pipeline_mode<synchronous>, transform_indices = @transform_3, window_bounds = array<i64: 1, 128>}, {transform_indices = @transform_4, window_bounds = array<i64: 1, 16, 16, 128>}]} {
    %c0 = arith.constant 0 : index
    %c0_0 = arith.constant 0 : index
    %c0_1 = arith.constant 0 : index
    %c0_2 = arith.constant 0 : index
    %0 = vector.load %arg1[%c0, %c0_0, %c0_1, %c0_2] : memref<1x16x16x128xf32, #tpu.memory_space<vmem>>, vector<1x16x16x128xf32>
    %c0_3 = arith.constant 0 : index
    %c0_4 = arith.constant 0 : index
    %c0_5 = arith.constant 0 : index
    %c0_6 = arith.constant 0 : index
    %1 = vector.load %arg2[%c0_3, %c0_4, %c0_5, %c0_6] : memref<1x16x16x128xf32, #tpu.memory_space<vmem>>, vector<1x16x16x128xf32>
    %c0_7 = arith.constant 0 : index
    %c0_8 = arith.constant 0 : index
    %2 = vector.load %arg3[%c0_7, %c0_8] : memref<1x128xf32, #tpu.memory_space<vmem>>, vector<1x128xf32>
    %3 = vector.shape_cast %2 : vector<1x128xf32> to vector<128xf32>
    %4 = vector.shape_cast %3 : vector<128xf32> to vector<1x1x1x128xf32>
    %5 = vector.broadcast %4 : vector<1x1x1x128xf32> to vector<1x16x16x128xf32>
    %6 = arith.mulf %0, %5 : vector<1x16x16x128xf32>
    %c0_9 = arith.constant 0 : index
    %c0_10 = arith.constant 0 : index
    %7 = vector.load %arg4[%c0_9, %c0_10] : memref<1x128xf32, #tpu.memory_space<vmem>>, vector<1x128xf32>
    %8 = vector.shape_cast %7 : vector<1x128xf32> to vector<128xf32>
    %9 = vector.shape_cast %8 : vector<128xf32> to vector<1x1x1x128xf32>
    %10 = vector.broadcast %9 : vector<1x1x1x128xf32> to vector<1x16x16x128xf32>
    %11 = arith.addf %6, %10 : vector<1x16x16x128xf32>
    %12 = arith.addf %11, %1 : vector<1x16x16x128xf32>
    %cst = arith.constant 0.000000e+00 : f32
    %13 = vector.broadcast %cst : f32 to vector<1x16x16x128xf32>
    %14 = arith.maximumf %12, %13 : vector<1x16x16x128xf32>
    %c0_11 = arith.constant 0 : index
    %c0_12 = arith.constant 0 : index
    %c0_13 = arith.constant 0 : index
    %c0_14 = arith.constant 0 : index
    %15 = vector.load %arg5[%c0_11, %c0_12, %c0_13, %c0_14] : memref<1x16x16x128xf32, #tpu.memory_space<vmem>>, vector<1x16x16x128xf32>
    tpu.vector_store %arg5[%c0_11, %c0_12, %c0_13, %c0_14], %14 {strides = array<i32>} : memref<1x16x16x128xf32, #tpu.memory_space<vmem>>, vector<1x16x16x128xf32>,
    return
  }
  func.func @transform_0(%arg0: i32) -> (i32, i32, i32, i32) {
    %c0_i32 = arith.constant 0 : i32
    %c0_i32_0 = arith.constant 0 : i32
    %c0_i32_1 = arith.constant 0 : i32
    %c0_i32_2 = arith.constant 0 : i32
    return %arg0, %c0_i32, %c0_i32_0, %c0_i32_1 : i32, i32, i32, i32
  }
  func.func @transform_1(%arg0: i32) -> (i32, i32, i32, i32) {
    %c0_i32 = arith.constant 0 : i32
    %c0_i32_0 = arith.constant 0 : i32
    %c0_i32_1 = arith.constant 0 : i32
    %c0_i32_2 = arith.constant 0 : i32
    return %arg0, %c0_i32, %c0_i32_0, %c0_i32_1 : i32, i32, i32, i32
  }
  func.func @transform_2(%arg0: i32) -> (i32, i32) {
    %c0_i32 = arith.constant 0 : i32
    %c0_i32_0 = arith.constant 0 : i32
    %c0_i32_1 = arith.constant 0 : i32
    return %c0_i32, %c0_i32_0 : i32, i32
  }
  func.func @transform_3(%arg0: i32) -> (i32, i32) {
    %c0_i32 = arith.constant 0 : i32
    %c0_i32_0 = arith.constant 0 : i32
    %c0_i32_1 = arith.constant 0 : i32
    return %c0_i32, %c0_i32_0 : i32, i32
  }
  func.func @transform_4(%arg0: i32) -> (i32, i32, i32, i32) {
    %c0_i32 = arith.constant 0 : i32
    %c0_i32_0 = arith.constant 0 : i32
    %c0_i32_1 = arith.constant 0 : i32
    %c0_i32_2 = arith.constant 0 : i32
    return %arg0, %c0_i32, %c0_i32_0, %c0_i32_1 : i32, i32, i32, i32
  }
}

</mosaic_0001>

<bundles_post_ra>
// kernel: basic_block_forward.5
= control target key start
LH: loop header
LB: loop body
LE: loop exit
PB: predicated region body
PF: predicated region fallthrough
CT: control target
= control target key end

     0   :  { %s582_s15 = smov 0   ;;  %s849_s0 = inlined_call_operand.vmem [shape: f32[2,16,16,128], index: 0, kind: input, shape index: {}, may-alias: {0,4}]   ;;  %s850_s1 = inlined_call_operand.vmem [shape: f32[2,16,16,128], index: 1, kind: input, shape index: {}]   ;;  %s851_s2 = inlined_call_operand.vmem [shape: f32[1,128], index: 2, kind: input, shape index: {}]   ;;  %s852_s3 = inlined_call_operand.vmem [shape: f32[1,128], index: 3, kind: input, shape index: {}]   ;;  %s853_s4 = inlined_call_operand.vmem [shape: f32[2,16,16,128], index: 4, kind: output, shape index: {}, may-alias: {0,4}]  }
   0x1 LB: > { %s523_s16 = sadd.s32 4294967295, %s555_s15   ;;  %p527_p0 = scmp.ge.s32.totalorder %s555_s15, 1  ;;  %s555_s15 = sphi %s582_s15, %s14_s15  }
   0x2   : > { %p172_p1 = scmp.lt.s32.totalorder %s555_s15, 3 }
   0x4   : > { %p173_p2 = pnand %p527_p0, %p172_p1 }
   0x5   : > { %p203_p3 = scmp.lt.s32.totalorder (!%p173_p2), %s523_s16, 1 }
   0x6   : > { %176 = sbr.rel (%p173_p2) target bundleno = 53 (0x35), region = 36 }
   0xb   : > { %s855_s16 = smov (!%p203_p3, %s523_s16), 1  ;;  %v595_v0 = vld [vmem:[%s851_s2] ss:$0 sm:$0xff] }
   0xc   : > { %s590_s17 = sshll.u32 %s855_s16, 8  ;;  %v606_v1 = vld [vmem:[%s852_s3] ss:$0 sm:$0xff] }
   0xd   : > { %s601_s22 = scalar_lea.vmem %s849_s0, %s590_s17  ;;  %s653_s27 = scalar_lea.vmem %s850_s1, %s590_s17 }
   0xe   : > { %v218_v2 = vld [vmem:[%s601_s22] sm:$0xff]  ;;  %v219_v3 = vld [vmem:[%s601_s22 + $0x8] sm:$0xff]  ;;  %v220_v4 = vld [vmem:[%s601_s22 + $0x10] sm:$0xff]  ;;  %s709_s30 = scalar_lea.vmem %s853_s4, %s590_s17 }
   0xf   : > { %v221_v5 = vld [vmem:[%s601_s22 + $0x18] sm:$0xff]  ;;  %v222_v6 = vld [vmem:[%s601_s22 + $0x20] sm:$0xff]  ;;  %v223_v7 = vld [vmem:[%s601_s22 + $0x28] sm:$0xff]  ;;  %v289_v8 = vmul.f32 %v595_v0, %v218_v2  ;;  %v290_v9 = vmul.f32 %v595_v0, %v219_v3  ;;  %v291_v10 = vmul.f32 %v595_v0, %v220_v4 }
  0x10   : > { %v224_v11 = vld [vmem:[%s601_s22 + $0x30] sm:$0xff]  ;;  %v225_v12 = vld [vmem:[%s601_s22 + $0x38] sm:$0xff]  ;;  %v226_v13 = vld [vmem:[%s601_s22 + $0x40] sm:$0xff]  ;;  %v292_v14 = vmul.f32 %v595_v0, %v221_v5  ;;  %v293_v15 = vmul.f32 %v595_v0, %v222_v6  ;;  %v294_v16 = vmul.f32 %v595_v0, %v223_v7 }
  0x11   : > { %v227_v17 = vld [vmem:[%s601_s22 + $0x48] sm:$0xff]  ;;  %v228_v18 = vld [vmem:[%s601_s22 + $0x50] sm:$0xff]  ;;  %v229_v19 = vld [vmem:[%s601_s22 + $0x58] sm:$0xff]  ;;  %v328_v20 = vadd.f32 %v606_v1, %v289_v8  ;;  %v329_v21 = vadd.f32 %v606_v1, %v290_v9  ;;  %v330_v22 = vadd.f32 %v606_v1, %v291_v10  ;;  %v295_v23 = vmul.f32 %v595_v0, %v224_v11 }
  0x12   : > { %v230_v24 = vld [vmem:[%s601_s22 + $0x60] sm:$0xff]  ;;  %v231_v25 = vld [vmem:[%s601_s22 + $0x68] sm:$0xff]  ;;  %v232_v26 = vld [vmem:[%s601_s22 + $0x70] sm:$0xff]  ;;  %v331_v27 = vadd.f32 %v606_v1, %v292_v14  ;;  %v332_v28 = vadd.f32 %v606_v1, %v293_v15  ;;  %v333_v29 = vadd.f32 %v606_v1, %v294_v16  ;;  %v296_v30 = vmul.f32 %v595_v0, %v225_v12 }
  0x13   : > { %v233_v31 = vld [vmem:[%s601_s22 + $0x78] sm:$0xff]  ;;  %v334_v32 = vadd.f32 %v606_v1, %v295_v23  ;;  %v297_v33 = vmul.f32 %v595_v0, %v226_v13  ;;  %v298_v34 = vmul.f32 %v595_v0, %v227_v17  ;;  %v299_v35 = vmul.f32 %v595_v0, %v228_v18  ;;  %v234_v36 = vld [vmem:[%s601_s22 + $0x80] sm:$0xff]  ;;  %v235_v37 = vld [vmem:[%s601_s22 + $0x88] sm:$0xff] }
  0x14   : > { %v236_v38 = vld [vmem:[%s601_s22 + $0x90] sm:$0xff]  ;;  %v335_v39 = vadd.f32 %v606_v1, %v296_v30  ;;  %v300_v40 = vmul.f32 %v595_v0, %v229_v19  ;;  %v301_v41 = vmul.f32 %v595_v0, %v230_v24  ;;  %v302_v42 = vmul.f32 %v595_v0, %v231_v25  ;;  %v237_v43 = vld [vmem:[%s601_s22 + $0x98] sm:$0xff]  ;;  %v238_v44 = vld [vmem:[%s601_s22 + $0xa0] sm:$0xff] }
  0x15   : > { %v239_v45 = vld [vmem:[%s601_s22 + $0xa8] sm:$0xff]  ;;  %v336_v46 = vadd.f32 %v606_v1, %v297_v33  ;;  %v660_v47 = vadd.f32 %v606_v1, %v298_v34  ;;  %v663_v48 = vadd.f32 %v606_v1, %v299_v35  ;;  %v303_v49 = vmul.f32 %v595_v0, %v232_v26  ;;  %v250_v58 = vld [vmem:[%s653_s27] sm:$0xff]  ;;  %v252_v3 = vld [vmem:[%s653_s27 + $0x10] sm:$0xff] }
  0x16   : > { %v667_v50 = vadd.f32 %v606_v1, %v300_v40  ;;  %v670_v51 = vadd.f32 %v606_v1, %v301_v41  ;;  %v673_v52 = vadd.f32 %v606_v1, %v302_v42  ;;  %v304_v53 = vmul.f32 %v595_v0, %v233_v31  ;;  %v251_v2 = vld [vmem:[%s653_s27 + $0x8] sm:$0xff]  ;;  %v253_v4 = vld [vmem:[%s653_s27 + $0x18] sm:$0xff]  ;;  %v712_v8 = vld [vmem:[%s601_s22 + $0xb0] sm:$0xff] }
  0x17   : > { %v677_v54 = vadd.f32 %v606_v1, %v303_v49  ;;  %v305_v55 = vmul.f32 %v595_v0, %v234_v36  ;;  %v306_v56 = vmul.f32 %v595_v0, %v235_v37  ;;  %v307_v57 = vmul.f32 %v595_v0, %v236_v38  ;;  %v715_v9 = vld [vmem:[%s601_s22 + $0xb8] sm:$0xff]  ;;  %v718_v10 = vld [vmem:[%s601_s22 + $0xc0] sm:$0xff]  ;;  %v721_v11 = vld [vmem:[%s601_s22 + $0xc8] sm:$0xff] }
  0x18   : > { %v684_v59 = vadd.f32 %v606_v1, %v304_v53  ;;  %v308_v60 = vmul.f32 %v595_v0, %v237_v43  ;;  %v688_v61 = vmul.f32 %v595_v0, %v238_v44  ;;  %v691_v62 = vmul.f32 %v595_v0, %v239_v45  ;;  %v724_v12 = vld [vmem:[%s601_s22 + $0xd0] sm:$0xff]  ;;  %v727_v13 = vld [vmem:[%s601_s22 + $0xd8] sm:$0xff]  ;;  %v730_v14 = vld [vmem:[%s601_s22 + $0xe0] sm:$0xff] }
  0x19   : > { %v360_v63 = vadd.f32 %v328_v20, %v250_v58  ;;  %v697_v5 = vadd.f32 %v606_v1, %v305_v55  ;;  %v700_v6 = vadd.f32 %v606_v1, %v306_v56  ;;  %v703_v7 = vadd.f32 %v606_v1, %v307_v57  ;;  %v733_v15 = vld [vmem:[%s601_s22 + $0xe8] sm:$0xff]  ;;  %v736_v16 = vld [vmem:[%s601_s22 + $0xf0] sm:$0xff]  ;;  %v739_v17 = vld [vmem:[%s601_s22 + $0xf8] sm:$0xff] }
  0x1a   : > { %v361_v18 = vadd.f32 %v329_v21, %v251_v2  ;;  %v362_v19 = vadd.f32 %v330_v22, %v252_v3  ;;  %v363_v20 = vadd.f32 %v331_v27, %v253_v4  ;;  %v254_v23 = vld [vmem:[%s653_s27 + $0x20] sm:$0xff]  ;;  %v255_v24 = vld [vmem:[%s653_s27 + $0x28] sm:$0xff]  ;;  %v256_v25 = vld [vmem:[%s653_s27 + $0x30] sm:$0xff]  ;;  %v347_v26 = vadd.f32 %v606_v1, %v308_v60 }
  0x1b   : > { %v392_v30 = vmax.f32 %v360_v63, 0.0  ;;  %v364_v31 = vadd.f32 %v332_v28, %v254_v23  ;;  %v365_v33 = vadd.f32 %v333_v29, %v255_v24  ;;  %v366_v34 = vadd.f32 %v334_v32, %v256_v25  ;;  %v257_v35 = vld [vmem:[%s653_s27 + $0x38] sm:$0xff]  ;;  %v258_v36 = vld [vmem:[%s653_s27 + $0x40] sm:$0xff]  ;;  %v259_v21 = vld [vmem:[%s653_s27 + $0x48] sm:$0xff] }
  0x1c   : > { %v393_v22 = vmax.f32 %v361_v18, 0.0  ;;  %v394_v27 = vmax.f32 %v362_v19, 0.0  ;;  %v395_v37 = vmax.f32 %v363_v20, 0.0  ;;  %v367_v38 = vadd.f32 %v335_v39, %v257_v35  ;;  %v260_v40 = vld [vmem:[%s653_s27 + $0x50] sm:$0xff]  ;;  %v261_v41 = vld [vmem:[%s653_s27 + $0x58] sm:$0xff]  ;;  %v262_v42 = vld [vmem:[%s653_s27 + $0x60] sm:$0xff] }
  0x1d   : > { %424 = vst [vmem:[%s709_s30] sm:$0xff] %v392_v30  ;;  %v396_v28 = vmax.f32 %v364_v31, 0.0  ;;  %v397_v29 = vmax.f32 %v365_v33, 0.0  ;;  %v398_v32 = vmax.f32 %v366_v34, 0.0  ;;  %v368_v43 = vadd.f32 %v336_v46, %v258_v36  ;;  %v263_v44 = vld [vmem:[%s653_s27 + $0x68] sm:$0xff]  ;;  %v264_v45 = vld [vmem:[%s653_s27 + $0x70] sm:$0xff]  ;;  %v265_v49 = vld [vmem:[%s653_s27 + $0x78] sm:$0xff] }
  0x1e   : > { %425 = vst [vmem:[%s709_s30 + $0x8] sm:$0xff] %v393_v22  ;;  %426 = vst [vmem:[%s709_s30 + $0x10] sm:$0xff] %v394_v27  ;;  %v399_v39 = vmax.f32 %v367_v38, 0.0  ;;  %v369_v53 = vadd.f32 %v660_v47, %v259_v21  ;;  %v370_v55 = vadd.f32 %v663_v48, %v260_v40  ;;  %v371_v56 = vadd.f32 %v667_v50, %v261_v41  ;;  %v266_v57 = vld [vmem:[%s653_s27 + $0x80] sm:$0xff]  ;;  %v267_v47 = vld [vmem:[%s653_s27 + $0x88] sm:$0xff] }
  0x1f   : > { %427 = vst [vmem:[%s709_s30 + $0x18] sm:$0xff] %v395_v37  ;;  %428 = vst [vmem:[%s709_s30 + $0x20] sm:$0xff] %v396_v28  ;;  %v400_v46 = vmax.f32 %v368_v43, 0.0  ;;  %v372_v58 = vadd.f32 %v670_v51, %v262_v42  ;;  %v373_v60 = vadd.f32 %v673_v52, %v263_v44  ;;  %v374_v63 = vadd.f32 %v677_v54, %v264_v45  ;;  %v268_v2 = vld [vmem:[%s653_s27 + $0x90] sm:$0xff]  ;;  %v269_v48 = vld [vmem:[%s653_s27 + $0x98] sm:$0xff] }
  0x20   : > { %429 = vst [vmem:[%s709_s30 + $0x28] sm:$0xff] %v397_v29  ;;  %430 = vst [vmem:[%s709_s30 + $0x30] sm:$0xff] %v398_v32  ;;  %v401_v50 = vmax.f32 %v369_v53, 0.0  ;;  %v402_v3 = vmax.f32 %v370_v55, 0.0  ;;  %v403_v4 = vmax.f32 %v371_v56, 0.0  ;;  %v375_v18 = vadd.f32 %v684_v59, %v265_v49  ;;  %v270_v59 = vld [vmem:[%s653_s27 + $0xa0] sm:$0xff] }
  0x21   : > { %431 = vst [vmem:[%s709_s30 + $0x38] sm:$0xff] %v399_v39  ;;  %432 = vst [vmem:[%s709_s30 + $0x40] sm:$0xff] %v400_v46  ;;  %v404_v51 = vmax.f32 %v372_v58, 0.0  ;;  %v405_v52 = vmax.f32 %v373_v60, 0.0  ;;  %v406_v19 = vmax.f32 %v374_v63, 0.0  ;;  %v376_v54 = vadd.f32 %v697_v5, %v266_v57  ;;  %v271_v30 = vld [vmem:[%s653_s27 + $0xa8] sm:$0xff] }
  0x22   : > { %433 = vst [vmem:[%s709_s30 + $0x48] sm:$0xff] %v401_v50  ;;  %434 = vst [vmem:[%s709_s30 + $0x50] sm:$0xff] %v402_v3  ;;  %v407_v20 = vmax.f32 %v375_v18, 0.0  ;;  %v377_v23 = vadd.f32 %v700_v6, %v267_v47  ;;  %v378_v24 = vadd.f32 %v703_v7, %v268_v2  ;;  %v379_v25 = vadd.f32 %v347_v26, %v269_v48  ;;  %v272_v35 = vld [vmem:[%s653_s27 + $0xb0] sm:$0xff]  ;;  %v274_v37 = vld [vmem:[%s653_s27 + $0xc0] sm:$0xff] }
  0x23   : > { %435 = vst [vmem:[%s709_s30 + $0x58] sm:$0xff] %v403_v4  ;;  %436 = vst [vmem:[%s709_s30 + $0x60] sm:$0xff] %v404_v51  ;;  %v408_v31 = vmax.f32 %v376_v54, 0.0  ;;  %v348_v5 = vadd.f32 %v606_v1, %v688_v61  ;;  %v349_v6 = vadd.f32 %v606_v1, %v691_v62  ;;  %v311_v7 = vmul.f32 %v595_v0, %v712_v8  ;;  %v273_v62 = vld [vmem:[%s653_s27 + $0xb8] sm:$0xff]  ;;  %v275_v29 = vld [vmem:[%s653_s27 + $0xc8] sm:$0xff] }
  0x24   : > { %437 = vst [vmem:[%s709_s30 + $0x68] sm:$0xff] %v405_v52  ;;  %438 = vst [vmem:[%s709_s30 + $0x70] sm:$0xff] %v406_v19  ;;  %v409_v26 = vmax.f32 %v377_v23, 0.0  ;;  %v410_v33 = vmax.f32 %v378_v24, 0.0  ;;  %v411_v34 = vmax.f32 %v379_v25, 0.0  ;;  %v312_v36 = vmul.f32 %v595_v0, %v715_v9  ;;  %v276_v32 = vld [vmem:[%s653_s27 + $0xd0] sm:$0xff] }
  0x25   : > { %439 = vst [vmem:[%s709_s30 + $0x78] sm:$0xff] %v407_v20  ;;  %440 = vst [vmem:[%s709_s30 + $0x80] sm:$0xff] %v408_v31  ;;  %v380_v21 = vadd.f32 %v348_v5, %v270_v59  ;;  %v381_v61 = vadd.f32 %v349_v6, %v271_v30  ;;  %v350_v22 = vadd.f32 %v606_v1, %v311_v7  ;;  %v277_v43 = vld [vmem:[%s653_s27 + $0xd8] sm:$0xff]  ;;  %v278_v58 = vld [vmem:[%s653_s27 + $0xe0] sm:$0xff] }
  0x26   : > { %v313_v8 = vmul.f32 %v595_v0, %v718_v10  ;;  %441 = vst [vmem:[%s709_s30 + $0x88] sm:$0xff] %v409_v26  ;;  %442 = vst [vmem:[%s709_s30 + $0x90] sm:$0xff] %v410_v33  ;;  %v351_v27 = vadd.f32 %v606_v1, %v312_v36  ;;  %v314_v9 = vmul.f32 %v595_v0, %v721_v11  ;;  %v279_v60 = vld [vmem:[%s653_s27 + $0xe8] sm:$0xff]  ;;  %v280_v3 = vld [vmem:[%s653_s27 + $0xf0] sm:$0xff] }
  0x27   : > { %443 = vst [vmem:[%s709_s30 + $0x98] sm:$0xff] %v411_v34  ;;  %v315_v38 = vmul.f32 %v595_v0, %v724_v12  ;;  %v316_v40 = vmul.f32 %v595_v0, %v727_v13  ;;  %v412_v41 = vmax.f32 %v380_v21, 0.0  ;;  %v413_v42 = vmax.f32 %v381_v61, 0.0  ;;  %v281_v19 = vld [vmem:[%s653_s27 + $0xf8] sm:$0xff] }
  0x28   : > { %v382_v10 = vadd.f32 %v350_v22, %v272_v35  ;;  %v352_v28 = vadd.f32 %v606_v1, %v313_v8  ;;  %v383_v44 = vadd.f32 %v351_v27, %v273_v62  ;;  %v353_v11 = vadd.f32 %v606_v1, %v314_v9 }
  0x29   : > { %v354_v45 = vadd.f32 %v606_v1, %v315_v38  ;;  %v355_v12 = vadd.f32 %v606_v1, %v316_v40  ;;  %444 = vst [vmem:[%s709_s30 + $0xa0] sm:$0xff] %v412_v41  ;;  %445 = vst [vmem:[%s709_s30 + $0xa8] sm:$0xff] %v413_v42  ;;  %v317_v39 = vmul.f32 %v595_v0, %v730_v14 }
  0x2a   : > { %v414_v13 = vmax.f32 %v382_v10, 0.0  ;;  %v384_v49 = vadd.f32 %v352_v28, %v274_v37  ;;  %v318_v53 = vmul.f32 %v595_v0, %v733_v15  ;;  %v415_v55 = vmax.f32 %v383_v44, 0.0 }
  0x2b   : > { %v385_v56 = vadd.f32 %v353_v11, %v275_v29  ;;  %v386_v57 = vadd.f32 %v354_v45, %v276_v32  ;;  %v387_v46 = vadd.f32 %v355_v12, %v277_v43  ;;  %v356_v47 = vadd.f32 %v606_v1, %v317_v39 }
  0x2c   : > { %446 = vst [vmem:[%s709_s30 + $0xb0] sm:$0xff] %v414_v13  ;;  %v416_v63 = vmax.f32 %v384_v49, 0.0  ;;  %v357_v14 = vadd.f32 %v606_v1, %v318_v53  ;;  %v319_v15 = vmul.f32 %v595_v0, %v736_v16  ;;  %447 = vst [vmem:[%s709_s30 + $0xb8] sm:$0xff] %v415_v55  ;;  %v320_v4 = vmul.f32 %v595_v0, %v739_v17 }
  0x2d   : > { %v417_v2 = vmax.f32 %v385_v56, 0.0  ;;  %v418_v48 = vmax.f32 %v386_v57, 0.0  ;;  %v419_v50 = vmax.f32 %v387_v46, 0.0  ;;  %v388_v18 = vadd.f32 %v356_v47, %v278_v58 }
  0x2e   : > { %448 = vst [vmem:[%s709_s30 + $0xc0] sm:$0xff] %v416_v63  ;;  %v389_v51 = vadd.f32 %v357_v14, %v279_v60  ;;  %v358_v52 = vadd.f32 %v606_v1, %v319_v15  ;;  %v359_v16 = vadd.f32 %v606_v1, %v320_v4 }
  0x2f   : > { %449 = vst [vmem:[%s709_s30 + $0xc8] sm:$0xff] %v417_v2  ;;  %450 = vst [vmem:[%s709_s30 + $0xd0] sm:$0xff] %v418_v48  ;;  %v420_v54 = vmax.f32 %v388_v18, 0.0 }
  0x30   : > { %451 = vst [vmem:[%s709_s30 + $0xd8] sm:$0xff] %v419_v50  ;;  %v421_v20 = vmax.f32 %v389_v51, 0.0  ;;  %v390_v23 = vadd.f32 %v358_v52, %v280_v3  ;;  %v391_v24 = vadd.f32 %v359_v16, %v281_v19 }
  0x31   : > { %452 = vst [vmem:[%s709_s30 + $0xe0] sm:$0xff] %v420_v54 }
  0x32   : > { %453 = vst [vmem:[%s709_s30 + $0xe8] sm:$0xff] %v421_v20  ;;  %v422_v0 = vmax.f32 %v390_v23, 0.0  ;;  %v423_v17 = vmax.f32 %v391_v24, 0.0 }
  0x34   : > { %454 = vst [vmem:[%s709_s30 + $0xf0] sm:$0xff] %v422_v0  ;;  %455 = vst [vmem:[%s709_s30 + $0xf8] sm:$0xff] %v423_v17 }
  0x35 PF: > { %s14_s15 = sadd.s32 1, %s555_s15  }
  0x36   : > { %p11_p4 = scmp.ge.s32.totalorder %s14_s15, 4  }
  0x38   :  { %13 = sbr.rel (!%p11_p4) target bundleno = 1 (0x1), region = 69 }

// kernel: basic_block_forward.3
= control target key start
LH: loop header
LB: loop body
LE: loop exit
PB: predicated region body
PF: predicated region fallthrough
CT: control target
= control target key end

     0   :  { %s4448_s12 = smov 0   ;;  %s5893_s0 = inlined_call_operand.vmem [shape: f32[2,16,16,128], index: 0, kind: input, shape index: {}]   ;;  %s5894_s1 = inlined_call_operand.vmem [shape: f32[1152,128], index: 1, kind: input, shape index: {}]   ;;  %s5895_s2 = inlined_call_operand.vmem [shape: f32[2,16,16,128], index: 2, kind: output, shape index: {0}]   ;;  %s5896_s3 = inlined_call_operand.vmem [shape: f32[2,2,128], index: 3, kind: output, shape index: {1}]  }
   0x1 LB: > { %s3199_s13 = sadd.s32 4294967295, %s4425_s12   ;;  %p3203_p0 = scmp.ge.s32.totalorder %s4425_s12, 1  ;;  %s4425_s12 = sphi %s4448_s12, %s14_s12  }
   0x2   : > { %p140_p1 = scmp.lt.s32.totalorder %s4425_s12, 3 }
   0x4   : > { %p141_p2 = pnand %p3203_p0, %p140_p1 }
   0x6   : > { %144 = sbr.rel (%p141_p2) target bundleno = 591 (0x24f), region = 28 }
   0xb   : > { %p168_p3 = scmp.lt.s32.totalorder %s3199_s13, 1  ;;  %p3209_p4 = scmp.ne.s32.totalorder %s3199_s13, 0 }
   0xd   : > { %s169_s14 = scalar_select %p168_p3, %s3199_s13, 1 }
   0xe   : > { %185 = sbr.rel (%p3209_p4) target bundleno = 39 (0x27), region = 32 }
   0xf   : > { %s3212_s15 = sshll.u32 %s169_s14, 8  ;;  %s3208_s16 = sshll.u32 %s169_s14, 1 }
  0x10   : > { %s4459_s19 = scalar_lea.vmem %s5893_s0, %s3212_s15  ;;  %s4464_s22 = scalar_lea.vmem %s5895_s2, %s3212_s15 }
  0x11   : > { %s4469_s25 = scalar_lea.vmem %s5896_s3, %s3208_s16 }
  0x13   : > { %v4427_v0 = vmov 0.0  }
  0x14   : > { %186 = vst [vmem:[#allocation2] sm:$0xff] %v4427_v0  ;;  %187 = vst [vmem:[#allocation2 + $0x8] sm:$0xff] %v4427_v0 }
  0x15   : > { %188 = vst [vmem:[#allocation2 + $0x10] sm:$0x3] %v4427_v0  ;;  %190 = vst [vmem:[#allocation2 + $0x198] sm:$0xff] %v4427_v0 }
  0x16   : > { %191 = vst [vmem:[#allocation2 + $0x1a0] sm:$0xff] %v4427_v0  ;;  %192 = vst [vmem:[#allocation2 + $0x1a8] sm:$0x3] %v4427_v0 }
  0x17   : > { %194 = vst [vmem:[#allocation2 + $0x18] sm:$0x1] %v4427_v0  ;;  %195 = vst [vmem:[#allocation2 + $0x30] sm:$0x1] %v4427_v0 }
  0x18   : > { %196 = vst [vmem:[#allocation2 + $0x48] sm:$0x1] %v4427_v0  ;;  %197 = vst [vmem:[#allocation2 + $0x60] sm:$0x1] %v4427_v0 }
  0x19   : > { %198 = vst [vmem:[#allocation2 + $0x78] sm:$0x1] %v4427_v0  ;;  %199 = vst [vmem:[#allocation2 + $0x90] sm:$0x1] %v4427_v0 }
  0x1a   : > { %200 = vst [vmem:[#allocation2 + $0xa8] sm:$0x1] %v4427_v0  ;;  %201 = vst [vmem:[#allocation2 + $0xc0] sm:$0x1] %v4427_v0 }
  0x1b   : > { %202 = vst [vmem:[#allocation2 + $0xd8] sm:$0x1] %v4427_v0  ;;  %203 = vst [vmem:[#allocation2 + $0xf0] sm:$0x1] %v4427_v0 }
  0x1c   : > { %204 = vst [vmem:[#allocation2 + $0x108] sm:$0x1] %v4427_v0  ;;  %205 = vst [vmem:[#allocation2 + $0x120] sm:$0x1] %v4427_v0 }
  0x1d   : > { %206 = vst [vmem:[#allocation2 + $0x138] sm:$0x1] %v4427_v0  ;;  %207 = vst [vmem:[#allocation2 + $0x150] sm:$0x1] %v4427_v0 }
  0x1e   : > { %208 = vst [vmem:[#allocation2 + $0x168] sm:$0x1] %v4427_v0  ;;  %209 = vst [vmem:[#allocation2 + $0x180] sm:$0x1] %v4427_v0 }
  0x1f   : > { %210 = vst [vmem:[#allocation2 + $0x29] sm:$0x1] %v4427_v0  ;;  %211 = vst [vmem:[#allocation2 + $0x41] sm:$0x1] %v4427_v0 }
  0x20   : > { %212 = vst [vmem:[#allocation2 + $0x59] sm:$0x1] %v4427_v0  ;;  %213 = vst [vmem:[#allocation2 + $0x71] sm:$0x1] %v4427_v0 }
  0x21   : > { %214 = vst [vmem:[#allocation2 + $0x89] sm:$0x1] %v4427_v0  ;;  %215 = vst [vmem:[#allocation2 + $0xa1] sm:$0x1] %v4427_v0 }
  0x22   : > { %216 = vst [vmem:[#allocation2 + $0xb9] sm:$0x1] %v4427_v0  ;;  %217 = vst [vmem:[#allocation2 + $0xd1] sm:$0x1] %v4427_v0 }
  0x23   : > { %218 = vst [vmem:[#allocation2 + $0xe9] sm:$0x1] %v4427_v0  ;;  %219 = vst [vmem:[#allocation2 + $0x101] sm:$0x1] %v4427_v0 }
  0x24   : > { %220 = vst [vmem:[#allocation2 + $0x119] sm:$0x1] %v4427_v0  ;;  %221 = vst [vmem:[#allocation2 + $0x131] sm:$0x1] %v4427_v0 }
  0x25   : > { %222 = vst [vmem:[#allocation2 + $0x149] sm:$0x1] %v4427_v0  ;;  %223 = vst [vmem:[#allocation2 + $0x161] sm:$0x1] %v4427_v0 }
  0x26   : > { %224 = vst [vmem:[#allocation2 + $0x179] sm:$0x1] %v4427_v0  ;;  %225 = vst [vmem:[#allocation2 + $0x191] sm:$0x1] %v4427_v0 }
  0x27 PF: > { %v386_v1 = vld [vmem:[%s5894_s1 + $0xf8] sm:$0xff]  ;;  %v385_v2 = vld [vmem:[%s5894_s1 + $0xf0] sm:$0xff]  ;;  %v384_v3 = vld [vmem:[%s5894_s1 + $0xe8] sm:$0xff] }
  0x28   : > { %4366 = vmatprep.subr.mxu1 %v386_v1  ;;  %3646 = vmatprep.subr.mxu0 %v386_v1  ;;  %v383_v4 = vld [vmem:[%s5894_s1 + $0xe0] sm:$0xff]  ;;  %v4484_v5 = vld [vmem:[%s4459_s19 + $0x70] sm:$0xff]  ;;  %v382_v6 = vld [vmem:[%s5894_s1 + $0xd8] sm:$0xff] }
  0x29   : > { %4382 = vmatpush3.msra.mxu1 %v386_v1  ;;  %3647 = vmatpush3.msra.mxu0 %v386_v1  ;;  %273 = vst [vmem:[#allocation2 + $0xc1] sm:$0xff] %v4484_v5  ;;  %v4491_v7 = vld [vmem:[%s4459_s19 + $0x78] sm:$0xff]  ;;  %v4495_v8 = vld [vmem:[%s4459_s19 + $0x80] sm:$0xff]  ;;  %v381_v9 = vld [vmem:[%s5894_s1 + $0xd0] sm:$0xff] }
  0x2a   : > { %4367 = vmatprep.subr.mxu1 %v385_v2  ;;  %3648 = vmatprep.subr.mxu0 %v385_v2  ;;  %274 = vst [vmem:[#allocation2 + $0xc9] sm:$0xff] %v4491_v7  ;;  %275 = vst [vmem:[#allocation2 + $0xd9] sm:$0xff] %v4495_v8  ;;  %v4502_v10 = vld [vmem:[%s4459_s19] sm:$0xff]  ;;  %v4505_v11 = vld [vmem:[%s4459_s19 + $0x88] sm:$0xff] }
  0x2b   : > { %4383 = vmatpush3.msra.mxu1 %v385_v2  ;;  %3649 = vmatpush3.msra.mxu0 %v385_v2  ;;  %259 = vst [vmem:[#allocation2 + $0x19] sm:$0xff] %v4502_v10  ;;  %276 = vst [vmem:[#allocation2 + $0xe1] sm:$0xff] %v4505_v11  ;;  %v4510_v12 = vld [vmem:[%s4459_s19 + $0x8] sm:$0xff]  ;;  %v4517_v14 = vld [vmem:[%s4459_s19 + $0x90] sm:$0xff] }
  0x2c   : > { %4368 = vmatprep.subr.mxu1 %v384_v3  ;;  %3650 = vmatprep.subr.mxu0 %v384_v3  ;;  %v380_v13 = vld [vmem:[%s5894_s1 + $0xc8] sm:$0xff]  ;;  %260 = vst [vmem:[#allocation2 + $0x21] sm:$0xff] %v4510_v12  ;;  %277 = vst [vmem:[#allocation2 + $0xf1] sm:$0xff] %v4517_v14  ;;  %v4521_v15 = vld [vmem:[%s4459_s19 + $0x10] sm:$0xff] }
  0x2d   : > { %4384 = vmatpush3.msra.mxu1 %v384_v3  ;;  %3651 = vmatpush3.msra.mxu0 %v384_v3  ;;  %v4524_v16 = vld [vmem:[%s4459_s19 + $0x98] sm:$0xff]  ;;  %v379_v17 = vld [vmem:[%s5894_s1 + $0xc0] sm:$0xff]  ;;  %261 = vst [vmem:[#allocation2 + $0x31] sm:$0xff] %v4521_v15  ;;  %v4547_v22 = vld [vmem:[%s4459_s19 + $0xa8] sm:$0xff] }
  0x2e   : > { %4369 = vmatprep.subr.mxu1 %v383_v4  ;;  %3652 = vmatprep.subr.mxu0 %v383_v4  ;;  %278 = vst [vmem:[#allocation2 + $0xf9] sm:$0xff] %v4524_v16  ;;  %v4532_v18 = vld [vmem:[%s4459_s19 + $0x18] sm:$0xff]  ;;  %v4536_v19 = vld [vmem:[%s4459_s19 + $0xa0] sm:$0xff]  ;;  %v4550_v23 = vld [vmem:[%s4459_s19 + $0x28] sm:$0xff] }
  0x2f   : > { %4385 = vmatpush3.msra.mxu1 %v383_v4  ;;  %3653 = vmatpush3.msra.mxu0 %v383_v4  ;;  %262 = vst [vmem:[#allocation2 + $0x39] sm:$0xff] %v4532_v18  ;;  %v4539_v20 = vld [vmem:[%s4459_s19 + $0x20] sm:$0xff]  ;;  %v378_v21 = vld [vmem:[%s5894_s1 + $0xb8] sm:$0xff]  ;;  %279 = vst [vmem:[#allocation2 + $0x109] sm:$0xff] %v4536_v19 }
  0x30   : > { %4370 = vmatprep.subr.mxu1 %v382_v6  ;;  %3654 = vmatprep.subr.mxu0 %v382_v6  ;;  %263 = vst [vmem:[#allocation2 + $0x49] sm:$0xff] %v4539_v20  ;;  %280 = vst [vmem:[#allocation2 + $0x111] sm:$0xff] %v4547_v22  ;;  %v4555_v24 = vld [vmem:[%s4459_s19 + $0xb0] sm:$0xff]  ;;  %v4565_v27 = vld [vmem:[%s4459_s19 + $0xb8] sm:$0xff] }
  0x31   : > { %4386 = vmatpush3.msra.mxu1 %v382_v6  ;;  %3655 = vmatpush3.msra.mxu0 %v382_v6  ;;  %264 = vst [vmem:[#allocation2 + $0x51] sm:$0xff] %v4550_v23  ;;  %v377_v25 = vld [vmem:[%s5894_s1 + $0xb0] sm:$0xff]  ;;  %281 = vst [vmem:[#allocation2 + $0x121] sm:$0xff] %v4555_v24  ;;  %v4570_v28 = vld [vmem:[%s4459_s19 + $0x38] sm:$0xff] }
  0x32   : > { %4371 = vmatprep.subr.mxu1 %v381_v9  ;;  %3656 = vmatprep.subr.mxu0 %v381_v9  ;;  %v4562_v26 = vld [vmem:[%s4459_s19 + $0x30] sm:$0xff]  ;;  %282 = vst [vmem:[#allocation2 + $0x129] sm:$0xff] %v4565_v27  ;;  %v376_v29 = vld [vmem:[%s5894_s1 + $0xa8] sm:$0xff]  ;;  %266 = vst [vmem:[#allocation2 + $0x69] sm:$0xff] %v4570_v28 }
  0x33   : > { %4387 = vmatpush3.msra.mxu1 %v381_v9  ;;  %3657 = vmatpush3.msra.mxu0 %v381_v9  ;;  %265 = vst [vmem:[#allocation2 + $0x61] sm:$0xff] %v4562_v26  ;;  %v4577_v30 = vld [vmem:[%s4459_s19 + $0xc0] sm:$0xff]  ;;  %v4584_v32 = vld [vmem:[%s4459_s19 + $0xc8] sm:$0xff]  ;;  %v4596_v35 = vld [vmem:[%s4459_s19 + $0xd0] sm:$0xff] }
  0x34   : > { %4372 = vmatprep.subr.mxu1 %v380_v13  ;;  %3658 = vmatprep.subr.mxu0 %v380_v13  ;;  %283 = vst [vmem:[#allocation2 + $0x139] sm:$0xff] %v4577_v30  ;;  %v4581_v31 = vld [vmem:[%s4459_s19 + $0x40] sm:$0xff]  ;;  %284 = vst [vmem:[#allocation2 + $0x141] sm:$0xff] %v4584_v32  ;;  %v4592_v34 = vld [vmem:[%s4459_s19 + $0x48] sm:$0xff] }
  0x35   : > { %4388 = vmatpush3.msra.mxu1 %v380_v13  ;;  %3659 = vmatpush3.msra.mxu0 %v380_v13  ;;  %v375_v33 = vld [vmem:[%s5894_s1 + $0xa0] sm:$0xff]  ;;  %267 = vst [vmem:[#allocation2 + $0x79] sm:$0xff] %v4581_v31  ;;  %268 = vst [vmem:[#allocation2 + $0x81] sm:$0xff] %v4592_v34  ;;  %v4599_v36 = vld [vmem:[%s4459_s19 + $0x50] sm:$0xff] }
  0x36   : > { %4373 = vmatprep.subr.mxu1 %v379_v17  ;;  %3660 = vmatprep.subr.mxu0 %v379_v17  ;;  %v374_v37 = vld [vmem:[%s5894_s1 + $0x98] sm:$0xff]  ;;  %285 = vst [vmem:[#allocation2 + $0x151] sm:$0xff] %v4596_v35  ;;  %269 = vst [vmem:[#allocation2 + $0x91] sm:$0xff] %v4599_v36  ;;  %v4615_v40 = vld [vmem:[%s4459_s19 + $0xe0] sm:$0xff] }
  0x37   : > { %4389 = vmatpush3.msra.mxu1 %v379_v17  ;;  %3661 = vmatpush3.msra.mxu0 %v379_v17  ;;  %v4607_v38 = vld [vmem:[%s4459_s19 + $0xd8] sm:$0xff]  ;;  %v373_v41 = vld [vmem:[%s5894_s1 + $0x90] sm:$0xff]  ;;  %287 = vst [vmem:[#allocation2 + $0x169] sm:$0xff] %v4615_v40  ;;  %v4622_v42 = vld [vmem:[%s4459_s19 + $0x60] sm:$0xff] }
  0x38   : > { %4374 = vmatprep.subr.mxu1 %v378_v21  ;;  %3662 = vmatprep.subr.mxu0 %v378_v21  ;;  %v4610_v39 = vld [vmem:[%s4459_s19 + $0x58] sm:$0xff]  ;;  %286 = vst [vmem:[#allocation2 + $0x159] sm:$0xff] %v4607_v38  ;;  %v4625_v43 = vld [vmem:[%s4459_s19 + $0xe8] sm:$0xff]  ;;  %271 = vst [vmem:[#allocation2 + $0xa9] sm:$0xff] %v4622_v42 }
  0x39   : > { %4390 = vmatpush3.msra.mxu1 %v378_v21  ;;  %3663 = vmatpush3.msra.mxu0 %v378_v21  ;;  %270 = vst [vmem:[#allocation2 + $0x99] sm:$0xff] %v4610_v39  ;;  %288 = vst [vmem:[#allocation2 + $0x171] sm:$0xff] %v4625_v43  ;;  %v4630_v44 = vld [vmem:[%s4459_s19 + $0x68] sm:$0xff]  ;;  %v371_v46 = vld [vmem:[%s5894_s1 + $0x80] sm:$0xff] }
  0x3a   : > { %4375 = vmatprep.subr.mxu1 %v377_v25  ;;  %3664 = vmatprep.subr.mxu0 %v377_v25  ;;  %v372_v45 = vld [vmem:[%s5894_s1 + $0x88] sm:$0xff]  ;;  %272 = vst [vmem:[#allocation2 + $0xb1] sm:$0xff] %v4630_v44  ;;  %v338_v48 = vld [vmem:[%s5894_s1 + $0x78] sm:$0xff]  ;;  %v337_v51 = vld [vmem:[%s5894_s1 + $0x70] sm:$0xff] }
  0x3b   : > { %4391 = vmatpush3.msra.mxu1 %v377_v25  ;;  %3665 = vmatpush3.msra.mxu0 %v377_v25  ;;  %v339_v47 = vld [vmem:[#allocation2 + $0x1] sm:$0xff]  ;;  %v340_v49 = vld [vmem:[#allocation2 + $0x9] sm:$0xff]  ;;  %v884_v50 = vld [vmem:[%s5894_s1 + $0x178] sm:$0xff] }
  0x3c   : > { %4376 = vmatprep.subr.mxu1 %v376_v29  ;;  %3666 = vmatprep.subr.mxu0 %v376_v29  ;;  %v883_v52 = vld [vmem:[%s5894_s1 + $0x170] sm:$0xff]  ;;  %v336_v53 = vld [vmem:[%s5894_s1 + $0x68] sm:$0xff]  ;;  %v335_v55 = vld [vmem:[%s5894_s1 + $0x60] sm:$0xff] }
  0x3d   : > { %4392 = vmatpush3.msra.mxu1 %v376_v29  ;;  %3667 = vmatpush3.msra.mxu0 %v376_v29  ;;  %v882_v54 = vld [vmem:[%s5894_s1 + $0x168] sm:$0xff]  ;;  %v881_v56 = vld [vmem:[%s5894_s1 + $0x160] sm:$0xff]  ;;  %v334_v57 = vld [vmem:[%s5894_s1 + $0x58] sm:$0xff] }
  0x3e   : > { %4377 = vmatprep.subr.mxu1 %v375_v33  ;;  %3668 = vmatprep.subr.mxu0 %v375_v33  ;;  %v880_v58 = vld [vmem:[%s5894_s1 + $0x158] sm:$0xff]  ;;  %v333_v59 = vld [vmem:[%s5894_s1 + $0x50] sm:$0xff]  ;;  %v332_v61 = vld [vmem:[%s5894_s1 + $0x48] sm:$0xff] }
  0x3f   : > { %4393 = vmatpush3.msra.mxu1 %v375_v33  ;;  %3669 = vmatpush3.msra.mxu0 %v375_v33  ;;  %v879_v60 = vld [vmem:[%s5894_s1 + $0x150] sm:$0xff]  ;;  %v878_v62 = vld [vmem:[%s5894_s1 + $0x148] sm:$0xff]  ;;  %v331_v63 = vld [vmem:[%s5894_s1 + $0x40] sm:$0xff] }
  0x40   : > { %4378 = vmatprep.subr.mxu1 %v374_v37  ;;  %3670 = vmatprep.subr.mxu0 %v374_v37  ;;  %v877_v0 = vld [vmem:[%s5894_s1 + $0x140] sm:$0xff]  ;;  %v330_v1 = vld [vmem:[%s5894_s1 + $0x38] sm:$0xff]  ;;  %v329_v3 = vld [vmem:[%s5894_s1 + $0x30] sm:$0xff] }
  0x41   : > { %4394 = vmatpush3.msra.mxu1 %v374_v37  ;;  %3671 = vmatpush3.msra.mxu0 %v374_v37  ;;  %v876_v2 = vld [vmem:[%s5894_s1 + $0x138] sm:$0xff]  ;;  %v875_v4 = vld [vmem:[%s5894_s1 + $0x130] sm:$0xff]  ;;  %v874_v6 = vld [vmem:[%s5894_s1 + $0x128] sm:$0xff] }
  0x42   : > { %4379 = vmatprep.subr.mxu1 %v373_v41  ;;  %3672 = vmatprep.subr.mxu0 %v373_v41  ;;  %v326_v9 = vld [vmem:[%s5894_s1 + $0x18] sm:$0xff]  ;;  %v325_v13 = vld [vmem:[%s5894_s1 + $0x10] sm:$0xff]  ;;  %v870_v21 = vld [vmem:[%s5894_s1 + $0x108] sm:$0xff] }
  0x43   : > { %4395 = vmatpush3.msra.mxu1 %v373_v41  ;;  %3673 = vmatpush3.msra.mxu0 %v373_v41  ;;  %v871_v17 = vld [vmem:[%s5894_s1 + $0x110] sm:$0xff]  ;;  %v869_v25 = vld [vmem:[%s5894_s1 + $0x100] sm:$0xff]  ;;  %v1494_v33 = vld [vmem:[%s5894_s1 + $0x278] sm:$0xff] }
  0x44   : > { %4380 = vmatprep.subr.mxu1 %v372_v45  ;;  %3674 = vmatprep.subr.mxu0 %v372_v45  ;;  %v837_v29 = vld [vmem:[#allocation2 + $0x2] sm:$0xff] }
  0x45   : > { %4396 = vmatpush3.msra.mxu1 %v372_v45  ;;  %3675 = vmatpush3.msra.mxu0 %v372_v45  ;;  %v4781_v37 = vld [vmem:[#allocation2 + $0x20] sm:$0xff]  ;;  %v4795_v45 = vld [vmem:[#allocation2 + $0x30] sm:$0xff] }
  0x46   : > { %4381 = vmatprep.subr.mxu1 %v371_v46  ;;  %3676 = vmatprep.subr.mxu0 %v371_v46  ;;  %v4789_v41 = vld [vmem:[#allocation2 + $0x22] sm:$0xff] }
  0x47   : > { %4397 = vmatpush3.msra.mxu1 %v371_v46  ;;  %3702 = vmatprep.mubr.f32.mxu1 %v4484_v5  ;;  %v328_v5 = vld [vmem:[%s5894_s1 + $0x28] sm:$0xff] }
  0x48   : > { %3677 = vmatpush3.msra.mxu0 %v371_v46  ;;  %3678 = vmatprep.mubr.f32.mxu0 %v339_v47  ;;  %v4798_v46 = vld [vmem:[#allocation2 + $0x38] sm:$0xff] }
  0x49   : > { %3703 = vmatmul.mubr.f32.vlgmr.msra.gmra.mxu1 %v4491_v7  ;;  %3726 = vmatprep.subr.mxu1 %v338_v48  ;;  %v327_v7 = vld [vmem:[%s5894_s1 + $0x20] sm:$0xff]  ;;  %v4801_v47 = vld [vmem:[#allocation2 + $0x32] sm:$0xff] }
  0x4a   : > { %3679 = vmatmul.mubr.f32.vlgmr.msra.gmra.mxu0 %v340_v49  ;;  %3727 = vmatpush3.msra.mxu1 %v338_v48  ;;  %v1187_v48 = vld [vmem:[%s5894_s1 + $0x1e8] sm:$0xff]  ;;  %v4807_v49 = vld [vmem:[#allocation2 + $0x3a] sm:$0xff] }
  0x4b   : > { %3806 = vmatprep.subr.mxu0 %v884_v50  ;;  %3728 = vmatprep.subr.mxu1 %v337_v51 }
  0x4c   : > { %3807 = vmatpush3.msra.mxu0 %v884_v50  ;;  %3705 = vmatprep.mubr.f32.mxu1 %v4495_v8  ;;  %v873_v8 = vld [vmem:[%s5894_s1 + $0x120] sm:$0xff]  ;;  %v1492_v50 = vld [vmem:[%s5894_s1 + $0x268] sm:$0xff] }
  0x4d   : > { %3729 = vmatpush3.msra.mxu1 %v337_v51  ;;  %3808 = vmatprep.subr.mxu0 %v883_v52  ;;  %v4813_v51 = vld [vmem:[#allocation2 + $0x48] sm:$0xff] }
  0x4e   : > { %3681 = vmatprep.mubr.f32.mxu0 %v4502_v10  ;;  %3706 = vmatmul.mubr.f32.gmra.mxu1 %v4505_v11  ;;  %v872_v11 = vld [vmem:[%s5894_s1 + $0x118] sm:$0xff] }
  0x4f   : > { %3730 = vmatprep.subr.mxu1 %v336_v53  ;;  %3809 = vmatpush3.msra.mxu0 %v883_v52  ;;  %v4816_v52 = vld [vmem:[#allocation2 + $0x50] sm:$0xff] }
  0x50   : > { %3682 = vmatmul.mubr.f32.gmra.mxu0 %v4510_v12  ;;  %3731 = vmatpush3.msra.mxu1 %v336_v53  ;;  %v4819_v53 = vld [vmem:[#allocation2 + $0x4a] sm:$0xff] }
  0x51   : > { %3810 = vmatprep.subr.mxu0 %v882_v54  ;;  %3732 = vmatprep.subr.mxu1 %v335_v55 }
  0x52   : > { %3811 = vmatpush3.msra.mxu0 %v882_v54  ;;  %3708 = vmatprep.mubr.f32.mxu1 %v4517_v14  ;;  %v4746_v14 = vld [vmem:[%s4459_s19 + $0xf0] sm:$0xff]  ;;  %v1186_v54 = vld [vmem:[%s5894_s1 + $0x1e0] sm:$0xff] }
  0x53   : > { %3733 = vmatpush3.msra.mxu1 %v335_v55  ;;  %3812 = vmatprep.subr.mxu0 %v881_v56  ;;  %289 = vst [vmem:[#allocation2 + $0x181] sm:$0xff] %v4746_v14  ;;  %v4825_v55 = vld [vmem:[#allocation2 + $0x52] sm:$0xff] }
  0x54   : > { %3684 = vmatprep.mubr.f32.mxu0 %v4521_v15  ;;  %3709 = vmatmul.mubr.f32.gmra.mxu1 %v4524_v16  ;;  %v4750_v16 = vld [vmem:[%s4459_s19 + $0xf8] sm:$0xff] }
  0x55   : > { %3734 = vmatprep.subr.mxu1 %v334_v57  ;;  %3813 = vmatpush3.msra.mxu0 %v881_v56  ;;  %290 = vst [vmem:[#allocation2 + $0x189] sm:$0xff] %v4750_v16  ;;  %v1491_v56 = vld [vmem:[%s5894_s1 + $0x260] sm:$0xff] }
  0x56   : > { %3685 = vmatmul.mubr.f32.gmra.mxu0 %v4532_v18  ;;  %3735 = vmatpush3.msra.mxu1 %v334_v57  ;;  %v4831_v57 = vld [vmem:[#allocation2 + $0x60] sm:$0xff] }
  0x57   : > { %3814 = vmatprep.subr.mxu0 %v880_v58  ;;  %3736 = vmatprep.subr.mxu1 %v333_v59 }
  0x58   : > { %3815 = vmatpush3.msra.mxu0 %v880_v58  ;;  %3711 = vmatprep.mubr.f32.mxu1 %v4536_v19  ;;  %v324_v19 = vld [vmem:[%s5894_s1 + $0x8] sm:$0xff] }
  0x59   : > { %3737 = vmatpush3.msra.mxu1 %v333_v59  ;;  %3816 = vmatprep.subr.mxu0 %v879_v60  ;;  %v4834_v58 = vld [vmem:[#allocation2 + $0x68] sm:$0xff] }
  0x5a   : > { %3687 = vmatprep.mubr.f32.mxu0 %v4539_v20  ;;  %3712 = vmatmul.mubr.f32.gmra.mxu1 %v4547_v22  ;;  %v323_v22 = vld [vmem:[%s5894_s1] sm:$0xff] }
  0x5b   : > { %3738 = vmatprep.subr.mxu1 %v332_v61  ;;  %3817 = vmatpush3.msra.mxu0 %v879_v60  ;;  %v4837_v59 = vld [vmem:[#allocation2 + $0x62] sm:$0xff]  ;;  %v1185_v60 = vld [vmem:[%s5894_s1 + $0x1d8] sm:$0xff] }
  0x5c   : > { %3688 = vmatmul.mubr.f32.gmra.mxu0 %v4550_v23  ;;  %3739 = vmatpush3.msra.mxu1 %v332_v61  ;;  %v4843_v61 = vld [vmem:[#allocation2 + $0x6a] sm:$0xff] }
  0x5d   : > { %3818 = vmatprep.subr.mxu0 %v878_v62  ;;  %3740 = vmatprep.subr.mxu1 %v331_v63 }
  0x5e   : > { %3819 = vmatpush3.msra.mxu0 %v878_v62  ;;  %3714 = vmatprep.mubr.f32.mxu1 %v4555_v24  ;;  %v291_v24 = vld [vmem:[#allocation2] sm:$0xff]  ;;  %v1490_v62 = vld [vmem:[%s5894_s1 + $0x258] sm:$0xff] }
  0x5f   : > { %3741 = vmatpush3.msra.mxu1 %v331_v63  ;;  %3820 = vmatprep.subr.mxu0 %v877_v0  ;;  %v4849_v63 = vld [vmem:[#allocation2 + $0x78] sm:$0xff] }
  0x60   : > { %3690 = vmatprep.mubr.f32.mxu0 %v4562_v26  ;;  %3715 = vmatmul.mubr.f32.gmra.mxu1 %v4565_v27  ;;  %v292_v27 = vld [vmem:[#allocation2 + $0x8] sm:$0xff] }
  0x61   : > { %3742 = vmatprep.subr.mxu1 %v330_v1  ;;  %3821 = vmatpush3.msra.mxu0 %v877_v0  ;;  %v4852_v0 = vld [vmem:[#allocation2 + $0x80] sm:$0xff] }
  0x62   : > { %3691 = vmatmul.mubr.f32.gmra.mxu0 %v4570_v28  ;;  %3743 = vmatpush3.msra.mxu1 %v330_v1  ;;  %v4855_v1 = vld [vmem:[#allocation2 + $0x7a] sm:$0xff] }
  0x63   : > { %3822 = vmatprep.subr.mxu0 %v876_v2  ;;  %3744 = vmatprep.subr.mxu1 %v329_v3 }
  0x64   : > { %3823 = vmatpush3.msra.mxu0 %v876_v2  ;;  %3717 = vmatprep.mubr.f32.mxu1 %v4577_v30  ;;  %v1189_v30 = vld [vmem:[%s5894_s1 + $0x1f8] sm:$0xff]  ;;  %v1184_v2 = vld [vmem:[%s5894_s1 + $0x1d0] sm:$0xff] }
  0x65   : > { %3745 = vmatpush3.msra.mxu1 %v329_v3  ;;  %3824 = vmatprep.subr.mxu0 %v875_v4  ;;  %v4861_v3 = vld [vmem:[#allocation2 + $0x82] sm:$0xff] }
  0x66   : > { %3693 = vmatprep.mubr.f32.mxu0 %v4581_v31  ;;  %3718 = vmatmul.mubr.f32.gmra.mxu1 %v4584_v32  ;;  %v838_v32 = vld [vmem:[#allocation2 + $0xa] sm:$0xff] }
  0x67   : > { %3746 = vmatprep.subr.mxu1 %v328_v5  ;;  %3825 = vmatpush3.msra.mxu0 %v875_v4  ;;  %v1489_v4 = vld [vmem:[%s5894_s1 + $0x250] sm:$0xff] }
  0x68   : > { %3694 = vmatmul.mubr.f32.gmra.mxu0 %v4592_v34  ;;  %3747 = vmatpush3.msra.mxu1 %v328_v5  ;;  %v4867_v5 = vld [vmem:[#allocation2 + $0x90] sm:$0xff] }
  0x69   : > { %3826 = vmatprep.subr.mxu0 %v874_v6  ;;  %3748 = vmatprep.subr.mxu1 %v327_v7 }
  0x6a   : > { %3827 = vmatpush3.msra.mxu0 %v874_v6  ;;  %3720 = vmatprep.mubr.f32.mxu1 %v4596_v35  ;;  %v4779_v35 = vld [vmem:[#allocation2 + $0x18] sm:$0xff] }
  0x6b   : > { %3749 = vmatpush3.msra.mxu1 %v327_v7  ;;  %3828 = vmatprep.subr.mxu0 %v873_v8  ;;  %v4870_v6 = vld [vmem:[#allocation2 + $0x98] sm:$0xff] }
  0x6c   : > { %3696 = vmatprep.mubr.f32.mxu0 %v4599_v36  ;;  %3721 = vmatmul.mubr.f32.gmra.mxu1 %v4607_v38  ;;  %v4783_v38 = vld [vmem:[#allocation2 + $0x1a] sm:$0xff]  ;;  %v4873_v7 = vld [vmem:[#allocation2 + $0x92] sm:$0xff] }
  0x6d   : > { %3750 = vmatprep.subr.mxu1 %v326_v9  ;;  %3829 = vmatpush3.msra.mxu0 %v873_v8  ;;  %v1183_v8 = vld [vmem:[%s5894_s1 + $0x1c8] sm:$0xff] }
  0x6e   : > { %3697 = vmatmul.mubr.f32.gmra.mxu0 %v4610_v39  ;;  %3751 = vmatpush3.msra.mxu1 %v326_v9  ;;  %v4879_v9 = vld [vmem:[#allocation2 + $0x9a] sm:$0xff] }
  0x6f   : > { %3830 = vmatprep.subr.mxu0 %v872_v11  ;;  %3752 = vmatprep.subr.mxu1 %v325_v13  ;;  %5913 = vst [vmem:[#allocation3_spill] sm:$0xff] %v4879_v9 }
  0x70   : > { %3831 = vmatpush3.msra.mxu0 %v872_v11  ;;  %3723 = vmatprep.mubr.f32.mxu1 %v4615_v40  ;;  %v1188_v40 = vld [vmem:[%s5894_s1 + $0x1f0] sm:$0xff]  ;;  %v1488_v11 = vld [vmem:[%s5894_s1 + $0x248] sm:$0xff] }
  0x71   : > { %3753 = vmatpush3.msra.mxu1 %v325_v13  ;;  %3832 = vmatprep.subr.mxu0 %v871_v17  ;;  %v4885_v13 = vld [vmem:[#allocation2 + $0xa8] sm:$0xff] }
  0x72   : > { %3699 = vmatprep.mubr.f32.mxu0 %v4622_v42  ;;  %3724 = vmatmul.mubr.f32.gmra.mxu1 %v4625_v43  ;;  %v1493_v43 = vld [vmem:[%s5894_s1 + $0x270] sm:$0xff] }
  0x73   : > { %3754 = vmatprep.subr.mxu1 %v324_v19  ;;  %3833 = vmatpush3.msra.mxu0 %v871_v17  ;;  %v4888_v17 = vld [vmem:[#allocation2 + $0xb0] sm:$0xff] }
  0x74   : > { %3700 = vmatmul.mubr.f32.gmra.mxu0 %v4630_v44  ;;  %3755 = vmatpush3.msra.mxu1 %v324_v19  ;;  %v4891_v19 = vld [vmem:[#allocation2 + $0xaa] sm:$0xff] }
  0x75   : > { %3834 = vmatprep.subr.mxu0 %v870_v21  ;;  %3756 = vmatprep.subr.mxu1 %v323_v22  ;;  %5914 = vst [vmem:[#allocation4_spill] sm:$0xff] %v4891_v19 }
  0x76   : > { %3835 = vmatpush3.msra.mxu0 %v870_v21  ;;  %3757 = vmatpush3.msra.mxu1 %v323_v22  ;;  %v1182_v21 = vld [vmem:[%s5894_s1 + $0x1c0] sm:$0xff]  ;;  %v4897_v22 = vld [vmem:[#allocation2 + $0xb2] sm:$0xff] }
  0x77   : > { %3758 = vmatprep.mubr.f32.mxu1 %v291_v24  ;;  %3836 = vmatprep.subr.mxu0 %v869_v25  ;;  %5915 = vst [vmem:[#allocation5_spill] sm:$0xff] %v4897_v22  ;;  %v1487_v24 = vld [vmem:[%s5894_s1 + $0x240] sm:$0xff] }
  0x78   : > { %3759 = vmatmul.mubr.f32.vlgmr.msra.gmra.mxu1 %v292_v27  ;;  %3837 = vmatpush3.msra.mxu0 %v869_v25  ;;  %v4903_v25 = vld [vmem:[#allocation2 + $0xc0] sm:$0xff]  ;;  %v4906_v27 = vld [vmem:[#allocation2 + $0xc8] sm:$0xff] }
  0x79   : > { %3838 = vmatprep.mubr.f32.mxu0 %v837_v29  ;;  %3886 = vmatprep.subr.mxu1 %v1189_v30  ;;  %v4909_v29 = vld [vmem:[#allocation2 + $0xc2] sm:$0xff] }
  0x7a   : > { %3839 = vmatmul.mubr.f32.vlgmr.msra.gmra.mxu0 %v838_v32  ;;  %3887 = vmatpush3.msra.mxu1 %v1189_v30  ;;  %5916 = vst [vmem:[#allocation6_spill] sm:$0xff] %v4909_v29  ;;  %v1181_v30 = vld [vmem:[%s5894_s1 + $0x1b8] sm:$0xff]  ;;  %v4915_v32 = vld [vmem:[#allocation2 + $0xca] sm:$0xff] }
  0x7b   : > { %3966 = vmatprep.subr.mxu0 %v1494_v33  ;;  %3761 = vmatprep.mubr.f32.mxu1 %v4779_v35  ;;  %5917 = vst [vmem:[#allocation7_spill] sm:$0xff] %v4915_v32 }
  0x7c   : > { %3967 = vmatpush3.msra.mxu0 %v1494_v33  ;;  %3762 = vmatmul.mubr.f32.gmra.mxu1 %v4781_v37  ;;  %v1486_v33 = vld [vmem:[%s5894_s1 + $0x238] sm:$0xff] }
  0x7d   : > { %3841 = vmatprep.mubr.f32.mxu0 %v4783_v38  ;;  %3888 = vmatprep.subr.mxu1 %v1188_v40 }
  0x7e   : > { %3842 = vmatmul.mubr.f32.gmra.mxu0 %v4789_v41  ;;  %3889 = vmatpush3.msra.mxu1 %v1188_v40  ;;  %v4921_v40 = vld [vmem:[#allocation2 + $0xd8] sm:$0xff] }
  0x7f   : > { %3968 = vmatprep.subr.mxu0 %v1493_v43  ;;  %3764 = vmatprep.mubr.f32.mxu1 %v4795_v45 }
  0x80   : > { %3969 = vmatpush3.msra.mxu0 %v1493_v43  ;;  %3765 = vmatmul.mubr.f32.gmra.mxu1 %v4798_v46  ;;  %v4924_v43 = vld [vmem:[#allocation2 + $0xe0] sm:$0xff] }
  0x81   : > { %3844 = vmatprep.mubr.f32.mxu0 %v4801_v47  ;;  %3890 = vmatprep.subr.mxu1 %v1187_v48 }
  0x82   : > { %3845 = vmatmul.mubr.f32.gmra.mxu0 %v4807_v49  ;;  %3891 = vmatpush3.msra.mxu1 %v1187_v48  ;;  %v4927_v48 = vld [vmem:[#allocation2 + $0xda] sm:$0xff] }
  0x83   : > { %3970 = vmatprep.subr.mxu0 %v1492_v50  ;;  %3767 = vmatprep.mubr.f32.mxu1 %v4813_v51  ;;  %5918 = vst [vmem:[#allocation8_spill] sm:$0xff] %v4927_v48 }
  0x84   : > { %3971 = vmatpush3.msra.mxu0 %v1492_v50  ;;  %3768 = vmatmul.mubr.f32.gmra.mxu1 %v4816_v52  ;;  %v1180_v50 = vld [vmem:[%s5894_s1 + $0x1b0] sm:$0xff] }
  0x85   : > { %3847 = vmatprep.mubr.f32.mxu0 %v4819_v53  ;;  %3892 = vmatprep.subr.mxu1 %v1186_v54 }
  0x86   : > { %3848 = vmatmul.mubr.f32.gmra.mxu0 %v4825_v55  ;;  %3893 = vmatpush3.msra.mxu1 %v1186_v54  ;;  %v4933_v54 = vld [vmem:[#allocation2 + $0xe2] sm:$0xff] }
  0x87   : > { %3972 = vmatprep.subr.mxu0 %v1491_v56  ;;  %3770 = vmatprep.mubr.f32.mxu1 %v4831_v57  ;;  %5919 = vst [vmem:[#allocation9_spill] sm:$0xff] %v4933_v54 }
  0x88   : > { %3973 = vmatpush3.msra.mxu0 %v1491_v56  ;;  %3771 = vmatmul.mubr.f32.gmra.mxu1 %v4834_v58  ;;  %v1485_v56 = vld [vmem:[%s5894_s1 + $0x230] sm:$0xff] }
  0x89   : > { %3850 = vmatprep.mubr.f32.mxu0 %v4837_v59  ;;  %3894 = vmatprep.subr.mxu1 %v1185_v60 }
  0x8a   : > { %3851 = vmatmul.mubr.f32.gmra.mxu0 %v4843_v61  ;;  %3895 = vmatpush3.msra.mxu1 %v1185_v60  ;;  %v4939_v60 = vld [vmem:[#allocation2 + $0xf0] sm:$0xff] }
  0x8b   : > { %3974 = vmatprep.subr.mxu0 %v1490_v62  ;;  %3773 = vmatprep.mubr.f32.mxu1 %v4849_v63 }
  0x8c   : > { %3975 = vmatpush3.msra.mxu0 %v1490_v62  ;;  %3774 = vmatmul.mubr.f32.gmra.mxu1 %v4852_v0  ;;  %v4942_v62 = vld [vmem:[#allocation2 + $0xf8] sm:$0xff] }
  0x8d   : > { %3853 = vmatprep.mubr.f32.mxu0 %v4855_v1  ;;  %3896 = vmatprep.subr.mxu1 %v1184_v2 }
  0x8e   : > { %3854 = vmatmul.mubr.f32.gmra.mxu0 %v4861_v3  ;;  %3897 = vmatpush3.msra.mxu1 %v1184_v2  ;;  %v4945_v2 = vld [vmem:[#allocation2 + $0xf2] sm:$0xff] }
  0x8f   : > { %3976 = vmatprep.subr.mxu0 %v1489_v4  ;;  %3776 = vmatprep.mubr.f32.mxu1 %v4867_v5  ;;  %5920 = vst [vmem:[#allocation10_spill] sm:$0xff] %v4945_v2 }
  0x90   : > { %3977 = vmatpush3.msra.mxu0 %v1489_v4  ;;  %3777 = vmatmul.mubr.f32.gmra.mxu1 %v4870_v6  ;;  %v1179_v4 = vld [vmem:[%s5894_s1 + $0x1a8] sm:$0xff] }
  0x91   : > { %3856 = vmatprep.mubr.f32.mxu0 %v4873_v7  ;;  %3898 = vmatprep.subr.mxu1 %v1183_v8 }
  0x92   : > { %3857 = vmatmul.mubr.f32.gmra.mxu0 %v4879_v9  ;;  %3899 = vmatpush3.msra.mxu1 %v1183_v8  ;;  %v4951_v8 = vld [vmem:[#allocation2 + $0xfa] sm:$0xff]  ;;  %v5041_v9 = vld [vmem:[#allocation2 + $0x172] sm:$0xff] }
  0x93   : > { %3978 = vmatprep.subr.mxu0 %v1488_v11  ;;  %3779 = vmatprep.mubr.f32.mxu1 %v4885_v13  ;;  %5921 = vst [vmem:[#allocation11_spill] sm:$0xff] %v4951_v8 }
  0x94   : > { %3979 = vmatpush3.msra.mxu0 %v1488_v11  ;;  %3780 = vmatmul.mubr.f32.gmra.mxu1 %v4888_v17  ;;  %v1484_v11 = vld [vmem:[%s5894_s1 + $0x228] sm:$0xff] }
  0x95   : > { %3859 = vmatprep.mubr.f32.mxu0 %v4891_v19  ;;  %3900 = vmatprep.subr.mxu1 %v1182_v21  ;;  %v5035_v19 = vld [vmem:[#allocation2 + $0x16a] sm:$0xff] }
  0x96   : > { %3860 = vmatmul.mubr.f32.gmra.mxu0 %v4897_v22  ;;  %3901 = vmatpush3.msra.mxu1 %v1182_v21  ;;  %v4957_v21 = vld [vmem:[#allocation2 + $0x108] sm:$0xff]  ;;  %v5023_v22 = vld [vmem:[#allocation2 + $0x15a] sm:$0xff] }
  0x97   : > { %3980 = vmatprep.subr.mxu0 %v1487_v24  ;;  %3782 = vmatprep.mubr.f32.mxu1 %v4903_v25 }
  0x98   : > { %3981 = vmatpush3.msra.mxu0 %v1487_v24  ;;  %3783 = vmatmul.mubr.f32.gmra.mxu1 %v4906_v27  ;;  %v4960_v24 = vld [vmem:[#allocation2 + $0x110] sm:$0xff] }
  0x99   : > { %3862 = vmatprep.mubr.f32.mxu0 %v4909_v29  ;;  %3902 = vmatprep.subr.mxu1 %v1181_v30  ;;  %v5017_v29 = vld [vmem:[#allocation2 + $0x152] sm:$0xff] }
  0x9a   : > { %3863 = vmatmul.mubr.f32.gmra.mxu0 %v4915_v32  ;;  %3903 = vmatpush3.msra.mxu1 %v1181_v30  ;;  %v4963_v30 = vld [vmem:[#allocation2 + $0x10a] sm:$0xff]  ;;  %v5005_v32 = vld [vmem:[#allocation2 + $0x142] sm:$0xff]  ;;  %5928 = vst [vmem:[#allocation18_spill] sm:$0xff] %v5017_v29 }
  0x9b   : > { %3982 = vmatprep.subr.mxu0 %v1486_v33  ;;  %3785 = vmatprep.mubr.f32.mxu1 %v4921_v40  ;;  %5922 = vst [vmem:[#allocation12_spill] sm:$0xff] %v4963_v30  ;;  %5927 = vst [vmem:[#allocation17_spill] sm:$0xff] %v5005_v32 }
  0x9c   : > { %3983 = vmatpush3.msra.mxu0 %v1486_v33  ;;  %3786 = vmatmul.mubr.f32.gmra.mxu1 %v4924_v43  ;;  %v1178_v33 = vld [vmem:[%s5894_s1 + $0x1a0] sm:$0xff] }
  0x9d   : > { %3865 = vmatprep.mubr.f32.mxu0 %v4927_v48  ;;  %3904 = vmatprep.subr.mxu1 %v1180_v50  ;;  %v4999_v48 = vld [vmem:[#allocation2 + $0x13a] sm:$0xff] }
  0x9e   : > { %3866 = vmatmul.mubr.f32.gmra.mxu0 %v4933_v54  ;;  %3905 = vmatpush3.msra.mxu1 %v1180_v50  ;;  %v4969_v50 = vld [vmem:[#allocation2 + $0x112] sm:$0xff]  ;;  %v4987_v54 = vld [vmem:[#allocation2 + $0x12a] sm:$0xff]  ;;  %5926 = vst [vmem:[#allocation16_spill] sm:$0xff] %v4999_v48 }
  0x9f   : > { %3984 = vmatprep.subr.mxu0 %v1485_v56  ;;  %3788 = vmatprep.mubr.f32.mxu1 %v4939_v60  ;;  %5923 = vst [vmem:[#allocation13_spill] sm:$0xff] %v4969_v50  ;;  %5925 = vst [vmem:[#allocation15_spill] sm:$0xff] %v4987_v54 }
  0xa0   : > { %3985 = vmatpush3.msra.mxu0 %v1485_v56  ;;  %3789 = vmatmul.mubr.f32.gmra.mxu1 %v4942_v62  ;;  %v1483_v56 = vld [vmem:[%s5894_s1 + $0x220] sm:$0xff] }
  0xa1   : > { %3868 = vmatprep.mubr.f32.mxu0 %v4945_v2  ;;  %3906 = vmatprep.subr.mxu1 %v1179_v4  ;;  %v4981_v2 = vld [vmem:[#allocation2 + $0x122] sm:$0xff] }
  0xa2   : > { %3869 = vmatmul.mubr.f32.gmra.mxu0 %v4951_v8  ;;  %3907 = vmatpush3.msra.mxu1 %v1179_v4  ;;  %v4975_v8 = vld [vmem:[#allocation2 + $0x120] sm:$0xff]  ;;  %v4978_v4 = vld [vmem:[#allocation2 + $0x128] sm:$0xff]  ;;  %5924 = vst [vmem:[#allocation14_spill] sm:$0xff] %v4981_v2 }
  0xa3   : > { %3986 = vmatprep.subr.mxu0 %v1484_v11  ;;  %3791 = vmatprep.mubr.f32.mxu1 %v4957_v21 }
  0xa4   : > { %3987 = vmatpush3.msra.mxu0 %v1484_v11  ;;  %3792 = vmatmul.mubr.f32.gmra.mxu1 %v4960_v24  ;;  %v1177_v11 = vld [vmem:[%s5894_s1 + $0x198] sm:$0xff] }
  0xa5   : > { %3871 = vmatprep.mubr.f32.mxu0 %v4963_v30  ;;  %3908 = vmatprep.subr.mxu1 %v1178_v33  ;;  %v1482_v30 = vld [vmem:[%s5894_s1 + $0x218] sm:$0xff] }
  0xa6   : > { %3872 = vmatmul.mubr.f32.gmra.mxu0 %v4969_v50  ;;  %3909 = vmatpush3.msra.mxu1 %v1178_v33  ;;  %v4993_v50 = vld [vmem:[#allocation2 + $0x138] sm:$0xff]  ;;  %v4996_v33 = vld [vmem:[#allocation2 + $0x140] sm:$0xff] }
  0xa7   : > { %3988 = vmatprep.subr.mxu0 %v1483_v56  ;;  %3794 = vmatprep.mubr.f32.mxu1 %v4975_v8 }
  0xa8   : > { %3989 = vmatpush3.msra.mxu0 %v1483_v56  ;;  %3795 = vmatmul.mubr.f32.gmra.mxu1 %v4978_v4  ;;  %v1176_v56 = vld [vmem:[%s5894_s1 + $0x190] sm:$0xff] }
  0xa9   : > { %3874 = vmatprep.mubr.f32.mxu0 %v4981_v2  ;;  %3910 = vmatprep.subr.mxu1 %v1177_v11  ;;  %v1481_v2 = vld [vmem:[%s5894_s1 + $0x210] sm:$0xff] }
  0xaa   : > { %3875 = vmatmul.mubr.f32.gmra.mxu0 %v4987_v54  ;;  %3911 = vmatpush3.msra.mxu1 %v1177_v11  ;;  %v5011_v54 = vld [vmem:[#allocation2 + $0x150] sm:$0xff]  ;;  %v5014_v11 = vld [vmem:[#allocation2 + $0x158] sm:$0xff] }
  0xab   : > { %3990 = vmatprep.subr.mxu0 %v1482_v30  ;;  %3797 = vmatprep.mubr.f32.mxu1 %v4993_v50 }
  0xac   : > { %3991 = vmatpush3.msra.mxu0 %v1482_v30  ;;  %3798 = vmatmul.mubr.f32.gmra.mxu1 %v4996_v33  ;;  %v1175_v30 = vld [vmem:[%s5894_s1 + $0x188] sm:$0xff] }
  0xad   : > { %3877 = vmatprep.mubr.f32.mxu0 %v4999_v48  ;;  %3912 = vmatprep.subr.mxu1 %v1176_v56  ;;  %v1480_v48 = vld [vmem:[%s5894_s1 + $0x208] sm:$0xff] }
  0xae   : > { %3878 = vmatmul.mubr.f32.gmra.mxu0 %v5005_v32  ;;  %3913 = vmatpush3.msra.mxu1 %v1176_v56  ;;  %v5029_v32 = vld [vmem:[#allocation2 + $0x168] sm:$0xff]  ;;  %v5032_v56 = vld [vmem:[#allocation2 + $0x170] sm:$0xff] }
  0xaf   : > { %3992 = vmatprep.subr.mxu0 %v1481_v2  ;;  %3800 = vmatprep.mubr.f32.mxu1 %v5011_v54 }
  0xb0   : > { %3993 = vmatpush3.msra.mxu0 %v1481_v2  ;;  %3801 = vmatmul.mubr.f32.gmra.mxu1 %v5014_v11  ;;  %v1174_v2 = vld [vmem:[%s5894_s1 + $0x180] sm:$0xff] }
  0xb1   : > { %3880 = vmatprep.mubr.f32.mxu0 %v5017_v29  ;;  %3914 = vmatprep.subr.mxu1 %v1175_v30  ;;  %v1479_v29 = vld [vmem:[%s5894_s1 + $0x200] sm:$0xff] }
  0xb2   : > { %3881 = vmatmul.mubr.f32.gmra.mxu0 %v5023_v22  ;;  %3915 = vmatpush3.msra.mxu1 %v1175_v30  ;;  %v1799_v30 = vld [vmem:[%s5894_s1 + $0x2f8] sm:$0xff] }
  0xb3   : > { %3994 = vmatprep.subr.mxu0 %v1480_v48  ;;  %3803 = vmatprep.mubr.f32.mxu1 %v5029_v32 }
  0xb4   : > { %3995 = vmatpush3.msra.mxu0 %v1480_v48  ;;  %3804 = vmatmul.mubr.f32.gmra.mxu1 %v5032_v56  ;;  %v2105_v48 = vld [vmem:[%s5894_s1 + $0x378] sm:$0xff] }
  0xb5   : > { %3883 = vmatprep.mubr.f32.mxu0 %v5035_v19  ;;  %3916 = vmatprep.subr.mxu1 %v1174_v2 }
  0xb6   : > { %3884 = vmatmul.mubr.f32.gmra.mxu0 %v5041_v9  ;;  %3917 = vmatpush3.msra.mxu1 %v1174_v2  ;;  %v1798_v2 = vld [vmem:[%s5894_s1 + $0x2f0] sm:$0xff] }
  0xb7   : > { %3996 = vmatprep.subr.mxu0 %v1479_v29  ;;  %3918 = vmatprep.mubr.f32.mxu1 %v4779_v35  ;;  %v2104_v35 = vld [vmem:[%s5894_s1 + $0x370] sm:$0xff] }
  0xb8   : > { %3997 = vmatpush3.msra.mxu0 %v1479_v29  ;;  %3919 = vmatmul.mubr.f32.vlgmr.msra.gmra.mxu1 %v4781_v37  ;;  %v5125_v37 = vld [vmem:[#allocation2 + $0xc9] sm:$0xff]  ;;  %v1791_v29 = vld [vmem:[%s5894_s1 + $0x2b8] sm:$0xff] }
  0xb9   : > { %3998 = vmatprep.mubr.f32.mxu0 %v4502_v10  ;;  %4046 = vmatprep.subr.mxu1 %v1799_v30  ;;  %v1797_v10 = vld [vmem:[%s5894_s1 + $0x2e8] sm:$0xff] }
  0xba   : > { %3999 = vmatmul.mubr.f32.vlgmr.msra.gmra.mxu0 %v4510_v12  ;;  %4047 = vmatpush3.msra.mxu1 %v1799_v30  ;;  %v2103_v12 = vld [vmem:[%s5894_s1 + $0x368] sm:$0xff] }
  0xbb   : > { %4126 = vmatprep.subr.mxu0 %v2105_v48  ;;  %3921 = vmatprep.mubr.f32.mxu1 %v4795_v45  ;;  %v5139_v30 = vld [vmem:[#allocation2 + $0xe1] sm:$0xff] }
  0xbc   : > { %4127 = vmatpush3.msra.mxu0 %v2105_v48  ;;  %3922 = vmatmul.mubr.f32.gmra.mxu1 %v4798_v46  ;;  %v2097_v48 = vld [vmem:[%s5894_s1 + $0x338] sm:$0xff] }
  0xbd   : > { %4001 = vmatprep.mubr.f32.mxu0 %v4521_v15  ;;  %4048 = vmatprep.subr.mxu1 %v1798_v2  ;;  %v1796_v15 = vld [vmem:[%s5894_s1 + $0x2e0] sm:$0xff] }
  0xbe   : > { %4002 = vmatmul.mubr.f32.gmra.mxu0 %v4532_v18  ;;  %4049 = vmatpush3.msra.mxu1 %v1798_v2  ;;  %v2102_v18 = vld [vmem:[%s5894_s1 + $0x360] sm:$0xff]  ;;  %v5147_v2 = vld [vmem:[#allocation2 + $0xf1] sm:$0xff] }
  0xbf   : > { %4128 = vmatprep.subr.mxu0 %v2104_v35  ;;  %3924 = vmatprep.mubr.f32.mxu1 %v4813_v51 }
  0xc0   : > { %4129 = vmatpush3.msra.mxu0 %v2104_v35  ;;  %3925 = vmatmul.mubr.f32.gmra.mxu1 %v4816_v52  ;;  %v1790_v35 = vld [vmem:[%s5894_s1 + $0x2b0] sm:$0xff] }
  0xc1   : > { %4004 = vmatprep.mubr.f32.mxu0 %v4539_v20  ;;  %4050 = vmatprep.subr.mxu1 %v1797_v10  ;;  %v1795_v20 = vld [vmem:[%s5894_s1 + $0x2d8] sm:$0xff] }
  0xc2   : > { %4005 = vmatmul.mubr.f32.gmra.mxu0 %v4550_v23  ;;  %4051 = vmatpush3.msra.mxu1 %v1797_v10  ;;  %v2101_v23 = vld [vmem:[%s5894_s1 + $0x358] sm:$0xff] }
  0xc3   : > { %4130 = vmatprep.subr.mxu0 %v2103_v12  ;;  %3927 = vmatprep.mubr.f32.mxu1 %v4831_v57  ;;  %v5153_v10 = vld [vmem:[#allocation2 + $0xf9] sm:$0xff] }
  0xc4   : > { %4131 = vmatpush3.msra.mxu0 %v2103_v12  ;;  %3928 = vmatmul.mubr.f32.gmra.mxu1 %v4834_v58  ;;  %v2096_v12 = vld [vmem:[%s5894_s1 + $0x330] sm:$0xff] }
  0xc5   : > { %4007 = vmatprep.mubr.f32.mxu0 %v4562_v26  ;;  %4052 = vmatprep.subr.mxu1 %v1796_v15  ;;  %v1794_v26 = vld [vmem:[%s5894_s1 + $0x2d0] sm:$0xff] }
  0xc6   : > { %4008 = vmatmul.mubr.f32.gmra.mxu0 %v4570_v28  ;;  %4053 = vmatpush3.msra.mxu1 %v1796_v15  ;;  %v2100_v28 = vld [vmem:[%s5894_s1 + $0x350] sm:$0xff]  ;;  %v1789_v15 = vld [vmem:[%s5894_s1 + $0x2a8] sm:$0xff] }
  0xc7   : > { %4132 = vmatprep.subr.mxu0 %v2102_v18  ;;  %3930 = vmatprep.mubr.f32.mxu1 %v4849_v63 }
  0xc8   : > { %4133 = vmatpush3.msra.mxu0 %v2102_v18  ;;  %3931 = vmatmul.mubr.f32.gmra.mxu1 %v4852_v0  ;;  %v2095_v18 = vld [vmem:[%s5894_s1 + $0x328] sm:$0xff] }
  0xc9   : > { %4010 = vmatprep.mubr.f32.mxu0 %v4581_v31  ;;  %4054 = vmatprep.subr.mxu1 %v1795_v20  ;;  %v1793_v31 = vld [vmem:[%s5894_s1 + $0x2c8] sm:$0xff] }
  0xca   : > { %4011 = vmatmul.mubr.f32.gmra.mxu0 %v4592_v34  ;;  %4055 = vmatpush3.msra.mxu1 %v1795_v20  ;;  %v2099_v34 = vld [vmem:[%s5894_s1 + $0x348] sm:$0xff] }
  0xcb   : > { %4134 = vmatprep.subr.mxu0 %v2101_v23  ;;  %3933 = vmatprep.mubr.f32.mxu1 %v4867_v5  ;;  %v4407_v20 = vld [vmem:[#allocation2 + $0x109] sm:$0xff] }
  0xcc   : > { %4135 = vmatpush3.msra.mxu0 %v2101_v23  ;;  %3934 = vmatmul.mubr.f32.gmra.mxu1 %v4870_v6  ;;  %v4408_v23 = vld [vmem:[#allocation2 + $0x111] sm:$0xff] }
  0xcd   : > { %4013 = vmatprep.mubr.f32.mxu0 %v4599_v36  ;;  %4056 = vmatprep.subr.mxu1 %v1794_v26  ;;  %v5119_v36 = vld [vmem:[#allocation2 + $0xc1] sm:$0xff] }
  0xce   : > { %4014 = vmatmul.mubr.f32.gmra.mxu0 %v4610_v39  ;;  %4057 = vmatpush3.msra.mxu1 %v1794_v26  ;;  %v1792_v39 = vld [vmem:[%s5894_s1 + $0x2c0] sm:$0xff] }
  0xcf   : > { %4136 = vmatprep.subr.mxu0 %v2100_v28  ;;  %3936 = vmatprep.mubr.f32.mxu1 %v4885_v13  ;;  %v1788_v26 = vld [vmem:[%s5894_s1 + $0x2a0] sm:$0xff] }
  0xd0   : > { %4137 = vmatpush3.msra.mxu0 %v2100_v28  ;;  %3937 = vmatmul.mubr.f32.gmra.mxu1 %v4888_v17  ;;  %v2094_v28 = vld [vmem:[%s5894_s1 + $0x320] sm:$0xff] }
  0xd1   : > { %4016 = vmatprep.mubr.f32.mxu0 %v4622_v42  ;;  %4058 = vmatprep.subr.mxu1 %v1793_v31  ;;  %v2098_v42 = vld [vmem:[%s5894_s1 + $0x340] sm:$0xff] }
  0xd2   : > { %4017 = vmatmul.mubr.f32.gmra.mxu0 %v4630_v44  ;;  %4059 = vmatpush3.msra.mxu1 %v1793_v31  ;;  %v5133_v44 = vld [vmem:[#allocation2 + $0xd9] sm:$0xff]  ;;  %v4409_v31 = vld [vmem:[#allocation2 + $0x121] sm:$0xff] }
  0xd3   : > { %4138 = vmatprep.subr.mxu0 %v2099_v34  ;;  %3939 = vmatprep.mubr.f32.mxu1 %v4903_v25 }
  0xd4   : > { %4139 = vmatpush3.msra.mxu0 %v2099_v34  ;;  %3940 = vmatmul.mubr.f32.gmra.mxu1 %v4906_v27  ;;  %v4410_v34 = vld [vmem:[#allocation2 + $0x129] sm:$0xff] }
  0xd5   : > { %4019 = vmatprep.mubr.f32.mxu0 %v5119_v36  ;;  %4060 = vmatprep.subr.mxu1 %v1792_v39 }
  0xd6   : > { %4020 = vmatmul.mubr.f32.gmra.mxu0 %v5125_v37  ;;  %4061 = vmatpush3.msra.mxu1 %v1792_v39  ;;  %v1787_v39 = vld [vmem:[%s5894_s1 + $0x298] sm:$0xff] }
  0xd7   : > { %4140 = vmatprep.subr.mxu0 %v2098_v42  ;;  %3942 = vmatprep.mubr.f32.mxu1 %v4921_v40 }
  0xd8   : > { %4141 = vmatpush3.msra.mxu0 %v2098_v42  ;;  %3943 = vmatmul.mubr.f32.gmra.mxu1 %v4924_v43  ;;  %v2093_v42 = vld [vmem:[%s5894_s1 + $0x318] sm:$0xff] }
  0xd9   : > { %4022 = vmatprep.mubr.f32.mxu0 %v5133_v44  ;;  %4062 = vmatprep.subr.mxu1 %v1791_v29 }
  0xda   : > { %4023 = vmatmul.mubr.f32.gmra.mxu0 %v5139_v30  ;;  %4063 = vmatpush3.msra.mxu1 %v1791_v29  ;;  %v4411_v29 = vld [vmem:[#allocation2 + $0x139] sm:$0xff] }
  0xdb   : > { %4142 = vmatprep.subr.mxu0 %v2097_v48  ;;  %3945 = vmatprep.mubr.f32.mxu1 %v4939_v60 }
  0xdc   : > { %4143 = vmatpush3.msra.mxu0 %v2097_v48  ;;  %3946 = vmatmul.mubr.f32.gmra.mxu1 %v4942_v62  ;;  %v4412_v48 = vld [vmem:[#allocation2 + $0x141] sm:$0xff] }
  0xdd   : > { %4025 = vmatprep.mubr.f32.mxu0 %v5147_v2  ;;  %4064 = vmatprep.subr.mxu1 %v1790_v35 }
  0xde   : > { %4026 = vmatmul.mubr.f32.gmra.mxu0 %v5153_v10  ;;  %4065 = vmatpush3.msra.mxu1 %v1790_v35  ;;  %v1786_v35 = vld [vmem:[%s5894_s1 + $0x290] sm:$0xff] }
  0xdf   : > { %4144 = vmatprep.subr.mxu0 %v2096_v12  ;;  %3948 = vmatprep.mubr.f32.mxu1 %v4957_v21 }
  0xe0   : > { %4145 = vmatpush3.msra.mxu0 %v2096_v12  ;;  %3949 = vmatmul.mubr.f32.gmra.mxu1 %v4960_v24  ;;  %v2092_v12 = vld [vmem:[%s5894_s1 + $0x310] sm:$0xff] }
  0xe1   : > { %4028 = vmatprep.mubr.f32.mxu0 %v4407_v20  ;;  %4066 = vmatprep.subr.mxu1 %v1789_v15  ;;  %v1785_v20 = vld [vmem:[%s5894_s1 + $0x288] sm:$0xff] }
  0xe2   : > { %4029 = vmatmul.mubr.f32.gmra.mxu0 %v4408_v23  ;;  %4067 = vmatpush3.msra.mxu1 %v1789_v15  ;;  %v4413_v15 = vld [vmem:[#allocation2 + $0x151] sm:$0xff]  ;;  %v2091_v23 = vld [vmem:[%s5894_s1 + $0x308] sm:$0xff] }
  0xe3   : > { %4146 = vmatprep.subr.mxu0 %v2095_v18  ;;  %3951 = vmatprep.mubr.f32.mxu1 %v4975_v8 }
  0xe4   : > { %4147 = vmatpush3.msra.mxu0 %v2095_v18  ;;  %3952 = vmatmul.mubr.f32.gmra.mxu1 %v4978_v4  ;;  %v4414_v18 = vld [vmem:[#allocation2 + $0x159] sm:$0xff] }
  0xe5   : > { %4031 = vmatprep.mubr.f32.mxu0 %v4409_v31  ;;  %4068 = vmatprep.subr.mxu1 %v1788_v26  ;;  %v5203_v31 = vld [vmem:[#allocation2 + $0x188] sm:$0xff] }
  0xe6   : > { %4032 = vmatmul.mubr.f32.gmra.mxu0 %v4410_v34  ;;  %4069 = vmatpush3.msra.mxu1 %v1788_v26  ;;  %v5201_v26 = vld [vmem:[#allocation2 + $0x180] sm:$0xff]  ;;  %v4416_v34 = vld [vmem:[#allocation2 + $0x171] sm:$0xff] }
  0xe7   : > { %4148 = vmatprep.subr.mxu0 %v2094_v28  ;;  %3954 = vmatprep.mubr.f32.mxu1 %v4993_v50 }
  0xe8   : > { %4149 = vmatpush3.msra.mxu0 %v2094_v28  ;;  %3955 = vmatmul.mubr.f32.gmra.mxu1 %v4996_v33  ;;  %v4415_v28 = vld [vmem:[#allocation2 + $0x169] sm:$0xff] }
  0xe9   : > { %4034 = vmatprep.mubr.f32.mxu0 %v4411_v29  ;;  %4070 = vmatprep.subr.mxu1 %v1787_v39  ;;  %v2410_v29 = vld [vmem:[%s5894_s1 + $0x3f8] sm:$0xff] }
  0xea   : > { %4035 = vmatmul.mubr.f32.gmra.mxu0 %v4412_v48  ;;  %4071 = vmatpush3.msra.mxu1 %v1787_v39  ;;  %v1784_v39 = vld [vmem:[%s5894_s1 + $0x280] sm:$0xff]  ;;  %v2715_v48 = vld [vmem:[%s5894_s1 + $0x478] sm:$0xff] }
  0xeb   : > { %4150 = vmatprep.subr.mxu0 %v2093_v42  ;;  %3957 = vmatprep.mubr.f32.mxu1 %v5011_v54 }
  0xec   : > { %4151 = vmatpush3.msra.mxu0 %v2093_v42  ;;  %3958 = vmatmul.mubr.f32.gmra.mxu1 %v5014_v11  ;;  %v2090_v42 = vld [vmem:[%s5894_s1 + $0x300] sm:$0xff] }
  0xed   : > { %4037 = vmatprep.mubr.f32.mxu0 %v4413_v15  ;;  %4072 = vmatprep.subr.mxu1 %v1786_v35 }
  0xee   : > { %4038 = vmatmul.mubr.f32.gmra.mxu0 %v4414_v18  ;;  %4073 = vmatpush3.msra.mxu1 %v1786_v35  ;;  %v5933_v35 = vld [vmem:[#allocation7_spill] sm:$0xff] }
  0xef   : > { %4152 = vmatprep.subr.mxu0 %v2092_v12  ;;  %3960 = vmatprep.mubr.f32.mxu1 %v5029_v32 }
  0xf0   : > { %4153 = vmatpush3.msra.mxu0 %v2092_v12  ;;  %3961 = vmatmul.mubr.f32.gmra.mxu1 %v5032_v56 }
  0xf1   : > { %4040 = vmatprep.mubr.f32.mxu0 %v4415_v28  ;;  %4074 = vmatprep.subr.mxu1 %v1785_v20  ;;  %v2401_v28 = vld [vmem:[%s5894_s1 + $0x3b0] sm:$0xff] }
  0xf2   : > { %4041 = vmatmul.mubr.f32.gmra.mxu0 %v4416_v34  ;;  %4075 = vmatpush3.msra.mxu1 %v1785_v20  ;;  %v5934_v20 = vld [vmem:[#allocation8_spill] sm:$0xff] }
  0xf3   : > { %4154 = vmatprep.subr.mxu0 %v2091_v23  ;;  %3963 = vmatprep.mubr.f32.mxu1 %v5201_v26 }
  0xf4   : > { %4155 = vmatpush3.msra.mxu0 %v2091_v23  ;;  %3964 = vmatmul.mubr.f32.gmra.mxu1 %v5203_v31  ;;  %v5935_v23 = vld [vmem:[#allocation9_spill] sm:$0xff] }
  0xf5   : > { %4043 = vmatprep.mubr.f32.mxu0 %v4746_v14  ;;  %4076 = vmatprep.subr.mxu1 %v1784_v39  ;;  %v2409_v14 = vld [vmem:[%s5894_s1 + $0x3f0] sm:$0xff] }
  0xf6   : > { %4044 = vmatmul.mubr.f32.gmra.mxu0 %v4750_v16  ;;  %4077 = vmatpush3.msra.mxu1 %v1784_v39  ;;  %v2714_v16 = vld [vmem:[%s5894_s1 + $0x470] sm:$0xff]  ;;  %v5936_v39 = vld [vmem:[#allocation10_spill] sm:$0xff] }
  0xf7   : > { %4156 = vmatprep.subr.mxu0 %v2090_v42  ;;  %4078 = vmatprep.mubr.f32.mxu1 %v4783_v38  ;;  %v2408_v38 = vld [vmem:[%s5894_s1 + $0x3e8] sm:$0xff] }
  0xf8   : > { %4157 = vmatpush3.msra.mxu0 %v2090_v42  ;;  %4079 = vmatmul.mubr.f32.vlgmr.msra.gmra.mxu1 %v4789_v41  ;;  %v2713_v41 = vld [vmem:[%s5894_s1 + $0x468] sm:$0xff]  ;;  %v5937_v42 = vld [vmem:[#allocation11_spill] sm:$0xff] }
  0xf9   : > { %4158 = vmatprep.mubr.f32.mxu0 %v4795_v45  ;;  %4206 = vmatprep.subr.mxu1 %v2410_v29  ;;  %v2407_v45 = vld [vmem:[%s5894_s1 + $0x3e0] sm:$0xff] }
  0xfa   : > { %4159 = vmatmul.mubr.f32.vlgmr.msra.gmra.mxu0 %v4798_v46  ;;  %4207 = vmatpush3.msra.mxu1 %v2410_v29  ;;  %v2712_v46 = vld [vmem:[%s5894_s1 + $0x460] sm:$0xff] }
  0xfb   : > { %4286 = vmatprep.subr.mxu0 %v2715_v48  ;;  %4081 = vmatprep.mubr.f32.mxu1 %v4801_v47  ;;  %v2406_v47 = vld [vmem:[%s5894_s1 + $0x3d8] sm:$0xff] }
  0xfc   : > { %4287 = vmatpush3.msra.mxu0 %v2715_v48  ;;  %4082 = vmatmul.mubr.f32.gmra.mxu1 %v4807_v49  ;;  %v2711_v49 = vld [vmem:[%s5894_s1 + $0x458] sm:$0xff]  ;;  %v2400_v48 = vld [vmem:[%s5894_s1 + $0x3a8] sm:$0xff] }
  0xfd   : > { %4161 = vmatprep.mubr.f32.mxu0 %v4813_v51  ;;  %4208 = vmatprep.subr.mxu1 %v2409_v14 }
  0xfe   : > { %4162 = vmatmul.mubr.f32.gmra.mxu0 %v4816_v52  ;;  %4209 = vmatpush3.msra.mxu1 %v2409_v14  ;;  %v2405_v52 = vld [vmem:[%s5894_s1 + $0x3d0] sm:$0xff] }
  0xff   : > { %4288 = vmatprep.subr.mxu0 %v2714_v16  ;;  %4084 = vmatprep.mubr.f32.mxu1 %v4819_v53 }
 0x100   : > { %4289 = vmatpush3.msra.mxu0 %v2714_v16  ;;  %4085 = vmatmul.mubr.f32.gmra.mxu1 %v4825_v55  ;;  %v5938_v16 = vld [vmem:[#allocation12_spill] sm:$0xff] }
 0x101   : > { %4164 = vmatprep.mubr.f32.mxu0 %v4831_v57  ;;  %4210 = vmatprep.subr.mxu1 %v2408_v38  ;;  %v5929_v57 = vld [vmem:[#allocation3_spill] sm:$0xff] }
 0x102   : > { %4165 = vmatmul.mubr.f32.gmra.mxu0 %v4834_v58  ;;  %4211 = vmatpush3.msra.mxu1 %v2408_v38  ;;  %v2710_v58 = vld [vmem:[%s5894_s1 + $0x450] sm:$0xff]  ;;  %v5939_v38 = vld [vmem:[#allocation13_spill] sm:$0xff] }
 0x103   : > { %4290 = vmatprep.subr.mxu0 %v2713_v41  ;;  %4087 = vmatprep.mubr.f32.mxu1 %v4837_v59 }
 0x104   : > { %4291 = vmatpush3.msra.mxu0 %v2713_v41  ;;  %4088 = vmatmul.mubr.f32.gmra.mxu1 %v4843_v61  ;;  %v2404_v61 = vld [vmem:[%s5894_s1 + $0x3c8] sm:$0xff] }
 0x105   : > { %4167 = vmatprep.mubr.f32.mxu0 %v4849_v63  ;;  %4212 = vmatprep.subr.mxu1 %v2407_v45 }
 0x106   : > { %4168 = vmatmul.mubr.f32.gmra.mxu0 %v4852_v0  ;;  %4213 = vmatpush3.msra.mxu1 %v2407_v45  ;;  %v5930_v0 = vld [vmem:[#allocation4_spill] sm:$0xff] }
 0x107   : > { %4292 = vmatprep.subr.mxu0 %v2712_v46  ;;  %4090 = vmatprep.mubr.f32.mxu1 %v4855_v1  ;;  %v5931_v1 = vld [vmem:[#allocation5_spill] sm:$0xff] }
 0x108   : > { %4293 = vmatpush3.msra.mxu0 %v2712_v46  ;;  %4091 = vmatmul.mubr.f32.gmra.mxu1 %v4861_v3  ;;  %v2709_v3 = vld [vmem:[%s5894_s1 + $0x448] sm:$0xff] }
 0x109   : > { %4170 = vmatprep.mubr.f32.mxu0 %v4867_v5  ;;  %4214 = vmatprep.subr.mxu1 %v2406_v47  ;;  %v5264_v51 = vpop.f32.mrf.mxu1 }
 0x10a   : > { %4171 = vmatmul.mubr.f32.gmra.mxu0 %v4870_v6  ;;  %4215 = vmatpush3.msra.mxu1 %v2406_v47  ;;  %v5270_v53 = vpop.f32.mrf.mxu0  ;;  %v5940_v47 = vld [vmem:[#allocation14_spill] sm:$0xff] }
 0x10b   : > { %4294 = vmatprep.subr.mxu0 %v2711_v49  ;;  %4093 = vmatprep.mubr.f32.mxu1 %v4873_v7  ;;  %v5273_v55 = vpop.f32.mrf.mxu1  ;;  %v2403_v7 = vld [vmem:[%s5894_s1 + $0x3c0] sm:$0xff] }
 0x10c   : > { %4295 = vmatpush3.msra.mxu0 %v2711_v49  ;;  %4094 = vmatmul.mubr.f32.gmra.mxu1 %v5929_v57  ;;  %v5279_v59 = vpop.f32.mrf.mxu0  ;;  %v5941_v49 = vld [vmem:[#allocation15_spill] sm:$0xff] }
 0x10d   : > { %4173 = vmatprep.mubr.f32.mxu0 %v4885_v13  ;;  %4216 = vmatprep.subr.mxu1 %v2405_v52 }
 0x10e   : > { %4174 = vmatmul.mubr.f32.gmra.mxu0 %v4888_v17  ;;  %4217 = vmatpush3.msra.mxu1 %v2405_v52  ;;  %v5286_v63 = vpop.f32.mrf.mxu1  ;;  %v5932_v17 = vld [vmem:[#allocation6_spill] sm:$0xff]  ;;  %v2398_v52 = vld [vmem:[%s5894_s1 + $0x398] sm:$0xff] }
 0x10f   : > { %4296 = vmatprep.subr.mxu0 %v2710_v58  ;;  %4096 = vmatprep.mubr.f32.mxu1 %v5930_v0 }
 0x110   : > { %4297 = vmatpush3.msra.mxu0 %v2710_v58  ;;  %4097 = vmatmul.mubr.f32.gmra.mxu1 %v5931_v1  ;;  %v5293_v5 = vpop.f32.mrf.mxu0  ;;  %v5295_v6 = vpop.f32.mrf.mxu1  ;;  %v5942_v58 = vld [vmem:[#allocation16_spill] sm:$0xff]  ;;  %v2397_v1 = vld [vmem:[%s5894_s1 + $0x390] sm:$0xff] }
 0x111   : > { %4176 = vmatprep.mubr.f32.mxu0 %v4903_v25  ;;  %4218 = vmatprep.subr.mxu1 %v2404_v61  ;;  %v2708_v25 = vld [vmem:[%s5894_s1 + $0x440] sm:$0xff] }
 0x112   : > { %4177 = vmatmul.mubr.f32.gmra.mxu0 %v4906_v27  ;;  %4219 = vmatpush3.msra.mxu1 %v2404_v61  ;;  %v5302_v13 = vpop.f32.mrf.mxu0  ;;  %v2402_v27 = vld [vmem:[%s5894_s1 + $0x3b8] sm:$0xff]  ;;  %v5943_v61 = vld [vmem:[#allocation17_spill] sm:$0xff] }
 0x113   : > { %4298 = vmatprep.subr.mxu0 %v2709_v3  ;;  %4099 = vmatprep.mubr.f32.mxu1 %v5932_v17 }
 0x114   : > { %4299 = vmatpush3.msra.mxu0 %v2709_v3  ;;  %4100 = vmatmul.mubr.f32.gmra.mxu1 %v5933_v35  ;;  %v5309_v12 = vpop.f32.mrf.mxu1 }
 0x115   : > { %4179 = vmatprep.mubr.f32.mxu0 %v4921_v40  ;;  %4220 = vmatprep.subr.mxu1 %v2403_v7  ;;  %v2707_v40 = vld [vmem:[%s5894_s1 + $0x438] sm:$0xff] }
 0x116   : > { %4180 = vmatmul.mubr.f32.gmra.mxu0 %v4924_v43  ;;  %4221 = vmatpush3.msra.mxu1 %v2403_v7  ;;  %v5316_v15 = vpop.f32.mrf.mxu0  ;;  %v5318_v18 = vpop.f32.mrf.mxu1  ;;  %v5944_v7 = vld [vmem:[#allocation18_spill] sm:$0xff] }
 0x117   : > { %4300 = vmatprep.subr.mxu0 %v2708_v25  ;;  %4102 = vmatprep.mubr.f32.mxu1 %v5934_v20  ;;  %v2088_v20 = vld [vmem:[#allocation2 + $0x198] sm:$0xff] }
 0x118   : > { %4301 = vmatpush3.msra.mxu0 %v2708_v25  ;;  %4103 = vmatmul.mubr.f32.gmra.mxu1 %v5935_v23  ;;  %v5325_v43 = vpop.f32.mrf.mxu0  ;;  %v2089_v23 = vld [vmem:[#allocation2 + $0x1a0] sm:$0xff] }
 0x119   : > { %4182 = vmatprep.mubr.f32.mxu0 %v4939_v60  ;;  %4222 = vmatprep.subr.mxu1 %v2402_v27  ;;  %v2706_v60 = vld [vmem:[%s5894_s1 + $0x430] sm:$0xff] }
 0x11a   : > { %4183 = vmatmul.mubr.f32.gmra.mxu0 %v4942_v62  ;;  %4223 = vmatpush3.msra.mxu1 %v2402_v27  ;;  %v5332_v34 = vpop.f32.mrf.mxu1  ;;  %v5422_v27 = vld [vmem:[#allocation2 + $0x18a] sm:$0xff] }
 0x11b   : > { %4302 = vmatprep.subr.mxu0 %v2707_v40  ;;  %4105 = vmatprep.mubr.f32.mxu1 %v5936_v39  ;;  %v2364_v39 = vld [vmem:[#allocation2 + $0x39] sm:$0xff] }
 0x11c   : > { %4303 = vmatpush3.msra.mxu0 %v2707_v40  ;;  %4106 = vmatmul.mubr.f32.gmra.mxu1 %v5937_v42  ;;  %v5339_v29 = vpop.f32.mrf.mxu0  ;;  %v5341_v62 = vpop.f32.mrf.mxu1 }
 0x11d   : > { %4185 = vmatprep.mubr.f32.mxu0 %v4957_v21  ;;  %4224 = vmatprep.subr.mxu1 %v2401_v28  ;;  %v2705_v21 = vld [vmem:[%s5894_s1 + $0x428] sm:$0xff] }
 0x11e   : > { %4186 = vmatmul.mubr.f32.gmra.mxu0 %v4960_v24  ;;  %4225 = vmatpush3.msra.mxu1 %v2401_v28  ;;  %v5348_v14 = vpop.f32.mrf.mxu0  ;;  %v2399_v24 = vld [vmem:[%s5894_s1 + $0x3a0] sm:$0xff]  ;;  %v2363_v28 = vld [vmem:[#allocation2 + $0x31] sm:$0xff] }
 0x11f   : > { %4304 = vmatprep.subr.mxu0 %v2706_v60  ;;  %4108 = vmatprep.mubr.f32.mxu1 %v5938_v16  ;;  %v2669_v16 = vld [vmem:[#allocation2 + $0x3a] sm:$0xff] }
 0x120   : > { %4305 = vmatpush3.msra.mxu0 %v2706_v60  ;;  %4109 = vmatmul.mubr.f32.gmra.mxu1 %v5939_v38  ;;  %v5355_v41 = vpop.f32.mrf.mxu1  ;;  %v2668_v60 = vld [vmem:[#allocation2 + $0x32] sm:$0xff] }
 0x121   : > { %4188 = vmatprep.mubr.f32.mxu0 %v4975_v8  ;;  %4226 = vmatprep.subr.mxu1 %v2400_v48  ;;  %v2704_v8 = vld [vmem:[%s5894_s1 + $0x420] sm:$0xff] }
 0x122   : > { %4189 = vmatmul.mubr.f32.gmra.mxu0 %v4978_v4  ;;  %4227 = vmatpush3.msra.mxu1 %v2400_v48  ;;  %v5362_v45 = vpop.f32.mrf.mxu0  ;;  %v5364_v46 = vpop.f32.mrf.mxu1  ;;  %v2365_v48 = vld [vmem:[#allocation2 + $0x49] sm:$0xff] }
 0x123   : > { %4306 = vmatprep.subr.mxu0 %v2705_v21  ;;  %4111 = vmatprep.mubr.f32.mxu1 %v5940_v47  ;;  %v2366_v47 = vld [vmem:[#allocation2 + $0x51] sm:$0xff] }
 0x124   : > { %4307 = vmatpush3.msra.mxu0 %v2705_v21  ;;  %4112 = vmatmul.mubr.f32.gmra.mxu1 %v5941_v49  ;;  %v5371_v4 = vpop.f32.mrf.mxu0  ;;  %v2670_v21 = vld [vmem:[#allocation2 + $0x4a] sm:$0xff] }
 0x125   : > { %4191 = vmatprep.mubr.f32.mxu0 %v4993_v50  ;;  %4228 = vmatprep.subr.mxu1 %v2399_v24  ;;  %v2703_v50 = vld [vmem:[%s5894_s1 + $0x418] sm:$0xff] }
 0x126   : > { %4192 = vmatmul.mubr.f32.gmra.mxu0 %v4996_v33  ;;  %4229 = vmatpush3.msra.mxu1 %v2399_v24  ;;  %v5378_v57 = vpop.f32.mrf.mxu1 }
 0x127   : > { %4308 = vmatprep.subr.mxu0 %v2704_v8  ;;  %4114 = vmatprep.mubr.f32.mxu1 %v5942_v58 }
 0x128   : > { %4309 = vmatpush3.msra.mxu0 %v2704_v8  ;;  %4115 = vmatmul.mubr.f32.gmra.mxu1 %v5943_v61  ;;  %v5385_v0 = vpop.f32.mrf.mxu0  ;;  %v5387_v33 = vpop.f32.mrf.mxu1 }
 0x129   : > { %4194 = vmatprep.mubr.f32.mxu0 %v5011_v54  ;;  %4230 = vmatprep.subr.mxu1 %v2398_v52  ;;  %v2702_v54 = vld [vmem:[%s5894_s1 + $0x410] sm:$0xff] }
 0x12a   : > { %4195 = vmatmul.mubr.f32.gmra.mxu0 %v5014_v11  ;;  %4231 = vmatpush3.msra.mxu1 %v2398_v52  ;;  %v5394_v3 = vpop.f32.mrf.mxu0  ;;  %v2396_v11 = vld [vmem:[%s5894_s1 + $0x388] sm:$0xff] }
 0x12b   : > { %4310 = vmatprep.subr.mxu0 %v2703_v50  ;;  %4117 = vmatprep.mubr.f32.mxu1 %v5944_v7  ;;  %v2367_v52 = vld [vmem:[#allocation2 + $0x61] sm:$0xff] }
 0x12c   : > { %4311 = vmatpush3.msra.mxu0 %v2703_v50  ;;  %4118 = vmatmul.mubr.f32.gmra.mxu1 %v5023_v22  ;;  %v5401_v17 = vpop.f32.mrf.mxu1  ;;  %v2701_v22 = vld [vmem:[%s5894_s1 + $0x408] sm:$0xff]  ;;  %v2671_v50 = vld [vmem:[#allocation2 + $0x52] sm:$0xff] }
 0x12d   : > { %4197 = vmatprep.mubr.f32.mxu0 %v5029_v32  ;;  %4232 = vmatprep.subr.mxu1 %v2397_v1 }
 0x12e   : > { %4198 = vmatmul.mubr.f32.gmra.mxu0 %v5032_v56  ;;  %4233 = vmatpush3.msra.mxu1 %v2397_v1  ;;  %v5408_v35 = vpop.f32.mrf.mxu0  ;;  %v5410_v25 = vpop.f32.mrf.mxu1  ;;  %v5419_v56 = vld [vmem:[#allocation2 + $0x182] sm:$0xff] }
 0x12f   : > { %4312 = vmatprep.subr.mxu0 %v2702_v54  ;;  %4120 = vmatprep.mubr.f32.mxu1 %v5035_v19 }
 0x130   : > { %4313 = vmatpush3.msra.mxu0 %v2702_v54  ;;  %4121 = vmatmul.mubr.f32.gmra.mxu1 %v5041_v9  ;;  %v5417_v32 = vpop.f32.mrf.mxu0  ;;  %v2395_v9 = vld [vmem:[%s5894_s1 + $0x380] sm:$0xff] }
 0x131   : > { %4200 = vmatprep.mubr.f32.mxu0 %v5201_v26  ;;  %4234 = vmatprep.subr.mxu1 %v2396_v11  ;;  %v2672_v54 = vld [vmem:[#allocation2 + $0x62] sm:$0xff] }
 0x132   : > { %4201 = vmatmul.mubr.f32.gmra.mxu0 %v5203_v31  ;;  %4235 = vmatpush3.msra.mxu1 %v2396_v11  ;;  %v5425_v19 = vpop.f32.mrf.mxu1  ;;  %v2700_v31 = vld [vmem:[%s5894_s1 + $0x400] sm:$0xff] }
 0x133   : > { %4314 = vmatprep.subr.mxu0 %v2701_v22  ;;  %4123 = vmatprep.mubr.f32.mxu1 %v5419_v56 }
 0x134   : > { %4315 = vmatpush3.msra.mxu0 %v2701_v22  ;;  %4124 = vmatmul.mubr.f32.gmra.mxu1 %v5422_v27  ;;  %v5432_v26 = vpop.f32.mrf.mxu0  ;;  %v5434_v40 = vpop.f32.mrf.mxu1  ;;  %v2368_v22 = vld [vmem:[#allocation2 + $0x69] sm:$0xff] }
 0x135   : > { %4203 = vmatprep.mubr.f32.mxu0 %v2088_v20  ;;  %4236 = vmatprep.subr.mxu1 %v2395_v9 }
 0x136   : > { %4204 = vmatmul.mubr.f32.gmra.mxu0 %v2089_v23  ;;  %4237 = vmatpush3.msra.mxu1 %v2395_v9  ;;  %v5439_v42 = vpop.f32.mrf.mxu0  ;;  %v2369_v23 = vld [vmem:[#allocation2 + $0x79] sm:$0xff] }
 0x137   : > { %4316 = vmatprep.subr.mxu0 %v2700_v31  ;;  %4238 = vmatprep.mubr.f32.mxu1 %v2363_v28  ;;  %v2673_v28 = vld [vmem:[#allocation2 + $0x6a] sm:$0xff] }
 0x138   : > { %4317 = vmatpush3.msra.mxu0 %v2700_v31  ;;  %v3760_v38 = vpop.f32.mrf.mxu1  ;;  %4239 = vmatmul.mubr.f32.vlgmr.msra.gmra.mxu1 %v2364_v39 }
 0x139   : > { %v684_v24 = vadd.f32 %v3760_v38, %v5270_v53  ;;  %4318 = vmatprep.mubr.f32.mxu0 %v2668_v60  ;;  %4241 = vmatprep.mubr.f32.mxu1 %v2365_v48  ;;  %v2674_v48 = vld [vmem:[#allocation2 + $0x7a] sm:$0xff] }
 0x13a   : > { %v3840_v49 = vpop.f32.mrf.mxu0  ;;  %4319 = vmatmul.mubr.f32.vlgmr.msra.gmra.mxu0 %v2669_v16  ;;  %v678_v8 = vpop.f32.mrf.mxu1  ;;  %v2370_v38 = vld [vmem:[#allocation2 + $0x81] sm:$0xff] }
 0x13b   : > { %v5442_v58 = vadd.f32 %v3840_v49, %v684_v24  ;;  %v679_v61 = vadd.f32 %v678_v8, %v5279_v59  ;;  %4321 = vmatprep.mubr.f32.mxu0 %v2670_v21  ;;  %v2675_v8 = vld [vmem:[#allocation2 + $0x82] sm:$0xff] }
 0x13c   : > { %v951_v1 = vpop.f32.mrf.mxu0  ;;  %v3763_v7 = vpop.f32.mrf.mxu1  ;;  %4242 = vmatmul.mubr.f32.gmra.mxu1 %v2366_v47  ;;  %v2371_v47 = vld [vmem:[#allocation2 + $0x91] sm:$0xff] }
 0x13d   : > { %v5445_v11 = vadd.f32 %v951_v1, %v679_v61  ;;  %v694_v53 = vadd.f32 %v3763_v7, %v5293_v5  ;;  %4244 = vmatprep.mubr.f32.mxu1 %v2367_v52  ;;  %v2372_v7 = vld [vmem:[#allocation2 + $0x99] sm:$0xff] }
 0x13e   : > { %v3843_v20 = vpop.f32.mrf.mxu0  ;;  %4322 = vmatmul.mubr.f32.gmra.mxu0 %v2671_v50  ;;  %v688_v9 = vpop.f32.mrf.mxu1  ;;  %v2676_v50 = vld [vmem:[#allocation2 + $0x92] sm:$0xff] }
 0x13f   : > { %v5448_v31 = vadd.f32 %v3843_v20, %v694_v53  ;;  %v689_v59 = vadd.f32 %v688_v9, %v5302_v13  ;;  %4324 = vmatprep.mubr.f32.mxu0 %v2672_v54  ;;  %v2677_v9 = vld [vmem:[#allocation2 + $0x9a] sm:$0xff] }
 0x140   : > { %v961_v39 = vpop.f32.mrf.mxu0  ;;  %v3766_v60 = vpop.f32.mrf.mxu1  ;;  %4245 = vmatmul.mubr.f32.gmra.mxu1 %v2368_v22  ;;  %v2373_v22 = vld [vmem:[#allocation2 + $0xa9] sm:$0xff] }
 0x141   : > { %v5451_v16 = vadd.f32 %v961_v39, %v689_v59  ;;  %v704_v5 = vadd.f32 %v3766_v60, %v5316_v15  ;;  %4247 = vmatprep.mubr.f32.mxu1 %v2369_v23  ;;  %v2374_v60 = vld [vmem:[#allocation2 + $0xb1] sm:$0xff] }
 0x142   : > { %v3846_v21 = vpop.f32.mrf.mxu0  ;;  %4325 = vmatmul.mubr.f32.gmra.mxu0 %v2673_v28  ;;  %v698_v24 = vpop.f32.mrf.mxu1  ;;  %v2678_v28 = vld [vmem:[#allocation2 + $0xaa] sm:$0xff] }
 0x143   : > { %v5454_v49 = vadd.f32 %v3846_v21, %v704_v5  ;;  %v699_v13 = vadd.f32 %v698_v24, %v5325_v43  ;;  %4327 = vmatprep.mubr.f32.mxu0 %v2674_v48 }
 0x144   : > { %v971_v52 = vpop.f32.mrf.mxu0  ;;  %v3769_v61 = vpop.f32.mrf.mxu1  ;;  %4248 = vmatmul.mubr.f32.gmra.mxu1 %v2370_v38 }
 0x145   : > { %v5457_v1 = vadd.f32 %v971_v52, %v699_v13  ;;  %v714_v15 = vadd.f32 %v3769_v61, %v5339_v29  ;;  %4250 = vmatprep.mubr.f32.mxu1 %v2371_v47  ;;  %v2680_v13 = vld [vmem:[#allocation2 + $0xc2] sm:$0xff] }
 0x146   : > { %v3849_v54 = vpop.f32.mrf.mxu0  ;;  %4328 = vmatmul.mubr.f32.gmra.mxu0 %v2675_v8  ;;  %v708_v53 = vpop.f32.mrf.mxu1 }
 0x147   : > { %v5460_v20 = vadd.f32 %v3849_v54, %v714_v15  ;;  %v709_v43 = vadd.f32 %v708_v53, %v5348_v14  ;;  %4330 = vmatprep.mubr.f32.mxu0 %v2676_v50  ;;  %v2679_v14 = vld [vmem:[#allocation2 + $0xb2] sm:$0xff]  ;;  %v2682_v53 = vld [vmem:[#allocation2 + $0xda] sm:$0xff] }
 0x148   : > { %v981_v23 = vpop.f32.mrf.mxu0  ;;  %v3772_v59 = vpop.f32.mrf.mxu1  ;;  %4251 = vmatmul.mubr.f32.gmra.mxu1 %v2372_v7 }
 0x149   : > { %v5463_v39 = vadd.f32 %v981_v23, %v709_v43  ;;  %v724_v29 = vadd.f32 %v3772_v59, %v5362_v45  ;;  %4253 = vmatprep.mubr.f32.mxu1 %v2373_v22  ;;  %v2683_v23 = vld [vmem:[#allocation2 + $0xe2] sm:$0xff] }
 0x14a   : > { %v3852_v48 = vpop.f32.mrf.mxu0  ;;  %4331 = vmatmul.mubr.f32.gmra.mxu0 %v2677_v9  ;;  %v718_v5 = vpop.f32.mrf.mxu1 }
 0x14b   : > { %v5466_v38 = vadd.f32 %v3852_v48, %v724_v29  ;;  %v719_v21 = vadd.f32 %v718_v5, %v5371_v4  ;;  %4333 = vmatprep.mubr.f32.mxu0 %v2678_v28  ;;  %v2681_v4 = vld [vmem:[#allocation2 + $0xca] sm:$0xff] }
 0x14c   : > { %v991_v24 = vpop.f32.mrf.mxu0  ;;  %v3775_v47 = vpop.f32.mrf.mxu1  ;;  %4254 = vmatmul.mubr.f32.gmra.mxu1 %v2374_v60  ;;  %v2381_v48 = vld [vmem:[#allocation2 + $0x109] sm:$0xff] }
 0x14d   : > { %v5469_v8 = vadd.f32 %v991_v24, %v719_v21  ;;  %v734_v52 = vadd.f32 %v3775_v47, %v5385_v0  ;;  %4256 = vmatprep.mubr.f32.mxu1 %v5119_v36  ;;  %v2685_v21 = vld [vmem:[#allocation2 + $0xfa] sm:$0xff] }
 0x14e   : > { %v3855_v45 = vpop.f32.mrf.mxu0  ;;  %4334 = vmatmul.mubr.f32.gmra.mxu0 %v2679_v14  ;;  %v728_v61 = vpop.f32.mrf.mxu1 }
 0x14f   : > { %v5473_v50 = vadd.f32 %v3855_v45, %v734_v52  ;;  %v729_v15 = vadd.f32 %v728_v61, %v5394_v3  ;;  %4336 = vmatprep.mubr.f32.mxu0 %v2680_v13  ;;  %v2383_v45 = vld [vmem:[#allocation2 + $0x121] sm:$0xff] }
 0x150   : > { %v1001_v7 = vpop.f32.mrf.mxu0  ;;  %v3778_v54 = vpop.f32.mrf.mxu1  ;;  %4257 = vmatmul.mubr.f32.gmra.mxu1 %v5125_v37  ;;  %v2684_v37 = vld [vmem:[#allocation2 + $0xf2] sm:$0xff] }
 0x151   : > { %v5477_v22 = vadd.f32 %v1001_v7, %v729_v15  ;;  %v744_v0 = vadd.f32 %v3778_v54, %v5408_v35  ;;  %4259 = vmatprep.mubr.f32.mxu1 %v5133_v44  ;;  %v2687_v15 = vld [vmem:[#allocation2 + $0x112] sm:$0xff] }
 0x152   : > { %v3858_v36 = vpop.f32.mrf.mxu0  ;;  %4337 = vmatmul.mubr.f32.gmra.mxu0 %v2681_v4  ;;  %v738_v43 = vpop.f32.mrf.mxu1 }
 0x153   : > { %v5481_v9 = vadd.f32 %v3858_v36, %v744_v0  ;;  %v739_v3 = vadd.f32 %v738_v43, %v5417_v32  ;;  %4339 = vmatprep.mubr.f32.mxu0 %v2682_v53  ;;  %v2384_v53 = vld [vmem:[#allocation2 + $0x129] sm:$0xff]  ;;  %v2385_v43 = vld [vmem:[#allocation2 + $0x139] sm:$0xff] }
 0x154   : > { %v1011_v59 = vpop.f32.mrf.mxu0  ;;  %v3781_v28 = vpop.f32.mrf.mxu1  ;;  %4260 = vmatmul.mubr.f32.gmra.mxu1 %v5139_v30  ;;  %v2686_v30 = vld [vmem:[#allocation2 + $0x10a] sm:$0xff] }
 0x155   : > { %v5485_v29 = vadd.f32 %v1011_v59, %v739_v3  ;;  %v754_v35 = vadd.f32 %v3781_v28, %v5432_v26  ;;  %4262 = vmatprep.mubr.f32.mxu1 %v5147_v2  ;;  %v2382_v2 = vld [vmem:[#allocation2 + $0x111] sm:$0xff] }
 0x156   : > { %v3861_v44 = vpop.f32.mrf.mxu0  ;;  %4340 = vmatmul.mubr.f32.gmra.mxu0 %v2683_v23  ;;  %v748_v60 = vpop.f32.mrf.mxu1  ;;  %v2689_v23 = vld [vmem:[#allocation2 + $0x12a] sm:$0xff] }
 0x157   : > { %v5489_v5 = vadd.f32 %v3861_v44, %v754_v35  ;;  %v749_v32 = vadd.f32 %v748_v60, %v5439_v42  ;;  %4342 = vmatprep.mubr.f32.mxu0 %v2684_v37  ;;  %v2690_v37 = vld [vmem:[#allocation2 + $0x13a] sm:$0xff] }
 0x158   : > { %v1021_v14 = vpop.f32.mrf.mxu0  ;;  %v3784_v24 = vpop.f32.mrf.mxu1  ;;  %4263 = vmatmul.mubr.f32.gmra.mxu1 %v5153_v10  ;;  %v2688_v10 = vld [vmem:[#allocation2 + $0x122] sm:$0xff] }
 0x159   : > { %v5493_v47 = vadd.f32 %v1021_v14, %v749_v32  ;;  %v764_v26 = vadd.f32 %v3784_v24, %v5264_v51  ;;  %4265 = vmatprep.mubr.f32.mxu1 %v2381_v48  ;;  %v2386_v44 = vld [vmem:[#allocation2 + $0x141] sm:$0xff]  ;;  %v2387_v32 = vld [vmem:[#allocation2 + $0x151] sm:$0xff] }
 0x15a   : > { %v3864_v13 = vpop.f32.mrf.mxu0  ;;  %4343 = vmatmul.mubr.f32.gmra.mxu0 %v2685_v21  ;;  %v758_v52 = vpop.f32.mrf.mxu1  ;;  %v2691_v14 = vld [vmem:[#allocation2 + $0x142] sm:$0xff] }
 0x15b   : > { %v5496_v61 = vadd.f32 %v3864_v13, %v764_v26  ;;  %v759_v42 = vadd.f32 %v758_v52, %v5273_v55  ;;  %4345 = vmatprep.mubr.f32.mxu0 %v2686_v30  ;;  %v2692_v26 = vld [vmem:[#allocation2 + $0x152] sm:$0xff] }
 0x15c   : > { %v1031_v4 = vpop.f32.mrf.mxu0  ;;  %v3787_v7 = vpop.f32.mrf.mxu1  ;;  %4266 = vmatmul.mubr.f32.gmra.mxu1 %v2382_v2  ;;  %v2388_v13 = vld [vmem:[#allocation2 + $0x159] sm:$0xff] }
 0x15d   : > { %v5499_v54 = vadd.f32 %v1031_v4, %v759_v42  ;;  %v774_v51 = vadd.f32 %v3787_v7, %v5286_v63  ;;  %4268 = vmatprep.mubr.f32.mxu1 %v2383_v45  ;;  %v2389_v42 = vld [vmem:[#allocation2 + $0x169] sm:$0xff]  ;;  %v2693_v4 = vld [vmem:[#allocation2 + $0x15a] sm:$0xff] }
 0x15e   : > { %v3867_v0 = vpop.f32.mrf.mxu0  ;;  %4346 = vmatmul.mubr.f32.gmra.mxu0 %v2687_v15  ;;  %v768_v36 = vpop.f32.mrf.mxu1 }
 0x15f   : > { %v5502_v3 = vadd.f32 %v3867_v0, %v774_v51  ;;  %v769_v55 = vadd.f32 %v768_v36, %v5295_v6  ;;  %4348 = vmatprep.mubr.f32.mxu0 %v2688_v10  ;;  %v2694_v51 = vld [vmem:[#allocation2 + $0x16a] sm:$0xff] }
 0x160   : > { %v1041_v59 = vpop.f32.mrf.mxu0  ;;  %v3790_v28 = vpop.f32.mrf.mxu1  ;;  %4269 = vmatmul.mubr.f32.gmra.mxu1 %v2384_v53  ;;  %v2390_v0 = vld [vmem:[#allocation2 + $0x171] sm:$0xff] }
 0x161   : > { %v5505_v35 = vadd.f32 %v1041_v59, %v769_v55  ;;  %v784_v63 = vadd.f32 %v3790_v28, %v5309_v12  ;;  %4271 = vmatprep.mubr.f32.mxu1 %v2385_v43 }
 0x162   : > { %v3870_v60 = vpop.f32.mrf.mxu0  ;;  %4349 = vmatmul.mubr.f32.gmra.mxu0 %v2689_v23  ;;  %v778_v48 = vpop.f32.mrf.mxu1 }
 0x163   : > { %v5508_v21 = vadd.f32 %v3870_v60, %v784_v63  ;;  %v779_v6 = vadd.f32 %v778_v48, %v5318_v18  ;;  %4351 = vmatprep.mubr.f32.mxu0 %v2690_v37  ;;  %v2393_v48 = vld [vmem:[#allocation2 + $0x199] sm:$0xff] }
 0x164   : > { %v1051_v24 = vpop.f32.mrf.mxu0  ;;  %v3793_v30 = vpop.f32.mrf.mxu1  ;;  %4272 = vmatmul.mubr.f32.gmra.mxu1 %v2386_v44  ;;  %v4417_v44 = vld [vmem:[#allocation2 + $0x181] sm:$0xff] }
 0x165   : > { %v5511_v2 = vadd.f32 %v1051_v24, %v779_v6  ;;  %v794_v12 = vadd.f32 %v3793_v30, %v5332_v34  ;;  %4274 = vmatprep.mubr.f32.mxu1 %v2387_v32  ;;  %v4418_v24 = vld [vmem:[#allocation2 + $0x189] sm:$0xff]  ;;  %v2698_v30 = vld [vmem:[#allocation2 + $0x19a] sm:$0xff] }
 0x166   : > { %v3873_v52 = vpop.f32.mrf.mxu0  ;;  %4352 = vmatmul.mubr.f32.gmra.mxu0 %v2691_v14  ;;  %v788_v45 = vpop.f32.mrf.mxu1 }
 0x167   : > { %v5514_v15 = vadd.f32 %v3873_v52, %v794_v12  ;;  %v789_v18 = vadd.f32 %v788_v45, %v5341_v62  ;;  %4354 = vmatprep.mubr.f32.mxu0 %v2692_v26  ;;  %v2695_v62 = vld [vmem:[#allocation2 + $0x172] sm:$0xff]  ;;  %v2394_v12 = vld [vmem:[#allocation2 + $0x1a1] sm:$0xff] }
 0x168   : > { %v1061_v7 = vpop.f32.mrf.mxu0  ;;  %v3796_v10 = vpop.f32.mrf.mxu1  ;;  %4275 = vmatmul.mubr.f32.gmra.mxu1 %v2388_v13 }
 0x169   : > { %v5517_v53 = vadd.f32 %v1061_v7, %v789_v18  ;;  %v804_v34 = vadd.f32 %v3796_v10, %v5355_v41  ;;  %4277 = vmatprep.mubr.f32.mxu1 %v2389_v42 }
 0x16a   : > { %v3876_v36 = vpop.f32.mrf.mxu0  ;;  %4355 = vmatmul.mubr.f32.gmra.mxu0 %v2693_v4  ;;  %v798_v43 = vpop.f32.mrf.mxu1 }
 0x16b   : > { %v5520_v55 = vadd.f32 %v3876_v36, %v804_v34  ;;  %v799_v23 = vadd.f32 %v798_v43, %v5364_v46  ;;  %4357 = vmatprep.mubr.f32.mxu0 %v2694_v51 }
 0x16c   : > { %v1071_v59 = vpop.f32.mrf.mxu0  ;;  %v3799_v28 = vpop.f32.mrf.mxu1  ;;  %4278 = vmatmul.mubr.f32.gmra.mxu1 %v2390_v0 }
 0x16d   : > { %v5523_v37 = vadd.f32 %v1071_v59, %v799_v23  ;;  %v814_v63 = vadd.f32 %v3799_v28, %v5378_v57  ;;  %4280 = vmatprep.mubr.f32.mxu1 %v4417_v44 }
 0x16e   : > { %v3879_v41 = vpop.f32.mrf.mxu0  ;;  %4358 = vmatmul.mubr.f32.gmra.mxu0 %v2695_v62  ;;  %v808_v60 = vpop.f32.mrf.mxu1 }
 0x16f   : > { %v5526_v32 = vadd.f32 %v3879_v41, %v814_v63  ;;  %v809_v6 = vadd.f32 %v808_v60, %v5387_v33  ;;  %4360 = vmatprep.mubr.f32.mxu0 %v5419_v56  ;;  %v2699_v56 = vld [vmem:[#allocation2 + $0x1a2] sm:$0xff] }
 0x170   : > { %v1081_v46 = vpop.f32.mrf.mxu0  ;;  %v3802_v14 = vpop.f32.mrf.mxu1  ;;  %4281 = vmatmul.mubr.f32.gmra.mxu1 %v4418_v24 }
 0x171   : > { %v5530_v26 = vadd.f32 %v1081_v46, %v809_v6  ;;  %v824_v57 = vadd.f32 %v3802_v14, %v5401_v17  ;;  %4283 = vmatprep.mubr.f32.mxu1 %v2393_v48 }
 0x172   : > { %v3882_v13 = vpop.f32.mrf.mxu0  ;;  %4361 = vmatmul.mubr.f32.gmra.mxu0 %v5422_v27  ;;  %v818_v52 = vpop.f32.mrf.mxu1 }
 0x173   : > { %v5534_v45 = vadd.f32 %v3882_v13, %v824_v57  ;;  %v819_v33 = vadd.f32 %v818_v52, %v5410_v25  ;;  %4363 = vmatprep.mubr.f32.mxu0 %v2698_v30 }
 0x174   : > { %v1091_v42 = vpop.f32.mrf.mxu0  ;;  %v3805_v18 = vpop.f32.mrf.mxu1  ;;  %4284 = vmatmul.mubr.f32.gmra.mxu1 %v2394_v12 }
 0x175   : > { %v5537_v4 = vadd.f32 %v1091_v42, %v819_v33  ;;  %v834_v7 = vadd.f32 %v3805_v18, %v5425_v19 }
 0x176   : > { %v3885_v17 = vpop.f32.mrf.mxu0  ;;  %4364 = vmatmul.mubr.f32.gmra.mxu0 %v2699_v56  ;;  %v828_v10 = vpop.f32.mrf.mxu1 }
 0x177   : > { %v5540_v51 = vadd.f32 %v3885_v17, %v834_v7  ;;  %v829_v27 = vadd.f32 %v828_v10, %v5434_v40 }
 0x178   : > { %v1101_v34 = vpop.f32.mrf.mxu0  ;;  %v3920_v0 = vpop.f32.mrf.mxu1 }
 0x179   : > { %v5543_v36 = vadd.f32 %v1101_v34, %v829_v27  ;;  %v1416_v25 = vadd.f32 %v3920_v0, %v5442_v58 }
 0x17a   : > { %v4000_v43 = vpop.f32.mrf.mxu0  ;;  %v1256_v23 = vpop.f32.mrf.mxu1 }
 0x17b   : > { %v5546_v62 = vadd.f32 %v4000_v43, %v1416_v25  ;;  %v1415_v59 = vadd.f32 %v1256_v23, %v5445_v11 }
 0x17c   : > { %v1561_v19 = vpop.f32.mrf.mxu0  ;;  %v3923_v28 = vpop.f32.mrf.mxu1 }
 0x17d   : > { %v5549_v63 = vadd.f32 %v1561_v19, %v1415_v59  ;;  %v1418_v44 = vadd.f32 %v3923_v28, %v5448_v31 }
 0x17e   : > { %v4003_v41 = vpop.f32.mrf.mxu0  ;;  %v1266_v40 = vpop.f32.mrf.mxu1 }
 0x17f   : > { %v5552_v60 = vadd.f32 %v4003_v41, %v1418_v44  ;;  %v1417_v48 = vadd.f32 %v1266_v40, %v5451_v16 }
 0x180   : > { %v1571_v6 = vpop.f32.mrf.mxu0  ;;  %v3926_v58 = vpop.f32.mrf.mxu1 }
 0x181   : > { %v5555_v46 = vadd.f32 %v1571_v6, %v1417_v48  ;;  %v1420_v14 = vadd.f32 %v3926_v58, %v5454_v49 }
 0x182   : > { %v4006_v24 = vpop.f32.mrf.mxu0  ;;  %v1276_v11 = vpop.f32.mrf.mxu1 }
 0x183   : > { %v5558_v30 = vadd.f32 %v4006_v24, %v1420_v14  ;;  %v1419_v57 = vadd.f32 %v1276_v11, %v5457_v1 }
 0x184   : > { %v1581_v12 = vpop.f32.mrf.mxu0  ;;  %v3929_v31 = vpop.f32.mrf.mxu1 }
 0x185   : > { %v5561_v13 = vadd.f32 %v1581_v12, %v1419_v57  ;;  %v1422_v52 = vadd.f32 %v3929_v31, %v5460_v20 }
 0x186   : > { %v4009_v33 = vpop.f32.mrf.mxu0  ;;  %v1286_v16 = vpop.f32.mrf.mxu1 }
 0x187   : > { %v5564_v56 = vadd.f32 %v4009_v33, %v1422_v52  ;;  %v1421_v42 = vadd.f32 %v1286_v16, %v5463_v39 }
 0x188   : > { %v1591_v18 = vpop.f32.mrf.mxu0  ;;  %v3932_v49 = vpop.f32.mrf.mxu1 }
 0x189   : > { %v5567_v7 = vadd.f32 %v1591_v18, %v1421_v42  ;;  %v1424_v17 = vadd.f32 %v3932_v49, %v5466_v38 }
 0x18a   : > { %v4012_v10 = vpop.f32.mrf.mxu0  ;;  %v1296_v1 = vpop.f32.mrf.mxu1 }
 0x18b   : > { %v5570_v27 = vadd.f32 %v4012_v10, %v1424_v17  ;;  %v1423_v34 = vadd.f32 %v1296_v1, %v5469_v8 }
 0x18c   : > { %v1601_v0 = vpop.f32.mrf.mxu0  ;;  %v3935_v20 = vpop.f32.mrf.mxu1 }
 0x18d   : > { %v5573_v25 = vadd.f32 %v1601_v0, %v1423_v34  ;;  %v1426_v43 = vadd.f32 %v3935_v20, %v5473_v50 }
 0x18e   : > { %v4015_v23 = vpop.f32.mrf.mxu0  ;;  %v1306_v39 = vpop.f32.mrf.mxu1 }
 0x18f   : > { %v5576_v59 = vadd.f32 %v4015_v23, %v1426_v43  ;;  %v1425_v19 = vadd.f32 %v1306_v39, %v5477_v22 }
 0x190   : > { %v1611_v28 = vpop.f32.mrf.mxu0  ;;  %v3938_v38 = vpop.f32.mrf.mxu1 }
 0x191   : > { %v5579_v44 = vadd.f32 %v1611_v28, %v1425_v19  ;;  %v1428_v41 = vadd.f32 %v3938_v38, %v5481_v9 }
 0x192   : > { %v4018_v40 = vpop.f32.mrf.mxu0  ;;  %v1316_v8 = vpop.f32.mrf.mxu1 }
 0x193   : > { %v5582_v48 = vadd.f32 %v4018_v40, %v1428_v41  ;;  %v1427_v6 = vadd.f32 %v1316_v8, %v5485_v29 }
 0x194   : > { %v1621_v58 = vpop.f32.mrf.mxu0  ;;  %v3941_v50 = vpop.f32.mrf.mxu1 }
 0x195   : > { %v5585_v14 = vadd.f32 %v1621_v58, %v1427_v6  ;;  %v1430_v24 = vadd.f32 %v3941_v50, %v5489_v5 }
 0x196   : > { %v4021_v11 = vpop.f32.mrf.mxu0  ;;  %v1326_v22 = vpop.f32.mrf.mxu1 }
 0x197   : > { %v5588_v57 = vadd.f32 %v4021_v11, %v1430_v24  ;;  %v1429_v12 = vadd.f32 %v1326_v22, %v5493_v47 }
 0x198   : > { %v1631_v31 = vpop.f32.mrf.mxu0  ;;  %v3944_v9 = vpop.f32.mrf.mxu1 }
 0x199   : > { %v5591_v52 = vadd.f32 %v1631_v31, %v1429_v12  ;;  %v1432_v33 = vadd.f32 %v3944_v9, %v5496_v61 }
 0x19a   : > { %v4024_v16 = vpop.f32.mrf.mxu0  ;;  %v1336_v29 = vpop.f32.mrf.mxu1 }
 0x19b   : > { %v5594_v42 = vadd.f32 %v4024_v16, %v1432_v33  ;;  %v1431_v18 = vadd.f32 %v1336_v29, %v5499_v54 }
 0x19c   : > { %v1641_v49 = vpop.f32.mrf.mxu0  ;;  %v3947_v5 = vpop.f32.mrf.mxu1 }
 0x19d   : > { %v5597_v17 = vadd.f32 %v1641_v49, %v1431_v18  ;;  %v1434_v10 = vadd.f32 %v3947_v5, %v5502_v3 }
 0x19e   : > { %v4027_v1 = vpop.f32.mrf.mxu0  ;;  %v1346_v47 = vpop.f32.mrf.mxu1 }
 0x19f   : > { %v5600_v34 = vadd.f32 %v4027_v1, %v1434_v10  ;;  %v1433_v0 = vadd.f32 %v1346_v47, %v5505_v35 }
 0x1a0   : > { %v1651_v20 = vpop.f32.mrf.mxu0  ;;  %v3950_v61 = vpop.f32.mrf.mxu1 }
 0x1a1   : > { %5945 = vst [vmem:[#allocation3_spill] sm:$0xff] %v5600_v34  ;;  %v5603_v43 = vadd.f32 %v1651_v20, %v1433_v0  ;;  %v1436_v23 = vadd.f32 %v3950_v61, %v5508_v21 }
 0x1a2   : > { %v4030_v39 = vpop.f32.mrf.mxu0  ;;  %v1356_v54 = vpop.f32.mrf.mxu1 }
 0x1a3   : > { %5946 = vst [vmem:[#allocation4_spill] sm:$0xff] %v5603_v43  ;;  %v5606_v19 = vadd.f32 %v4030_v39, %v1436_v23  ;;  %v1435_v28 = vadd.f32 %v1356_v54, %v5511_v2 }
 0x1a4   : > { %v1661_v38 = vpop.f32.mrf.mxu0  ;;  %v3953_v3 = vpop.f32.mrf.mxu1 }
 0x1a5   : > { %5947 = vst [vmem:[#allocation5_spill] sm:$0xff] %v5606_v19  ;;  %v5609_v41 = vadd.f32 %v1661_v38, %v1435_v28  ;;  %v1438_v40 = vadd.f32 %v3953_v3, %v5514_v15 }
 0x1a6   : > { %v4033_v8 = vpop.f32.mrf.mxu0  ;;  %v1366_v35 = vpop.f32.mrf.mxu1 }
 0x1a7   : > { %5948 = vst [vmem:[#allocation6_spill] sm:$0xff] %v5609_v41  ;;  %v5612_v6 = vadd.f32 %v4033_v8, %v1438_v40  ;;  %v1437_v58 = vadd.f32 %v1366_v35, %v5517_v53 }
 0x1a8   : > { %v1671_v50 = vpop.f32.mrf.mxu0  ;;  %v3956_v21 = vpop.f32.mrf.mxu1 }
 0x1a9   : > { %5949 = vst [vmem:[#allocation7_spill] sm:$0xff] %v5612_v6  ;;  %v5615_v24 = vadd.f32 %v1671_v50, %v1437_v58  ;;  %v1440_v11 = vadd.f32 %v3956_v21, %v5520_v55 }
 0x1aa   : > { %v4036_v22 = vpop.f32.mrf.mxu0  ;;  %v1376_v2 = vpop.f32.mrf.mxu1 }
 0x1ab   : > { %5950 = vst [vmem:[#allocation8_spill] sm:$0xff] %v5615_v24  ;;  %v5618_v12 = vadd.f32 %v4036_v22, %v1440_v11  ;;  %v1439_v31 = vadd.f32 %v1376_v2, %v5523_v37 }
 0x1ac   : > { %v1681_v9 = vpop.f32.mrf.mxu0  ;;  %v3959_v15 = vpop.f32.mrf.mxu1 }
 0x1ad   : > { %5951 = vst [vmem:[#allocation9_spill] sm:$0xff] %v5618_v12  ;;  %v5621_v33 = vadd.f32 %v1681_v9, %v1439_v31  ;;  %v1442_v16 = vadd.f32 %v3959_v15, %v5526_v32 }
 0x1ae   : > { %v4039_v29 = vpop.f32.mrf.mxu0  ;;  %v1386_v53 = vpop.f32.mrf.mxu1 }
 0x1af   : > { %5952 = vst [vmem:[#allocation10_spill] sm:$0xff] %v5621_v33  ;;  %v5624_v18 = vadd.f32 %v4039_v29, %v1442_v16  ;;  %v1441_v49 = vadd.f32 %v1386_v53, %v5530_v26 }
 0x1b0   : > { %v1691_v5 = vpop.f32.mrf.mxu0  ;;  %v3962_v55 = vpop.f32.mrf.mxu1 }
 0x1b1   : > { %5953 = vst [vmem:[#allocation11_spill] sm:$0xff] %v5624_v18  ;;  %v5627_v10 = vadd.f32 %v1691_v5, %v1441_v49  ;;  %v1444_v1 = vadd.f32 %v3962_v55, %v5534_v45 }
 0x1b2   : > { %v4042_v47 = vpop.f32.mrf.mxu0  ;;  %v1396_v37 = vpop.f32.mrf.mxu1 }
 0x1b3   : > { %5954 = vst [vmem:[#allocation12_spill] sm:$0xff] %v5627_v10  ;;  %v5630_v0 = vadd.f32 %v4042_v47, %v1444_v1  ;;  %v1443_v20 = vadd.f32 %v1396_v37, %v5537_v4 }
 0x1b4   : > { %v1701_v61 = vpop.f32.mrf.mxu0  ;;  %v3965_v32 = vpop.f32.mrf.mxu1 }
 0x1b5   : > { %5955 = vst [vmem:[#allocation13_spill] sm:$0xff] %v5630_v0  ;;  %v5633_v23 = vadd.f32 %v1701_v61, %v1443_v20  ;;  %v1446_v39 = vadd.f32 %v3965_v32, %v5540_v51 }
 0x1b6   : > { %v4045_v54 = vpop.f32.mrf.mxu0  ;;  %v1406_v26 = vpop.f32.mrf.mxu1 }
 0x1b7   : > { %5956 = vst [vmem:[#allocation14_spill] sm:$0xff] %v5633_v23  ;;  %v5636_v28 = vadd.f32 %v4045_v54, %v1446_v39  ;;  %v1445_v38 = vadd.f32 %v1406_v26, %v5543_v36 }
 0x1b8   : > { %v1711_v3 = vpop.f32.mrf.mxu0  ;;  %v4080_v45 = vpop.f32.mrf.mxu1 }
 0x1b9   : > { %5957 = vst [vmem:[#allocation15_spill] sm:$0xff] %v5636_v28  ;;  %v5639_v40 = vadd.f32 %v1711_v3, %v1445_v38 }
 0x1ba   : > { %v5641_v8 = vpop.f32.mrf.mxu0  ;;  %v1866_v35 = vpop.f32.mrf.mxu1 }
 0x1bb   : > { %5958 = vst [vmem:[#allocation16_spill] sm:$0xff] %v5639_v40 }
 0x1bc   : > { %v5643_v4 = vpop.f32.mrf.mxu0  ;;  %v4083_v58 = vpop.f32.mrf.mxu1 }
 0x1be   : > { %v5645_v50 = vpop.f32.mrf.mxu0  ;;  %v5647_v21 = vpop.f32.mrf.mxu1 }
 0x1c0   : > { %v5649_v51 = vpop.f32.mrf.mxu0  ;;  %v5651_v11 = vpop.f32.mrf.mxu1 }
 0x1c2   : > { %v5653_v22 = vpop.f32.mrf.mxu0  ;;  %v5655_v36 = vpop.f32.mrf.mxu1 }
 0x1c4   : > { %v5657_v2 = vpop.f32.mrf.mxu0  ;;  %v5659_v31 = vpop.f32.mrf.mxu1 }
 0x1c6   : > { %v5661_v9 = vpop.f32.mrf.mxu0  ;;  %v5663_v15 = vpop.f32.mrf.mxu1 }
 0x1c8   : > { %v5665_v16 = vpop.f32.mrf.mxu0  ;;  %v5667_v29 = vpop.f32.mrf.mxu1 }
 0x1ca   : > { %v5669_v53 = vpop.f32.mrf.mxu0  ;;  %v5671_v49 = vpop.f32.mrf.mxu1 }
 0x1cc   : > { %v5673_v5 = vpop.f32.mrf.mxu0  ;;  %v5675_v55 = vpop.f32.mrf.mxu1 }
 0x1ce   : > { %v5677_v1 = vpop.f32.mrf.mxu0  ;;  %v5679_v47 = vpop.f32.mrf.mxu1 }
 0x1d0   : > { %v5681_v37 = vpop.f32.mrf.mxu0  ;;  %v5683_v20 = vpop.f32.mrf.mxu1 }
 0x1d2   : > { %v5685_v61 = vpop.f32.mrf.mxu0  ;;  %v5687_v32 = vpop.f32.mrf.mxu1 }
 0x1d4   : > { %v5689_v39 = vpop.f32.mrf.mxu0  ;;  %v5691_v54 = vpop.f32.mrf.mxu1 }
 0x1d6   : > { %v5693_v26 = vpop.f32.mrf.mxu0  ;;  %v5695_v38 = vpop.f32.mrf.mxu1 }
 0x1d8   : > { %v5697_v3 = vpop.f32.mrf.mxu0  ;;  %v5699_v40 = vpop.f32.mrf.mxu1 }
 0x1da   : > { %v5701_v28 = vpop.f32.mrf.mxu0  ;;  %v5703_v23 = vpop.f32.mrf.mxu1 }
 0x1dc   : > { %v5705_v0 = vpop.f32.mrf.mxu0  ;;  %v5707_v10 = vpop.f32.mrf.mxu1 }
 0x1dd   : > { %5959 = vst [vmem:[#allocation17_spill] sm:$0xff] %v5705_v0  ;;  %5960 = vst [vmem:[#allocation18_spill] sm:$0xff] %v5707_v10 }
 0x1de   : > { %v5709_v18 = vpop.f32.mrf.mxu0  ;;  %v5711_v33 = vpop.f32.mrf.mxu1 }
 0x1df   : > { %5961 = vst [vmem:[#allocation19_spill] sm:$0xff] %v5709_v18  ;;  %5962 = vst [vmem:[#allocation20_spill] sm:$0xff] %v5711_v33 }
 0x1e0   : > { %v5713_v12 = vpop.f32.mrf.mxu0  ;;  %v5715_v24 = vpop.f32.mrf.mxu1 }
 0x1e1   : > { %5963 = vst [vmem:[#allocation21_spill] sm:$0xff] %v5713_v12  ;;  %5964 = vst [vmem:[#allocation22_spill] sm:$0xff] %v5715_v24 }
 0x1e2   : > { %v5717_v6 = vpop.f32.mrf.mxu0  ;;  %v5719_v41 = vpop.f32.mrf.mxu1 }
 0x1e3   : > { %5965 = vst [vmem:[#allocation23_spill] sm:$0xff] %v5717_v6  ;;  %5966 = vst [vmem:[#allocation24_spill] sm:$0xff] %v5719_v41 }
 0x1e4   : > { %v5721_v19 = vpop.f32.mrf.mxu0  ;;  %v5723_v43 = vpop.f32.mrf.mxu1 }
 0x1e5   : > { %5967 = vst [vmem:[#allocation25_spill] sm:$0xff] %v5721_v19  ;;  %5968 = vst [vmem:[#allocation26_spill] sm:$0xff] %v5723_v43 }
 0x1e6   : > { %v5725_v34 = vpop.f32.mrf.mxu0  ;;  %v5727_v0 = vpop.f32.mrf.mxu1 }
 0x1e7   : > { %5969 = vst [vmem:[#allocation27_spill] sm:$0xff] %v5725_v34  ;;  %5970 = vst [vmem:[#allocation28_spill] sm:$0xff] %v5727_v0 }
 0x1e8   : > { %v5729_v10 = vpop.f32.mrf.mxu0  ;;  %v5731_v18 = vpop.f32.mrf.mxu1 }
 0x1e9   : > { %5971 = vst [vmem:[#allocation29_spill] sm:$0xff] %v5729_v10  ;;  %5972 = vst [vmem:[#allocation30_spill] sm:$0xff] %v5731_v18 }
 0x1ea   : > { %v5733_v33 = vpop.f32.mrf.mxu0  ;;  %v5735_v12 = vpop.f32.mrf.mxu1 }
 0x1eb   : > { %5973 = vst [vmem:[#allocation31_spill] sm:$0xff] %v5733_v33  ;;  %5974 = vst [vmem:[#allocation32_spill] sm:$0xff] %v5735_v12  ;;  %v2026_v33 = vadd.f32 %v4080_v45, %v5546_v62  ;;  %v2027_v45 = vadd.f32 %v5647_v21, %v5555_v46 }
 0x1ec   : > { %v5737_v24 = vpop.f32.mrf.mxu0  ;;  %v5739_v6 = vpop.f32.mrf.mxu1 }
 0x1ed   : > { %5975 = vst [vmem:[#allocation33_spill] sm:$0xff] %v5737_v24  ;;  %5976 = vst [vmem:[#allocation34_spill] sm:$0xff] %v5739_v6  ;;  %v2025_v24 = vadd.f32 %v1866_v35, %v5549_v63  ;;  %v2030_v63 = vadd.f32 %v5651_v11, %v5558_v30 }
 0x1ee   : > { %v5741_v41 = vpop.f32.mrf.mxu0  ;;  %v5743_v19 = vpop.f32.mrf.mxu1 }
 0x1ef   : > { %5977 = vst [vmem:[#allocation35_spill] sm:$0xff] %v5741_v41  ;;  %v2331_v62 = vadd.f32 %v5643_v4, %v2025_v24  ;;  %v2029_v24 = vadd.f32 %v5655_v36, %v5561_v13  ;;  %v2336_v30 = vadd.f32 %v5653_v22, %v2030_v63  ;;  %v2031_v13 = vadd.f32 %v5663_v15, %v5567_v7 }
 0x1f0   : > { %v5745_v43 = vpop.f32.mrf.mxu0  ;;  %v5747_v34 = vpop.f32.mrf.mxu1  ;;  %v2034_v63 = vadd.f32 %v5667_v29, %v5570_v27  ;;  %v2033_v29 = vadd.f32 %v5671_v49, %v5573_v25 }
 0x1f1   : > { %5978 = vst [vmem:[#allocation36_spill] sm:$0xff] %v5745_v43  ;;  %5979 = vst [vmem:[#allocation37_spill] sm:$0xff] %v5747_v34  ;;  %v2332_v43 = vadd.f32 %v5641_v8, %v2026_v33  ;;  %v2028_v34 = vadd.f32 %v4083_v58, %v5552_v60  ;;  %v2335_v36 = vadd.f32 %v5657_v2, %v2029_v24 }
 0x1f2   : > { %v5749_v0 = vpop.f32.mrf.mxu0  ;;  %v5751_v10 = vpop.f32.mrf.mxu1  ;;  %v2337_v2 = vadd.f32 %v5665_v16, %v2031_v13  ;;  %v2340_v27 = vadd.f32 %v5669_v53, %v2034_v63 }
 0x1f3   : > { %5980 = vst [vmem:[#allocation38_spill] sm:$0xff] %v5749_v0  ;;  %5981 = vst [vmem:[#allocation39_spill] sm:$0xff] %v5751_v10  ;;  %v2334_v33 = vadd.f32 %v5645_v50, %v2028_v34 }
 0x1f4   : > { %v5754_v18 = vpop.f32.mrf.mxu0  ;;  %v5756_v12 = vpop.f32.mrf.mxu1 }
 0x1f5   : > { %5982 = vst [vmem:[#allocation40_spill] sm:$0xff] %v5754_v18 }
 0x1f6   : > { %v5759_v6 = vpop.f32.mrf.mxu0  ;;  %v5761_v41 = vpop.f32.mrf.mxu1 }
 0x1f7   : > { %5983 = vst [vmem:[#allocation41_spill] sm:$0xff] %v5759_v6  ;;  %5984 = vst [vmem:[#allocation42_spill] sm:$0xff] %v5761_v41 }
 0x1f8   : > { %v5765_v0 = vpop.f32.mrf.mxu0  ;;  %v4240_v10 = vpop.f32.mrf.mxu1 }
 0x1f9   : > { %5985 = vst [vmem:[#allocation43_spill] sm:$0xff] %v5765_v0  ;;  %v2637_v18 = vadd.f32 %v4240_v10, %v2332_v43  ;;  %v2333_v0 = vadd.f32 %v5649_v51, %v2027_v45  ;;  %v2032_v51 = vadd.f32 %v5659_v31, %v5564_v56 }
 0x1fa   : > { %v4320_v35 = vpop.f32.mrf.mxu0  ;;  %v2477_v6 = vpop.f32.mrf.mxu1 }
 0x1fb   : > { %v2942_v8 = vadd.f32 %v4320_v35, %v2637_v18  ;;  %v2636_v60 = vadd.f32 %v2477_v6, %v2331_v62  ;;  %v2338_v7 = vadd.f32 %v5661_v9, %v2032_v51 }
 0x1fc   : > { %v2782_v58 = vpop.f32.mrf.mxu0  ;;  %v4243_v41 = vpop.f32.mrf.mxu1 }
 0x1fd   : > { %2974 = vst [vmem:[%s4464_s22 + $0x8] sm:$0xff] %v2942_v8  ;;  %v2941_v46 = vadd.f32 %v2782_v58, %v2636_v60  ;;  %v2639_v43 = vadd.f32 %v4243_v41, %v2334_v33  ;;  %v3044_v10 = vmul.f32 %v2942_v8, %v2942_v8 }
 0x1fe   : > { %v4323_v4 = vpop.f32.mrf.mxu0  ;;  %v2487_v21 = vpop.f32.mrf.mxu1 }
 0x1ff   : > { %2973 = vst [vmem:[%s4464_s22] sm:$0xff] %v2941_v46  ;;  %v3005_v34 = vadd.f32 %v2942_v8, %v2941_v46  ;;  %v3043_v6 = vmul.f32 %v2941_v46, %v2941_v46  ;;  %v2944_v18 = vadd.f32 %v4323_v4, %v2639_v43  ;;  %v2638_v50 = vadd.f32 %v2487_v21, %v2333_v0 }
 0x200   : > { %v2792_v11 = vpop.f32.mrf.mxu0  ;;  %v4246_v41 = vpop.f32.mrf.mxu1 }
 0x201   : > { %v3075_v22 = vadd.f32 %v3044_v10, %v3043_v6  ;;  %2976 = vst [vmem:[%s4464_s22 + $0x18] sm:$0xff] %v2944_v18  ;;  %v2943_v62 = vadd.f32 %v2792_v11, %v2638_v50  ;;  %v2641_v45 = vadd.f32 %v4246_v41, %v2336_v30  ;;  %v3046_v58 = vmul.f32 %v2944_v18, %v2944_v18 }
 0x202   : > { %v4326_v35 = vpop.f32.mrf.mxu0  ;;  %v2497_v0 = vpop.f32.mrf.mxu1  ;;  %v2036_v30 = vadd.f32 %v5675_v55, %v5576_v59  ;;  %v2339_v11 = vadd.f32 %v5673_v5, %v2033_v29 }
 0x203   : > { %2975 = vst [vmem:[%s4464_s22 + $0x10] sm:$0xff] %v2943_v62  ;;  %v3006_v33 = vadd.f32 %v3005_v34, %v2943_v62  ;;  %v3045_v56 = vmul.f32 %v2943_v62, %v2943_v62  ;;  %v2946_v31 = vadd.f32 %v4326_v35, %v2641_v45  ;;  %v2640_v8 = vadd.f32 %v2497_v0, %v2335_v36 }
 0x204   : > { %v2802_v15 = vpop.f32.mrf.mxu0  ;;  %v4249_v60 = vpop.f32.mrf.mxu1  ;;  %v2342_v41 = vadd.f32 %v5677_v1, %v2036_v30  ;;  %v2038_v36 = vadd.f32 %v5683_v20, %v5582_v48  ;;  %v2037_v0 = vadd.f32 %v5687_v32, %v5585_v14 }
 0x205   : > { %v3076_v24 = vadd.f32 %v3075_v22, %v3045_v56  ;;  %2978 = vst [vmem:[%s4464_s22 + $0x28] sm:$0xff] %v2946_v31  ;;  %v2945_v46 = vadd.f32 %v2802_v15, %v2640_v8  ;;  %v3007_v43 = vadd.f32 %v3006_v33, %v2944_v18  ;;  %v2643_v10 = vadd.f32 %v4249_v60, %v2338_v7 }
 0x206   : > { %v4329_v4 = vpop.f32.mrf.mxu0  ;;  %v2507_v9 = vpop.f32.mrf.mxu1  ;;  %v2035_v18 = vadd.f32 %v5679_v47, %v5579_v44  ;;  %v3048_v53 = vmul.f32 %v2946_v31, %v2946_v31  ;;  %v2344_v8 = vadd.f32 %v5685_v61, %v2038_v36  ;;  %v2039_v61 = vadd.f32 %v5695_v38, %v5591_v52 }
 0x207   : > { %2977 = vst [vmem:[%s4464_s22 + $0x20] sm:$0xff] %v2945_v46  ;;  %v3008_v16 = vadd.f32 %v3007_v43, %v2945_v46  ;;  %v3047_v21 = vmul.f32 %v2945_v46, %v2945_v46  ;;  %v3077_v34 = vadd.f32 %v3076_v24, %v3046_v58  ;;  %v2642_v6 = vadd.f32 %v2507_v9, %v2337_v2 }
 0x208   : > { %v2948_v50 = vadd.f32 %v4329_v4, %v2643_v10  ;;  %v2812_v51 = vpop.f32.mrf.mxu0  ;;  %v4252_v25 = vpop.f32.mrf.mxu1  ;;  %v2341_v35 = vadd.f32 %v5681_v37, %v2035_v18  ;;  %v2040_v37 = vadd.f32 %v5691_v54, %v5588_v57  ;;  %v2042_v57 = vadd.f32 %v5699_v40, %v5594_v42 }
 0x209   : > { %v3078_v49 = vadd.f32 %v3077_v34, %v3047_v21  ;;  %v2947_v13 = vadd.f32 %v2812_v51, %v2642_v6  ;;  %v3009_v59 = vadd.f32 %v3008_v16, %v2946_v31  ;;  %v2645_v55 = vadd.f32 %v4252_v25, %v2340_v27 }
 0x20a   : > { %2980 = vst [vmem:[%s4464_s22 + $0x38] sm:$0xff] %v2948_v50  ;;  %v4332_v22 = vpop.f32.mrf.mxu0  ;;  %v2517_v62 = vpop.f32.mrf.mxu1  ;;  %v3050_v56 = vmul.f32 %v2948_v50, %v2948_v50  ;;  %v2343_v27 = vadd.f32 %v5689_v39, %v2037_v0  ;;  %v2346_v21 = vadd.f32 %v5693_v26, %v2040_v37  ;;  %v2041_v42 = vadd.f32 %v5703_v23, %v5597_v17 }
 0x20b   : > { %2979 = vst [vmem:[%s4464_s22 + $0x30] sm:$0xff] %v2947_v13  ;;  %v3010_v44 = vadd.f32 %v3009_v59, %v2947_v13  ;;  %v3049_v47 = vmul.f32 %v2947_v13, %v2947_v13  ;;  %v3079_v45 = vadd.f32 %v3078_v49, %v3048_v53  ;;  %v2950_v63 = vadd.f32 %v4332_v22, %v2645_v55 }
 0x20c   : > { %v2644_v5 = vadd.f32 %v2517_v62, %v2339_v11  ;;  %v2822_v1 = vpop.f32.mrf.mxu0  ;;  %v4255_v33 = vpop.f32.mrf.mxu1  ;;  %v2348_v25 = vadd.f32 %v5701_v28, %v2042_v57  ;;  %v5986_v11 = vld [vmem:[#allocation3_spill] sm:$0xff] }
 0x20d   : > { %v3080_v48 = vadd.f32 %v3079_v45, %v3049_v47  ;;  %2982 = vst [vmem:[%s4464_s22 + $0x48] sm:$0xff] %v2950_v63  ;;  %v3011_v20 = vadd.f32 %v3010_v44, %v2948_v50  ;;  %v2647_v31 = vadd.f32 %v4255_v33, %v2342_v41  ;;  %v3052_v54 = vmul.f32 %v2950_v63, %v2950_v63  ;;  %v5987_v41 = vld [vmem:[#allocation18_spill] sm:$0xff]  ;;  %v5988_v45 = vld [vmem:[#allocation17_spill] sm:$0xff] }
 0x20e   : > { %v2949_v7 = vadd.f32 %v2822_v1, %v2644_v5  ;;  %v4335_v2 = vpop.f32.mrf.mxu0  ;;  %v2527_v15 = vpop.f32.mrf.mxu1  ;;  %v2345_v50 = vadd.f32 %v5697_v3, %v2039_v61  ;;  %v2044_v36 = vadd.f32 %v5987_v41, %v5986_v11  ;;  %v2347_v28 = vadd.f32 %v5988_v45, %v2041_v42  ;;  %v5991_v33 = vld [vmem:[#allocation5_spill] sm:$0xff] }
 0x20f   : > { %v3081_v60 = vadd.f32 %v3080_v48, %v3050_v56  ;;  %v2952_v14 = vadd.f32 %v4335_v2, %v2647_v31  ;;  %v2646_v32 = vadd.f32 %v2527_v15, %v2341_v35  ;;  %v5990_v35 = vld [vmem:[#allocation20_spill] sm:$0xff]  ;;  %v5992_v56 = vld [vmem:[#allocation22_spill] sm:$0xff]  ;;  %v5993_v15 = vld [vmem:[#allocation19_spill] sm:$0xff] }
 0x210   : > { %2981 = vst [vmem:[%s4464_s22 + $0x40] sm:$0xff] %v2949_v7  ;;  %v3012_v58 = vadd.f32 %v3011_v20, %v2949_v7  ;;  %v3051_v24 = vmul.f32 %v2949_v7, %v2949_v7  ;;  %v2832_v46 = vpop.f32.mrf.mxu0  ;;  %v4258_v43 = vpop.f32.mrf.mxu1  ;;  %v2046_v48 = vadd.f32 %v5992_v56, %v5991_v33  ;;  %v2350_v37 = vadd.f32 %v5993_v15, %v2044_v36 }
 0x211   : > { %2984 = vst [vmem:[%s4464_s22 + $0x58] sm:$0xff] %v2952_v14  ;;  %v2951_v29 = vadd.f32 %v2832_v46, %v2646_v32  ;;  %v2649_v30 = vadd.f32 %v4258_v43, %v2344_v8  ;;  %v3054_v26 = vmul.f32 %v2952_v14, %v2952_v14 }
 0x212   : > { %v3082_v10 = vadd.f32 %v3081_v60, %v3051_v24  ;;  %v3013_v4 = vadd.f32 %v3012_v58, %v2950_v63  ;;  %v4338_v9 = vpop.f32.mrf.mxu0  ;;  %v2537_v16 = vpop.f32.mrf.mxu1  ;;  %v5989_v63 = vld [vmem:[#allocation4_spill] sm:$0xff] }
 0x213   : > { %2983 = vst [vmem:[%s4464_s22 + $0x50] sm:$0xff] %v2951_v29  ;;  %v3053_v34 = vmul.f32 %v2951_v29, %v2951_v29  ;;  %v2954_v39 = vadd.f32 %v4338_v9, %v2649_v30  ;;  %v2648_v6 = vadd.f32 %v2537_v16, %v2343_v27  ;;  %v2043_v0 = vadd.f32 %v5990_v35, %v5989_v63  ;;  %v5994_v27 = vld [vmem:[#allocation21_spill] sm:$0xff]  ;;  %v5996_v30 = vld [vmem:[#allocation24_spill] sm:$0xff] }
 0x214   : > { %v3014_v18 = vadd.f32 %v3013_v4, %v2951_v29  ;;  %v3083_v52 = vadd.f32 %v3082_v10, %v3052_v54  ;;  %v2842_v38 = vpop.f32.mrf.mxu0  ;;  %v4261_v53 = vpop.f32.mrf.mxu1  ;;  %v5995_v29 = vld [vmem:[#allocation6_spill] sm:$0xff]  ;;  %v5997_v4 = vld [vmem:[#allocation23_spill] sm:$0xff] }
 0x215   : > { %2986 = vst [vmem:[%s4464_s22 + $0x68] sm:$0xff] %v2954_v39  ;;  %v2953_v40 = vadd.f32 %v2842_v38, %v2648_v6  ;;  %v2651_v51 = vadd.f32 %v4261_v53, %v2346_v21  ;;  %v3056_v20 = vmul.f32 %v2954_v39, %v2954_v39  ;;  %v2349_v61 = vadd.f32 %v5994_v27, %v2043_v0  ;;  %v6010_v27 = vld [vmem:[#allocation11_spill] sm:$0xff] }
 0x216   : > { %v3084_v49 = vadd.f32 %v3083_v52, %v3053_v34  ;;  %v3015_v13 = vadd.f32 %v3014_v18, %v2952_v14  ;;  %v4341_v59 = vpop.f32.mrf.mxu0  ;;  %v2547_v55 = vpop.f32.mrf.mxu1  ;;  %v2045_v57 = vadd.f32 %v5996_v30, %v5995_v29  ;;  %v2352_v9 = vadd.f32 %v5997_v4, %v2046_v48  ;;  %v5998_v18 = vld [vmem:[#allocation7_spill] sm:$0xff]  ;;  %v5999_v52 = vld [vmem:[#allocation26_spill] sm:$0xff] }
 0x217   : > { %2985 = vst [vmem:[%s4464_s22 + $0x60] sm:$0xff] %v2953_v40  ;;  %v3055_v22 = vmul.f32 %v2953_v40, %v2953_v40  ;;  %v2956_v3 = vadd.f32 %v4341_v59, %v2651_v51  ;;  %v2650_v62 = vadd.f32 %v2547_v55, %v2345_v50  ;;  %v2048_v38 = vadd.f32 %v5999_v52, %v5998_v18  ;;  %v6001_v59 = vld [vmem:[#allocation8_spill] sm:$0xff] }
 0x218   : > { %v3016_v44 = vadd.f32 %v3015_v13, %v2953_v40  ;;  %v3085_v17 = vadd.f32 %v3084_v49, %v3054_v26  ;;  %v2852_v23 = vpop.f32.mrf.mxu0  ;;  %v4264_v47 = vpop.f32.mrf.mxu1  ;;  %v6000_v49 = vld [vmem:[#allocation25_spill] sm:$0xff]  ;;  %v6002_v55 = vld [vmem:[#allocation28_spill] sm:$0xff] }
 0x219   : > { %2988 = vst [vmem:[%s4464_s22 + $0x78] sm:$0xff] %v2956_v3  ;;  %v2955_v5 = vadd.f32 %v2852_v23, %v2650_v62  ;;  %v2653_v1 = vadd.f32 %v4264_v47, %v2348_v25  ;;  %v3058_v16 = vmul.f32 %v2956_v3, %v2956_v3  ;;  %v2351_v13 = vadd.f32 %v6000_v49, %v2045_v57  ;;  %v6016_v49 = vld [vmem:[#allocation35_spill] sm:$0xff] }
 0x21a   : > { %v3086_v31 = vadd.f32 %v3085_v17, %v3055_v22  ;;  %v3017_v8 = vadd.f32 %v3016_v44, %v2954_v39  ;;  %v4344_v7 = vpop.f32.mrf.mxu0  ;;  %v2557_v2 = vpop.f32.mrf.mxu1  ;;  %v2047_v11 = vadd.f32 %v6002_v55, %v6001_v59  ;;  %v6003_v22 = vld [vmem:[#allocation9_spill] sm:$0xff] }
 0x21b   : > { %2987 = vst [vmem:[%s4464_s22 + $0x70] sm:$0xff] %v2955_v5  ;;  %v3057_v60 = vmul.f32 %v2955_v5, %v2955_v5  ;;  %v2958_v14 = vadd.f32 %v4344_v7, %v2653_v1  ;;  %v2652_v32 = vadd.f32 %v2557_v2, %v2347_v28  ;;  %v6005_v28 = vld [vmem:[#allocation27_spill] sm:$0xff]  ;;  %v6008_v7 = vld [vmem:[#allocation32_spill] sm:$0xff] }
 0x21c   : > { %v3018_v58 = vadd.f32 %v3017_v8, %v2955_v5  ;;  %v3087_v24 = vadd.f32 %v3086_v31, %v3056_v20  ;;  %v2862_v46 = vpop.f32.mrf.mxu0  ;;  %v4267_v43 = vpop.f32.mrf.mxu1  ;;  %v2354_v63 = vadd.f32 %v6005_v28, %v2048_v38  ;;  %v6006_v20 = vld [vmem:[#allocation29_spill] sm:$0xff]  ;;  %v6007_v8 = vld [vmem:[#allocation10_spill] sm:$0xff] }
 0x21d   : > { %2990 = vst [vmem:[%s4464_s22 + $0x88] sm:$0xff] %v2958_v14  ;;  %v2957_v54 = vadd.f32 %v2862_v46, %v2652_v32  ;;  %v2655_v10 = vadd.f32 %v4267_v43, %v2350_v37  ;;  %v3060_v44 = vmul.f32 %v2958_v14, %v2958_v14  ;;  %v2353_v31 = vadd.f32 %v6006_v20, %v2047_v11  ;;  %v6014_v38 = vld [vmem:[#allocation13_spill] sm:$0xff]  ;;  %v6020_v28 = vld [vmem:[#allocation38_spill] sm:$0xff] }
 0x21e   : > { %v3088_v21 = vadd.f32 %v3087_v24, %v3057_v60  ;;  %v3019_v34 = vadd.f32 %v3018_v58, %v2956_v3  ;;  %v4347_v39 = vpop.f32.mrf.mxu0  ;;  %v2567_v6 = vpop.f32.mrf.mxu1  ;;  %v6004_v3 = vld [vmem:[#allocation30_spill] sm:$0xff]  ;;  %v2049_v2 = vadd.f32 %v6008_v7, %v6007_v8  ;;  %v6009_v60 = vld [vmem:[#allocation31_spill] sm:$0xff] }
 0x21f   : > { %2989 = vst [vmem:[%s4464_s22 + $0x80] sm:$0xff] %v2957_v54  ;;  %v3059_v53 = vmul.f32 %v2957_v54, %v2957_v54  ;;  %v2960_v50 = vadd.f32 %v4347_v39, %v2655_v10  ;;  %v2654_v42 = vadd.f32 %v2567_v6, %v2349_v61  ;;  %v2050_v62 = vadd.f32 %v6004_v3, %v6003_v22  ;;  %v6011_v61 = vld [vmem:[#allocation34_spill] sm:$0xff]  ;;  %v6013_v39 = vld [vmem:[#allocation12_spill] sm:$0xff] }
 0x220   : > { %v3020_v40 = vadd.f32 %v3019_v34, %v2957_v54  ;;  %v3089_v51 = vadd.f32 %v3088_v21, %v3058_v16  ;;  %v2872_v25 = vpop.f32.mrf.mxu0  ;;  %v4270_v26 = vpop.f32.mrf.mxu1  ;;  %v2052_v29 = vadd.f32 %v6011_v61, %v6010_v27  ;;  %v6012_v21 = vld [vmem:[#allocation33_spill] sm:$0xff]  ;;  %v2051_v6 = vadd.f32 %v5743_v19, %v6013_v39  ;;  %v6017_v3 = vld [vmem:[#allocation36_spill] sm:$0xff] }
 0x221   : > { %2992 = vst [vmem:[%s4464_s22 + $0x98] sm:$0xff] %v2960_v50  ;;  %v2959_v41 = vadd.f32 %v2872_v25, %v2654_v42  ;;  %v2657_v36 = vadd.f32 %v4270_v26, %v2352_v9  ;;  %v3062_v32 = vmul.f32 %v2960_v50, %v2960_v50  ;;  %v2355_v34 = vadd.f32 %v6012_v21, %v2049_v2 }
 0x222   : > { %v3090_v17 = vadd.f32 %v3089_v51, %v3059_v53  ;;  %v3021_v23 = vadd.f32 %v3020_v40, %v2958_v14  ;;  %v4350_v47 = vpop.f32.mrf.mxu0  ;;  %v2577_v45 = vpop.f32.mrf.mxu1  ;;  %v2356_v14 = vadd.f32 %v6009_v60, %v2050_v62  ;;  %v6015_v53 = vld [vmem:[#allocation37_spill] sm:$0xff]  ;;  %v2357_v62 = vadd.f32 %v6017_v3, %v2051_v6  ;;  %v6022_v60 = vld [vmem:[#allocation40_spill] sm:$0xff]  ;;  %v6026_v6 = vld [vmem:[#allocation43_spill] sm:$0xff] }
 0x223   : > { %2991 = vst [vmem:[%s4464_s22 + $0x90] sm:$0xff] %v2959_v41  ;;  %v3061_v35 = vmul.f32 %v2959_v41, %v2959_v41  ;;  %v2962_v0 = vadd.f32 %v4350_v47, %v2657_v36  ;;  %v2656_v5 = vadd.f32 %v2577_v45, %v2351_v13  ;;  %v2358_v13 = vadd.f32 %v6016_v49, %v2052_v29 }
 0x224   : > { %v3022_v1 = vadd.f32 %v3021_v23, %v2959_v41  ;;  %v3091_v33 = vadd.f32 %v3090_v17, %v3060_v44  ;;  %v2882_v56 = vpop.f32.mrf.mxu0  ;;  %v4273_v48 = vpop.f32.mrf.mxu1  ;;  %v6018_v44 = vld [vmem:[#allocation14_spill] sm:$0xff]  ;;  %v6019_v17 = vld [vmem:[#allocation39_spill] sm:$0xff] }
 0x225   : > { %2994 = vst [vmem:[%s4464_s22 + $0xa8] sm:$0xff] %v2962_v0  ;;  %v2961_v15 = vadd.f32 %v2882_v56, %v2656_v5  ;;  %v2659_v37 = vadd.f32 %v4273_v48, %v2354_v63  ;;  %v3064_v42 = vmul.f32 %v2962_v0, %v2962_v0  ;;  %v2053_v23 = vadd.f32 %v6019_v17, %v6018_v44  ;;  %v6021_v56 = vld [vmem:[#allocation15_spill] sm:$0xff] }
 0x226   : > { %v3092_v58 = vadd.f32 %v3091_v33, %v3061_v35  ;;  %v3023_v24 = vadd.f32 %v3022_v1, %v2960_v50  ;;  %v4353_v46 = vpop.f32.mrf.mxu0  ;;  %v2587_v43 = vpop.f32.mrf.mxu1  ;;  %v2054_v50 = vadd.f32 %v6015_v53, %v6014_v38  ;;  %v2056_v48 = vadd.f32 %v5756_v12, %v6021_v56 }
 0x227   : > { %2993 = vst [vmem:[%s4464_s22 + $0xa0] sm:$0xff] %v2961_v15  ;;  %v3063_v30 = vmul.f32 %v2961_v15, %v2961_v15  ;;  %v2964_v57 = vadd.f32 %v4353_v46, %v2659_v37  ;;  %v2658_v54 = vadd.f32 %v2587_v43, %v2353_v31 }
 0x228   : > { %v3024_v10 = vadd.f32 %v3023_v24, %v2961_v15  ;;  %v3093_v4 = vadd.f32 %v3092_v58, %v3062_v32  ;;  %v2892_v9 = vpop.f32.mrf.mxu0  ;;  %v4276_v16 = vpop.f32.mrf.mxu1  ;;  %v2360_v63 = vadd.f32 %v6020_v28, %v2054_v50  ;;  %v6023_v32 = vld [vmem:[#allocation16_spill] sm:$0xff]  ;;  %v6024_v58 = vld [vmem:[#allocation42_spill] sm:$0xff] }
 0x229   : > { %2996 = vst [vmem:[%s4464_s22 + $0xb8] sm:$0xff] %v2964_v57  ;;  %v2963_v18 = vadd.f32 %v2892_v9, %v2658_v54  ;;  %v2661_v52 = vadd.f32 %v4276_v16, %v2356_v14  ;;  %v3066_v35 = vmul.f32 %v2964_v57, %v2964_v57  ;;  %v2359_v14 = vadd.f32 %v6022_v60, %v2053_v23 }
 0x22a   : > { %v3094_v40 = vadd.f32 %v3093_v4, %v3063_v30  ;;  %v3025_v51 = vadd.f32 %v3024_v10, %v2962_v0  ;;  %v4356_v25 = vpop.f32.mrf.mxu0  ;;  %v2597_v26 = vpop.f32.mrf.mxu1  ;;  %v2055_v24 = vadd.f32 %v6024_v58, %v6023_v32 }
 0x22b   : > { %2995 = vst [vmem:[%s4464_s22 + $0xb0] sm:$0xff] %v2963_v18  ;;  %v3065_v59 = vmul.f32 %v2963_v18, %v2963_v18  ;;  %v2966_v55 = vadd.f32 %v4356_v25, %v2661_v52  ;;  %v2660_v11 = vadd.f32 %v2597_v26, %v2355_v34 }
 0x22c   : > { %v3026_v41 = vadd.f32 %v3025_v51, %v2963_v18  ;;  %v3095_v19 = vadd.f32 %v3094_v40, %v3064_v42  ;;  %v2902_v36 = vpop.f32.mrf.mxu0  ;;  %v4279_v22 = vpop.f32.mrf.mxu1  ;;  %v2361_v18 = vadd.f32 %v6026_v6, %v2055_v24 }
 0x22d   : > { %2998 = vst [vmem:[%s4464_s22 + $0xc8] sm:$0xff] %v2966_v55  ;;  %v2965_v47 = vadd.f32 %v2902_v36, %v2660_v11  ;;  %v2663_v45 = vadd.f32 %v4279_v22, %v2358_v13  ;;  %v3068_v27 = vmul.f32 %v2966_v55, %v2966_v55 }
 0x22e   : > { %v3096_v0 = vadd.f32 %v3095_v19, %v3065_v59  ;;  %v3027_v5 = vadd.f32 %v3026_v41, %v2964_v57  ;;  %v4359_v1 = vpop.f32.mrf.mxu0  ;;  %v2607_v33 = vpop.f32.mrf.mxu1  ;;  %v6025_v57 = vld [vmem:[#allocation41_spill] sm:$0xff] }
 0x22f   : > { %2997 = vst [vmem:[%s4464_s22 + $0xc0] sm:$0xff] %v2965_v47  ;;  %v3067_v20 = vmul.f32 %v2965_v47, %v2965_v47  ;;  %v2968_v31 = vadd.f32 %v4359_v1, %v2663_v45  ;;  %v2662_v8 = vadd.f32 %v2607_v33, %v2357_v62  ;;  %v2362_v54 = vadd.f32 %v6025_v57, %v2056_v48 }
 0x230   : > { %v3028_v7 = vadd.f32 %v3027_v5, %v2965_v47  ;;  %v3097_v2 = vadd.f32 %v3096_v0, %v3066_v35  ;;  %v2912_v15 = vpop.f32.mrf.mxu0  ;;  %v4282_v37 = vpop.f32.mrf.mxu1 }
 0x231   : > { %3000 = vst [vmem:[%s4464_s22 + $0xd8] sm:$0xff] %v2968_v31  ;;  %v2967_v46 = vadd.f32 %v2912_v15, %v2662_v8  ;;  %v2665_v43 = vadd.f32 %v4282_v37, %v2360_v63  ;;  %v3070_v53 = vmul.f32 %v2968_v31, %v2968_v31 }
 0x232   : > { %v3098_v12 = vadd.f32 %v3097_v2, %v3067_v20  ;;  %v3029_v61 = vadd.f32 %v3028_v7, %v2966_v55  ;;  %v4362_v29 = vpop.f32.mrf.mxu0  ;;  %v2617_v30 = vpop.f32.mrf.mxu1 }
 0x233   : > { %2999 = vst [vmem:[%s4464_s22 + $0xd0] sm:$0xff] %v2967_v46  ;;  %v3069_v10 = vmul.f32 %v2967_v46, %v2967_v46  ;;  %v2970_v4 = vadd.f32 %v4362_v29, %v2665_v43  ;;  %v2664_v9 = vadd.f32 %v2617_v30, %v2359_v14 }
 0x234   : > { %v3030_v16 = vadd.f32 %v3029_v61, %v2967_v46  ;;  %v3099_v21 = vadd.f32 %v3098_v12, %v3068_v27  ;;  %v2922_v34 = vpop.f32.mrf.mxu0  ;;  %v4285_v39 = vpop.f32.mrf.mxu1 }
 0x235   : > { %3002 = vst [vmem:[%s4464_s22 + $0xe8] sm:$0xff] %v2970_v4  ;;  %v2969_v52 = vadd.f32 %v2922_v34, %v2664_v9  ;;  %v2667_v38 = vadd.f32 %v4285_v39, %v2362_v54  ;;  %v3072_v41 = vmul.f32 %v2970_v4, %v2970_v4 }
 0x236   : > { %v3100_v50 = vadd.f32 %v3099_v21, %v3069_v10  ;;  %v3031_v42 = vadd.f32 %v3030_v16, %v2968_v31  ;;  %v4365_v40 = vpop.f32.mrf.mxu0  ;;  %v2627_v51 = vpop.f32.mrf.mxu1 }
 0x237   : > { %3001 = vst [vmem:[%s4464_s22 + $0xe0] sm:$0xff] %v2969_v52  ;;  %v3071_v25 = vmul.f32 %v2969_v52, %v2969_v52  ;;  %v2972_v26 = vadd.f32 %v4365_v40, %v2667_v38  ;;  %v2666_v49 = vadd.f32 %v2627_v51, %v2361_v18 }
 0x238   : > { %v3032_v13 = vadd.f32 %v3031_v42, %v2969_v52  ;;  %v3101_v59 = vadd.f32 %v3100_v50, %v3070_v53  ;;  %v2932_v55 = vpop.f32.mrf.mxu0 }
 0x239   : > { %3004 = vst [vmem:[%s4464_s22 + $0xf8] sm:$0xff] %v2972_v26  ;;  %v2971_v11 = vadd.f32 %v2932_v55, %v2666_v49  ;;  %v3074_v44 = vmul.f32 %v2972_v26, %v2972_v26 }
 0x23a   : > { %v3102_v19 = vadd.f32 %v3101_v59, %v3071_v25  ;;  %v3033_v36 = vadd.f32 %v3032_v13, %v2970_v4 }
 0x23b   : > { %3003 = vst [vmem:[%s4464_s22 + $0xf0] sm:$0xff] %v2971_v11  ;;  %v3073_v22 = vmul.f32 %v2971_v11, %v2971_v11 }
 0x23c   : > { %v3034_v3 = vadd.f32 %v3033_v36, %v2971_v11  ;;  %v3103_v62 = vadd.f32 %v3102_v19, %v3072_v41 }
 0x23e   : > { %v3035_v17 = vadd.f32 %v3034_v3, %v2972_v26  ;;  %v3104_v23 = vadd.f32 %v3103_v62, %v3073_v22 }
 0x240   : > { %v3036_v47 = vrot.slane %v3035_v17, 4  ;;  %v3105_v45 = vadd.f32 %v3104_v23, %v3074_v44 }
 0x242   : > { %v3037_v28 = vadd.f32 %v3036_v47, %v3035_v17  ;;  %v3106_v63 = vrot.slane %v3105_v45, 4 }
 0x244   : > { %v3038_v35 = vrot.slane %v3037_v28, 2  ;;  %v3107_v0 = vadd.f32 %v3106_v63, %v3105_v45 }
 0x246   : > { %v3039_v5 = vadd.f32 %v3038_v35, %v3037_v28  ;;  %v3108_v1 = vrot.slane %v3107_v0, 2 }
 0x248   : > { %v3040_v33 = vrot.slane %v3039_v5, 1  ;;  %v3109_v56 = vadd.f32 %v3108_v1, %v3107_v0 }
 0x24a   : > { %v3041_v48 = vadd.f32 %v3040_v33, %v3039_v5  ;;  %v3110_v20 = vrot.slane %v3109_v56, 1 }
 0x24c   : > { %3042 = vst [vmem:[%s4469_s25] sm:$0x1] %v3041_v48  ;;  %v3111_v31 = vadd.f32 %v3110_v20, %v3109_v56 }
 0x24e   : > { %3112 = vst [vmem:[%s4469_s25 + $0x1] sm:$0x1] %v3111_v31 }
 0x24f PF: > { %s14_s12 = sadd.s32 1, %s4425_s12  }
 0x250   : > { %p11_p5 = scmp.ge.s32.totalorder %s14_s12, 4  }
 0x252   :  { %13 = sbr.rel (!%p11_p5) target bundleno = 1 (0x1), region = 78 }

// kernel: basic_block_forward.4
= control target key start
LH: loop header
LB: loop body
LE: loop exit
PB: predicated region body
PF: predicated region fallthrough
CT: control target
= control target key end

     0   :  { %s4620_s18 = smov 0   ;;  %s6215_s0 = inlined_call_operand.vmem [shape: f32[2,16,16,128], index: 0, kind: input, shape index: {}]   ;;  %s6216_s1 = inlined_call_operand.vmem [shape: f32[1152,128], index: 1, kind: input, shape index: {}]   ;;  %s6217_s2 = inlined_call_operand.vmem [shape: f32[1,128], index: 2, kind: input, shape index: {}]   ;;  %s6218_s3 = inlined_call_operand.vmem [shape: f32[1,128], index: 3, kind: input, shape index: {}]   ;;  %s6219_s4 = inlined_call_operand.vmem [shape: f32[2,16,16,128], index: 4, kind: output, shape index: {0}]   ;;  %s6220_s5 = inlined_call_operand.vmem [shape: f32[2,2,128], index: 5, kind: output, shape index: {1}]  }
   0x1 LB: > { %s3363_s19 = sadd.s32 4294967295, %s4587_s18   ;;  %p3367_p0 = scmp.ge.s32.totalorder %s4587_s18, 1  ;;  %s4587_s18 = sphi %s4620_s18, %s16_s18  }
   0x2   : > { %p190_p1 = scmp.lt.s32.totalorder %s4587_s18, 3 }
   0x4   : > { %p191_p2 = pnand %p3367_p0, %p190_p1 }
   0x6   : > { %194 = sbr.rel (%p191_p2) target bundleno = 591 (0x24f), region = 36 }
   0xb   : > { %p222_p3 = scmp.lt.s32.totalorder %s3363_s19, 1  ;;  %p3373_p4 = scmp.ne.s32.totalorder %s3363_s19, 0 }
   0xd   : > { %s223_s20 = scalar_select %p222_p3, %s3363_s19, 1 }
   0xe   : > { %239 = sbr.rel (%p3373_p4) target bundleno = 39 (0x27), region = 40 }
   0xf   : > { %s3378_s21 = sshll.u32 %s223_s20, 8  ;;  %s3372_s22 = sshll.u32 %s223_s20, 1 }
  0x10   : > { %s4631_s25 = scalar_lea.vmem %s6215_s0, %s3378_s21  ;;  %s4636_s28 = scalar_lea.vmem %s6219_s4, %s3378_s21 }
  0x11   : > { %s4641_s6 = scalar_lea.vmem %s6220_s5, %s3372_s22 }
  0x13   : > { %v4589_v0 = vmov 0.0  }
  0x14   : > { %240 = vst [vmem:[#allocation2] sm:$0xff] %v4589_v0  ;;  %241 = vst [vmem:[#allocation2 + $0x8] sm:$0xff] %v4589_v0 }
  0x15   : > { %242 = vst [vmem:[#allocation2 + $0x10] sm:$0x3] %v4589_v0  ;;  %244 = vst [vmem:[#allocation2 + $0x198] sm:$0xff] %v4589_v0 }
  0x16   : > { %245 = vst [vmem:[#allocation2 + $0x1a0] sm:$0xff] %v4589_v0  ;;  %246 = vst [vmem:[#allocation2 + $0x1a8] sm:$0x3] %v4589_v0 }
  0x17   : > { %248 = vst [vmem:[#allocation2 + $0x18] sm:$0x1] %v4589_v0  ;;  %249 = vst [vmem:[#allocation2 + $0x30] sm:$0x1] %v4589_v0 }
  0x18   : > { %250 = vst [vmem:[#allocation2 + $0x48] sm:$0x1] %v4589_v0  ;;  %251 = vst [vmem:[#allocation2 + $0x60] sm:$0x1] %v4589_v0 }
  0x19   : > { %252 = vst [vmem:[#allocation2 + $0x78] sm:$0x1] %v4589_v0  ;;  %253 = vst [vmem:[#allocation2 + $0x90] sm:$0x1] %v4589_v0 }
  0x1a   : > { %254 = vst [vmem:[#allocation2 + $0xa8] sm:$0x1] %v4589_v0  ;;  %255 = vst [vmem:[#allocation2 + $0xc0] sm:$0x1] %v4589_v0 }
  0x1b   : > { %256 = vst [vmem:[#allocation2 + $0xd8] sm:$0x1] %v4589_v0  ;;  %257 = vst [vmem:[#allocation2 + $0xf0] sm:$0x1] %v4589_v0 }
  0x1c   : > { %258 = vst [vmem:[#allocation2 + $0x108] sm:$0x1] %v4589_v0  ;;  %259 = vst [vmem:[#allocation2 + $0x120] sm:$0x1] %v4589_v0 }
  0x1d   : > { %260 = vst [vmem:[#allocation2 + $0x138] sm:$0x1] %v4589_v0  ;;  %261 = vst [vmem:[#allocation2 + $0x150] sm:$0x1] %v4589_v0 }
  0x1e   : > { %262 = vst [vmem:[#allocation2 + $0x168] sm:$0x1] %v4589_v0  ;;  %263 = vst [vmem:[#allocation2 + $0x180] sm:$0x1] %v4589_v0 }
  0x1f   : > { %264 = vst [vmem:[#allocation2 + $0x29] sm:$0x1] %v4589_v0  ;;  %265 = vst [vmem:[#allocation2 + $0x41] sm:$0x1] %v4589_v0 }
  0x20   : > { %266 = vst [vmem:[#allocation2 + $0x59] sm:$0x1] %v4589_v0  ;;  %267 = vst [vmem:[#allocation2 + $0x71] sm:$0x1] %v4589_v0 }
  0x21   : > { %268 = vst [vmem:[#allocation2 + $0x89] sm:$0x1] %v4589_v0  ;;  %269 = vst [vmem:[#allocation2 + $0xa1] sm:$0x1] %v4589_v0 }
  0x22   : > { %270 = vst [vmem:[#allocation2 + $0xb9] sm:$0x1] %v4589_v0  ;;  %271 = vst [vmem:[#allocation2 + $0xd1] sm:$0x1] %v4589_v0 }
  0x23   : > { %272 = vst [vmem:[#allocation2 + $0xe9] sm:$0x1] %v4589_v0  ;;  %273 = vst [vmem:[#allocation2 + $0x101] sm:$0x1] %v4589_v0 }
  0x24   : > { %274 = vst [vmem:[#allocation2 + $0x119] sm:$0x1] %v4589_v0  ;;  %275 = vst [vmem:[#allocation2 + $0x131] sm:$0x1] %v4589_v0 }
  0x25   : > { %276 = vst [vmem:[#allocation2 + $0x149] sm:$0x1] %v4589_v0  ;;  %277 = vst [vmem:[#allocation2 + $0x161] sm:$0x1] %v4589_v0 }
  0x26   : > { %278 = vst [vmem:[#allocation2 + $0x179] sm:$0x1] %v4589_v0  ;;  %279 = vst [vmem:[#allocation2 + $0x191] sm:$0x1] %v4589_v0 }
  0x27 PF: > { %v550_v1 = vld [vmem:[%s6216_s1 + $0xf8] sm:$0xff]  ;;  %v549_v2 = vld [vmem:[%s6216_s1 + $0xf0] sm:$0xff]  ;;  %v548_v3 = vld [vmem:[%s6216_s1 + $0xe8] sm:$0xff] }
  0x28   : > { %4532 = vmatprep.subr.mxu1 %v550_v1  ;;  %3812 = vmatprep.subr.mxu0 %v550_v1  ;;  %v547_v4 = vld [vmem:[%s6216_s1 + $0xe0] sm:$0xff]  ;;  %v294_v5 = vld [vmem:[%s4631_s25 + $0x70] sm:$0xff]  ;;  %v546_v7 = vld [vmem:[%s6216_s1 + $0xd8] sm:$0xff] }
  0x29   : > { %4548 = vmatpush3.msra.mxu1 %v550_v1  ;;  %3813 = vmatpush3.msra.mxu0 %v550_v1  ;;  %v4659_v6 = vld [vmem:[%s6217_s2] ss:$0 sm:$0xff]  ;;  %v295_v10 = vld [vmem:[%s4631_s25 + $0x78] sm:$0xff]  ;;  %v545_v12 = vld [vmem:[%s6216_s1 + $0xd0] sm:$0xff] }
  0x2a   : > { %4533 = vmatprep.subr.mxu1 %v549_v2  ;;  %3814 = vmatprep.subr.mxu0 %v549_v2  ;;  %v333_v8 = vmul.f32 %v4659_v6, %v294_v5  ;;  %v4668_v9 = vld [vmem:[%s6218_s3] ss:$0 sm:$0xff]  ;;  %v334_v11 = vmul.f32 %v4659_v6, %v295_v10  ;;  %v297_v18 = vld [vmem:[%s4631_s25 + $0x88] sm:$0xff]  ;;  %v298_v27 = vld [vmem:[%s4631_s25 + $0x90] sm:$0xff] }
  0x2b   : > { %4549 = vmatpush3.msra.mxu1 %v549_v2  ;;  %3815 = vmatpush3.msra.mxu0 %v549_v2  ;;  %v296_v14 = vld [vmem:[%s4631_s25 + $0x80] sm:$0xff]  ;;  %v544_v19 = vld [vmem:[%s6216_s1 + $0xc8] sm:$0xff]  ;;  %v336_v22 = vmul.f32 %v4659_v6, %v297_v18  ;;  %v282_v28 = vld [vmem:[%s4631_s25 + $0x10] sm:$0xff]  ;;  %v337_v32 = vmul.f32 %v4659_v6, %v298_v27 }
  0x2c   : > { %4534 = vmatprep.subr.mxu1 %v548_v3  ;;  %3816 = vmatprep.subr.mxu0 %v548_v3  ;;  %v4676_v13 = vadd.f32 %v4668_v9, %v333_v8  ;;  %v4680_v15 = vadd.f32 %v4668_v9, %v334_v11  ;;  %v335_v16 = vmul.f32 %v4659_v6, %v296_v14  ;;  %v280_v17 = vld [vmem:[%s4631_s25] sm:$0xff]  ;;  %v281_v23 = vld [vmem:[%s4631_s25 + $0x8] sm:$0xff]  ;;  %v299_v33 = vld [vmem:[%s4631_s25 + $0x98] sm:$0xff] }
  0x2d   : > { %4550 = vmatpush3.msra.mxu1 %v548_v3  ;;  %3817 = vmatpush3.msra.mxu0 %v548_v3  ;;  %v319_v21 = vmul.f32 %v4659_v6, %v280_v17  ;;  %v320_v26 = vmul.f32 %v4659_v6, %v281_v23  ;;  %v543_v29 = vld [vmem:[%s6216_s1 + $0xc0] sm:$0xff]  ;;  %v4708_v31 = vadd.f32 %v4668_v9, %v336_v22  ;;  %v283_v34 = vld [vmem:[%s4631_s25 + $0x18] sm:$0xff]  ;;  %v301_v46 = vld [vmem:[%s4631_s25 + $0xa8] sm:$0xff] }
  0x2e   : > { %4535 = vmatprep.subr.mxu1 %v547_v4  ;;  %3818 = vmatprep.subr.mxu0 %v547_v4  ;;  %v404_v20 = vmax.f32 %v4676_v13, 0.0  ;;  %v405_v24 = vmax.f32 %v4680_v15, 0.0  ;;  %v4694_v25 = vadd.f32 %v4668_v9, %v335_v16  ;;  %v321_v37 = vmul.f32 %v4659_v6, %v282_v28  ;;  %v300_v39 = vld [vmem:[%s4631_s25 + $0xa0] sm:$0xff]  ;;  %v542_v40 = vld [vmem:[%s6216_s1 + $0xb8] sm:$0xff]  ;;  %v285_v51 = vld [vmem:[%s4631_s25 + $0x28] sm:$0xff] }
  0x2f   : > { %4551 = vmatpush3.msra.mxu1 %v547_v4  ;;  %3819 = vmatpush3.msra.mxu0 %v547_v4  ;;  %v4705_v30 = vadd.f32 %v4668_v9, %v319_v21  ;;  %v359_v36 = vadd.f32 %v4668_v9, %v320_v26  ;;  %v338_v38 = vmul.f32 %v4659_v6, %v299_v33  ;;  %v407_v42 = vmax.f32 %v4708_v31, 0.0  ;;  %v284_v45 = vld [vmem:[%s4631_s25 + $0x20] sm:$0xff]  ;;  %v541_v52 = vld [vmem:[%s6216_s1 + $0xb0] sm:$0xff]  ;;  %v303_v63 = vld [vmem:[%s4631_s25 + $0xb8] sm:$0xff] }
  0x30   : > { %4536 = vmatprep.subr.mxu1 %v546_v7  ;;  %3820 = vmatprep.subr.mxu0 %v546_v7  ;;  %437 = vst [vmem:[#allocation2 + $0xc1] sm:$0xff] %v404_v20  ;;  %438 = vst [vmem:[#allocation2 + $0xc9] sm:$0xff] %v405_v24  ;;  %v406_v35 = vmax.f32 %v4694_v25, 0.0  ;;  %v4726_v43 = vadd.f32 %v4668_v9, %v337_v32  ;;  %v322_v44 = vmul.f32 %v4659_v6, %v283_v34  ;;  %v302_v57 = vld [vmem:[%s4631_s25 + $0xb0] sm:$0xff]  ;;  %v540_v0 = vld [vmem:[%s6216_s1 + $0xa8] sm:$0xff] }
  0x31   : > { %4552 = vmatpush3.msra.mxu1 %v546_v7  ;;  %3821 = vmatpush3.msra.mxu0 %v546_v7  ;;  %v390_v41 = vmax.f32 %v4705_v30, 0.0  ;;  %v4733_v47 = vmax.f32 %v359_v36, 0.0  ;;  %v360_v48 = vadd.f32 %v4668_v9, %v321_v37  ;;  %v4737_v49 = vadd.f32 %v4668_v9, %v338_v38  ;;  %440 = vst [vmem:[#allocation2 + $0xe1] sm:$0xff] %v407_v42  ;;  %v286_v62 = vld [vmem:[%s4631_s25 + $0x30] sm:$0xff]  ;;  %v287_v5 = vld [vmem:[%s4631_s25 + $0x38] sm:$0xff]  ;;  %v288_v14 = vld [vmem:[%s4631_s25 + $0x40] sm:$0xff] }
  0x32   : > { %4537 = vmatprep.subr.mxu1 %v545_v12  ;;  %3822 = vmatprep.subr.mxu0 %v545_v12  ;;  %439 = vst [vmem:[#allocation2 + $0xd9] sm:$0xff] %v406_v35  ;;  %v339_v50 = vmul.f32 %v4659_v6, %v300_v39  ;;  %v408_v53 = vmax.f32 %v4726_v43, 0.0  ;;  %v361_v54 = vadd.f32 %v4668_v9, %v322_v44  ;;  %v539_v16 = vld [vmem:[%s6216_s1 + $0xa0] sm:$0xff]  ;;  %v305_v22 = vld [vmem:[%s4631_s25 + $0xc8] sm:$0xff]  ;;  %v306_v32 = vld [vmem:[%s4631_s25 + $0xd0] sm:$0xff] }
  0x33   : > { %4553 = vmatpush3.msra.mxu1 %v545_v12  ;;  %3823 = vmatpush3.msra.mxu0 %v545_v12  ;;  %423 = vst [vmem:[#allocation2 + $0x19] sm:$0xff] %v390_v41  ;;  %v323_v55 = vmul.f32 %v4659_v6, %v284_v45  ;;  %v340_v56 = vmul.f32 %v4659_v6, %v301_v46  ;;  %424 = vst [vmem:[#allocation2 + $0x21] sm:$0xff] %v4733_v47  ;;  %v4754_v58 = vmax.f32 %v360_v48, 0.0  ;;  %v304_v12 = vld [vmem:[%s4631_s25 + $0xc0] sm:$0xff]  ;;  %v289_v23 = vld [vmem:[%s4631_s25 + $0x48] sm:$0xff] }
  0x34   : > { %4538 = vmatprep.subr.mxu1 %v544_v19  ;;  %3824 = vmatprep.subr.mxu0 %v544_v19  ;;  %v409_v59 = vmax.f32 %v4737_v49, 0.0  ;;  %v4758_v60 = vadd.f32 %v4668_v9, %v339_v50  ;;  %v324_v61 = vmul.f32 %v4659_v6, %v285_v51  ;;  %441 = vst [vmem:[#allocation2 + $0xf1] sm:$0xff] %v408_v53  ;;  %v4768_v1 = vmax.f32 %v361_v54, 0.0  ;;  %v538_v33 = vld [vmem:[%s6216_s1 + $0x98] sm:$0xff]  ;;  %v290_v39 = vld [vmem:[%s4631_s25 + $0x50] sm:$0xff]  ;;  %v500_v15 = vld [vmem:[%s6216_s1 + $0x68] sm:$0xff] }
  0x35   : > { %4554 = vmatpush3.msra.mxu1 %v544_v19  ;;  %3825 = vmatpush3.msra.mxu0 %v544_v19  ;;  %v362_v2 = vadd.f32 %v4668_v9, %v323_v55  ;;  %v4772_v3 = vadd.f32 %v4668_v9, %v340_v56  ;;  %v341_v4 = vmul.f32 %v4659_v6, %v302_v57  ;;  %v291_v50 = vld [vmem:[%s4631_s25 + $0x58] sm:$0xff]  ;;  %v537_v51 = vld [vmem:[%s6216_s1 + $0x90] sm:$0xff]  ;;  %v308_v57 = vld [vmem:[%s4631_s25 + $0xe0] sm:$0xff] }
  0x36   : > { %4539 = vmatprep.subr.mxu1 %v543_v29  ;;  %3826 = vmatprep.subr.mxu0 %v543_v29  ;;  %425 = vst [vmem:[#allocation2 + $0x31] sm:$0xff] %v4754_v58  ;;  %442 = vst [vmem:[#allocation2 + $0xf9] sm:$0xff] %v409_v59  ;;  %v410_v7 = vmax.f32 %v4758_v60, 0.0  ;;  %v363_v8 = vadd.f32 %v4668_v9, %v324_v61  ;;  %v325_v10 = vmul.f32 %v4659_v6, %v286_v62  ;;  %v499_v25 = vld [vmem:[%s6216_s1 + $0x60] sm:$0xff]  ;;  %v498_v31 = vld [vmem:[%s6216_s1 + $0x58] sm:$0xff] }
  0x37   : > { %4555 = vmatpush3.msra.mxu1 %v543_v29  ;;  %3827 = vmatpush3.msra.mxu0 %v543_v29  ;;  %v342_v11 = vmul.f32 %v4659_v6, %v303_v63  ;;  %426 = vst [vmem:[#allocation2 + $0x39] sm:$0xff] %v4768_v1  ;;  %v4789_v17 = vmax.f32 %v362_v2, 0.0  ;;  %v411_v18 = vmax.f32 %v4772_v3, 0.0  ;;  %v4793_v19 = vadd.f32 %v4668_v9, %v341_v4  ;;  %v292_v2 = vld [vmem:[%s4631_s25 + $0x60] sm:$0xff]  ;;  %v309_v4 = vld [vmem:[%s4631_s25 + $0xe8] sm:$0xff]  ;;  %v494_v60 = vld [vmem:[%s6216_s1 + $0x38] sm:$0xff] }
  0x38   : > { %4540 = vmatprep.subr.mxu1 %v542_v40  ;;  %3828 = vmatprep.subr.mxu0 %v542_v40  ;;  %v326_v21 = vmul.f32 %v4659_v6, %v287_v5  ;;  %443 = vst [vmem:[#allocation2 + $0x109] sm:$0xff] %v410_v7  ;;  %v4800_v26 = vmax.f32 %v363_v8, 0.0  ;;  %v364_v27 = vadd.f32 %v4668_v9, %v325_v10  ;;  %v536_v5 = vld [vmem:[%s6216_s1 + $0x88] sm:$0xff]  ;;  %v1045_v30 = vld [vmem:[%s6216_s1 + $0x160] sm:$0xff]  ;;  %v1040_v3 = vld [vmem:[%s6216_s1 + $0x138] sm:$0xff] }
  0x39   : > { %4556 = vmatpush3.msra.mxu1 %v542_v40  ;;  %3829 = vmatpush3.msra.mxu0 %v542_v40  ;;  %v4804_v28 = vadd.f32 %v4668_v9, %v342_v11  ;;  %v343_v29 = vmul.f32 %v4659_v6, %v304_v12  ;;  %427 = vst [vmem:[#allocation2 + $0x49] sm:$0xff] %v4789_v17  ;;  %444 = vst [vmem:[#allocation2 + $0x111] sm:$0xff] %v411_v18  ;;  %v412_v34 = vmax.f32 %v4793_v19, 0.0  ;;  %v307_v40 = vld [vmem:[%s4631_s25 + $0xd8] sm:$0xff]  ;;  %v496_v43 = vld [vmem:[%s6216_s1 + $0x48] sm:$0xff] }
  0x3a   : > { %4541 = vmatprep.subr.mxu1 %v541_v52  ;;  %3830 = vmatprep.subr.mxu0 %v541_v52  ;;  %v365_v36 = vadd.f32 %v4668_v9, %v326_v21  ;;  %v327_v37 = vmul.f32 %v4659_v6, %v288_v14  ;;  %v344_v38 = vmul.f32 %v4659_v6, %v305_v22  ;;  %v4821_v44 = vmax.f32 %v364_v27, 0.0  ;;  %v293_v14 = vld [vmem:[%s4631_s25 + $0x68] sm:$0xff]  ;;  %v535_v27 = vld [vmem:[%s6216_s1 + $0x80] sm:$0xff] }
  0x3b   : > { %4557 = vmatpush3.msra.mxu1 %v541_v52  ;;  %3831 = vmatpush3.msra.mxu0 %v541_v52  ;;  %428 = vst [vmem:[#allocation2 + $0x51] sm:$0xff] %v4800_v26  ;;  %v413_v45 = vmax.f32 %v4804_v28, 0.0  ;;  %v4825_v46 = vadd.f32 %v4668_v9, %v343_v29  ;;  %v328_v48 = vmul.f32 %v4659_v6, %v289_v23  ;;  %445 = vst [vmem:[#allocation2 + $0x121] sm:$0xff] %v412_v34  ;;  %v1042_v49 = vld [vmem:[%s6216_s1 + $0x148] sm:$0xff] }
  0x3c   : > { %4542 = vmatprep.subr.mxu1 %v540_v0  ;;  %3832 = vmatprep.subr.mxu0 %v540_v0  ;;  %v4834_v52 = vmax.f32 %v365_v36, 0.0  ;;  %v366_v54 = vadd.f32 %v4668_v9, %v327_v37  ;;  %v4838_v55 = vadd.f32 %v4668_v9, %v344_v38  ;;  %v345_v56 = vmul.f32 %v4659_v6, %v306_v32  ;;  %v492_v19 = vld [vmem:[%s6216_s1 + $0x28] sm:$0xff] }
  0x3d   : > { %4558 = vmatpush3.msra.mxu1 %v540_v0  ;;  %3833 = vmatpush3.msra.mxu0 %v540_v0  ;;  %429 = vst [vmem:[#allocation2 + $0x61] sm:$0xff] %v4821_v44  ;;  %446 = vst [vmem:[#allocation2 + $0x129] sm:$0xff] %v413_v45  ;;  %v414_v61 = vmax.f32 %v4825_v46, 0.0  ;;  %v367_v62 = vadd.f32 %v4668_v9, %v328_v48  ;;  %v329_v63 = vmul.f32 %v4659_v6, %v290_v39  ;;  %v503_v48 = vld [vmem:[#allocation2 + $0x1] sm:$0xff]  ;;  %v490_v46 = vld [vmem:[%s6216_s1 + $0x18] sm:$0xff] }
  0x3e   : > { %4543 = vmatprep.subr.mxu1 %v539_v16  ;;  %3834 = vmatprep.subr.mxu0 %v539_v16  ;;  %v346_v0 = vmul.f32 %v4659_v6, %v307_v40  ;;  %430 = vst [vmem:[#allocation2 + $0x69] sm:$0xff] %v4834_v52  ;;  %v4855_v8 = vmax.f32 %v366_v54, 0.0  ;;  %v415_v10 = vmax.f32 %v4838_v55, 0.0  ;;  %v4859_v11 = vadd.f32 %v4668_v9, %v345_v56  ;;  %v502_v56 = vld [vmem:[%s6216_s1 + $0x78] sm:$0xff]  ;;  %v1038_v28 = vld [vmem:[%s6216_s1 + $0x128] sm:$0xff] }
  0x3f   : > { %4559 = vmatpush3.msra.mxu1 %v539_v16  ;;  %3835 = vmatpush3.msra.mxu0 %v539_v16  ;;  %v330_v12 = vmul.f32 %v4659_v6, %v291_v50  ;;  %447 = vst [vmem:[#allocation2 + $0x139] sm:$0xff] %v414_v61  ;;  %v4865_v16 = vmax.f32 %v367_v62, 0.0  ;;  %v368_v21 = vadd.f32 %v4668_v9, %v329_v63  ;;  %v504_v63 = vld [vmem:[#allocation2 + $0x9] sm:$0xff]  ;;  %v1036_v55 = vld [vmem:[%s6216_s1 + $0x118] sm:$0xff] }
  0x40   : > { %4544 = vmatprep.subr.mxu1 %v538_v33  ;;  %3836 = vmatprep.subr.mxu0 %v538_v33  ;;  %v4869_v22 = vadd.f32 %v4668_v9, %v346_v0  ;;  %v347_v23 = vmul.f32 %v4659_v6, %v308_v57  ;;  %431 = vst [vmem:[#allocation2 + $0x79] sm:$0xff] %v4855_v8  ;;  %448 = vst [vmem:[#allocation2 + $0x141] sm:$0xff] %v415_v10  ;;  %v416_v29 = vmax.f32 %v4859_v11, 0.0  ;;  %v310_v11 = vld [vmem:[%s4631_s25 + $0xf0] sm:$0xff] }
  0x41   : > { %4560 = vmatpush3.msra.mxu1 %v538_v33  ;;  %3837 = vmatpush3.msra.mxu0 %v538_v33  ;;  %v369_v32 = vadd.f32 %v4668_v9, %v330_v12  ;;  %v331_v33 = vmul.f32 %v4659_v6, %v292_v2  ;;  %v348_v36 = vmul.f32 %v4659_v6, %v309_v4  ;;  %v4883_v37 = vmax.f32 %v368_v21, 0.0  ;;  %v1048_v4 = vld [vmem:[%s6216_s1 + $0x178] sm:$0xff] }
  0x42   : > { %4545 = vmatprep.subr.mxu1 %v537_v51  ;;  %3838 = vmatprep.subr.mxu0 %v537_v51  ;;  %432 = vst [vmem:[#allocation2 + $0x81] sm:$0xff] %v4865_v16  ;;  %v417_v38 = vmax.f32 %v4869_v22, 0.0  ;;  %v4887_v39 = vadd.f32 %v4668_v9, %v347_v23  ;;  %v332_v40 = vmul.f32 %v4659_v6, %v293_v14  ;;  %449 = vst [vmem:[#allocation2 + $0x151] sm:$0xff] %v416_v29  ;;  %v311_v12 = vld [vmem:[%s4631_s25 + $0xf8] sm:$0xff]  ;;  %v488_v14 = vld [vmem:[%s6216_s1 + $0x8] sm:$0xff] }
  0x43   : > { %4561 = vmatpush3.msra.mxu1 %v537_v51  ;;  %3839 = vmatpush3.msra.mxu0 %v537_v51  ;;  %v4892_v50 = vmax.f32 %v369_v32, 0.0  ;;  %v370_v51 = vadd.f32 %v4668_v9, %v331_v33  ;;  %v4896_v54 = vadd.f32 %v4668_v9, %v348_v36  ;;  %433 = vst [vmem:[#allocation2 + $0x91] sm:$0xff] %v4883_v37  ;;  %v1034_v23 = vld [vmem:[%s6216_s1 + $0x108] sm:$0xff]  ;;  %v455_v32 = vld [vmem:[#allocation2] sm:$0xff] }
  0x44   : > { %4546 = vmatprep.subr.mxu1 %v536_v5  ;;  %3840 = vmatprep.subr.mxu0 %v536_v5  ;;  %450 = vst [vmem:[#allocation2 + $0x159] sm:$0xff] %v417_v38  ;;  %v418_v57 = vmax.f32 %v4887_v39, 0.0  ;;  %v371_v62 = vadd.f32 %v4668_v9, %v332_v40  ;;  %v349_v21 = vmul.f32 %v4659_v6, %v310_v11  ;;  %v1033_v33 = vld [vmem:[%s6216_s1 + $0x100] sm:$0xff]  ;;  %v456_v39 = vld [vmem:[#allocation2 + $0x8] sm:$0xff]  ;;  %v1353_v40 = vld [vmem:[%s6216_s1 + $0x1f8] sm:$0xff] }
  0x45   : > { %4562 = vmatpush3.msra.mxu1 %v536_v5  ;;  %3841 = vmatpush3.msra.mxu0 %v536_v5  ;;  %434 = vst [vmem:[#allocation2 + $0x99] sm:$0xff] %v4892_v50  ;;  %v4909_v0 = vmax.f32 %v370_v51, 0.0  ;;  %v419_v2 = vmax.f32 %v4896_v54, 0.0  ;;  %v501_v5 = vld [vmem:[%s6216_s1 + $0x70] sm:$0xff]  ;;  %v350_v22 = vmul.f32 %v4659_v6, %v311_v12  ;;  %v1658_v51 = vld [vmem:[%s6216_s1 + $0x278] sm:$0xff]  ;;  %v1347_v11 = vld [vmem:[%s6216_s1 + $0x1c8] sm:$0xff] }
  0x46   : > { %4547 = vmatprep.subr.mxu1 %v535_v27  ;;  %3842 = vmatprep.subr.mxu0 %v535_v27  ;;  %451 = vst [vmem:[#allocation2 + $0x169] sm:$0xff] %v418_v57  ;;  %v4920_v13 = vmax.f32 %v371_v62, 0.0  ;;  %v5080_v54 = vld [vmem:[#allocation2 + $0x18] sm:$0xff]  ;;  %v1352_v62 = vld [vmem:[%s6216_s1 + $0x1f0] sm:$0xff] }
  0x47   : > { %4563 = vmatpush3.msra.mxu1 %v535_v27  ;;  %3868 = vmatprep.mubr.f32.mxu1 %v404_v20  ;;  %435 = vst [vmem:[#allocation2 + $0xa9] sm:$0xff] %v4909_v0  ;;  %452 = vst [vmem:[#allocation2 + $0x171] sm:$0xff] %v419_v2  ;;  %v1047_v20 = vld [vmem:[%s6216_s1 + $0x170] sm:$0xff]  ;;  %v5062_v6 = vadd.f32 %v4668_v9, %v350_v22 }
  0x48   : > { %3843 = vmatpush3.msra.mxu0 %v535_v27  ;;  %3844 = vmatprep.mubr.f32.mxu0 %v503_v48  ;;  %436 = vst [vmem:[#allocation2 + $0xb1] sm:$0xff] %v4920_v13  ;;  %v487_v27 = vld [vmem:[%s6216_s1] sm:$0xff]  ;;  %v1002_v48 = vld [vmem:[#allocation2 + $0xa] sm:$0xff] }
  0x49   : > { %3869 = vmatmul.mubr.f32.vlgmr.msra.gmra.mxu1 %v405_v24  ;;  %3892 = vmatprep.subr.mxu1 %v502_v56  ;;  %v1046_v24 = vld [vmem:[%s6216_s1 + $0x168] sm:$0xff] }
  0x4a   : > { %3845 = vmatmul.mubr.f32.vlgmr.msra.gmra.mxu0 %v504_v63  ;;  %3893 = vmatpush3.msra.mxu1 %v502_v56  ;;  %v5082_v56 = vld [vmem:[#allocation2 + $0x20] sm:$0xff] }
  0x4b   : > { %3972 = vmatprep.subr.mxu0 %v1048_v4  ;;  %3894 = vmatprep.subr.mxu1 %v501_v5  ;;  %v5090_v63 = vld [vmem:[#allocation2 + $0x22] sm:$0xff] }
  0x4c   : > { %3973 = vmatpush3.msra.mxu0 %v1048_v4  ;;  %3871 = vmatprep.mubr.f32.mxu1 %v406_v35  ;;  %v1044_v35 = vld [vmem:[%s6216_s1 + $0x158] sm:$0xff]  ;;  %v5096_v4 = vld [vmem:[#allocation2 + $0x30] sm:$0xff] }
  0x4d   : > { %3895 = vmatpush3.msra.mxu1 %v501_v5  ;;  %3974 = vmatprep.subr.mxu0 %v1047_v20  ;;  %v5099_v5 = vld [vmem:[#allocation2 + $0x38] sm:$0xff] }
  0x4e   : > { %3847 = vmatprep.mubr.f32.mxu0 %v390_v41  ;;  %3872 = vmatmul.mubr.f32.gmra.mxu1 %v407_v42  ;;  %v497_v41 = vld [vmem:[%s6216_s1 + $0x50] sm:$0xff]  ;;  %v5180_v12 = vld [vmem:[#allocation2 + $0x9a] sm:$0xff] }
  0x4f   : > { %3896 = vmatprep.subr.mxu1 %v500_v15  ;;  %3975 = vmatpush3.msra.mxu0 %v1047_v20  ;;  %v1043_v42 = vld [vmem:[%s6216_s1 + $0x150] sm:$0xff] }
  0x50   : > { %3848 = vmatmul.mubr.f32.gmra.mxu0 %v4733_v47  ;;  %3897 = vmatpush3.msra.mxu1 %v500_v15  ;;  %v5102_v20 = vld [vmem:[#allocation2 + $0x32] sm:$0xff]  ;;  %v1351_v15 = vld [vmem:[%s6216_s1 + $0x1e8] sm:$0xff] }
  0x51   : > { %3976 = vmatprep.subr.mxu0 %v1046_v24  ;;  %3898 = vmatprep.subr.mxu1 %v499_v25  ;;  %v5189_v22 = vld [vmem:[#allocation2 + $0xb0] sm:$0xff] }
  0x52   : > { %3977 = vmatpush3.msra.mxu0 %v1046_v24  ;;  %3874 = vmatprep.mubr.f32.mxu1 %v408_v53  ;;  %v495_v53 = vld [vmem:[%s6216_s1 + $0x40] sm:$0xff] }
  0x53   : > { %3899 = vmatpush3.msra.mxu1 %v499_v25  ;;  %3978 = vmatprep.subr.mxu0 %v1045_v30  ;;  %v5108_v24 = vld [vmem:[#allocation2 + $0x3a] sm:$0xff]  ;;  %v1656_v25 = vld [vmem:[%s6216_s1 + $0x268] sm:$0xff] }
  0x54   : > { %3850 = vmatprep.mubr.f32.mxu0 %v4754_v58  ;;  %3875 = vmatmul.mubr.f32.gmra.mxu1 %v409_v59  ;;  %v1041_v59 = vld [vmem:[%s6216_s1 + $0x140] sm:$0xff] }
  0x55   : > { %3900 = vmatprep.subr.mxu1 %v498_v31  ;;  %3979 = vmatpush3.msra.mxu0 %v1045_v30  ;;  %v5114_v30 = vld [vmem:[#allocation2 + $0x48] sm:$0xff] }
  0x56   : > { %3851 = vmatmul.mubr.f32.gmra.mxu0 %v4768_v1  ;;  %3901 = vmatpush3.msra.mxu1 %v498_v31  ;;  %v5117_v31 = vld [vmem:[#allocation2 + $0x50] sm:$0xff] }
  0x57   : > { %3980 = vmatprep.subr.mxu0 %v1044_v35  ;;  %3902 = vmatprep.subr.mxu1 %v497_v41 }
  0x58   : > { %3981 = vmatpush3.msra.mxu0 %v1044_v35  ;;  %3877 = vmatprep.mubr.f32.mxu1 %v410_v7  ;;  %v493_v7 = vld [vmem:[%s6216_s1 + $0x30] sm:$0xff] }
  0x59   : > { %3903 = vmatpush3.msra.mxu1 %v497_v41  ;;  %3982 = vmatprep.subr.mxu0 %v1043_v42  ;;  %v5120_v35 = vld [vmem:[#allocation2 + $0x4a] sm:$0xff]  ;;  %v1350_v41 = vld [vmem:[%s6216_s1 + $0x1e0] sm:$0xff] }
  0x5a   : > { %3853 = vmatprep.mubr.f32.mxu0 %v4789_v17  ;;  %3878 = vmatmul.mubr.f32.gmra.mxu1 %v411_v18  ;;  %v1039_v18 = vld [vmem:[%s6216_s1 + $0x130] sm:$0xff] }
  0x5b   : > { %3904 = vmatprep.subr.mxu1 %v496_v43  ;;  %3983 = vmatpush3.msra.mxu0 %v1043_v42  ;;  %v5126_v42 = vld [vmem:[#allocation2 + $0x52] sm:$0xff] }
  0x5c   : > { %3854 = vmatmul.mubr.f32.gmra.mxu0 %v4800_v26  ;;  %3905 = vmatpush3.msra.mxu1 %v496_v43  ;;  %v1655_v43 = vld [vmem:[%s6216_s1 + $0x260] sm:$0xff] }
  0x5d   : > { %3984 = vmatprep.subr.mxu0 %v1042_v49  ;;  %3906 = vmatprep.subr.mxu1 %v495_v53 }
  0x5e   : > { %3985 = vmatpush3.msra.mxu0 %v1042_v49  ;;  %3880 = vmatprep.mubr.f32.mxu1 %v412_v34  ;;  %v491_v34 = vld [vmem:[%s6216_s1 + $0x20] sm:$0xff] }
  0x5f   : > { %3907 = vmatpush3.msra.mxu1 %v495_v53  ;;  %3986 = vmatprep.subr.mxu0 %v1041_v59  ;;  %v5132_v49 = vld [vmem:[#allocation2 + $0x60] sm:$0xff]  ;;  %v5135_v53 = vld [vmem:[#allocation2 + $0x68] sm:$0xff] }
  0x60   : > { %3856 = vmatprep.mubr.f32.mxu0 %v4821_v44  ;;  %3881 = vmatmul.mubr.f32.gmra.mxu1 %v413_v45  ;;  %v1037_v45 = vld [vmem:[%s6216_s1 + $0x120] sm:$0xff] }
  0x61   : > { %3908 = vmatprep.subr.mxu1 %v494_v60  ;;  %3987 = vmatpush3.msra.mxu0 %v1041_v59  ;;  %v5138_v59 = vld [vmem:[#allocation2 + $0x62] sm:$0xff] }
  0x62   : > { %3857 = vmatmul.mubr.f32.gmra.mxu0 %v4834_v52  ;;  %3909 = vmatpush3.msra.mxu1 %v494_v60  ;;  %v1349_v60 = vld [vmem:[%s6216_s1 + $0x1d8] sm:$0xff] }
  0x63   : > { %3988 = vmatprep.subr.mxu0 %v1040_v3  ;;  %3910 = vmatprep.subr.mxu1 %v493_v7 }
  0x64   : > { %3989 = vmatpush3.msra.mxu0 %v1040_v3  ;;  %3883 = vmatprep.mubr.f32.mxu1 %v414_v61  ;;  %v489_v61 = vld [vmem:[%s6216_s1 + $0x10] sm:$0xff] }
  0x65   : > { %3911 = vmatpush3.msra.mxu1 %v493_v7  ;;  %3990 = vmatprep.subr.mxu0 %v1039_v18  ;;  %v5144_v3 = vld [vmem:[#allocation2 + $0x6a] sm:$0xff]  ;;  %v1654_v7 = vld [vmem:[%s6216_s1 + $0x258] sm:$0xff] }
  0x66   : > { %3859 = vmatprep.mubr.f32.mxu0 %v4855_v8  ;;  %3884 = vmatmul.mubr.f32.gmra.mxu1 %v415_v10  ;;  %v1035_v10 = vld [vmem:[%s6216_s1 + $0x110] sm:$0xff] }
  0x67   : > { %3912 = vmatprep.subr.mxu1 %v492_v19  ;;  %3991 = vmatpush3.msra.mxu0 %v1039_v18  ;;  %v5150_v18 = vld [vmem:[#allocation2 + $0x78] sm:$0xff] }
  0x68   : > { %3860 = vmatmul.mubr.f32.gmra.mxu0 %v4865_v16  ;;  %3913 = vmatpush3.msra.mxu1 %v492_v19  ;;  %v5153_v19 = vld [vmem:[#allocation2 + $0x80] sm:$0xff] }
  0x69   : > { %3992 = vmatprep.subr.mxu0 %v1038_v28  ;;  %3914 = vmatprep.subr.mxu1 %v491_v34 }
  0x6a   : > { %3993 = vmatpush3.msra.mxu0 %v1038_v28  ;;  %3886 = vmatprep.mubr.f32.mxu1 %v416_v29  ;;  %v5059_v29 = vadd.f32 %v4668_v9, %v349_v21  ;;  %v1001_v9 = vld [vmem:[#allocation2 + $0x2] sm:$0xff]  ;;  %v5156_v28 = vld [vmem:[#allocation2 + $0x7a] sm:$0xff] }
  0x6b   : > { %3915 = vmatpush3.msra.mxu1 %v491_v34  ;;  %3994 = vmatprep.subr.mxu0 %v1037_v45  ;;  %v1348_v34 = vld [vmem:[%s6216_s1 + $0x1d0] sm:$0xff]  ;;  %v5186_v21 = vld [vmem:[#allocation2 + $0xa8] sm:$0xff] }
  0x6c   : > { %3862 = vmatprep.mubr.f32.mxu0 %v4883_v37  ;;  %3887 = vmatmul.mubr.f32.gmra.mxu1 %v417_v38  ;;  %v6222_v36 = vmax.f32 %v5059_v29, 0.0  ;;  %v6221_v38 = vmax.f32 %v5062_v6, 0.0 }
  0x6d   : > { %3916 = vmatprep.subr.mxu1 %v490_v46  ;;  %3995 = vmatpush3.msra.mxu0 %v1037_v45  ;;  %v5162_v45 = vld [vmem:[#allocation2 + $0x82] sm:$0xff] }
  0x6e   : > { %3863 = vmatmul.mubr.f32.gmra.mxu0 %v4892_v50  ;;  %3917 = vmatpush3.msra.mxu1 %v490_v46  ;;  %453 = vst [vmem:[#allocation2 + $0x181] sm:$0xff] %v6222_v36  ;;  %454 = vst [vmem:[#allocation2 + $0x189] sm:$0xff] %v6221_v38  ;;  %v1653_v46 = vld [vmem:[%s6216_s1 + $0x250] sm:$0xff]  ;;  %v1647_v38 = vld [vmem:[%s6216_s1 + $0x220] sm:$0xff] }
  0x6f   : > { %3996 = vmatprep.subr.mxu0 %v1036_v55  ;;  %3918 = vmatprep.subr.mxu1 %v489_v61  ;;  %v5276_v36 = vld [vmem:[#allocation2 + $0x120] sm:$0xff] }
  0x70   : > { %3997 = vmatpush3.msra.mxu0 %v1036_v55  ;;  %3889 = vmatprep.mubr.f32.mxu1 %v418_v57  ;;  %v5084_v57 = vld [vmem:[#allocation2 + $0x1a] sm:$0xff]  ;;  %v5168_v55 = vld [vmem:[#allocation2 + $0x90] sm:$0xff] }
  0x71   : > { %3919 = vmatpush3.msra.mxu1 %v489_v61  ;;  %3998 = vmatprep.subr.mxu0 %v1035_v10  ;;  %v5171_v61 = vld [vmem:[#allocation2 + $0x98] sm:$0xff] }
  0x72   : > { %3865 = vmatprep.mubr.f32.mxu0 %v4909_v0  ;;  %3890 = vmatmul.mubr.f32.gmra.mxu1 %v419_v2  ;;  %v1657_v2 = vld [vmem:[%s6216_s1 + $0x270] sm:$0xff] }
  0x73   : > { %3920 = vmatprep.subr.mxu1 %v488_v14  ;;  %3999 = vmatpush3.msra.mxu0 %v1035_v10  ;;  %v5174_v10 = vld [vmem:[#allocation2 + $0x92] sm:$0xff] }
  0x74   : > { %3866 = vmatmul.mubr.f32.gmra.mxu0 %v4920_v13  ;;  %3921 = vmatpush3.msra.mxu1 %v488_v14  ;;  %v1652_v14 = vld [vmem:[%s6216_s1 + $0x248] sm:$0xff] }
  0x75   : > { %4000 = vmatprep.subr.mxu0 %v1034_v23  ;;  %3922 = vmatprep.subr.mxu1 %v487_v27 }
  0x76   : > { %4001 = vmatpush3.msra.mxu0 %v1034_v23  ;;  %3923 = vmatpush3.msra.mxu1 %v487_v27  ;;  %v5192_v23 = vld [vmem:[#allocation2 + $0xaa] sm:$0xff]  ;;  %v1346_v27 = vld [vmem:[%s6216_s1 + $0x1c0] sm:$0xff] }
  0x77   : > { %3924 = vmatprep.mubr.f32.mxu1 %v455_v32  ;;  %4002 = vmatprep.subr.mxu0 %v1033_v33  ;;  %6239 = vst [vmem:[#allocation3_spill] sm:$0xff] %v5192_v23  ;;  %v5198_v32 = vld [vmem:[#allocation2 + $0xb2] sm:$0xff] }
  0x78   : > { %3925 = vmatmul.mubr.f32.vlgmr.msra.gmra.mxu1 %v456_v39  ;;  %4003 = vmatpush3.msra.mxu0 %v1033_v33  ;;  %6240 = vst [vmem:[#allocation4_spill] sm:$0xff] %v5198_v32  ;;  %v1651_v33 = vld [vmem:[%s6216_s1 + $0x240] sm:$0xff] }
  0x79   : > { %4004 = vmatprep.mubr.f32.mxu0 %v1001_v9  ;;  %4052 = vmatprep.subr.mxu1 %v1353_v40  ;;  %v5204_v39 = vld [vmem:[#allocation2 + $0xc0] sm:$0xff]  ;;  %v5207_v9 = vld [vmem:[#allocation2 + $0xc8] sm:$0xff] }
  0x7a   : > { %4005 = vmatmul.mubr.f32.vlgmr.msra.gmra.mxu0 %v1002_v48  ;;  %4053 = vmatpush3.msra.mxu1 %v1353_v40  ;;  %v5210_v40 = vld [vmem:[#allocation2 + $0xc2] sm:$0xff]  ;;  %v1345_v48 = vld [vmem:[%s6216_s1 + $0x1b8] sm:$0xff] }
  0x7b   : > { %4132 = vmatprep.subr.mxu0 %v1658_v51  ;;  %3927 = vmatprep.mubr.f32.mxu1 %v5080_v54  ;;  %6241 = vst [vmem:[#allocation5_spill] sm:$0xff] %v5210_v40 }
  0x7c   : > { %4133 = vmatpush3.msra.mxu0 %v1658_v51  ;;  %3928 = vmatmul.mubr.f32.gmra.mxu1 %v5082_v56  ;;  %v5216_v51 = vld [vmem:[#allocation2 + $0xca] sm:$0xff] }
  0x7d   : > { %4007 = vmatprep.mubr.f32.mxu0 %v5084_v57  ;;  %4054 = vmatprep.subr.mxu1 %v1352_v62  ;;  %6242 = vst [vmem:[#allocation6_spill] sm:$0xff] %v5216_v51 }
  0x7e   : > { %4008 = vmatmul.mubr.f32.gmra.mxu0 %v5090_v63  ;;  %4055 = vmatpush3.msra.mxu1 %v1352_v62  ;;  %v1650_v62 = vld [vmem:[%s6216_s1 + $0x238] sm:$0xff] }
  0x7f   : > { %4134 = vmatprep.subr.mxu0 %v1657_v2  ;;  %3930 = vmatprep.mubr.f32.mxu1 %v5096_v4 }
  0x80   : > { %4135 = vmatpush3.msra.mxu0 %v1657_v2  ;;  %3931 = vmatmul.mubr.f32.gmra.mxu1 %v5099_v5  ;;  %v5222_v2 = vld [vmem:[#allocation2 + $0xd8] sm:$0xff] }
  0x81   : > { %4010 = vmatprep.mubr.f32.mxu0 %v5102_v20  ;;  %4056 = vmatprep.subr.mxu1 %v1351_v15 }
  0x82   : > { %4011 = vmatmul.mubr.f32.gmra.mxu0 %v5108_v24  ;;  %4057 = vmatpush3.msra.mxu1 %v1351_v15  ;;  %v5225_v15 = vld [vmem:[#allocation2 + $0xe0] sm:$0xff] }
  0x83   : > { %4136 = vmatprep.subr.mxu0 %v1656_v25  ;;  %3933 = vmatprep.mubr.f32.mxu1 %v5114_v30 }
  0x84   : > { %4137 = vmatpush3.msra.mxu0 %v1656_v25  ;;  %3934 = vmatmul.mubr.f32.gmra.mxu1 %v5117_v31  ;;  %v5228_v25 = vld [vmem:[#allocation2 + $0xda] sm:$0xff] }
  0x85   : > { %4013 = vmatprep.mubr.f32.mxu0 %v5120_v35  ;;  %4058 = vmatprep.subr.mxu1 %v1350_v41  ;;  %6243 = vst [vmem:[#allocation7_spill] sm:$0xff] %v5228_v25 }
  0x86   : > { %4014 = vmatmul.mubr.f32.gmra.mxu0 %v5126_v42  ;;  %4059 = vmatpush3.msra.mxu1 %v1350_v41  ;;  %v1344_v41 = vld [vmem:[%s6216_s1 + $0x1b0] sm:$0xff] }
  0x87   : > { %4138 = vmatprep.subr.mxu0 %v1655_v43  ;;  %3936 = vmatprep.mubr.f32.mxu1 %v5132_v49 }
  0x88   : > { %4139 = vmatpush3.msra.mxu0 %v1655_v43  ;;  %3937 = vmatmul.mubr.f32.gmra.mxu1 %v5135_v53  ;;  %v5234_v43 = vld [vmem:[#allocation2 + $0xe2] sm:$0xff] }
  0x89   : > { %4016 = vmatprep.mubr.f32.mxu0 %v5138_v59  ;;  %4060 = vmatprep.subr.mxu1 %v1349_v60  ;;  %6244 = vst [vmem:[#allocation8_spill] sm:$0xff] %v5234_v43 }
  0x8a   : > { %4017 = vmatmul.mubr.f32.gmra.mxu0 %v5144_v3  ;;  %4061 = vmatpush3.msra.mxu1 %v1349_v60  ;;  %v1649_v60 = vld [vmem:[%s6216_s1 + $0x230] sm:$0xff] }
  0x8b   : > { %4140 = vmatprep.subr.mxu0 %v1654_v7  ;;  %3939 = vmatprep.mubr.f32.mxu1 %v5150_v18 }
  0x8c   : > { %4141 = vmatpush3.msra.mxu0 %v1654_v7  ;;  %3940 = vmatmul.mubr.f32.gmra.mxu1 %v5153_v19  ;;  %v5240_v7 = vld [vmem:[#allocation2 + $0xf0] sm:$0xff] }
  0x8d   : > { %4019 = vmatprep.mubr.f32.mxu0 %v5156_v28  ;;  %4062 = vmatprep.subr.mxu1 %v1348_v34 }
  0x8e   : > { %4020 = vmatmul.mubr.f32.gmra.mxu0 %v5162_v45  ;;  %4063 = vmatpush3.msra.mxu1 %v1348_v34  ;;  %v5243_v34 = vld [vmem:[#allocation2 + $0xf8] sm:$0xff] }
  0x8f   : > { %4142 = vmatprep.subr.mxu0 %v1653_v46  ;;  %3942 = vmatprep.mubr.f32.mxu1 %v5168_v55 }
  0x90   : > { %4143 = vmatpush3.msra.mxu0 %v1653_v46  ;;  %3943 = vmatmul.mubr.f32.gmra.mxu1 %v5171_v61  ;;  %v5246_v46 = vld [vmem:[#allocation2 + $0xf2] sm:$0xff] }
  0x91   : > { %4022 = vmatprep.mubr.f32.mxu0 %v5174_v10  ;;  %4064 = vmatprep.subr.mxu1 %v1347_v11  ;;  %6245 = vst [vmem:[#allocation9_spill] sm:$0xff] %v5246_v46 }
  0x92   : > { %4023 = vmatmul.mubr.f32.gmra.mxu0 %v5180_v12  ;;  %4065 = vmatpush3.msra.mxu1 %v1347_v11  ;;  %v1343_v11 = vld [vmem:[%s6216_s1 + $0x1a8] sm:$0xff] }
  0x93   : > { %4144 = vmatprep.subr.mxu0 %v1652_v14  ;;  %3945 = vmatprep.mubr.f32.mxu1 %v5186_v21 }
  0x94   : > { %4145 = vmatpush3.msra.mxu0 %v1652_v14  ;;  %3946 = vmatmul.mubr.f32.gmra.mxu1 %v5189_v22  ;;  %v5252_v14 = vld [vmem:[#allocation2 + $0xfa] sm:$0xff] }
  0x95   : > { %4025 = vmatprep.mubr.f32.mxu0 %v5192_v23  ;;  %4066 = vmatprep.subr.mxu1 %v1346_v27  ;;  %6246 = vst [vmem:[#allocation10_spill] sm:$0xff] %v5252_v14  ;;  %v5342_v23 = vld [vmem:[#allocation2 + $0x172] sm:$0xff] }
  0x96   : > { %4026 = vmatmul.mubr.f32.gmra.mxu0 %v5198_v32  ;;  %4067 = vmatpush3.msra.mxu1 %v1346_v27  ;;  %v1648_v27 = vld [vmem:[%s6216_s1 + $0x228] sm:$0xff] }
  0x97   : > { %4146 = vmatprep.subr.mxu0 %v1651_v33  ;;  %3948 = vmatprep.mubr.f32.mxu1 %v5204_v39  ;;  %v5336_v32 = vld [vmem:[#allocation2 + $0x16a] sm:$0xff] }
  0x98   : > { %4147 = vmatpush3.msra.mxu0 %v1651_v33  ;;  %3949 = vmatmul.mubr.f32.gmra.mxu1 %v5207_v9  ;;  %v5258_v33 = vld [vmem:[#allocation2 + $0x108] sm:$0xff] }
  0x99   : > { %4028 = vmatprep.mubr.f32.mxu0 %v5210_v40  ;;  %4068 = vmatprep.subr.mxu1 %v1345_v48  ;;  %v5324_v40 = vld [vmem:[#allocation2 + $0x15a] sm:$0xff] }
  0x9a   : > { %4029 = vmatmul.mubr.f32.gmra.mxu0 %v5216_v51  ;;  %4069 = vmatpush3.msra.mxu1 %v1345_v48  ;;  %v5261_v48 = vld [vmem:[#allocation2 + $0x110] sm:$0xff]  ;;  %6254 = vst [vmem:[#allocation18_spill] sm:$0xff] %v5324_v40 }
  0x9b   : > { %4148 = vmatprep.subr.mxu0 %v1650_v62  ;;  %3951 = vmatprep.mubr.f32.mxu1 %v5222_v2  ;;  %v5318_v51 = vld [vmem:[#allocation2 + $0x152] sm:$0xff] }
  0x9c   : > { %4149 = vmatpush3.msra.mxu0 %v1650_v62  ;;  %3952 = vmatmul.mubr.f32.gmra.mxu1 %v5225_v15  ;;  %v5264_v62 = vld [vmem:[#allocation2 + $0x10a] sm:$0xff]  ;;  %6253 = vst [vmem:[#allocation17_spill] sm:$0xff] %v5318_v51 }
  0x9d   : > { %4031 = vmatprep.mubr.f32.mxu0 %v5228_v25  ;;  %4070 = vmatprep.subr.mxu1 %v1344_v41  ;;  %6247 = vst [vmem:[#allocation11_spill] sm:$0xff] %v5264_v62  ;;  %v5306_v25 = vld [vmem:[#allocation2 + $0x142] sm:$0xff] }
  0x9e   : > { %4032 = vmatmul.mubr.f32.gmra.mxu0 %v5234_v43  ;;  %4071 = vmatpush3.msra.mxu1 %v1344_v41  ;;  %v1342_v41 = vld [vmem:[%s6216_s1 + $0x1a0] sm:$0xff]  ;;  %6252 = vst [vmem:[#allocation16_spill] sm:$0xff] %v5306_v25 }
  0x9f   : > { %4150 = vmatprep.subr.mxu0 %v1649_v60  ;;  %3954 = vmatprep.mubr.f32.mxu1 %v5240_v7  ;;  %v5300_v43 = vld [vmem:[#allocation2 + $0x13a] sm:$0xff] }
  0xa0   : > { %4151 = vmatpush3.msra.mxu0 %v1649_v60  ;;  %3955 = vmatmul.mubr.f32.gmra.mxu1 %v5243_v34  ;;  %v5270_v60 = vld [vmem:[#allocation2 + $0x112] sm:$0xff]  ;;  %6251 = vst [vmem:[#allocation15_spill] sm:$0xff] %v5300_v43 }
  0xa1   : > { %4034 = vmatprep.mubr.f32.mxu0 %v5246_v46  ;;  %4072 = vmatprep.subr.mxu1 %v1343_v11  ;;  %6248 = vst [vmem:[#allocation12_spill] sm:$0xff] %v5270_v60  ;;  %v5288_v46 = vld [vmem:[#allocation2 + $0x12a] sm:$0xff] }
  0xa2   : > { %4035 = vmatmul.mubr.f32.gmra.mxu0 %v5252_v14  ;;  %4073 = vmatpush3.msra.mxu1 %v1343_v11  ;;  %v5279_v11 = vld [vmem:[#allocation2 + $0x128] sm:$0xff]  ;;  %6250 = vst [vmem:[#allocation14_spill] sm:$0xff] %v5288_v46 }
  0xa3   : > { %4152 = vmatprep.subr.mxu0 %v1648_v27  ;;  %3957 = vmatprep.mubr.f32.mxu1 %v5258_v33  ;;  %v5282_v14 = vld [vmem:[#allocation2 + $0x122] sm:$0xff] }
  0xa4   : > { %4153 = vmatpush3.msra.mxu0 %v1648_v27  ;;  %3958 = vmatmul.mubr.f32.gmra.mxu1 %v5261_v48  ;;  %6249 = vst [vmem:[#allocation13_spill] sm:$0xff] %v5282_v14  ;;  %v1341_v27 = vld [vmem:[%s6216_s1 + $0x198] sm:$0xff] }
  0xa5   : > { %4037 = vmatprep.mubr.f32.mxu0 %v5264_v62  ;;  %4074 = vmatprep.subr.mxu1 %v1342_v41  ;;  %v1646_v62 = vld [vmem:[%s6216_s1 + $0x218] sm:$0xff] }
  0xa6   : > { %4038 = vmatmul.mubr.f32.gmra.mxu0 %v5270_v60  ;;  %4075 = vmatpush3.msra.mxu1 %v1342_v41  ;;  %v5294_v60 = vld [vmem:[#allocation2 + $0x138] sm:$0xff]  ;;  %v5297_v41 = vld [vmem:[#allocation2 + $0x140] sm:$0xff] }
  0xa7   : > { %4154 = vmatprep.subr.mxu0 %v1647_v38  ;;  %3960 = vmatprep.mubr.f32.mxu1 %v5276_v36 }
  0xa8   : > { %4155 = vmatpush3.msra.mxu0 %v1647_v38  ;;  %3961 = vmatmul.mubr.f32.gmra.mxu1 %v5279_v11  ;;  %v1340_v38 = vld [vmem:[%s6216_s1 + $0x190] sm:$0xff] }
  0xa9   : > { %4040 = vmatprep.mubr.f32.mxu0 %v5282_v14  ;;  %4076 = vmatprep.subr.mxu1 %v1341_v27  ;;  %v1645_v14 = vld [vmem:[%s6216_s1 + $0x210] sm:$0xff] }
  0xaa   : > { %4041 = vmatmul.mubr.f32.gmra.mxu0 %v5288_v46  ;;  %4077 = vmatpush3.msra.mxu1 %v1341_v27  ;;  %v5312_v46 = vld [vmem:[#allocation2 + $0x150] sm:$0xff]  ;;  %v5315_v27 = vld [vmem:[#allocation2 + $0x158] sm:$0xff] }
  0xab   : > { %4156 = vmatprep.subr.mxu0 %v1646_v62  ;;  %3963 = vmatprep.mubr.f32.mxu1 %v5294_v60 }
  0xac   : > { %4157 = vmatpush3.msra.mxu0 %v1646_v62  ;;  %3964 = vmatmul.mubr.f32.gmra.mxu1 %v5297_v41  ;;  %v1339_v62 = vld [vmem:[%s6216_s1 + $0x188] sm:$0xff] }
  0xad   : > { %4043 = vmatprep.mubr.f32.mxu0 %v5300_v43  ;;  %4078 = vmatprep.subr.mxu1 %v1340_v38  ;;  %v1644_v43 = vld [vmem:[%s6216_s1 + $0x208] sm:$0xff] }
  0xae   : > { %4044 = vmatmul.mubr.f32.gmra.mxu0 %v5306_v25  ;;  %4079 = vmatpush3.msra.mxu1 %v1340_v38  ;;  %v5330_v25 = vld [vmem:[#allocation2 + $0x168] sm:$0xff]  ;;  %v5333_v38 = vld [vmem:[#allocation2 + $0x170] sm:$0xff] }
  0xaf   : > { %4158 = vmatprep.subr.mxu0 %v1645_v14  ;;  %3966 = vmatprep.mubr.f32.mxu1 %v5312_v46 }
  0xb0   : > { %4159 = vmatpush3.msra.mxu0 %v1645_v14  ;;  %3967 = vmatmul.mubr.f32.gmra.mxu1 %v5315_v27  ;;  %v1338_v14 = vld [vmem:[%s6216_s1 + $0x180] sm:$0xff] }
  0xb1   : > { %4046 = vmatprep.mubr.f32.mxu0 %v5318_v51  ;;  %4080 = vmatprep.subr.mxu1 %v1339_v62  ;;  %v1643_v51 = vld [vmem:[%s6216_s1 + $0x200] sm:$0xff] }
  0xb2   : > { %4047 = vmatmul.mubr.f32.gmra.mxu0 %v5324_v40  ;;  %4081 = vmatpush3.msra.mxu1 %v1339_v62  ;;  %v1963_v62 = vld [vmem:[%s6216_s1 + $0x2f8] sm:$0xff] }
  0xb3   : > { %4160 = vmatprep.subr.mxu0 %v1644_v43  ;;  %3969 = vmatprep.mubr.f32.mxu1 %v5330_v25  ;;  %v4573_v40 = vld [vmem:[#allocation2 + $0x19] sm:$0xff] }
  0xb4   : > { %4161 = vmatpush3.msra.mxu0 %v1644_v43  ;;  %3970 = vmatmul.mubr.f32.gmra.mxu1 %v5333_v38  ;;  %v2269_v43 = vld [vmem:[%s6216_s1 + $0x378] sm:$0xff] }
  0xb5   : > { %4049 = vmatprep.mubr.f32.mxu0 %v5336_v32  ;;  %4082 = vmatprep.subr.mxu1 %v1338_v14 }
  0xb6   : > { %4050 = vmatmul.mubr.f32.gmra.mxu0 %v5342_v23  ;;  %4083 = vmatpush3.msra.mxu1 %v1338_v14  ;;  %v1962_v14 = vld [vmem:[%s6216_s1 + $0x2f0] sm:$0xff] }
  0xb7   : > { %4162 = vmatprep.subr.mxu0 %v1643_v51  ;;  %4084 = vmatprep.mubr.f32.mxu1 %v5080_v54  ;;  %v2268_v54 = vld [vmem:[%s6216_s1 + $0x370] sm:$0xff] }
  0xb8   : > { %4163 = vmatpush3.msra.mxu0 %v1643_v51  ;;  %4085 = vmatmul.mubr.f32.vlgmr.msra.gmra.mxu1 %v5082_v56  ;;  %v2267_v56 = vld [vmem:[%s6216_s1 + $0x368] sm:$0xff]  ;;  %v1955_v51 = vld [vmem:[%s6216_s1 + $0x2b8] sm:$0xff] }
  0xb9   : > { %4164 = vmatprep.mubr.f32.mxu0 %v4573_v40  ;;  %4212 = vmatprep.subr.mxu1 %v1963_v62  ;;  %v5425_v40 = vld [vmem:[#allocation2 + $0xc9] sm:$0xff] }
  0xba   : > { %4165 = vmatmul.mubr.f32.vlgmr.msra.gmra.mxu0 %v4733_v47  ;;  %4213 = vmatpush3.msra.mxu1 %v1963_v62  ;;  %v1961_v47 = vld [vmem:[%s6216_s1 + $0x2e8] sm:$0xff] }
  0xbb   : > { %4292 = vmatprep.subr.mxu0 %v2269_v43  ;;  %4087 = vmatprep.mubr.f32.mxu1 %v5096_v4  ;;  %v5439_v62 = vld [vmem:[#allocation2 + $0xe1] sm:$0xff] }
  0xbc   : > { %4293 = vmatpush3.msra.mxu0 %v2269_v43  ;;  %4088 = vmatmul.mubr.f32.gmra.mxu1 %v5099_v5  ;;  %v2261_v43 = vld [vmem:[%s6216_s1 + $0x338] sm:$0xff] }
  0xbd   : > { %4167 = vmatprep.mubr.f32.mxu0 %v4754_v58  ;;  %4214 = vmatprep.subr.mxu1 %v1962_v14  ;;  %v1960_v58 = vld [vmem:[%s6216_s1 + $0x2e0] sm:$0xff] }
  0xbe   : > { %4168 = vmatmul.mubr.f32.gmra.mxu0 %v4768_v1  ;;  %4215 = vmatpush3.msra.mxu1 %v1962_v14  ;;  %v2266_v1 = vld [vmem:[%s6216_s1 + $0x360] sm:$0xff]  ;;  %v5447_v14 = vld [vmem:[#allocation2 + $0xf1] sm:$0xff] }
  0xbf   : > { %4294 = vmatprep.subr.mxu0 %v2268_v54  ;;  %4090 = vmatprep.mubr.f32.mxu1 %v5114_v30 }
  0xc0   : > { %4295 = vmatpush3.msra.mxu0 %v2268_v54  ;;  %4091 = vmatmul.mubr.f32.gmra.mxu1 %v5117_v31  ;;  %v1954_v54 = vld [vmem:[%s6216_s1 + $0x2b0] sm:$0xff] }
  0xc1   : > { %4170 = vmatprep.mubr.f32.mxu0 %v4789_v17  ;;  %4216 = vmatprep.subr.mxu1 %v1961_v47  ;;  %v1959_v17 = vld [vmem:[%s6216_s1 + $0x2d8] sm:$0xff] }
  0xc2   : > { %4171 = vmatmul.mubr.f32.gmra.mxu0 %v4800_v26  ;;  %4217 = vmatpush3.msra.mxu1 %v1961_v47  ;;  %v2265_v26 = vld [vmem:[%s6216_s1 + $0x358] sm:$0xff] }
  0xc3   : > { %4296 = vmatprep.subr.mxu0 %v2267_v56  ;;  %4093 = vmatprep.mubr.f32.mxu1 %v5132_v49  ;;  %v5453_v47 = vld [vmem:[#allocation2 + $0xf9] sm:$0xff] }
  0xc4   : > { %4297 = vmatpush3.msra.mxu0 %v2267_v56  ;;  %4094 = vmatmul.mubr.f32.gmra.mxu1 %v5135_v53  ;;  %v2260_v56 = vld [vmem:[%s6216_s1 + $0x330] sm:$0xff] }
  0xc5   : > { %4173 = vmatprep.mubr.f32.mxu0 %v4821_v44  ;;  %4218 = vmatprep.subr.mxu1 %v1960_v58  ;;  %v1958_v44 = vld [vmem:[%s6216_s1 + $0x2d0] sm:$0xff] }
  0xc6   : > { %4174 = vmatmul.mubr.f32.gmra.mxu0 %v4834_v52  ;;  %4219 = vmatpush3.msra.mxu1 %v1960_v58  ;;  %v2264_v52 = vld [vmem:[%s6216_s1 + $0x350] sm:$0xff] }
  0xc7   : > { %4298 = vmatprep.subr.mxu0 %v2266_v1  ;;  %4096 = vmatprep.mubr.f32.mxu1 %v5150_v18  ;;  %v5461_v58 = vld [vmem:[#allocation2 + $0x109] sm:$0xff] }
  0xc8   : > { %4299 = vmatpush3.msra.mxu0 %v2266_v1  ;;  %4097 = vmatmul.mubr.f32.gmra.mxu1 %v5153_v19  ;;  %v1953_v1 = vld [vmem:[%s6216_s1 + $0x2a8] sm:$0xff] }
  0xc9   : > { %4176 = vmatprep.mubr.f32.mxu0 %v4855_v8  ;;  %4220 = vmatprep.subr.mxu1 %v1959_v17  ;;  %v1957_v8 = vld [vmem:[%s6216_s1 + $0x2c8] sm:$0xff] }
  0xca   : > { %4177 = vmatmul.mubr.f32.gmra.mxu0 %v4865_v16  ;;  %4221 = vmatpush3.msra.mxu1 %v1959_v17  ;;  %v2263_v16 = vld [vmem:[%s6216_s1 + $0x348] sm:$0xff]  ;;  %v5467_v17 = vld [vmem:[#allocation2 + $0x111] sm:$0xff] }
  0xcb   : > { %4300 = vmatprep.subr.mxu0 %v2265_v26  ;;  %4099 = vmatprep.mubr.f32.mxu1 %v5168_v55 }
  0xcc   : > { %4301 = vmatpush3.msra.mxu0 %v2265_v26  ;;  %4100 = vmatmul.mubr.f32.gmra.mxu1 %v5171_v61  ;;  %v2259_v26 = vld [vmem:[%s6216_s1 + $0x328] sm:$0xff] }
  0xcd   : > { %4179 = vmatprep.mubr.f32.mxu0 %v4883_v37  ;;  %4222 = vmatprep.subr.mxu1 %v1958_v44  ;;  %v5419_v37 = vld [vmem:[#allocation2 + $0xc1] sm:$0xff] }
  0xce   : > { %4180 = vmatmul.mubr.f32.gmra.mxu0 %v4892_v50  ;;  %4223 = vmatpush3.msra.mxu1 %v1958_v44  ;;  %v1956_v50 = vld [vmem:[%s6216_s1 + $0x2c0] sm:$0xff] }
  0xcf   : > { %4302 = vmatprep.subr.mxu0 %v2264_v52  ;;  %4102 = vmatprep.mubr.f32.mxu1 %v5186_v21  ;;  %v5475_v44 = vld [vmem:[#allocation2 + $0x121] sm:$0xff] }
  0xd0   : > { %4303 = vmatpush3.msra.mxu0 %v2264_v52  ;;  %4103 = vmatmul.mubr.f32.gmra.mxu1 %v5189_v22  ;;  %v1952_v52 = vld [vmem:[%s6216_s1 + $0x2a0] sm:$0xff] }
  0xd1   : > { %4182 = vmatprep.mubr.f32.mxu0 %v4909_v0  ;;  %4224 = vmatprep.subr.mxu1 %v1957_v8  ;;  %v2262_v0 = vld [vmem:[%s6216_s1 + $0x340] sm:$0xff] }
  0xd2   : > { %4183 = vmatmul.mubr.f32.gmra.mxu0 %v4920_v13  ;;  %4225 = vmatpush3.msra.mxu1 %v1957_v8  ;;  %v5433_v13 = vld [vmem:[#allocation2 + $0xd9] sm:$0xff]  ;;  %v5481_v8 = vld [vmem:[#allocation2 + $0x129] sm:$0xff] }
  0xd3   : > { %4304 = vmatprep.subr.mxu0 %v2263_v16  ;;  %4105 = vmatprep.mubr.f32.mxu1 %v5204_v39 }
  0xd4   : > { %4305 = vmatpush3.msra.mxu0 %v2263_v16  ;;  %4106 = vmatmul.mubr.f32.gmra.mxu1 %v5207_v9  ;;  %v2258_v16 = vld [vmem:[%s6216_s1 + $0x320] sm:$0xff] }
  0xd5   : > { %4185 = vmatprep.mubr.f32.mxu0 %v5419_v37  ;;  %4226 = vmatprep.subr.mxu1 %v1956_v50 }
  0xd6   : > { %4186 = vmatmul.mubr.f32.gmra.mxu0 %v5425_v40  ;;  %4227 = vmatpush3.msra.mxu1 %v1956_v50  ;;  %v5489_v50 = vld [vmem:[#allocation2 + $0x139] sm:$0xff] }
  0xd7   : > { %4306 = vmatprep.subr.mxu0 %v2262_v0  ;;  %4108 = vmatprep.mubr.f32.mxu1 %v5222_v2 }
  0xd8   : > { %4307 = vmatpush3.msra.mxu0 %v2262_v0  ;;  %4109 = vmatmul.mubr.f32.gmra.mxu1 %v5225_v15  ;;  %v1951_v0 = vld [vmem:[%s6216_s1 + $0x298] sm:$0xff] }
  0xd9   : > { %4188 = vmatprep.mubr.f32.mxu0 %v5433_v13  ;;  %4228 = vmatprep.subr.mxu1 %v1955_v51 }
  0xda   : > { %4189 = vmatmul.mubr.f32.gmra.mxu0 %v5439_v62  ;;  %4229 = vmatpush3.msra.mxu1 %v1955_v51  ;;  %v2257_v51 = vld [vmem:[%s6216_s1 + $0x318] sm:$0xff] }
  0xdb   : > { %4308 = vmatprep.subr.mxu0 %v2261_v43  ;;  %4111 = vmatprep.mubr.f32.mxu1 %v5240_v7 }
  0xdc   : > { %4309 = vmatpush3.msra.mxu0 %v2261_v43  ;;  %4112 = vmatmul.mubr.f32.gmra.mxu1 %v5243_v34  ;;  %v4574_v43 = vld [vmem:[#allocation2 + $0x141] sm:$0xff] }
  0xdd   : > { %4191 = vmatprep.mubr.f32.mxu0 %v5447_v14  ;;  %4230 = vmatprep.subr.mxu1 %v1954_v54 }
  0xde   : > { %4192 = vmatmul.mubr.f32.gmra.mxu0 %v5453_v47  ;;  %4231 = vmatpush3.msra.mxu1 %v1954_v54  ;;  %v1950_v54 = vld [vmem:[%s6216_s1 + $0x290] sm:$0xff] }
  0xdf   : > { %4310 = vmatprep.subr.mxu0 %v2260_v56  ;;  %4114 = vmatprep.mubr.f32.mxu1 %v5258_v33 }
  0xe0   : > { %4311 = vmatpush3.msra.mxu0 %v2260_v56  ;;  %4115 = vmatmul.mubr.f32.gmra.mxu1 %v5261_v48  ;;  %v2256_v56 = vld [vmem:[%s6216_s1 + $0x310] sm:$0xff] }
  0xe1   : > { %4194 = vmatprep.mubr.f32.mxu0 %v5461_v58  ;;  %4232 = vmatprep.subr.mxu1 %v1953_v1 }
  0xe2   : > { %4195 = vmatmul.mubr.f32.gmra.mxu0 %v5467_v17  ;;  %4233 = vmatpush3.msra.mxu1 %v1953_v1  ;;  %v4575_v1 = vld [vmem:[#allocation2 + $0x151] sm:$0xff] }
  0xe3   : > { %4312 = vmatprep.subr.mxu0 %v2259_v26  ;;  %4117 = vmatprep.mubr.f32.mxu1 %v5276_v36 }
  0xe4   : > { %4313 = vmatpush3.msra.mxu0 %v2259_v26  ;;  %4118 = vmatmul.mubr.f32.gmra.mxu1 %v5279_v11  ;;  %v4576_v26 = vld [vmem:[#allocation2 + $0x159] sm:$0xff] }
  0xe5   : > { %4197 = vmatprep.mubr.f32.mxu0 %v5475_v44  ;;  %4234 = vmatprep.subr.mxu1 %v1952_v52 }
  0xe6   : > { %4198 = vmatmul.mubr.f32.gmra.mxu0 %v5481_v8  ;;  %4235 = vmatpush3.msra.mxu1 %v1952_v52  ;;  %v1949_v52 = vld [vmem:[%s6216_s1 + $0x288] sm:$0xff] }
  0xe7   : > { %4314 = vmatprep.subr.mxu0 %v2258_v16  ;;  %4120 = vmatprep.mubr.f32.mxu1 %v5294_v60 }
  0xe8   : > { %4315 = vmatpush3.msra.mxu0 %v2258_v16  ;;  %4121 = vmatmul.mubr.f32.gmra.mxu1 %v5297_v41  ;;  %v2255_v16 = vld [vmem:[%s6216_s1 + $0x308] sm:$0xff] }
  0xe9   : > { %4200 = vmatprep.mubr.f32.mxu0 %v5489_v50  ;;  %4236 = vmatprep.subr.mxu1 %v1951_v0 }
  0xea   : > { %4201 = vmatmul.mubr.f32.gmra.mxu0 %v4574_v43  ;;  %4237 = vmatpush3.msra.mxu1 %v1951_v0  ;;  %v5516_v0 = vld [vmem:[#allocation2 + $0x180] sm:$0xff]  ;;  %v5518_v43 = vld [vmem:[#allocation2 + $0x188] sm:$0xff] }
  0xeb   : > { %4316 = vmatprep.subr.mxu0 %v2257_v51  ;;  %4123 = vmatprep.mubr.f32.mxu1 %v5312_v46 }
  0xec   : > { %4317 = vmatpush3.msra.mxu0 %v2257_v51  ;;  %4124 = vmatmul.mubr.f32.gmra.mxu1 %v5315_v27  ;;  %v4577_v51 = vld [vmem:[#allocation2 + $0x169] sm:$0xff] }
  0xed   : > { %4203 = vmatprep.mubr.f32.mxu0 %v4575_v1  ;;  %4238 = vmatprep.subr.mxu1 %v1950_v54  ;;  %v2254_v1 = vld [vmem:[%s6216_s1 + $0x300] sm:$0xff] }
  0xee   : > { %4204 = vmatmul.mubr.f32.gmra.mxu0 %v4576_v26  ;;  %4239 = vmatpush3.msra.mxu1 %v1950_v54  ;;  %v4578_v54 = vld [vmem:[#allocation2 + $0x171] sm:$0xff]  ;;  %v6255_v26 = vmax.f32 %v5059_v29, 0.0 }
  0xef   : > { %4318 = vmatprep.subr.mxu0 %v2256_v56  ;;  %4126 = vmatprep.mubr.f32.mxu1 %v5330_v25  ;;  %v2879_v29 = vld [vmem:[%s6216_s1 + $0x478] sm:$0xff] }
  0xf0   : > { %4319 = vmatpush3.msra.mxu0 %v2256_v56  ;;  %4127 = vmatmul.mubr.f32.gmra.mxu1 %v5333_v38  ;;  %v1948_v56 = vld [vmem:[%s6216_s1 + $0x280] sm:$0xff] }
  0xf1   : > { %4206 = vmatprep.mubr.f32.mxu0 %v4577_v51  ;;  %4240 = vmatprep.subr.mxu1 %v1949_v52  ;;  %v2574_v51 = vld [vmem:[%s6216_s1 + $0x3f8] sm:$0xff] }
  0xf2   : > { %4207 = vmatmul.mubr.f32.gmra.mxu0 %v4578_v54  ;;  %4241 = vmatpush3.msra.mxu1 %v1949_v52  ;;  %v6256_v52 = vmax.f32 %v5062_v6, 0.0  ;;  %v2573_v6 = vld [vmem:[%s6216_s1 + $0x3f0] sm:$0xff] }
  0xf3   : > { %4320 = vmatprep.subr.mxu0 %v2255_v16  ;;  %4129 = vmatprep.mubr.f32.mxu1 %v5516_v0 }
  0xf4   : > { %4321 = vmatpush3.msra.mxu0 %v2255_v16  ;;  %4130 = vmatmul.mubr.f32.gmra.mxu1 %v5518_v43 }
  0xf5   : > { %4209 = vmatprep.mubr.f32.mxu0 %v6255_v26  ;;  %4242 = vmatprep.subr.mxu1 %v1948_v56  ;;  %v6262_v26 = vld [vmem:[#allocation8_spill] sm:$0xff] }
  0xf6   : > { %4210 = vmatmul.mubr.f32.gmra.mxu0 %v6256_v52  ;;  %4243 = vmatpush3.msra.mxu1 %v1948_v56  ;;  %v2565_v52 = vld [vmem:[%s6216_s1 + $0x3b0] sm:$0xff] }
  0xf7   : > { %4322 = vmatprep.subr.mxu0 %v2254_v1  ;;  %4244 = vmatprep.mubr.f32.mxu1 %v5084_v57  ;;  %v2878_v57 = vld [vmem:[%s6216_s1 + $0x470] sm:$0xff] }
  0xf8   : > { %4323 = vmatpush3.msra.mxu0 %v2254_v1  ;;  %4245 = vmatmul.mubr.f32.vlgmr.msra.gmra.mxu1 %v5090_v63  ;;  %v2572_v63 = vld [vmem:[%s6216_s1 + $0x3e8] sm:$0xff]  ;;  %v6261_v1 = vld [vmem:[#allocation7_spill] sm:$0xff] }
  0xf9   : > { %4324 = vmatprep.mubr.f32.mxu0 %v5096_v4  ;;  %4372 = vmatprep.subr.mxu1 %v2574_v51  ;;  %v2877_v4 = vld [vmem:[%s6216_s1 + $0x468] sm:$0xff] }
  0xfa   : > { %4325 = vmatmul.mubr.f32.vlgmr.msra.gmra.mxu0 %v5099_v5  ;;  %4373 = vmatpush3.msra.mxu1 %v2574_v51  ;;  %v2571_v5 = vld [vmem:[%s6216_s1 + $0x3e0] sm:$0xff] }
  0xfb   : > { %4452 = vmatprep.subr.mxu0 %v2879_v29  ;;  %4247 = vmatprep.mubr.f32.mxu1 %v5102_v20  ;;  %v2876_v20 = vld [vmem:[%s6216_s1 + $0x460] sm:$0xff] }
  0xfc   : > { %4453 = vmatpush3.msra.mxu0 %v2879_v29  ;;  %4248 = vmatmul.mubr.f32.gmra.mxu1 %v5108_v24  ;;  %v2570_v24 = vld [vmem:[%s6216_s1 + $0x3d8] sm:$0xff]  ;;  %v6263_v29 = vld [vmem:[#allocation9_spill] sm:$0xff] }
  0xfd   : > { %4327 = vmatprep.mubr.f32.mxu0 %v5114_v30  ;;  %4374 = vmatprep.subr.mxu1 %v2573_v6  ;;  %v2875_v30 = vld [vmem:[%s6216_s1 + $0x458] sm:$0xff] }
  0xfe   : > { %4328 = vmatmul.mubr.f32.gmra.mxu0 %v5117_v31  ;;  %4375 = vmatpush3.msra.mxu1 %v2573_v6  ;;  %v6264_v6 = vld [vmem:[#allocation10_spill] sm:$0xff] }
  0xff   : > { %4454 = vmatprep.subr.mxu0 %v2878_v57  ;;  %4250 = vmatprep.mubr.f32.mxu1 %v5120_v35  ;;  %v2569_v35 = vld [vmem:[%s6216_s1 + $0x3d0] sm:$0xff] }
 0x100   : > { %4455 = vmatpush3.msra.mxu0 %v2878_v57  ;;  %4251 = vmatmul.mubr.f32.gmra.mxu1 %v5126_v42 }
 0x101   : > { %4330 = vmatprep.mubr.f32.mxu0 %v5132_v49  ;;  %4376 = vmatprep.subr.mxu1 %v2572_v63 }
 0x102   : > { %4331 = vmatmul.mubr.f32.gmra.mxu0 %v5135_v53  ;;  %4377 = vmatpush3.msra.mxu1 %v2572_v63  ;;  %v2874_v53 = vld [vmem:[%s6216_s1 + $0x450] sm:$0xff]  ;;  %v2564_v63 = vld [vmem:[%s6216_s1 + $0x3a8] sm:$0xff] }
 0x103   : > { %4456 = vmatprep.subr.mxu0 %v2877_v4  ;;  %4253 = vmatprep.mubr.f32.mxu1 %v5138_v59 }
 0x104   : > { %4457 = vmatpush3.msra.mxu0 %v2877_v4  ;;  %4254 = vmatmul.mubr.f32.gmra.mxu1 %v5144_v3  ;;  %v2568_v3 = vld [vmem:[%s6216_s1 + $0x3c8] sm:$0xff] }
 0x105   : > { %4333 = vmatprep.mubr.f32.mxu0 %v5150_v18  ;;  %4378 = vmatprep.subr.mxu1 %v2571_v5 }
 0x106   : > { %4334 = vmatmul.mubr.f32.gmra.mxu0 %v5153_v19  ;;  %4379 = vmatpush3.msra.mxu1 %v2571_v5  ;;  %v6257_v19 = vld [vmem:[#allocation3_spill] sm:$0xff] }
 0x107   : > { %4458 = vmatprep.subr.mxu0 %v2876_v20  ;;  %4256 = vmatprep.mubr.f32.mxu1 %v5156_v28  ;;  %v6258_v28 = vld [vmem:[#allocation4_spill] sm:$0xff]  ;;  %v6265_v5 = vld [vmem:[#allocation11_spill] sm:$0xff] }
 0x108   : > { %4459 = vmatpush3.msra.mxu0 %v2876_v20  ;;  %4257 = vmatmul.mubr.f32.gmra.mxu1 %v5162_v45  ;;  %v2873_v45 = vld [vmem:[%s6216_s1 + $0x448] sm:$0xff]  ;;  %v6266_v20 = vld [vmem:[#allocation12_spill] sm:$0xff] }
 0x109   : > { %4336 = vmatprep.mubr.f32.mxu0 %v5168_v55  ;;  %4380 = vmatprep.subr.mxu1 %v2570_v24  ;;  %v5581_v31 = vpop.f32.mrf.mxu1 }
 0x10a   : > { %4337 = vmatmul.mubr.f32.gmra.mxu0 %v5171_v61  ;;  %4381 = vmatpush3.msra.mxu1 %v2570_v24  ;;  %v5587_v42 = vpop.f32.mrf.mxu0 }
 0x10b   : > { %4460 = vmatprep.subr.mxu0 %v2875_v30  ;;  %4259 = vmatprep.mubr.f32.mxu1 %v5174_v10  ;;  %v5590_v49 = vpop.f32.mrf.mxu1  ;;  %v2567_v10 = vld [vmem:[%s6216_s1 + $0x3c0] sm:$0xff] }
 0x10c   : > { %4461 = vmatpush3.msra.mxu0 %v2875_v30  ;;  %4260 = vmatmul.mubr.f32.gmra.mxu1 %v5180_v12  ;;  %v5596_v59 = vpop.f32.mrf.mxu0 }
 0x10d   : > { %4339 = vmatprep.mubr.f32.mxu0 %v5186_v21  ;;  %4382 = vmatprep.subr.mxu1 %v2569_v35  ;;  %v6259_v21 = vld [vmem:[#allocation5_spill] sm:$0xff] }
 0x10e   : > { %4340 = vmatmul.mubr.f32.gmra.mxu0 %v5189_v22  ;;  %4383 = vmatpush3.msra.mxu1 %v2569_v35  ;;  %v5603_v18 = vpop.f32.mrf.mxu1  ;;  %v6260_v22 = vld [vmem:[#allocation6_spill] sm:$0xff] }
 0x10f   : > { %4462 = vmatprep.subr.mxu0 %v2874_v53  ;;  %4262 = vmatprep.mubr.f32.mxu1 %v6257_v19  ;;  %v2562_v19 = vld [vmem:[%s6216_s1 + $0x398] sm:$0xff] }
 0x110   : > { %4463 = vmatpush3.msra.mxu0 %v2874_v53  ;;  %4263 = vmatmul.mubr.f32.gmra.mxu1 %v6258_v28  ;;  %v5610_v55 = vpop.f32.mrf.mxu0  ;;  %v5612_v61 = vpop.f32.mrf.mxu1  ;;  %v6267_v53 = vld [vmem:[#allocation13_spill] sm:$0xff] }
 0x111   : > { %4342 = vmatprep.mubr.f32.mxu0 %v5204_v39  ;;  %4384 = vmatprep.subr.mxu1 %v2568_v3  ;;  %v2872_v39 = vld [vmem:[%s6216_s1 + $0x440] sm:$0xff] }
 0x112   : > { %4343 = vmatmul.mubr.f32.gmra.mxu0 %v5207_v9  ;;  %4385 = vmatpush3.msra.mxu1 %v2568_v3  ;;  %v5619_v12 = vpop.f32.mrf.mxu0  ;;  %v2566_v9 = vld [vmem:[%s6216_s1 + $0x3b8] sm:$0xff]  ;;  %v6268_v3 = vld [vmem:[#allocation14_spill] sm:$0xff] }
 0x113   : > { %4464 = vmatprep.subr.mxu0 %v2873_v45  ;;  %4265 = vmatprep.mubr.f32.mxu1 %v6259_v21 }
 0x114   : > { %4465 = vmatpush3.msra.mxu0 %v2873_v45  ;;  %4266 = vmatmul.mubr.f32.gmra.mxu1 %v6260_v22  ;;  %v5626_v16 = vpop.f32.mrf.mxu1  ;;  %v6269_v45 = vld [vmem:[#allocation15_spill] sm:$0xff] }
 0x115   : > { %4345 = vmatprep.mubr.f32.mxu0 %v5222_v2  ;;  %4386 = vmatprep.subr.mxu1 %v2567_v10  ;;  %v2871_v2 = vld [vmem:[%s6216_s1 + $0x438] sm:$0xff]  ;;  %v2561_v22 = vld [vmem:[%s6216_s1 + $0x390] sm:$0xff] }
 0x116   : > { %4346 = vmatmul.mubr.f32.gmra.mxu0 %v5225_v15  ;;  %4387 = vmatpush3.msra.mxu1 %v2567_v10  ;;  %v5633_v54 = vpop.f32.mrf.mxu0  ;;  %v5635_v56 = vpop.f32.mrf.mxu1  ;;  %v6270_v10 = vld [vmem:[#allocation16_spill] sm:$0xff] }
 0x117   : > { %4466 = vmatprep.subr.mxu0 %v2872_v39  ;;  %4268 = vmatprep.mubr.f32.mxu1 %v6261_v1  ;;  %v6272_v1 = vld [vmem:[#allocation18_spill] sm:$0xff] }
 0x118   : > { %4467 = vmatpush3.msra.mxu0 %v2872_v39  ;;  %4269 = vmatmul.mubr.f32.gmra.mxu1 %v6262_v26  ;;  %v5642_v15 = vpop.f32.mrf.mxu0 }
 0x119   : > { %4348 = vmatprep.mubr.f32.mxu0 %v5240_v7  ;;  %4388 = vmatprep.subr.mxu1 %v2566_v9  ;;  %v2870_v7 = vld [vmem:[%s6216_s1 + $0x430] sm:$0xff] }
 0x11a   : > { %4349 = vmatmul.mubr.f32.gmra.mxu0 %v5243_v34  ;;  %4389 = vmatpush3.msra.mxu1 %v2566_v9  ;;  %v5649_v51 = vpop.f32.mrf.mxu1  ;;  %v6271_v9 = vld [vmem:[#allocation17_spill] sm:$0xff] }
 0x11b   : > { %4468 = vmatprep.subr.mxu0 %v2871_v2  ;;  %4271 = vmatprep.mubr.f32.mxu1 %v6263_v29  ;;  %v5736_v29 = vld [vmem:[#allocation2 + $0x182] sm:$0xff] }
 0x11c   : > { %4469 = vmatpush3.msra.mxu0 %v2871_v2  ;;  %4272 = vmatmul.mubr.f32.gmra.mxu1 %v6264_v6  ;;  %v5656_v57 = vpop.f32.mrf.mxu0  ;;  %v5658_v34 = vpop.f32.mrf.mxu1  ;;  %v5739_v6 = vld [vmem:[#allocation2 + $0x18a] sm:$0xff] }
 0x11d   : > { %4351 = vmatprep.mubr.f32.mxu0 %v5258_v33  ;;  %4390 = vmatprep.subr.mxu1 %v2565_v52  ;;  %v2869_v33 = vld [vmem:[%s6216_s1 + $0x428] sm:$0xff] }
 0x11e   : > { %4352 = vmatmul.mubr.f32.gmra.mxu0 %v5261_v48  ;;  %4391 = vmatpush3.msra.mxu1 %v2565_v52  ;;  %v5665_v4 = vpop.f32.mrf.mxu0  ;;  %v2563_v48 = vld [vmem:[%s6216_s1 + $0x3a0] sm:$0xff] }
 0x11f   : > { %4470 = vmatprep.subr.mxu0 %v2870_v7  ;;  %4274 = vmatprep.mubr.f32.mxu1 %v6265_v5 }
 0x120   : > { %4471 = vmatpush3.msra.mxu0 %v2870_v7  ;;  %4275 = vmatmul.mubr.f32.gmra.mxu1 %v6266_v20  ;;  %v5672_v24 = vpop.f32.mrf.mxu1  ;;  %v2252_v7 = vld [vmem:[#allocation2 + $0x198] sm:$0xff] }
 0x121   : > { %4354 = vmatprep.mubr.f32.mxu0 %v5276_v36  ;;  %4392 = vmatprep.subr.mxu1 %v2564_v63  ;;  %v2868_v36 = vld [vmem:[%s6216_s1 + $0x420] sm:$0xff]  ;;  %v2527_v20 = vld [vmem:[#allocation2 + $0x31] sm:$0xff] }
 0x122   : > { %4355 = vmatmul.mubr.f32.gmra.mxu0 %v5279_v11  ;;  %4393 = vmatpush3.msra.mxu1 %v2564_v63  ;;  %v5679_v30 = vpop.f32.mrf.mxu0  ;;  %v5681_v35 = vpop.f32.mrf.mxu1  ;;  %v2253_v63 = vld [vmem:[#allocation2 + $0x1a0] sm:$0xff] }
 0x123   : > { %4472 = vmatprep.subr.mxu0 %v2869_v33  ;;  %4277 = vmatprep.mubr.f32.mxu1 %v6267_v53  ;;  %v2832_v53 = vld [vmem:[#allocation2 + $0x32] sm:$0xff] }
 0x124   : > { %4473 = vmatpush3.msra.mxu0 %v2869_v33  ;;  %4278 = vmatmul.mubr.f32.gmra.mxu1 %v6268_v3  ;;  %v5688_v11 = vpop.f32.mrf.mxu0  ;;  %v2528_v33 = vld [vmem:[#allocation2 + $0x39] sm:$0xff]  ;;  %v2529_v3 = vld [vmem:[#allocation2 + $0x49] sm:$0xff] }
 0x125   : > { %4357 = vmatprep.mubr.f32.mxu0 %v5294_v60  ;;  %4394 = vmatprep.subr.mxu1 %v2563_v48  ;;  %v2867_v60 = vld [vmem:[%s6216_s1 + $0x418] sm:$0xff] }
 0x126   : > { %4358 = vmatmul.mubr.f32.gmra.mxu0 %v5297_v41  ;;  %4395 = vmatpush3.msra.mxu1 %v2563_v48  ;;  %v5695_v28 = vpop.f32.mrf.mxu1 }
 0x127   : > { %4474 = vmatprep.subr.mxu0 %v2868_v36  ;;  %4280 = vmatprep.mubr.f32.mxu1 %v6269_v45  ;;  %v2834_v45 = vld [vmem:[#allocation2 + $0x4a] sm:$0xff] }
 0x128   : > { %4475 = vmatpush3.msra.mxu0 %v2868_v36  ;;  %4281 = vmatmul.mubr.f32.gmra.mxu1 %v6270_v10  ;;  %v5702_v21 = vpop.f32.mrf.mxu0  ;;  %v5704_v41 = vpop.f32.mrf.mxu1  ;;  %v2833_v36 = vld [vmem:[#allocation2 + $0x3a] sm:$0xff] }
 0x129   : > { %4360 = vmatprep.mubr.f32.mxu0 %v5312_v46  ;;  %4396 = vmatprep.subr.mxu1 %v2562_v19  ;;  %v2866_v46 = vld [vmem:[%s6216_s1 + $0x410] sm:$0xff] }
 0x12a   : > { %4361 = vmatmul.mubr.f32.gmra.mxu0 %v5315_v27  ;;  %4397 = vmatpush3.msra.mxu1 %v2562_v19  ;;  %v5711_v39 = vpop.f32.mrf.mxu0  ;;  %v2560_v27 = vld [vmem:[%s6216_s1 + $0x388] sm:$0xff] }
 0x12b   : > { %4476 = vmatprep.subr.mxu0 %v2867_v60  ;;  %4283 = vmatprep.mubr.f32.mxu1 %v6271_v9 }
 0x12c   : > { %4477 = vmatpush3.msra.mxu0 %v2867_v60  ;;  %4284 = vmatmul.mubr.f32.gmra.mxu1 %v6272_v1  ;;  %v5718_v26 = vpop.f32.mrf.mxu1  ;;  %v2530_v60 = vld [vmem:[#allocation2 + $0x51] sm:$0xff]  ;;  %v2531_v1 = vld [vmem:[#allocation2 + $0x61] sm:$0xff] }
 0x12d   : > { %4363 = vmatprep.mubr.f32.mxu0 %v5330_v25  ;;  %4398 = vmatprep.subr.mxu1 %v2561_v22  ;;  %v2865_v25 = vld [vmem:[%s6216_s1 + $0x408] sm:$0xff] }
 0x12e   : > { %4364 = vmatmul.mubr.f32.gmra.mxu0 %v5333_v38  ;;  %4399 = vmatpush3.msra.mxu1 %v2561_v22  ;;  %v5725_v2 = vpop.f32.mrf.mxu0  ;;  %v5727_v52 = vpop.f32.mrf.mxu1 }
 0x12f   : > { %4478 = vmatprep.subr.mxu0 %v2866_v46  ;;  %4286 = vmatprep.mubr.f32.mxu1 %v5336_v32 }
 0x130   : > { %4479 = vmatpush3.msra.mxu0 %v2866_v46  ;;  %4287 = vmatmul.mubr.f32.gmra.mxu1 %v5342_v23  ;;  %v5734_v38 = vpop.f32.mrf.mxu0  ;;  %v2559_v23 = vld [vmem:[%s6216_s1 + $0x380] sm:$0xff] }
 0x131   : > { %4366 = vmatprep.mubr.f32.mxu0 %v5516_v0  ;;  %4400 = vmatprep.subr.mxu1 %v2560_v27 }
 0x132   : > { %4367 = vmatmul.mubr.f32.gmra.mxu0 %v5518_v43  ;;  %4401 = vmatpush3.msra.mxu1 %v2560_v27  ;;  %v5742_v32 = vpop.f32.mrf.mxu1  ;;  %v2864_v43 = vld [vmem:[%s6216_s1 + $0x400] sm:$0xff] }
 0x133   : > { %4480 = vmatprep.subr.mxu0 %v2865_v25  ;;  %4289 = vmatprep.mubr.f32.mxu1 %v5736_v29 }
 0x134   : > { %4481 = vmatpush3.msra.mxu0 %v2865_v25  ;;  %4290 = vmatmul.mubr.f32.gmra.mxu1 %v5739_v6  ;;  %v5749_v0 = vpop.f32.mrf.mxu0  ;;  %v5751_v5 = vpop.f32.mrf.mxu1  ;;  %v2835_v25 = vld [vmem:[#allocation2 + $0x52] sm:$0xff] }
 0x135   : > { %4369 = vmatprep.mubr.f32.mxu0 %v2252_v7  ;;  %4402 = vmatprep.subr.mxu1 %v2559_v23 }
 0x136   : > { %4370 = vmatmul.mubr.f32.gmra.mxu0 %v2253_v63  ;;  %4403 = vmatpush3.msra.mxu1 %v2559_v23  ;;  %v5756_v48 = vpop.f32.mrf.mxu0  ;;  %v2836_v63 = vld [vmem:[#allocation2 + $0x62] sm:$0xff] }
 0x137   : > { %4482 = vmatprep.subr.mxu0 %v2864_v43  ;;  %4404 = vmatprep.mubr.f32.mxu1 %v2527_v20  ;;  %v2532_v20 = vld [vmem:[#allocation2 + $0x69] sm:$0xff] }
 0x138   : > { %4483 = vmatpush3.msra.mxu0 %v2864_v43  ;;  %v3926_v19 = vpop.f32.mrf.mxu1  ;;  %4405 = vmatmul.mubr.f32.vlgmr.msra.gmra.mxu1 %v2528_v33 }
 0x139   : > { %v848_v10 = vadd.f32 %v3926_v19, %v5587_v42  ;;  %4484 = vmatprep.mubr.f32.mxu0 %v2832_v53  ;;  %4407 = vmatprep.mubr.f32.mxu1 %v2529_v3  ;;  %v2533_v3 = vld [vmem:[#allocation2 + $0x79] sm:$0xff]  ;;  %v2837_v19 = vld [vmem:[#allocation2 + $0x6a] sm:$0xff] }
 0x13a   : > { %v4006_v22 = vpop.f32.mrf.mxu0  ;;  %4485 = vmatmul.mubr.f32.vlgmr.msra.gmra.mxu0 %v2833_v36  ;;  %v842_v9 = vpop.f32.mrf.mxu1 }
 0x13b   : > { %v5759_v46 = vadd.f32 %v4006_v22, %v848_v10  ;;  %v843_v27 = vadd.f32 %v842_v9, %v5596_v59  ;;  %4487 = vmatprep.mubr.f32.mxu0 %v2834_v45  ;;  %v2534_v9 = vld [vmem:[#allocation2 + $0x81] sm:$0xff] }
 0x13c   : > { %v1115_v7 = vpop.f32.mrf.mxu0  ;;  %v3929_v23 = vpop.f32.mrf.mxu1  ;;  %4408 = vmatmul.mubr.f32.gmra.mxu1 %v2530_v60  ;;  %v2838_v60 = vld [vmem:[#allocation2 + $0x7a] sm:$0xff] }
 0x13d   : > { %v5762_v43 = vadd.f32 %v1115_v7, %v843_v27  ;;  %v858_v42 = vadd.f32 %v3929_v23, %v5610_v55  ;;  %4410 = vmatprep.mubr.f32.mxu1 %v2531_v1  ;;  %v2839_v23 = vld [vmem:[#allocation2 + $0x82] sm:$0xff] }
 0x13e   : > { %v4009_v33 = vpop.f32.mrf.mxu0  ;;  %4488 = vmatmul.mubr.f32.gmra.mxu0 %v2835_v25  ;;  %v852_v53 = vpop.f32.mrf.mxu1  ;;  %v2535_v25 = vld [vmem:[#allocation2 + $0x91] sm:$0xff] }
 0x13f   : > { %v5765_v36 = vadd.f32 %v4009_v33, %v858_v42  ;;  %v853_v59 = vadd.f32 %v852_v53, %v5619_v12  ;;  %4490 = vmatprep.mubr.f32.mxu0 %v2836_v63  ;;  %v2536_v53 = vld [vmem:[#allocation2 + $0x99] sm:$0xff] }
 0x140   : > { %v1125_v45 = vpop.f32.mrf.mxu0  ;;  %v3932_v10 = vpop.f32.mrf.mxu1  ;;  %4411 = vmatmul.mubr.f32.gmra.mxu1 %v2532_v20  ;;  %v2840_v20 = vld [vmem:[#allocation2 + $0x92] sm:$0xff] }
 0x141   : > { %v5768_v22 = vadd.f32 %v1125_v45, %v853_v59  ;;  %v868_v55 = vadd.f32 %v3932_v10, %v5633_v54  ;;  %4413 = vmatprep.mubr.f32.mxu1 %v2533_v3  ;;  %v2841_v10 = vld [vmem:[#allocation2 + $0x9a] sm:$0xff] }
 0x142   : > { %v4012_v1 = vpop.f32.mrf.mxu0  ;;  %4491 = vmatmul.mubr.f32.gmra.mxu0 %v2837_v19  ;;  %v862_v27 = vpop.f32.mrf.mxu1  ;;  %v2537_v19 = vld [vmem:[#allocation2 + $0xa9] sm:$0xff] }
 0x143   : > { %v5771_v7 = vadd.f32 %v4012_v1, %v868_v55  ;;  %v863_v12 = vadd.f32 %v862_v27, %v5642_v15  ;;  %4493 = vmatprep.mubr.f32.mxu0 %v2838_v60  ;;  %v2538_v27 = vld [vmem:[#allocation2 + $0xb1] sm:$0xff] }
 0x144   : > { %v1135_v63 = vpop.f32.mrf.mxu0  ;;  %v3935_v42 = vpop.f32.mrf.mxu1  ;;  %4414 = vmatmul.mubr.f32.gmra.mxu1 %v2534_v9  ;;  %v2842_v9 = vld [vmem:[#allocation2 + $0xaa] sm:$0xff] }
 0x145   : > { %v5774_v33 = vadd.f32 %v1135_v63, %v863_v12  ;;  %v878_v54 = vadd.f32 %v3935_v42, %v5656_v57  ;;  %4416 = vmatprep.mubr.f32.mxu1 %v2535_v25 }
 0x146   : > { %v4015_v3 = vpop.f32.mrf.mxu0  ;;  %4494 = vmatmul.mubr.f32.gmra.mxu0 %v2839_v23  ;;  %v872_v59 = vpop.f32.mrf.mxu1 }
 0x147   : > { %v5777_v45 = vadd.f32 %v4015_v3, %v878_v54  ;;  %v873_v15 = vadd.f32 %v872_v59, %v5665_v4  ;;  %4496 = vmatprep.mubr.f32.mxu0 %v2840_v20  ;;  %v2843_v4 = vld [vmem:[#allocation2 + $0xb2] sm:$0xff]  ;;  %v2844_v54 = vld [vmem:[#allocation2 + $0xc2] sm:$0xff] }
 0x148   : > { %v1145_v60 = vpop.f32.mrf.mxu0  ;;  %v3938_v55 = vpop.f32.mrf.mxu1  ;;  %4417 = vmatmul.mubr.f32.gmra.mxu1 %v2536_v53 }
 0x149   : > { %v5780_v1 = vadd.f32 %v1145_v60, %v873_v15  ;;  %v888_v57 = vadd.f32 %v3938_v55, %v5679_v30  ;;  %4419 = vmatprep.mubr.f32.mxu1 %v2537_v19  ;;  %v2846_v55 = vld [vmem:[#allocation2 + $0xda] sm:$0xff] }
 0x14a   : > { %v4018_v25 = vpop.f32.mrf.mxu0  ;;  %4497 = vmatmul.mubr.f32.gmra.mxu0 %v2841_v10  ;;  %v882_v12 = vpop.f32.mrf.mxu1 }
 0x14b   : > { %v5783_v23 = vadd.f32 %v4018_v25, %v888_v57  ;;  %v883_v63 = vadd.f32 %v882_v12, %v5688_v11  ;;  %4499 = vmatprep.mubr.f32.mxu0 %v2842_v9  ;;  %v2845_v11 = vld [vmem:[#allocation2 + $0xca] sm:$0xff]  ;;  %v2847_v25 = vld [vmem:[#allocation2 + $0xe2] sm:$0xff] }
 0x14c   : > { %v1155_v42 = vpop.f32.mrf.mxu0  ;;  %v3941_v20 = vpop.f32.mrf.mxu1  ;;  %4420 = vmatmul.mubr.f32.gmra.mxu1 %v2538_v27 }
 0x14d   : > { %v5786_v53 = vadd.f32 %v1155_v42, %v883_v63  ;;  %v898_v3 = vadd.f32 %v3941_v20, %v5702_v21  ;;  %4422 = vmatprep.mubr.f32.mxu1 %v5419_v37 }
 0x14e   : > { %v4021_v30 = vpop.f32.mrf.mxu0  ;;  %4500 = vmatmul.mubr.f32.gmra.mxu0 %v2843_v4  ;;  %v892_v59 = vpop.f32.mrf.mxu1 }
 0x14f   : > { %v5790_v19 = vadd.f32 %v4021_v30, %v898_v3  ;;  %v893_v15 = vadd.f32 %v892_v59, %v5711_v39  ;;  %4502 = vmatprep.mubr.f32.mxu0 %v2844_v54  ;;  %v2849_v54 = vld [vmem:[#allocation2 + $0xfa] sm:$0xff] }
 0x150   : > { %v1165_v10 = vpop.f32.mrf.mxu0  ;;  %v3944_v60 = vpop.f32.mrf.mxu1  ;;  %4423 = vmatmul.mubr.f32.gmra.mxu1 %v5425_v40  ;;  %v2848_v40 = vld [vmem:[#allocation2 + $0xf2] sm:$0xff] }
 0x151   : > { %v5794_v9 = vadd.f32 %v1165_v10, %v893_v15  ;;  %v908_v21 = vadd.f32 %v3944_v60, %v5725_v2  ;;  %4425 = vmatprep.mubr.f32.mxu1 %v5433_v13  ;;  %v2851_v10 = vld [vmem:[#allocation2 + $0x112] sm:$0xff] }
 0x152   : > { %v4024_v37 = vpop.f32.mrf.mxu0  ;;  %4503 = vmatmul.mubr.f32.gmra.mxu0 %v2845_v11  ;;  %v902_v57 = vpop.f32.mrf.mxu1 }
 0x153   : > { %v5798_v27 = vadd.f32 %v4024_v37, %v908_v21  ;;  %v903_v39 = vadd.f32 %v902_v57, %v5734_v38  ;;  %4505 = vmatprep.mubr.f32.mxu0 %v2846_v55 }
 0x154   : > { %v1175_v12 = vpop.f32.mrf.mxu0  ;;  %v3947_v63 = vpop.f32.mrf.mxu1  ;;  %4426 = vmatmul.mubr.f32.gmra.mxu1 %v5439_v62  ;;  %v2850_v62 = vld [vmem:[#allocation2 + $0x10a] sm:$0xff] }
 0x155   : > { %v5802_v4 = vadd.f32 %v1175_v12, %v903_v39  ;;  %v918_v2 = vadd.f32 %v3947_v63, %v5749_v0  ;;  %4428 = vmatprep.mubr.f32.mxu1 %v5447_v14  ;;  %v2853_v39 = vld [vmem:[#allocation2 + $0x12a] sm:$0xff] }
 0x156   : > { %v4027_v13 = vpop.f32.mrf.mxu0  ;;  %4506 = vmatmul.mubr.f32.gmra.mxu0 %v2847_v25  ;;  %v912_v42 = vpop.f32.mrf.mxu1 }
 0x157   : > { %v5806_v20 = vadd.f32 %v4027_v13, %v918_v2  ;;  %v913_v38 = vadd.f32 %v912_v42, %v5756_v48  ;;  %4508 = vmatprep.mubr.f32.mxu0 %v2848_v40  ;;  %v2551_v13 = vld [vmem:[#allocation2 + $0x151] sm:$0xff] }
 0x158   : > { %v1185_v3 = vpop.f32.mrf.mxu0  ;;  %v3950_v30 = vpop.f32.mrf.mxu1  ;;  %4429 = vmatmul.mubr.f32.gmra.mxu1 %v5453_v47  ;;  %v2852_v47 = vld [vmem:[#allocation2 + $0x122] sm:$0xff] }
 0x159   : > { %v5810_v59 = vadd.f32 %v1185_v3, %v913_v38  ;;  %v928_v0 = vadd.f32 %v3950_v30, %v5581_v31  ;;  %4431 = vmatprep.mubr.f32.mxu1 %v5461_v58  ;;  %v2855_v38 = vld [vmem:[#allocation2 + $0x142] sm:$0xff]  ;;  %v2856_v3 = vld [vmem:[#allocation2 + $0x152] sm:$0xff] }
 0x15a   : > { %v4030_v14 = vpop.f32.mrf.mxu0  ;;  %4509 = vmatmul.mubr.f32.gmra.mxu0 %v2849_v54  ;;  %v922_v15 = vpop.f32.mrf.mxu1 }
 0x15b   : > { %v5814_v11 = vadd.f32 %v4030_v14, %v928_v0  ;;  %v923_v48 = vadd.f32 %v922_v15, %v5590_v49  ;;  %4511 = vmatprep.mubr.f32.mxu0 %v2850_v62  ;;  %v2553_v14 = vld [vmem:[#allocation2 + $0x169] sm:$0xff] }
 0x15c   : > { %v1195_v60 = vpop.f32.mrf.mxu0  ;;  %v3953_v55 = vpop.f32.mrf.mxu1  ;;  %4432 = vmatmul.mubr.f32.gmra.mxu1 %v5467_v17  ;;  %v2854_v17 = vld [vmem:[#allocation2 + $0x13a] sm:$0xff] }
 0x15d   : > { %v5818_v21 = vadd.f32 %v1195_v60, %v923_v48  ;;  %v938_v31 = vadd.f32 %v3953_v55, %v5603_v18  ;;  %4434 = vmatprep.mubr.f32.mxu1 %v5475_v44  ;;  %v2550_v44 = vld [vmem:[#allocation2 + $0x141] sm:$0xff]  ;;  %v2858_v55 = vld [vmem:[#allocation2 + $0x16a] sm:$0xff] }
 0x15e   : > { %v4033_v58 = vpop.f32.mrf.mxu0  ;;  %4512 = vmatmul.mubr.f32.gmra.mxu0 %v2851_v10  ;;  %v932_v37 = vpop.f32.mrf.mxu1  ;;  %v2857_v48 = vld [vmem:[#allocation2 + $0x15a] sm:$0xff] }
 0x15f   : > { %v5822_v57 = vadd.f32 %v4033_v58, %v938_v31  ;;  %v933_v49 = vadd.f32 %v932_v37, %v5612_v61  ;;  %4514 = vmatprep.mubr.f32.mxu0 %v2852_v47  ;;  %v2554_v31 = vld [vmem:[#allocation2 + $0x171] sm:$0xff] }
 0x160   : > { %v1205_v25 = vpop.f32.mrf.mxu0  ;;  %v3956_v12 = vpop.f32.mrf.mxu1  ;;  %4435 = vmatmul.mubr.f32.gmra.mxu1 %v5481_v8 }
 0x161   : > { %v5826_v63 = vadd.f32 %v1205_v25, %v933_v49  ;;  %v948_v18 = vadd.f32 %v3956_v12, %v5626_v16  ;;  %4437 = vmatprep.mubr.f32.mxu1 %v5489_v50  ;;  %v2552_v50 = vld [vmem:[#allocation2 + $0x159] sm:$0xff] }
 0x162   : > { %v4036_v40 = vpop.f32.mrf.mxu0  ;;  %4515 = vmatmul.mubr.f32.gmra.mxu0 %v2853_v39  ;;  %v942_v2 = vpop.f32.mrf.mxu1 }
 0x163   : > { %v5830_v42 = vadd.f32 %v4036_v40, %v948_v18  ;;  %v943_v61 = vadd.f32 %v942_v2, %v5635_v56  ;;  %4517 = vmatprep.mubr.f32.mxu0 %v2854_v17  ;;  %v2557_v2 = vld [vmem:[#allocation2 + $0x199] sm:$0xff] }
 0x164   : > { %v1215_v54 = vpop.f32.mrf.mxu0  ;;  %v3959_v8 = vpop.f32.mrf.mxu1  ;;  %4438 = vmatmul.mubr.f32.gmra.mxu1 %v2550_v44  ;;  %v4579_v44 = vld [vmem:[#allocation2 + $0x181] sm:$0xff] }
 0x165   : > { %v5833_v30 = vadd.f32 %v1215_v54, %v943_v61  ;;  %v958_v16 = vadd.f32 %v3959_v8, %v5649_v51  ;;  %4440 = vmatprep.mubr.f32.mxu1 %v2551_v13  ;;  %v4580_v54 = vld [vmem:[#allocation2 + $0x189] sm:$0xff]  ;;  %v2862_v8 = vld [vmem:[#allocation2 + $0x19a] sm:$0xff] }
 0x166   : > { %v4039_v62 = vpop.f32.mrf.mxu0  ;;  %4518 = vmatmul.mubr.f32.gmra.mxu0 %v2855_v38  ;;  %v952_v0 = vpop.f32.mrf.mxu1 }
 0x167   : > { %v5836_v15 = vadd.f32 %v4039_v62, %v958_v16  ;;  %v953_v56 = vadd.f32 %v952_v0, %v5658_v34  ;;  %4520 = vmatprep.mubr.f32.mxu0 %v2856_v3  ;;  %v2859_v34 = vld [vmem:[#allocation2 + $0x172] sm:$0xff]  ;;  %v2558_v16 = vld [vmem:[#allocation2 + $0x1a1] sm:$0xff] }
 0x168   : > { %v1225_v10 = vpop.f32.mrf.mxu0  ;;  %v3962_v60 = vpop.f32.mrf.mxu1  ;;  %4441 = vmatmul.mubr.f32.gmra.mxu1 %v2552_v50 }
 0x169   : > { %v5839_v47 = vadd.f32 %v1225_v10, %v953_v56  ;;  %v968_v51 = vadd.f32 %v3962_v60, %v5672_v24  ;;  %4443 = vmatprep.mubr.f32.mxu1 %v2553_v14 }
 0x16a   : > { %v4042_v58 = vpop.f32.mrf.mxu0  ;;  %4521 = vmatmul.mubr.f32.gmra.mxu0 %v2857_v48  ;;  %v962_v37 = vpop.f32.mrf.mxu1 }
 0x16b   : > { %v5842_v49 = vadd.f32 %v4042_v58, %v968_v51  ;;  %v963_v39 = vadd.f32 %v962_v37, %v5681_v35  ;;  %4523 = vmatprep.mubr.f32.mxu0 %v2858_v55 }
 0x16c   : > { %v1235_v25 = vpop.f32.mrf.mxu0  ;;  %v3965_v12 = vpop.f32.mrf.mxu1  ;;  %4444 = vmatmul.mubr.f32.gmra.mxu1 %v2554_v31 }
 0x16d   : > { %v5845_v17 = vadd.f32 %v1235_v25, %v963_v39  ;;  %v978_v18 = vadd.f32 %v3965_v12, %v5695_v28  ;;  %4446 = vmatprep.mubr.f32.mxu1 %v4579_v44 }
 0x16e   : > { %v4045_v24 = vpop.f32.mrf.mxu0  ;;  %4524 = vmatmul.mubr.f32.gmra.mxu0 %v2859_v34  ;;  %v972_v40 = vpop.f32.mrf.mxu1 }
 0x16f   : > { %v5848_v13 = vadd.f32 %v4045_v24, %v978_v18  ;;  %v973_v61 = vadd.f32 %v972_v40, %v5704_v41  ;;  %4526 = vmatprep.mubr.f32.mxu0 %v5736_v29  ;;  %v2863_v29 = vld [vmem:[#allocation2 + $0x1a2] sm:$0xff] }
 0x170   : > { %v1245_v35 = vpop.f32.mrf.mxu0  ;;  %v3968_v38 = vpop.f32.mrf.mxu1  ;;  %4447 = vmatmul.mubr.f32.gmra.mxu1 %v4580_v54 }
 0x171   : > { %v5852_v3 = vadd.f32 %v1245_v35, %v973_v61  ;;  %v988_v28 = vadd.f32 %v3968_v38, %v5718_v26  ;;  %4449 = vmatprep.mubr.f32.mxu1 %v2557_v2 }
 0x172   : > { %v4048_v50 = vpop.f32.mrf.mxu0  ;;  %4527 = vmatmul.mubr.f32.gmra.mxu0 %v5739_v6  ;;  %v982_v62 = vpop.f32.mrf.mxu1 }
 0x173   : > { %v5856_v0 = vadd.f32 %v4048_v50, %v988_v28  ;;  %v983_v41 = vadd.f32 %v982_v62, %v5727_v52  ;;  %4529 = vmatprep.mubr.f32.mxu0 %v2862_v8 }
 0x174   : > { %v1255_v14 = vpop.f32.mrf.mxu0  ;;  %v3971_v56 = vpop.f32.mrf.mxu1  ;;  %4450 = vmatmul.mubr.f32.gmra.mxu1 %v2558_v16 }
 0x175   : > { %v5859_v48 = vadd.f32 %v1255_v14, %v983_v41  ;;  %v998_v10 = vadd.f32 %v3971_v56, %v5742_v32 }
 0x176   : > { %v4051_v26 = vpop.f32.mrf.mxu0  ;;  %4530 = vmatmul.mubr.f32.gmra.mxu0 %v2863_v29  ;;  %v992_v60 = vpop.f32.mrf.mxu1 }
 0x177   : > { %v5862_v55 = vadd.f32 %v4051_v26, %v998_v10  ;;  %v993_v6 = vadd.f32 %v992_v60, %v5751_v5 }
 0x178   : > { %v1265_v51 = vpop.f32.mrf.mxu0  ;;  %v4086_v31 = vpop.f32.mrf.mxu1 }
 0x179   : > { %v5865_v58 = vadd.f32 %v1265_v51, %v993_v6  ;;  %v1580_v52 = vadd.f32 %v4086_v31, %v5759_v46 }
 0x17a   : > { %v4166_v37 = vpop.f32.mrf.mxu0  ;;  %v1420_v39 = vpop.f32.mrf.mxu1 }
 0x17b   : > { %v5868_v34 = vadd.f32 %v4166_v37, %v1580_v52  ;;  %v1579_v25 = vadd.f32 %v1420_v39, %v5762_v43 }
 0x17c   : > { %v1725_v32 = vpop.f32.mrf.mxu0  ;;  %v4089_v12 = vpop.f32.mrf.mxu1 }
 0x17d   : > { %v5871_v18 = vadd.f32 %v1725_v32, %v1579_v25  ;;  %v1582_v44 = vadd.f32 %v4089_v12, %v5765_v36 }
 0x17e   : > { %v4169_v24 = vpop.f32.mrf.mxu0  ;;  %v1430_v5 = vpop.f32.mrf.mxu1 }
 0x17f   : > { %v5874_v40 = vadd.f32 %v4169_v24, %v1582_v44  ;;  %v1581_v2 = vadd.f32 %v1430_v5, %v5768_v22 }
 0x180   : > { %v1735_v61 = vpop.f32.mrf.mxu0  ;;  %v4092_v46 = vpop.f32.mrf.mxu1 }
 0x181   : > { %v5877_v35 = vadd.f32 %v1735_v61, %v1581_v2  ;;  %v1584_v38 = vadd.f32 %v4092_v46, %v5771_v7 }
 0x182   : > { %v4172_v54 = vpop.f32.mrf.mxu0  ;;  %v1440_v43 = vpop.f32.mrf.mxu1 }
 0x183   : > { %v5880_v8 = vadd.f32 %v4172_v54, %v1584_v38  ;;  %v1583_v28 = vadd.f32 %v1440_v43, %v5774_v33 }
 0x184   : > { %v1745_v16 = vpop.f32.mrf.mxu0  ;;  %v4095_v36 = vpop.f32.mrf.mxu1 }
 0x185   : > { %v5883_v50 = vadd.f32 %v1745_v16, %v1583_v28  ;;  %v1586_v62 = vadd.f32 %v4095_v36, %v5777_v45 }
 0x186   : > { %v4175_v41 = vpop.f32.mrf.mxu0  ;;  %v1450_v22 = vpop.f32.mrf.mxu1 }
 0x187   : > { %v5886_v29 = vadd.f32 %v4175_v41, %v1586_v62  ;;  %v1585_v14 = vadd.f32 %v1450_v22, %v5780_v1 }
 0x188   : > { %v1755_v56 = vpop.f32.mrf.mxu0  ;;  %v4098_v7 = vpop.f32.mrf.mxu1 }
 0x189   : > { %v5889_v10 = vadd.f32 %v1755_v56, %v1585_v14  ;;  %v1588_v26 = vadd.f32 %v4098_v7, %v5783_v23 }
 0x18a   : > { %v4178_v60 = vpop.f32.mrf.mxu0  ;;  %v1460_v33 = vpop.f32.mrf.mxu1 }
 0x18b   : > { %v5892_v6 = vadd.f32 %v4178_v60, %v1588_v26  ;;  %v1587_v51 = vadd.f32 %v1460_v33, %v5786_v53 }
 0x18c   : > { %v1765_v31 = vpop.f32.mrf.mxu0  ;;  %v4101_v45 = vpop.f32.mrf.mxu1 }
 0x18d   : > { %v5895_v52 = vadd.f32 %v1765_v31, %v1587_v51  ;;  %v1590_v37 = vadd.f32 %v4101_v45, %v5790_v19 }
 0x18e   : > { %v4181_v39 = vpop.f32.mrf.mxu0  ;;  %v1470_v1 = vpop.f32.mrf.mxu1 }
 0x18f   : > { %v5898_v25 = vadd.f32 %v4181_v39, %v1590_v37  ;;  %v1589_v32 = vadd.f32 %v1470_v1, %v5794_v9 }
 0x190   : > { %v1775_v12 = vpop.f32.mrf.mxu0  ;;  %v4104_v23 = vpop.f32.mrf.mxu1 }
 0x191   : > { %v5901_v44 = vadd.f32 %v1775_v12, %v1589_v32  ;;  %v1592_v24 = vadd.f32 %v4104_v23, %v5798_v27 }
 0x192   : > { %v4184_v5 = vpop.f32.mrf.mxu0  ;;  %v1480_v53 = vpop.f32.mrf.mxu1 }
 0x193   : > { %v5904_v2 = vadd.f32 %v4184_v5, %v1592_v24  ;;  %v1591_v61 = vadd.f32 %v1480_v53, %v5802_v4 }
 0x194   : > { %v1785_v46 = vpop.f32.mrf.mxu0  ;;  %v4107_v19 = vpop.f32.mrf.mxu1 }
 0x195   : > { %v5907_v38 = vadd.f32 %v1785_v46, %v1591_v61  ;;  %v1594_v54 = vadd.f32 %v4107_v19, %v5806_v20 }
 0x196   : > { %v4187_v43 = vpop.f32.mrf.mxu0  ;;  %v1490_v9 = vpop.f32.mrf.mxu1 }
 0x197   : > { %v5910_v28 = vadd.f32 %v4187_v43, %v1594_v54  ;;  %v1593_v16 = vadd.f32 %v1490_v9, %v5810_v59 }
 0x198   : > { %v1795_v36 = vpop.f32.mrf.mxu0  ;;  %v4110_v27 = vpop.f32.mrf.mxu1 }
 0x199   : > { %v5913_v62 = vadd.f32 %v1795_v36, %v1593_v16  ;;  %v1596_v41 = vadd.f32 %v4110_v27, %v5814_v11 }
 0x19a   : > { %v4190_v22 = vpop.f32.mrf.mxu0  ;;  %v1500_v4 = vpop.f32.mrf.mxu1 }
 0x19b   : > { %v5916_v14 = vadd.f32 %v4190_v22, %v1596_v41  ;;  %v1595_v56 = vadd.f32 %v1500_v4, %v5818_v21 }
 0x19c   : > { %v1805_v7 = vpop.f32.mrf.mxu0  ;;  %v4113_v20 = vpop.f32.mrf.mxu1 }
 0x19d   : > { %v5919_v26 = vadd.f32 %v1805_v7, %v1595_v56  ;;  %v1598_v60 = vadd.f32 %v4113_v20, %v5822_v57 }
 0x19e   : > { %v4193_v33 = vpop.f32.mrf.mxu0  ;;  %v1510_v59 = vpop.f32.mrf.mxu1 }
 0x19f   : > { %v5922_v51 = vadd.f32 %v4193_v33, %v1598_v60  ;;  %v1597_v31 = vadd.f32 %v1510_v59, %v5826_v63 }
 0x1a0   : > { %v1815_v45 = vpop.f32.mrf.mxu0  ;;  %v4116_v11 = vpop.f32.mrf.mxu1 }
 0x1a1   : > { %6273 = vst [vmem:[#allocation3_spill] sm:$0xff] %v5922_v51  ;;  %v5925_v37 = vadd.f32 %v1815_v45, %v1597_v31  ;;  %v1600_v39 = vadd.f32 %v4116_v11, %v5830_v42 }
 0x1a2   : > { %v4196_v1 = vpop.f32.mrf.mxu0  ;;  %v1520_v21 = vpop.f32.mrf.mxu1 }
 0x1a3   : > { %6274 = vst [vmem:[#allocation4_spill] sm:$0xff] %v5925_v37  ;;  %v5928_v32 = vadd.f32 %v4196_v1, %v1600_v39  ;;  %v1599_v12 = vadd.f32 %v1520_v21, %v5833_v30 }
 0x1a4   : > { %v1825_v23 = vpop.f32.mrf.mxu0  ;;  %v4119_v57 = vpop.f32.mrf.mxu1 }
 0x1a5   : > { %6275 = vst [vmem:[#allocation5_spill] sm:$0xff] %v5928_v32  ;;  %v5931_v24 = vadd.f32 %v1825_v23, %v1599_v12  ;;  %v1602_v5 = vadd.f32 %v4119_v57, %v5836_v15 }
 0x1a6   : > { %v4199_v53 = vpop.f32.mrf.mxu0  ;;  %v1530_v63 = vpop.f32.mrf.mxu1 }
 0x1a7   : > { %6276 = vst [vmem:[#allocation6_spill] sm:$0xff] %v5931_v24  ;;  %v5934_v61 = vadd.f32 %v4199_v53, %v1602_v5  ;;  %v1601_v46 = vadd.f32 %v1530_v63, %v5839_v47 }
 0x1a8   : > { %v1835_v19 = vpop.f32.mrf.mxu0  ;;  %v4122_v42 = vpop.f32.mrf.mxu1 }
 0x1a9   : > { %6277 = vst [vmem:[#allocation7_spill] sm:$0xff] %v5934_v61  ;;  %v5937_v54 = vadd.f32 %v1835_v19, %v1601_v46  ;;  %v1604_v43 = vadd.f32 %v4122_v42, %v5842_v49 }
 0x1aa   : > { %v4202_v9 = vpop.f32.mrf.mxu0  ;;  %v1540_v30 = vpop.f32.mrf.mxu1 }
 0x1ab   : > { %6278 = vst [vmem:[#allocation8_spill] sm:$0xff] %v5937_v54  ;;  %v5940_v16 = vadd.f32 %v4202_v9, %v1604_v43  ;;  %v1603_v36 = vadd.f32 %v1540_v30, %v5845_v17 }
 0x1ac   : > { %v1845_v27 = vpop.f32.mrf.mxu0  ;;  %v4125_v15 = vpop.f32.mrf.mxu1 }
 0x1ad   : > { %6279 = vst [vmem:[#allocation9_spill] sm:$0xff] %v5940_v16  ;;  %v5943_v41 = vadd.f32 %v1845_v27, %v1603_v36  ;;  %v1606_v22 = vadd.f32 %v4125_v15, %v5848_v13 }
 0x1ae   : > { %v4205_v4 = vpop.f32.mrf.mxu0  ;;  %v1550_v47 = vpop.f32.mrf.mxu1 }
 0x1af   : > { %6280 = vst [vmem:[#allocation10_spill] sm:$0xff] %v5943_v41  ;;  %v5946_v56 = vadd.f32 %v4205_v4, %v1606_v22  ;;  %v1605_v7 = vadd.f32 %v1550_v47, %v5852_v3 }
 0x1b0   : > { %v1855_v20 = vpop.f32.mrf.mxu0  ;;  %v4128_v49 = vpop.f32.mrf.mxu1 }
 0x1b1   : > { %6281 = vst [vmem:[#allocation11_spill] sm:$0xff] %v5946_v56  ;;  %v5949_v60 = vadd.f32 %v1855_v20, %v1605_v7  ;;  %v1608_v33 = vadd.f32 %v4128_v49, %v5856_v0 }
 0x1b2   : > { %v4208_v59 = vpop.f32.mrf.mxu0  ;;  %v1560_v17 = vpop.f32.mrf.mxu1 }
 0x1b3   : > { %6282 = vst [vmem:[#allocation12_spill] sm:$0xff] %v5949_v60  ;;  %v5952_v31 = vadd.f32 %v4208_v59, %v1608_v33  ;;  %v1607_v45 = vadd.f32 %v1560_v17, %v5859_v48 }
 0x1b4   : > { %v1865_v11 = vpop.f32.mrf.mxu0  ;;  %v4131_v13 = vpop.f32.mrf.mxu1 }
 0x1b5   : > { %6283 = vst [vmem:[#allocation13_spill] sm:$0xff] %v5952_v31  ;;  %v5955_v39 = vadd.f32 %v1865_v11, %v1607_v45  ;;  %v1610_v1 = vadd.f32 %v4131_v13, %v5862_v55 }
 0x1b6   : > { %v4211_v21 = vpop.f32.mrf.mxu0  ;;  %v1570_v3 = vpop.f32.mrf.mxu1 }
 0x1b7   : > { %6284 = vst [vmem:[#allocation14_spill] sm:$0xff] %v5955_v39  ;;  %v5958_v12 = vadd.f32 %v4211_v21, %v1610_v1  ;;  %v1609_v23 = vadd.f32 %v1570_v3, %v5865_v58 }
 0x1b8   : > { %v1875_v57 = vpop.f32.mrf.mxu0  ;;  %v4246_v0 = vpop.f32.mrf.mxu1 }
 0x1b9   : > { %6285 = vst [vmem:[#allocation15_spill] sm:$0xff] %v5958_v12  ;;  %v5961_v5 = vadd.f32 %v1875_v57, %v1609_v23 }
 0x1ba   : > { %v5963_v53 = vpop.f32.mrf.mxu0  ;;  %v2030_v63 = vpop.f32.mrf.mxu1 }
 0x1bb   : > { %6286 = vst [vmem:[#allocation16_spill] sm:$0xff] %v5961_v5 }
 0x1bc   : > { %v5965_v48 = vpop.f32.mrf.mxu0  ;;  %v4249_v46 = vpop.f32.mrf.mxu1 }
 0x1be   : > { %v5967_v19 = vpop.f32.mrf.mxu0  ;;  %v5969_v42 = vpop.f32.mrf.mxu1 }
 0x1c0   : > { %v5971_v55 = vpop.f32.mrf.mxu0  ;;  %v5973_v43 = vpop.f32.mrf.mxu1 }
 0x1c2   : > { %v5975_v9 = vpop.f32.mrf.mxu0  ;;  %v5977_v58 = vpop.f32.mrf.mxu1 }
 0x1c4   : > { %v5979_v30 = vpop.f32.mrf.mxu0  ;;  %v5981_v36 = vpop.f32.mrf.mxu1 }
 0x1c6   : > { %v5983_v27 = vpop.f32.mrf.mxu0  ;;  %v5985_v15 = vpop.f32.mrf.mxu1 }
 0x1c8   : > { %v5987_v22 = vpop.f32.mrf.mxu0  ;;  %v5989_v4 = vpop.f32.mrf.mxu1 }
 0x1ca   : > { %v5991_v47 = vpop.f32.mrf.mxu0  ;;  %v5993_v7 = vpop.f32.mrf.mxu1 }
 0x1cc   : > { %v5995_v20 = vpop.f32.mrf.mxu0  ;;  %v5997_v49 = vpop.f32.mrf.mxu1 }
 0x1ce   : > { %v5999_v33 = vpop.f32.mrf.mxu0  ;;  %v6001_v59 = vpop.f32.mrf.mxu1 }
 0x1d0   : > { %v6003_v17 = vpop.f32.mrf.mxu0  ;;  %v6005_v45 = vpop.f32.mrf.mxu1 }
 0x1d2   : > { %v6007_v11 = vpop.f32.mrf.mxu0  ;;  %v6009_v13 = vpop.f32.mrf.mxu1 }
 0x1d4   : > { %v6011_v1 = vpop.f32.mrf.mxu0  ;;  %v6013_v21 = vpop.f32.mrf.mxu1 }
 0x1d6   : > { %v6015_v3 = vpop.f32.mrf.mxu0  ;;  %v6017_v23 = vpop.f32.mrf.mxu1 }
 0x1d8   : > { %v6019_v57 = vpop.f32.mrf.mxu0  ;;  %v6021_v5 = vpop.f32.mrf.mxu1 }
 0x1da   : > { %v6023_v12 = vpop.f32.mrf.mxu0  ;;  %v6025_v39 = vpop.f32.mrf.mxu1 }
 0x1dc   : > { %v6027_v31 = vpop.f32.mrf.mxu0  ;;  %v6029_v60 = vpop.f32.mrf.mxu1 }
 0x1dd   : > { %6287 = vst [vmem:[#allocation17_spill] sm:$0xff] %v6027_v31  ;;  %6288 = vst [vmem:[#allocation18_spill] sm:$0xff] %v6029_v60 }
 0x1de   : > { %v6031_v56 = vpop.f32.mrf.mxu0  ;;  %v6033_v41 = vpop.f32.mrf.mxu1 }
 0x1df   : > { %6289 = vst [vmem:[#allocation19_spill] sm:$0xff] %v6031_v56  ;;  %6290 = vst [vmem:[#allocation20_spill] sm:$0xff] %v6033_v41 }
 0x1e0   : > { %v6035_v16 = vpop.f32.mrf.mxu0  ;;  %v6037_v54 = vpop.f32.mrf.mxu1 }
 0x1e1   : > { %6291 = vst [vmem:[#allocation21_spill] sm:$0xff] %v6035_v16  ;;  %6292 = vst [vmem:[#allocation22_spill] sm:$0xff] %v6037_v54 }
 0x1e2   : > { %v6039_v61 = vpop.f32.mrf.mxu0  ;;  %v6041_v24 = vpop.f32.mrf.mxu1 }
 0x1e3   : > { %6293 = vst [vmem:[#allocation23_spill] sm:$0xff] %v6039_v61  ;;  %6294 = vst [vmem:[#allocation24_spill] sm:$0xff] %v6041_v24 }
 0x1e4   : > { %v6043_v32 = vpop.f32.mrf.mxu0  ;;  %v6045_v37 = vpop.f32.mrf.mxu1 }
 0x1e5   : > { %6295 = vst [vmem:[#allocation25_spill] sm:$0xff] %v6043_v32  ;;  %6296 = vst [vmem:[#allocation26_spill] sm:$0xff] %v6045_v37 }
 0x1e6   : > { %v6047_v51 = vpop.f32.mrf.mxu0  ;;  %v6049_v31 = vpop.f32.mrf.mxu1 }
 0x1e7   : > { %6297 = vst [vmem:[#allocation27_spill] sm:$0xff] %v6047_v51  ;;  %6298 = vst [vmem:[#allocation28_spill] sm:$0xff] %v6049_v31 }
 0x1e8   : > { %v6051_v60 = vpop.f32.mrf.mxu0  ;;  %v6053_v56 = vpop.f32.mrf.mxu1 }
 0x1e9   : > { %6299 = vst [vmem:[#allocation29_spill] sm:$0xff] %v6051_v60  ;;  %6300 = vst [vmem:[#allocation30_spill] sm:$0xff] %v6053_v56 }
 0x1ea   : > { %v6055_v41 = vpop.f32.mrf.mxu0  ;;  %v6057_v16 = vpop.f32.mrf.mxu1 }
 0x1eb   : > { %6301 = vst [vmem:[#allocation31_spill] sm:$0xff] %v6055_v41  ;;  %6302 = vst [vmem:[#allocation32_spill] sm:$0xff] %v6057_v16  ;;  %v2190_v41 = vadd.f32 %v4246_v0, %v5868_v34  ;;  %v2191_v0 = vadd.f32 %v5969_v42, %v5877_v35 }
 0x1ec   : > { %v6059_v54 = vpop.f32.mrf.mxu0  ;;  %v6061_v61 = vpop.f32.mrf.mxu1 }
 0x1ed   : > { %6303 = vst [vmem:[#allocation33_spill] sm:$0xff] %v6059_v54  ;;  %6304 = vst [vmem:[#allocation34_spill] sm:$0xff] %v6061_v61  ;;  %v2189_v54 = vadd.f32 %v2030_v63, %v5871_v18  ;;  %v2194_v18 = vadd.f32 %v5973_v43, %v5880_v8 }
 0x1ee   : > { %v6063_v24 = vpop.f32.mrf.mxu0  ;;  %v6065_v32 = vpop.f32.mrf.mxu1 }
 0x1ef   : > { %6305 = vst [vmem:[#allocation35_spill] sm:$0xff] %v6063_v24  ;;  %v2495_v34 = vadd.f32 %v5965_v48, %v2189_v54  ;;  %v2193_v54 = vadd.f32 %v5977_v58, %v5883_v50  ;;  %v2500_v8 = vadd.f32 %v5975_v9, %v2194_v18  ;;  %v2195_v50 = vadd.f32 %v5985_v15, %v5889_v10 }
 0x1f0   : > { %v6067_v37 = vpop.f32.mrf.mxu0  ;;  %v6069_v51 = vpop.f32.mrf.mxu1  ;;  %v2198_v18 = vadd.f32 %v5989_v4, %v5892_v6  ;;  %v2197_v4 = vadd.f32 %v5993_v7, %v5895_v52 }
 0x1f1   : > { %6306 = vst [vmem:[#allocation36_spill] sm:$0xff] %v6067_v37  ;;  %6307 = vst [vmem:[#allocation37_spill] sm:$0xff] %v6069_v51  ;;  %v2496_v37 = vadd.f32 %v5963_v53, %v2190_v41  ;;  %v2192_v51 = vadd.f32 %v4249_v46, %v5874_v40  ;;  %v2499_v58 = vadd.f32 %v5979_v30, %v2193_v54 }
 0x1f2   : > { %v6071_v31 = vpop.f32.mrf.mxu0  ;;  %v6073_v60 = vpop.f32.mrf.mxu1  ;;  %v2501_v30 = vadd.f32 %v5987_v22, %v2195_v50  ;;  %v2504_v6 = vadd.f32 %v5991_v47, %v2198_v18 }
 0x1f3   : > { %6308 = vst [vmem:[#allocation38_spill] sm:$0xff] %v6071_v31  ;;  %6309 = vst [vmem:[#allocation39_spill] sm:$0xff] %v6073_v60  ;;  %v2498_v41 = vadd.f32 %v5967_v19, %v2192_v51 }
 0x1f4   : > { %v6076_v56 = vpop.f32.mrf.mxu0  ;;  %v6078_v16 = vpop.f32.mrf.mxu1 }
 0x1f5   : > { %6310 = vst [vmem:[#allocation40_spill] sm:$0xff] %v6076_v56 }
 0x1f6   : > { %v6081_v61 = vpop.f32.mrf.mxu0  ;;  %v6083_v24 = vpop.f32.mrf.mxu1 }
 0x1f7   : > { %6311 = vst [vmem:[#allocation41_spill] sm:$0xff] %v6081_v61  ;;  %6312 = vst [vmem:[#allocation42_spill] sm:$0xff] %v6083_v24 }
 0x1f8   : > { %v6087_v31 = vpop.f32.mrf.mxu0  ;;  %v4406_v60 = vpop.f32.mrf.mxu1 }
 0x1f9   : > { %6313 = vst [vmem:[#allocation43_spill] sm:$0xff] %v6087_v31  ;;  %v2801_v56 = vadd.f32 %v4406_v60, %v2496_v37  ;;  %v2497_v31 = vadd.f32 %v5971_v55, %v2191_v0  ;;  %v2196_v55 = vadd.f32 %v5981_v36, %v5886_v29 }
 0x1fa   : > { %v4486_v63 = vpop.f32.mrf.mxu0  ;;  %v2641_v61 = vpop.f32.mrf.mxu1 }
 0x1fb   : > { %v3106_v53 = vadd.f32 %v4486_v63, %v2801_v56  ;;  %v2800_v40 = vadd.f32 %v2641_v61, %v2495_v34  ;;  %v2502_v10 = vadd.f32 %v5983_v27, %v2196_v55 }
 0x1fc   : > { %v2946_v46 = vpop.f32.mrf.mxu0  ;;  %v4409_v24 = vpop.f32.mrf.mxu1 }
 0x1fd   : > { %3138 = vst [vmem:[%s4636_s28 + $0x8] sm:$0xff] %v3106_v53  ;;  %v3105_v35 = vadd.f32 %v2946_v46, %v2800_v40  ;;  %v2803_v37 = vadd.f32 %v4409_v24, %v2498_v41  ;;  %v3208_v60 = vmul.f32 %v3106_v53, %v3106_v53 }
 0x1fe   : > { %v4489_v48 = vpop.f32.mrf.mxu0  ;;  %v2651_v42 = vpop.f32.mrf.mxu1 }
 0x1ff   : > { %3137 = vst [vmem:[%s4636_s28] sm:$0xff] %v3105_v35  ;;  %v3169_v51 = vadd.f32 %v3106_v53, %v3105_v35  ;;  %v3207_v61 = vmul.f32 %v3105_v35, %v3105_v35  ;;  %v3108_v56 = vadd.f32 %v4489_v48, %v2803_v37  ;;  %v2802_v19 = vadd.f32 %v2651_v42, %v2497_v31 }
 0x200   : > { %v2956_v43 = vpop.f32.mrf.mxu0  ;;  %v4412_v24 = vpop.f32.mrf.mxu1 }
 0x201   : > { %v3239_v9 = vadd.f32 %v3208_v60, %v3207_v61  ;;  %3140 = vst [vmem:[%s4636_s28 + $0x18] sm:$0xff] %v3108_v56  ;;  %v3107_v34 = vadd.f32 %v2956_v43, %v2802_v19  ;;  %v2805_v0 = vadd.f32 %v4412_v24, %v2500_v8  ;;  %v3210_v46 = vmul.f32 %v3108_v56, %v3108_v56 }
 0x202   : > { %v4492_v63 = vpop.f32.mrf.mxu0  ;;  %v2661_v31 = vpop.f32.mrf.mxu1  ;;  %v2200_v8 = vadd.f32 %v5997_v49, %v5898_v25  ;;  %v2503_v43 = vadd.f32 %v5995_v20, %v2197_v4 }
 0x203   : > { %3139 = vst [vmem:[%s4636_s28 + $0x10] sm:$0xff] %v3107_v34  ;;  %v3170_v41 = vadd.f32 %v3169_v51, %v3107_v34  ;;  %v3209_v29 = vmul.f32 %v3107_v34, %v3107_v34  ;;  %v3110_v36 = vadd.f32 %v4492_v63, %v2805_v0  ;;  %v2804_v53 = vadd.f32 %v2661_v31, %v2499_v58 }
 0x204   : > { %v2966_v15 = vpop.f32.mrf.mxu0  ;;  %v4415_v40 = vpop.f32.mrf.mxu1  ;;  %v2506_v24 = vadd.f32 %v5999_v33, %v2200_v8  ;;  %v2202_v58 = vadd.f32 %v6005_v45, %v5904_v2  ;;  %v2201_v31 = vadd.f32 %v6009_v13, %v5907_v38 }
 0x205   : > { %v3240_v54 = vadd.f32 %v3239_v9, %v3209_v29  ;;  %3142 = vst [vmem:[%s4636_s28 + $0x28] sm:$0xff] %v3110_v36  ;;  %v3109_v35 = vadd.f32 %v2966_v15, %v2804_v53  ;;  %v3171_v37 = vadd.f32 %v3170_v41, %v3108_v56  ;;  %v2807_v60 = vadd.f32 %v4415_v40, %v2502_v10 }
 0x206   : > { %v4495_v48 = vpop.f32.mrf.mxu0  ;;  %v2671_v27 = vpop.f32.mrf.mxu1  ;;  %v2199_v56 = vadd.f32 %v6001_v59, %v5901_v44  ;;  %v3212_v47 = vmul.f32 %v3110_v36, %v3110_v36  ;;  %v2508_v53 = vadd.f32 %v6007_v11, %v2202_v58  ;;  %v2203_v11 = vadd.f32 %v6017_v23, %v5913_v62 }
 0x207   : > { %3141 = vst [vmem:[%s4636_s28 + $0x20] sm:$0xff] %v3109_v35  ;;  %v3172_v22 = vadd.f32 %v3171_v37, %v3109_v35  ;;  %v3211_v42 = vmul.f32 %v3109_v35, %v3109_v35  ;;  %v3241_v51 = vadd.f32 %v3240_v54, %v3210_v46  ;;  %v2806_v61 = vadd.f32 %v2671_v27, %v2501_v30 }
 0x208   : > { %v3112_v19 = vadd.f32 %v4495_v48, %v2807_v60  ;;  %v2976_v55 = vpop.f32.mrf.mxu0  ;;  %v4418_v52 = vpop.f32.mrf.mxu1  ;;  %v2505_v63 = vadd.f32 %v6003_v17, %v2199_v56  ;;  %v2204_v17 = vadd.f32 %v6013_v21, %v5910_v28  ;;  %v2206_v28 = vadd.f32 %v6021_v5, %v5916_v14 }
 0x209   : > { %v3242_v7 = vadd.f32 %v3241_v51, %v3211_v42  ;;  %v3111_v50 = vadd.f32 %v2976_v55, %v2806_v61  ;;  %v3173_v25 = vadd.f32 %v3172_v22, %v3110_v36  ;;  %v2809_v49 = vadd.f32 %v4418_v52, %v2504_v6 }
 0x20a   : > { %3144 = vst [vmem:[%s4636_s28 + $0x38] sm:$0xff] %v3112_v19  ;;  %v4498_v9 = vpop.f32.mrf.mxu0  ;;  %v2681_v34 = vpop.f32.mrf.mxu1  ;;  %v3214_v29 = vmul.f32 %v3112_v19, %v3112_v19  ;;  %v2507_v6 = vadd.f32 %v6011_v1, %v2201_v31  ;;  %v2510_v42 = vadd.f32 %v6015_v3, %v2204_v17  ;;  %v2205_v14 = vadd.f32 %v6025_v39, %v5919_v26 }
 0x20b   : > { %3143 = vst [vmem:[%s4636_s28 + $0x30] sm:$0xff] %v3111_v50  ;;  %v3174_v44 = vadd.f32 %v3173_v25, %v3111_v50  ;;  %v3213_v59 = vmul.f32 %v3111_v50, %v3111_v50  ;;  %v3243_v0 = vadd.f32 %v3242_v7, %v3212_v47  ;;  %v3114_v18 = vadd.f32 %v4498_v9, %v2809_v49 }
 0x20c   : > { %v2808_v20 = vadd.f32 %v2681_v34, %v2503_v43  ;;  %v2986_v33 = vpop.f32.mrf.mxu0  ;;  %v4421_v41 = vpop.f32.mrf.mxu1  ;;  %v2512_v52 = vadd.f32 %v6023_v12, %v2206_v28  ;;  %v6314_v43 = vld [vmem:[#allocation3_spill] sm:$0xff] }
 0x20d   : > { %v3244_v2 = vadd.f32 %v3243_v0, %v3213_v59  ;;  %3146 = vst [vmem:[%s4636_s28 + $0x48] sm:$0xff] %v3114_v18  ;;  %v3175_v45 = vadd.f32 %v3174_v44, %v3112_v19  ;;  %v2811_v36 = vadd.f32 %v4421_v41, %v2506_v24  ;;  %v3216_v21 = vmul.f32 %v3114_v18, %v3114_v18  ;;  %v6315_v24 = vld [vmem:[#allocation18_spill] sm:$0xff]  ;;  %v6316_v0 = vld [vmem:[#allocation17_spill] sm:$0xff] }
 0x20e   : > { %v3113_v10 = vadd.f32 %v2986_v33, %v2808_v20  ;;  %v4501_v30 = vpop.f32.mrf.mxu0  ;;  %v2691_v15 = vpop.f32.mrf.mxu1  ;;  %v2509_v19 = vadd.f32 %v6019_v57, %v2203_v11  ;;  %v2208_v58 = vadd.f32 %v6315_v24, %v6314_v43  ;;  %v2511_v12 = vadd.f32 %v6316_v0, %v2205_v14  ;;  %v6319_v41 = vld [vmem:[#allocation5_spill] sm:$0xff] }
 0x20f   : > { %v3245_v40 = vadd.f32 %v3244_v2, %v3214_v29  ;;  %v3116_v38 = vadd.f32 %v4501_v30, %v2811_v36  ;;  %v2810_v13 = vadd.f32 %v2691_v15, %v2505_v63  ;;  %v6318_v63 = vld [vmem:[#allocation20_spill] sm:$0xff]  ;;  %v6320_v29 = vld [vmem:[#allocation22_spill] sm:$0xff]  ;;  %v6321_v15 = vld [vmem:[#allocation19_spill] sm:$0xff] }
 0x210   : > { %3145 = vst [vmem:[%s4636_s28 + $0x40] sm:$0xff] %v3113_v10  ;;  %v3176_v46 = vadd.f32 %v3175_v45, %v3113_v10  ;;  %v3215_v54 = vmul.f32 %v3113_v10, %v3113_v10  ;;  %v2996_v35 = vpop.f32.mrf.mxu0  ;;  %v4424_v37 = vpop.f32.mrf.mxu1  ;;  %v2210_v2 = vadd.f32 %v6320_v29, %v6319_v41  ;;  %v2514_v17 = vadd.f32 %v6321_v15, %v2208_v58 }
 0x211   : > { %3148 = vst [vmem:[%s4636_s28 + $0x58] sm:$0xff] %v3116_v38  ;;  %v3115_v4 = vadd.f32 %v2996_v35, %v2810_v13  ;;  %v2813_v8 = vadd.f32 %v4424_v37, %v2508_v53  ;;  %v3218_v3 = vmul.f32 %v3116_v38, %v3116_v38 }
 0x212   : > { %v3246_v60 = vadd.f32 %v3245_v40, %v3215_v54  ;;  %v3177_v48 = vadd.f32 %v3176_v46, %v3114_v18  ;;  %v4504_v27 = vpop.f32.mrf.mxu0  ;;  %v2701_v22 = vpop.f32.mrf.mxu1  ;;  %v6317_v18 = vld [vmem:[#allocation4_spill] sm:$0xff] }
 0x213   : > { %3147 = vst [vmem:[%s4636_s28 + $0x50] sm:$0xff] %v3115_v4  ;;  %v3217_v51 = vmul.f32 %v3115_v4, %v3115_v4  ;;  %v3118_v1 = vadd.f32 %v4504_v27, %v2813_v8  ;;  %v2812_v61 = vadd.f32 %v2701_v22, %v2507_v6  ;;  %v2207_v31 = vadd.f32 %v6318_v63, %v6317_v18  ;;  %v6322_v6 = vld [vmem:[#allocation21_spill] sm:$0xff]  ;;  %v6324_v8 = vld [vmem:[#allocation24_spill] sm:$0xff] }
 0x214   : > { %v3178_v56 = vadd.f32 %v3177_v48, %v3115_v4  ;;  %v3247_v62 = vadd.f32 %v3246_v60, %v3216_v21  ;;  %v3006_v23 = vpop.f32.mrf.mxu0  ;;  %v4427_v47 = vpop.f32.mrf.mxu1  ;;  %v6323_v4 = vld [vmem:[#allocation6_spill] sm:$0xff]  ;;  %v6325_v48 = vld [vmem:[#allocation23_spill] sm:$0xff] }
 0x215   : > { %3150 = vst [vmem:[%s4636_s28 + $0x68] sm:$0xff] %v3118_v1  ;;  %v3117_v5 = vadd.f32 %v3006_v23, %v2812_v61  ;;  %v2815_v55 = vadd.f32 %v4427_v47, %v2510_v42  ;;  %v3220_v45 = vmul.f32 %v3118_v1, %v3118_v1  ;;  %v2513_v11 = vadd.f32 %v6322_v6, %v2207_v31  ;;  %v6338_v6 = vld [vmem:[#allocation11_spill] sm:$0xff] }
 0x216   : > { %v3248_v7 = vadd.f32 %v3247_v62, %v3217_v51  ;;  %v3179_v50 = vadd.f32 %v3178_v56, %v3116_v38  ;;  %v4507_v25 = vpop.f32.mrf.mxu0  ;;  %v2711_v49 = vpop.f32.mrf.mxu1  ;;  %v2209_v28 = vadd.f32 %v6324_v8, %v6323_v4  ;;  %v2516_v27 = vadd.f32 %v6325_v48, %v2210_v2  ;;  %v6326_v56 = vld [vmem:[#allocation7_spill] sm:$0xff]  ;;  %v6327_v62 = vld [vmem:[#allocation26_spill] sm:$0xff] }
 0x217   : > { %3149 = vst [vmem:[%s4636_s28 + $0x60] sm:$0xff] %v3117_v5  ;;  %v3219_v9 = vmul.f32 %v3117_v5, %v3117_v5  ;;  %v3120_v57 = vadd.f32 %v4507_v25, %v2815_v55  ;;  %v2814_v34 = vadd.f32 %v2711_v49, %v2509_v19  ;;  %v2212_v23 = vadd.f32 %v6327_v62, %v6326_v56  ;;  %v6329_v25 = vld [vmem:[#allocation8_spill] sm:$0xff] }
 0x218   : > { %v3180_v44 = vadd.f32 %v3179_v50, %v3117_v5  ;;  %v3249_v26 = vadd.f32 %v3248_v7, %v3218_v3  ;;  %v3016_v39 = vpop.f32.mrf.mxu0  ;;  %v4430_v59 = vpop.f32.mrf.mxu1  ;;  %v6328_v7 = vld [vmem:[#allocation25_spill] sm:$0xff]  ;;  %v6330_v49 = vld [vmem:[#allocation28_spill] sm:$0xff] }
 0x219   : > { %3152 = vst [vmem:[%s4636_s28 + $0x78] sm:$0xff] %v3120_v57  ;;  %v3119_v20 = vadd.f32 %v3016_v39, %v2814_v34  ;;  %v2817_v33 = vadd.f32 %v4430_v59, %v2512_v52  ;;  %v3222_v22 = vmul.f32 %v3120_v57, %v3120_v57  ;;  %v2515_v50 = vadd.f32 %v6328_v7, %v2209_v28  ;;  %v6344_v7 = vld [vmem:[#allocation35_spill] sm:$0xff] }
 0x21a   : > { %v3250_v36 = vadd.f32 %v3249_v26, %v3219_v9  ;;  %v3181_v53 = vadd.f32 %v3180_v44, %v3118_v1  ;;  %v4510_v10 = vpop.f32.mrf.mxu0  ;;  %v2721_v30 = vpop.f32.mrf.mxu1  ;;  %v2211_v43 = vadd.f32 %v6330_v49, %v6329_v25  ;;  %v6331_v9 = vld [vmem:[#allocation9_spill] sm:$0xff] }
 0x21b   : > { %3151 = vst [vmem:[%s4636_s28 + $0x70] sm:$0xff] %v3119_v20  ;;  %v3221_v40 = vmul.f32 %v3119_v20, %v3119_v20  ;;  %v3122_v38 = vadd.f32 %v4510_v10, %v2817_v33  ;;  %v2816_v13 = vadd.f32 %v2721_v30, %v2511_v12  ;;  %v6333_v12 = vld [vmem:[#allocation27_spill] sm:$0xff]  ;;  %v6336_v10 = vld [vmem:[#allocation32_spill] sm:$0xff] }
 0x21c   : > { %v3182_v46 = vadd.f32 %v3181_v53, %v3119_v20  ;;  %v3251_v54 = vadd.f32 %v3250_v36, %v3220_v45  ;;  %v3026_v35 = vpop.f32.mrf.mxu0  ;;  %v4433_v37 = vpop.f32.mrf.mxu1  ;;  %v2518_v18 = vadd.f32 %v6333_v12, %v2212_v23  ;;  %v6334_v45 = vld [vmem:[#allocation29_spill] sm:$0xff]  ;;  %v6335_v53 = vld [vmem:[#allocation10_spill] sm:$0xff] }
 0x21d   : > { %3154 = vst [vmem:[%s4636_s28 + $0x88] sm:$0xff] %v3122_v38  ;;  %v3121_v21 = vadd.f32 %v3026_v35, %v2816_v13  ;;  %v2819_v60 = vadd.f32 %v4433_v37, %v2514_v17  ;;  %v3224_v44 = vmul.f32 %v3122_v38, %v3122_v38  ;;  %v2517_v36 = vadd.f32 %v6334_v45, %v2211_v43  ;;  %v6342_v23 = vld [vmem:[#allocation13_spill] sm:$0xff]  ;;  %v6348_v12 = vld [vmem:[#allocation38_spill] sm:$0xff] }
 0x21e   : > { %v3252_v42 = vadd.f32 %v3251_v54, %v3221_v40  ;;  %v3183_v51 = vadd.f32 %v3182_v46, %v3120_v57  ;;  %v4513_v1 = vpop.f32.mrf.mxu0  ;;  %v2731_v61 = vpop.f32.mrf.mxu1  ;;  %v6332_v57 = vld [vmem:[#allocation30_spill] sm:$0xff]  ;;  %v2213_v30 = vadd.f32 %v6336_v10, %v6335_v53  ;;  %v6337_v40 = vld [vmem:[#allocation31_spill] sm:$0xff] }
 0x21f   : > { %3153 = vst [vmem:[%s4636_s28 + $0x80] sm:$0xff] %v3121_v21  ;;  %v3223_v47 = vmul.f32 %v3121_v21, %v3121_v21  ;;  %v3124_v19 = vadd.f32 %v4513_v1, %v2819_v60  ;;  %v2818_v14 = vadd.f32 %v2731_v61, %v2513_v11  ;;  %v2214_v34 = vadd.f32 %v6332_v57, %v6331_v9  ;;  %v6339_v11 = vld [vmem:[#allocation34_spill] sm:$0xff]  ;;  %v6341_v1 = vld [vmem:[#allocation12_spill] sm:$0xff] }
 0x220   : > { %v3184_v5 = vadd.f32 %v3183_v51, %v3121_v21  ;;  %v3253_v55 = vadd.f32 %v3252_v42, %v3222_v22  ;;  %v3036_v52 = vpop.f32.mrf.mxu0  ;;  %v4436_v3 = vpop.f32.mrf.mxu1  ;;  %v2216_v4 = vadd.f32 %v6339_v11, %v6338_v6  ;;  %v6340_v42 = vld [vmem:[#allocation33_spill] sm:$0xff]  ;;  %v2215_v61 = vadd.f32 %v6065_v32, %v6341_v1  ;;  %v6345_v57 = vld [vmem:[#allocation36_spill] sm:$0xff] }
 0x221   : > { %3156 = vst [vmem:[%s4636_s28 + $0x98] sm:$0xff] %v3124_v19  ;;  %v3123_v24 = vadd.f32 %v3036_v52, %v2818_v14  ;;  %v2821_v58 = vadd.f32 %v4436_v3, %v2516_v27  ;;  %v3226_v13 = vmul.f32 %v3124_v19, %v3124_v19  ;;  %v2519_v51 = vadd.f32 %v6340_v42, %v2213_v30 }
 0x222   : > { %v3254_v26 = vadd.f32 %v3253_v55, %v3223_v47  ;;  %v3185_v39 = vadd.f32 %v3184_v5, %v3122_v38  ;;  %v4516_v59 = vpop.f32.mrf.mxu0  ;;  %v2741_v0 = vpop.f32.mrf.mxu1  ;;  %v2520_v38 = vadd.f32 %v6337_v40, %v2214_v34  ;;  %v6343_v47 = vld [vmem:[#allocation37_spill] sm:$0xff]  ;;  %v2521_v34 = vadd.f32 %v6345_v57, %v2215_v61  ;;  %v6350_v40 = vld [vmem:[#allocation40_spill] sm:$0xff]  ;;  %v6354_v61 = vld [vmem:[#allocation43_spill] sm:$0xff] }
 0x223   : > { %3155 = vst [vmem:[%s4636_s28 + $0x90] sm:$0xff] %v3123_v24  ;;  %v3225_v63 = vmul.f32 %v3123_v24, %v3123_v24  ;;  %v3126_v31 = vadd.f32 %v4516_v59, %v2821_v58  ;;  %v2820_v20 = vadd.f32 %v2741_v0, %v2515_v50  ;;  %v2522_v50 = vadd.f32 %v6344_v7, %v2216_v4 }
 0x224   : > { %v3186_v33 = vadd.f32 %v3185_v39, %v3123_v24  ;;  %v3255_v41 = vadd.f32 %v3254_v26, %v3224_v44  ;;  %v3046_v29 = vpop.f32.mrf.mxu0  ;;  %v4439_v2 = vpop.f32.mrf.mxu1  ;;  %v6346_v44 = vld [vmem:[#allocation14_spill] sm:$0xff]  ;;  %v6347_v26 = vld [vmem:[#allocation39_spill] sm:$0xff] }
 0x225   : > { %3158 = vst [vmem:[%s4636_s28 + $0xa8] sm:$0xff] %v3126_v31  ;;  %v3125_v15 = vadd.f32 %v3046_v29, %v2820_v20  ;;  %v2823_v17 = vadd.f32 %v4439_v2, %v2518_v18  ;;  %v3228_v14 = vmul.f32 %v3126_v31, %v3126_v31  ;;  %v2217_v39 = vadd.f32 %v6347_v26, %v6346_v44  ;;  %v6349_v29 = vld [vmem:[#allocation15_spill] sm:$0xff] }
 0x226   : > { %v3256_v46 = vadd.f32 %v3255_v41, %v3225_v63  ;;  %v3187_v54 = vadd.f32 %v3186_v33, %v3124_v19  ;;  %v4519_v35 = vpop.f32.mrf.mxu0  ;;  %v2751_v37 = vpop.f32.mrf.mxu1  ;;  %v2218_v19 = vadd.f32 %v6343_v47, %v6342_v23  ;;  %v2220_v2 = vadd.f32 %v6078_v16, %v6349_v29 }
 0x227   : > { %3157 = vst [vmem:[%s4636_s28 + $0xa0] sm:$0xff] %v3125_v15  ;;  %v3227_v8 = vmul.f32 %v3125_v15, %v3125_v15  ;;  %v3128_v28 = vadd.f32 %v4519_v35, %v2823_v17  ;;  %v2822_v21 = vadd.f32 %v2751_v37, %v2517_v36 }
 0x228   : > { %v3188_v60 = vadd.f32 %v3187_v54, %v3125_v15  ;;  %v3257_v48 = vadd.f32 %v3256_v46, %v3226_v13  ;;  %v3056_v27 = vpop.f32.mrf.mxu0  ;;  %v4442_v22 = vpop.f32.mrf.mxu1  ;;  %v2524_v18 = vadd.f32 %v6348_v12, %v2218_v19  ;;  %v6351_v13 = vld [vmem:[#allocation16_spill] sm:$0xff]  ;;  %v6352_v46 = vld [vmem:[#allocation42_spill] sm:$0xff] }
 0x229   : > { %3160 = vst [vmem:[%s4636_s28 + $0xb8] sm:$0xff] %v3128_v28  ;;  %v3127_v56 = vadd.f32 %v3056_v27, %v2822_v21  ;;  %v2825_v62 = vadd.f32 %v4442_v22, %v2520_v38  ;;  %v3230_v63 = vmul.f32 %v3128_v28, %v3128_v28  ;;  %v2523_v38 = vadd.f32 %v6350_v40, %v2217_v39 }
 0x22a   : > { %v3258_v5 = vadd.f32 %v3257_v48, %v3227_v8  ;;  %v3189_v55 = vadd.f32 %v3188_v60, %v3126_v31  ;;  %v4522_v52 = vpop.f32.mrf.mxu0  ;;  %v2761_v3 = vpop.f32.mrf.mxu1  ;;  %v2219_v54 = vadd.f32 %v6352_v46, %v6351_v13 }
 0x22b   : > { %3159 = vst [vmem:[%s4636_s28 + $0xb0] sm:$0xff] %v3127_v56  ;;  %v3229_v25 = vmul.f32 %v3127_v56, %v3127_v56  ;;  %v3130_v49 = vadd.f32 %v4522_v52, %v2825_v62  ;;  %v2824_v43 = vadd.f32 %v2761_v3, %v2519_v51 }
 0x22c   : > { %v3190_v24 = vadd.f32 %v3189_v55, %v3127_v56  ;;  %v3259_v32 = vadd.f32 %v3258_v5, %v3228_v14  ;;  %v3066_v58 = vpop.f32.mrf.mxu0  ;;  %v4445_v9 = vpop.f32.mrf.mxu1  ;;  %v2525_v56 = vadd.f32 %v6354_v61, %v2219_v54 }
 0x22d   : > { %3162 = vst [vmem:[%s4636_s28 + $0xc8] sm:$0xff] %v3130_v49  ;;  %v3129_v59 = vadd.f32 %v3066_v58, %v2824_v43  ;;  %v2827_v0 = vadd.f32 %v4445_v9, %v2522_v50  ;;  %v3232_v6 = vmul.f32 %v3130_v49, %v3130_v49 }
 0x22e   : > { %v3260_v31 = vadd.f32 %v3259_v32, %v3229_v25  ;;  %v3191_v20 = vadd.f32 %v3190_v24, %v3128_v28  ;;  %v4525_v33 = vpop.f32.mrf.mxu0  ;;  %v2771_v41 = vpop.f32.mrf.mxu1  ;;  %v6353_v28 = vld [vmem:[#allocation41_spill] sm:$0xff] }
 0x22f   : > { %3161 = vst [vmem:[%s4636_s28 + $0xc0] sm:$0xff] %v3129_v59  ;;  %v3231_v45 = vmul.f32 %v3129_v59, %v3129_v59  ;;  %v3132_v36 = vadd.f32 %v4525_v33, %v2827_v0  ;;  %v2826_v53 = vadd.f32 %v2771_v41, %v2521_v34  ;;  %v2526_v21 = vadd.f32 %v6353_v28, %v2220_v2 }
 0x230   : > { %v3192_v10 = vadd.f32 %v3191_v20, %v3129_v59  ;;  %v3261_v30 = vadd.f32 %v3260_v31, %v3230_v63  ;;  %v3076_v15 = vpop.f32.mrf.mxu0  ;;  %v4448_v17 = vpop.f32.mrf.mxu1 }
 0x231   : > { %3164 = vst [vmem:[%s4636_s28 + $0xd8] sm:$0xff] %v3132_v36  ;;  %v3131_v35 = vadd.f32 %v3076_v15, %v2826_v53  ;;  %v2829_v37 = vadd.f32 %v4448_v17, %v2524_v18  ;;  %v3234_v47 = vmul.f32 %v3132_v36, %v3132_v36 }
 0x232   : > { %v3262_v16 = vadd.f32 %v3261_v30, %v3231_v45  ;;  %v3193_v11 = vadd.f32 %v3192_v10, %v3130_v49  ;;  %v4528_v4 = vpop.f32.mrf.mxu0  ;;  %v2781_v8 = vpop.f32.mrf.mxu1 }
 0x233   : > { %3163 = vst [vmem:[%s4636_s28 + $0xd0] sm:$0xff] %v3131_v35  ;;  %v3233_v60 = vmul.f32 %v3131_v35, %v3131_v35  ;;  %v3134_v48 = vadd.f32 %v4528_v4, %v2829_v37  ;;  %v2828_v27 = vadd.f32 %v2781_v8, %v2523_v38 }
 0x234   : > { %v3194_v22 = vadd.f32 %v3193_v11, %v3131_v35  ;;  %v3263_v42 = vadd.f32 %v3262_v16, %v3232_v6  ;;  %v3086_v51 = vpop.f32.mrf.mxu0  ;;  %v4451_v1 = vpop.f32.mrf.mxu1 }
 0x235   : > { %3166 = vst [vmem:[%s4636_s28 + $0xe8] sm:$0xff] %v3134_v48  ;;  %v3133_v62 = vadd.f32 %v3086_v51, %v2828_v27  ;;  %v2831_v23 = vadd.f32 %v4451_v1, %v2526_v21  ;;  %v3236_v24 = vmul.f32 %v3134_v48, %v3134_v48 }
 0x236   : > { %v3264_v19 = vadd.f32 %v3263_v42, %v3233_v60  ;;  %v3195_v14 = vadd.f32 %v3194_v22, %v3132_v36  ;;  %v4531_v5 = vpop.f32.mrf.mxu0  ;;  %v2791_v55 = vpop.f32.mrf.mxu1 }
 0x237   : > { %3165 = vst [vmem:[%s4636_s28 + $0xe0] sm:$0xff] %v3133_v62  ;;  %v3235_v52 = vmul.f32 %v3133_v62, %v3133_v62  ;;  %v3136_v3 = vadd.f32 %v4531_v5, %v2831_v23  ;;  %v2830_v7 = vadd.f32 %v2791_v55, %v2525_v56 }
 0x238   : > { %v3196_v50 = vadd.f32 %v3195_v14, %v3133_v62  ;;  %v3265_v25 = vadd.f32 %v3264_v19, %v3234_v47  ;;  %v3096_v49 = vpop.f32.mrf.mxu0 }
 0x239   : > { %3168 = vst [vmem:[%s4636_s28 + $0xf8] sm:$0xff] %v3136_v3  ;;  %v3135_v43 = vadd.f32 %v3096_v49, %v2830_v7  ;;  %v3238_v44 = vmul.f32 %v3136_v3, %v3136_v3 }
 0x23a   : > { %v3266_v32 = vadd.f32 %v3265_v25, %v3235_v52  ;;  %v3197_v58 = vadd.f32 %v3196_v50, %v3134_v48 }
 0x23b   : > { %3167 = vst [vmem:[%s4636_s28 + $0xf0] sm:$0xff] %v3135_v43  ;;  %v3237_v9 = vmul.f32 %v3135_v43, %v3135_v43 }
 0x23c   : > { %v3198_v57 = vadd.f32 %v3197_v58, %v3135_v43  ;;  %v3267_v34 = vadd.f32 %v3266_v32, %v3236_v24 }
 0x23e   : > { %v3199_v26 = vadd.f32 %v3198_v57, %v3136_v3  ;;  %v3268_v39 = vadd.f32 %v3267_v34, %v3237_v9 }
 0x240   : > { %v3200_v59 = vrot.slane %v3199_v26, 4  ;;  %v3269_v0 = vadd.f32 %v3268_v39, %v3238_v44 }
 0x242   : > { %v3201_v12 = vadd.f32 %v3200_v59, %v3199_v26  ;;  %v3270_v18 = vrot.slane %v3269_v0, 4 }
 0x244   : > { %v3202_v63 = vrot.slane %v3201_v12, 2  ;;  %v3271_v31 = vadd.f32 %v3270_v18, %v3269_v0 }
 0x246   : > { %v3203_v20 = vadd.f32 %v3202_v63, %v3201_v12  ;;  %v3272_v33 = vrot.slane %v3271_v31, 2 }
 0x248   : > { %v3204_v41 = vrot.slane %v3203_v20, 1  ;;  %v3273_v29 = vadd.f32 %v3272_v33, %v3271_v31 }
 0x24a   : > { %v3205_v2 = vadd.f32 %v3204_v41, %v3203_v20  ;;  %v3274_v45 = vrot.slane %v3273_v29, 1 }
 0x24c   : > { %3206 = vst [vmem:[%s4641_s6] sm:$0x1] %v3205_v2  ;;  %v3275_v36 = vadd.f32 %v3274_v45, %v3273_v29 }
 0x24e   : > { %3276 = vst [vmem:[%s4641_s6 + $0x1] sm:$0x1] %v3275_v36 }
 0x24f PF: > { %s16_s18 = sadd.s32 1, %s4587_s18  }
 0x250   : > { %p13_p5 = scmp.ge.s32.totalorder %s16_s18, 4  }
 0x252   :  { %15 = sbr.rel (!%p13_p5) target bundleno = 1 (0x1), region = 86 }

</bundles_post_ra>
